<compile_context>
chip_gen: v7x
topology: tpu7x:2x2x1
jax: 0.10.0
libtpu: 0.0.40
codegen_flags: <defaults>
</compile_context>

<pallas_src>
import functools
import math

import jax
import jax.numpy as jnp
from jax.experimental import pallas as pl
from jax.experimental.pallas import tpu as pltpu


# ----------------------------------------------------------------------------
# Model config
# ----------------------------------------------------------------------------

INPUT_SIZE = 16
OUTPUT_SIZE = 16
FILTERS = 32
NUM_HEADS = 4
DIL_RATE_BASE = 2
N_PER_STACK = 4
N_LAYERS = 4
EXPANSION_FACTORS = (4, 4)
CONV_KERNEL_SIZE = 3

DIL_RATES = tuple(DIL_RATE_BASE ** (i % N_PER_STACK) for i in range(N_LAYERS))

FF1 = FILTERS * EXPANSION_FACTORS[0]     # 128
FF2 = FILTERS * EXPANSION_FACTORS[1]     # 128


def _ru(x, m):
  return ((x + m - 1) // m) * m


# ----------------------------------------------------------------------------
# Packed parameter layout (static offsets shared by packer and kernel)
# ----------------------------------------------------------------------------

# wa: per-layer row block of FILTERS rows; 128-aligned column sections
WA_FFN1_W1 = 0
WA_FFN2_W1 = _ru(WA_FFN1_W1 + FF1, 128)
WA_QKV = _ru(WA_FFN2_W1 + FF2, 128)
WA_PW1 = _ru(WA_QKV + 3 * FILTERS, 128)
WA_COLS = _ru(WA_PW1 + 2 * FILTERS, 128)
WA_ROWS = N_LAYERS * FILTERS

# wb: narrow (FILTERS-wide) matrices, row-stacked at 8-aligned offsets
WB_DI = 0
WB_OD = _ru(WB_DI + INPUT_SIZE, 8)
WB_LAYER0 = _ru(WB_OD + FILTERS, 8)
WB_WO = 0
WB_PW2 = FILTERS
WB_DW = 2 * FILTERS
WB_PER_LAYER = _ru(WB_DW + CONV_KERNEL_SIZE, 8)
WB_ROWS = WB_LAYER0 + N_LAYERS * WB_PER_LAYER
WB_COLS = FILTERS

# wc: fan-in-128 matrices (FFN down-projections), row-stacked
WC_FFN1_W2 = 0
WC_FFN2_W2 = _ru(WC_FFN1_W2 + FF1, 8)
WC_PER_LAYER = _ru(WC_FFN2_W2 + FF2, 8)
WC_ROWS = N_LAYERS * WC_PER_LAYER
WC_COLS = FILTERS

# bias slab: one 128-wide row per bias vector / per-channel affine row
BIAS_COLS = _ru(max(FF1, FF2, 3 * FILTERS), 128)
BI_DI_B = 0
BI_OD_B = 1
BI_LAYER0 = 8
BI_LN_G = 0        # 6 rows: [ffn1_ln, mhsa_ln, conv_ln, ffn2_ln, final_ln, batchnorm] gamma
BI_LN_B = 6        # 6 rows: betas in the same order
BI_FFN1_B1 = 12
BI_FFN2_B1 = 13
BI_QKV_B = 14
BI_PW1_B = 15
BI_FFN1_B2 = 16
BI_FFN2_B2 = 17
BI_BO = 18
BI_PW2_B = 19
BI_DW_B = 20
BI_PER_LAYER = _ru(BI_DW_B + 1, 8)
BI_ROWS = BI_LAYER0 + N_LAYERS * BI_PER_LAYER


# ----------------------------------------------------------------------------
# Fused whole-model Pallas kernel (one grid step == nb batch rows)
# ----------------------------------------------------------------------------

def _dfconformer_kernel(x_ref, wa_ref, wb_ref, wc_ref, bias_ref,
                        out_ref, attn_ref, *, nb, t):
  f32 = jnp.float32
  F = FILTERS
  H = NUM_HEADS
  K = CONV_KERNEL_SIZE
  Dh = F // H
  scale = 1.0 / math.sqrt(Dh)
  bn_scale = 1.0 / math.sqrt(1.0 + 1e-5)   # BatchNorm eval, running_var = 1

  def mm(a, w, b):
    return jnp.dot(a, w, preferred_element_type=f32) + b

  def layernorm(v, g, b):
    mu = jnp.mean(v, axis=-1, keepdims=True)
    var = jnp.mean(jnp.square(v - mu), axis=-1, keepdims=True)
    return (v - mu) * jax.lax.rsqrt(var + 1e-5) * g + b

  def swish(v):
    return v * jax.nn.sigmoid(v)

  def bias_row(r, width):
    return bias_ref[r:r + 1, 0:width]

  # per-batch local time index, for masking the conv 'same' padding
  t_idx = jax.lax.broadcasted_iota(jnp.int32, (t, F), 0)

  # ---- input projection ----
  x = x_ref[...].astype(f32)                                     # (rows, Din)
  di_w = wb_ref[WB_DI:WB_DI + INPUT_SIZE, 0:F]
  out = mm(x, di_w, bias_row(BI_DI_B, F))                        # (rows, F)

  attn_slabs = []
  for l in range(N_LAYERS):
    dil = DIL_RATES[l]
    ra = l * FILTERS
    rb = WB_LAYER0 + l * WB_PER_LAYER
    rc = l * WC_PER_LAYER
    rbias = BI_LAYER0 + l * BI_PER_LAYER

    def aff(i, _r=rbias):
      return bias_row(_r + BI_LN_G + i, F), bias_row(_r + BI_LN_B + i, F)

    xb = out

    # ---- FFN1 (half-step residual) ----
    g, b = aff(0)
    h = layernorm(xb, g, b)
    h = swish(mm(h, wa_ref[ra:ra + F, WA_FFN1_W1:WA_FFN1_W1 + FF1],
                 bias_row(rbias + BI_FFN1_B1, FF1)))
    h = mm(h, wc_ref[rc + WC_FFN1_W2:rc + WC_FFN1_W2 + FF1, 0:F],
           bias_row(rbias + BI_FFN1_B2, F))
    xb = xb + 0.5 * h

    # ---- Multi-head self-attention (fused QKV, one softmax for all heads) ----
    g, b = aff(1)
    h = layernorm(xb, g, b)
    qkv = mm(h, wa_ref[ra:ra + F, WA_QKV:WA_QKV + 3 * F],
             bias_row(rbias + BI_QKV_B, 3 * F))                  # (rows, 3F)

    s_blocks = []
    for bb in range(nb):
      r0 = bb * t
      for hd in range(H):
        q = qkv[r0:r0 + t, hd * Dh:(hd + 1) * Dh]
        k = qkv[r0:r0 + t, F + hd * Dh:F + (hd + 1) * Dh]
        s_blocks.append(jax.lax.dot_general(
            q, k, (((1,), (1,)), ((), ())), preferred_element_type=f32))
    s_all = jnp.concatenate(s_blocks, axis=0) * scale            # (nb*H*t, t)
    m = jnp.max(s_all, axis=-1, keepdims=True)
    e = jnp.exp(s_all - m)
    p_all = e / jnp.sum(e, axis=-1, keepdims=True)               # exact softmax

    ctx_rows, map_rows = [], []
    for bb in range(nb):
      r0 = bb * t
      ctx_heads, map_heads = [], []
      for hd in range(H):
        p = p_all[(bb * H + hd) * t:(bb * H + hd + 1) * t, :]    # (t, t)
        v = qkv[r0:r0 + t, 2 * F + hd * Dh:2 * F + (hd + 1) * Dh]
        ctx_heads.append(jnp.dot(p, v, preferred_element_type=f32))
        map_heads.append(p)
      ctx_rows.append(jnp.concatenate(ctx_heads, axis=1))        # (t, F)
      map_rows.append(jnp.concatenate(map_heads, axis=1))        # (t, H*t)
    ctx = jnp.concatenate(ctx_rows, axis=0)                      # (rows, F)
    attn_slabs.append(jnp.concatenate(map_rows, axis=0))         # (rows, H*t)

    o = mm(ctx, wb_ref[rb + WB_WO:rb + WB_WO + F, 0:F],
           bias_row(rbias + BI_BO, F))
    xb = xb + o

    # ---- Conv module: pointwise/GLU -> dilated DW conv -> BN -> swish -> pointwise
    g, b = aff(2)
    h = layernorm(xb, g, b)
    h = mm(h, wa_ref[ra:ra + F, WA_PW1:WA_PW1 + 2 * F],
           bias_row(rbias + BI_PW1_B, 2 * F))                    # (rows, 2F)
    h = h[:, :F] * jax.nn.sigmoid(h[:, F:2 * F])                 # GLU

    dw = wb_ref[rb + WB_DW:rb + WB_DW + K, 0:F]                  # (K, F)
    dw_b = bias_row(rbias + BI_DW_B, F)
    y_rows = []
    for bb in range(nb):                                         # per-batch 'same' conv
      hb = h[bb * t:(bb + 1) * t, :]                             # (t, F)
      taps = []
      for kk in range(K):
        off = (kk - (K - 1) // 2) * dil                          # static offset
        w_k = dw[kk:kk + 1, :]
        if off == 0:
          taps.append(hb * w_k)
        elif abs(off) < t:
          # row r <- hb[r + off]   (sublane rotate on the XLU, then mask padding)
          shifted = pltpu.roll(hb, shift=(-off) % t, axis=0)
          valid = (t_idx < (t - off)) if off > 0 else (t_idx >= (-off))
          taps.append(jnp.where(valid, shifted, 0.0) * w_k)
        # |off| >= t: window is entirely 'same' padding -> contributes zero
      y_rows.append(sum(taps))
    y = jnp.concatenate(y_rows, axis=0) + dw_b                   # (rows, F)

    g, b = aff(5)                                                # BatchNorm1d (eval) affine
    y = y * (g * bn_scale) + b
    y = swish(y)
    y = mm(y, wb_ref[rb + WB_PW2:rb + WB_PW2 + F, 0:F],
           bias_row(rbias + BI_PW2_B, F))
    xb = xb + y

    # ---- FFN2 (half-step residual) ----
    g, b = aff(3)
    h = layernorm(xb, g, b)
    h = swish(mm(h, wa_ref[ra:ra + F, WA_FFN2_W1:WA_FFN2_W1 + FF2],
                 bias_row(rbias + BI_FFN2_B1, FF2)))
    h = mm(h, wc_ref[rc + WC_FFN2_W2:rc + WC_FFN2_W2 + FF2, 0:F],
           bias_row(rbias + BI_FFN2_B2, F))
    xb = xb + 0.5 * h

    # ---- block's final LayerNorm + DFconformer residual (out = out + block(out)) ----
    g, b = aff(4)
    out = out + layernorm(xb, g, b)

  # ---- lane-dense attention-map store: ONE (rows, L*H*t)=(*,128) slab per step ----
  attn_ref[...] = jnp.concatenate(attn_slabs, axis=1).astype(attn_ref.dtype)

  # ---- output projection (out_act == None -> identity) ----
  od_w = wb_ref[WB_OD:WB_OD + F, 0:OUTPUT_SIZE]
  out_ref[...] = mm(out, od_w, bias_row(BI_OD_B, OUTPUT_SIZE)).astype(out_ref.dtype)


# ----------------------------------------------------------------------------
# Wrapper
# ----------------------------------------------------------------------------

def _fold_batch_default():
  """Fold B into one grid step on single-TensorCore chips (v5e/v6e); keep
  grid=(B,) 'parallel' on v7x so the two batch rows map to its two cores."""
  try:
    kind = jax.devices()[0].device_kind.lower()
  except Exception:
    return True
  return not ("v7" in kind or "7x" in kind)


def dfconformer_forward(inp, packed, fold_batch=None):
  """inp: (B, T, input_size). Eval mode: no attention masks, no condition."""
  B, T, Din = inp.shape
  assert Din == INPUT_SIZE
  L, H, Dout = N_LAYERS, NUM_HEADS, OUTPUT_SIZE
  if fold_batch is None:
    fold_batch = _fold_batch_default()
  nb = B if fold_batch else 1            # batch rows handled per grid step
  assert B % nb == 0
  grid = (B // nb,)
  rows = nb * T

  wa, wb, wc, bias = packed["wa"], packed["wb"], packed["wc"], packed["bias"]
  x2d = inp.reshape(B * T, Din)

  kernel = functools.partial(_dfconformer_kernel, nb=nb, t=T)
  resident = lambda a: pl.BlockSpec(a.shape, lambda i: (0, 0))

  out2d, attn = pl.pallas_call(
      kernel,
      grid=grid,
      out_shape=(jax.ShapeDtypeStruct((B * T, Dout), jnp.float32),
                 jax.ShapeDtypeStruct((B * T, L * H * T), jnp.float32)),
      in_specs=[pl.BlockSpec((rows, Din), lambda i: (i, 0)),
                resident(wa), resident(wb), resident(wc), resident(bias)],
      out_specs=(pl.BlockSpec((rows, Dout), lambda i: (i, 0)),
                 pl.BlockSpec((rows, L * H * T), lambda i: (i, 0))),
      compiler_params=pltpu.CompilerParams(dimension_semantics=("parallel",)),
  )(x2d, wa, wb, wc, bias)

  out = out2d.reshape(B, T, Dout)
  # (B*T, L*H*T) -> (L, B, H, T, T)
  attn = attn.reshape(B, T, L, H, T).transpose(2, 0, 3, 1, 4)
  self_att_maps = [attn[i] for i in range(L)]
  cross_att_maps = [None] * L
  return out, self_att_maps, cross_att_maps


# ----------------------------------------------------------------------------
# Deterministic parameter initialization + packing into 4 slabs
# ----------------------------------------------------------------------------

def _init_linear(key, fan_in, fan_out):
  kw, kb = jax.random.split(key)
  s = 1.0 / math.sqrt(fan_in)
  w = jax.random.uniform(kw, (fan_in, fan_out), jnp.float32, -s, s)
  b = jax.random.uniform(kb, (fan_out,), jnp.float32, -s, s)
  return w, b


def _init_block(key):
  F, ef = FILTERS, EXPANSION_FACTORS
  keys = jax.random.split(key, 12)
  p = {}
  p["ffn1_w1"], p["ffn1_b1"] = _init_linear(keys[0], F, F * ef[0])
  p["ffn1_w2"], p["ffn1_b2"] = _init_linear(keys[1], F * ef[0], F)
  wq, bq = _init_linear(keys[2], F, F)
  wk, bk = _init_linear(keys[3], F, F)
  wv, bv = _init_linear(keys[4], F, F)
  p["qkv_w"] = jnp.concatenate([wq, wk, wv], axis=1)
  p["qkv_b"] = jnp.concatenate([bq, bk, bv])
  p["wo"], p["bo"] = _init_linear(keys[5], F, F)
  p["pw1_w"], p["pw1_b"] = _init_linear(keys[6], F, 2 * F)
  s = 1.0 / math.sqrt(CONV_KERNEL_SIZE)
  p["dw_w"] = jax.random.uniform(keys[7], (CONV_KERNEL_SIZE, F), jnp.float32, -s, s)
  p["dw_b"] = jax.random.uniform(keys[8], (F,), jnp.float32, -s, s)
  p["pw2_w"], p["pw2_b"] = _init_linear(keys[9], F, F)
  p["ffn2_w1"], p["ffn2_b1"] = _init_linear(keys[10], F, F * ef[1])
  p["ffn2_w2"], p["ffn2_b2"] = _init_linear(keys[11], F * ef[1], F)
  # per-channel affines: [ffn1_ln, mhsa_ln, conv_ln, ffn2_ln, final_ln, batchnorm]
  p["ln_g"] = jnp.ones((6, F), jnp.float32)
  p["ln_b"] = jnp.zeros((6, F), jnp.float32)
  return p


def pack_params(di_w, di_b, od_w, od_b, blocks):
  """Pack the 25 logical parameters into 4 DMA-friendly slabs."""
  F = FILTERS
  wa = jnp.zeros((WA_ROWS, WA_COLS), jnp.float32)
  wb = jnp.zeros((WB_ROWS, WB_COLS), jnp.float32)
  wc = jnp.zeros((WC_ROWS, WC_COLS), jnp.float32)
  bias = jnp.zeros((BI_ROWS, BIAS_COLS), jnp.float32)

  wb = wb.at[WB_DI:WB_DI + INPUT_SIZE, :F].set(di_w)
  wb = wb.at[WB_OD:WB_OD + F, :OUTPUT_SIZE].set(od_w)
  bias = bias.at[BI_DI_B, :F].set(di_b)
  bias = bias.at[BI_OD_B, :OUTPUT_SIZE].set(od_b)

  for l, p in enumerate(blocks):
    ra = l * F
    wa = wa.at[ra:ra + F, WA_FFN1_W1:WA_FFN1_W1 + FF1].set(p["ffn1_w1"])
    wa = wa.at[ra:ra + F, WA_FFN2_W1:WA_FFN2_W1 + FF2].set(p["ffn2_w1"])
    wa = wa.at[ra:ra + F, WA_QKV:WA_QKV + 3 * F].set(p["qkv_w"])
    wa = wa.at[ra:ra + F, WA_PW1:WA_PW1 + 2 * F].set(p["pw1_w"])

    rb = WB_LAYER0 + l * WB_PER_LAYER
    wb = wb.at[rb + WB_WO:rb + WB_WO + F, :F].set(p["wo"])
    wb = wb.at[rb + WB_PW2:rb + WB_PW2 + F, :F].set(p["pw2_w"])
    wb = wb.at[rb + WB_DW:rb + WB_DW + CONV_KERNEL_SIZE, :F].set(p["dw_w"])

    rc = l * WC_PER_LAYER
    wc = wc.at[rc + WC_FFN1_W2:rc + WC_FFN1_W2 + FF1, :F].set(p["ffn1_w2"])
    wc = wc.at[rc + WC_FFN2_W2:rc + WC_FFN2_W2 + FF2, :F].set(p["ffn2_w2"])

    rbias = BI_LAYER0 + l * BI_PER_LAYER
    bias = bias.at[rbias + BI_LN_G:rbias + BI_LN_G + 6, :F].set(p["ln_g"])
    bias = bias.at[rbias + BI_LN_B:rbias + BI_LN_B + 6, :F].set(p["ln_b"])
    bias = bias.at[rbias + BI_FFN1_B1, :FF1].set(p["ffn1_b1"])
    bias = bias.at[rbias + BI_FFN2_B1, :FF2].set(p["ffn2_b1"])
    bias = bias.at[rbias + BI_QKV_B, :3 * F].set(p["qkv_b"])
    bias = bias.at[rbias + BI_PW1_B, :2 * F].set(p["pw1_b"])
    bias = bias.at[rbias + BI_FFN1_B2, :F].set(p["ffn1_b2"])
    bias = bias.at[rbias + BI_FFN2_B2, :F].set(p["ffn2_b2"])
    bias = bias.at[rbias + BI_BO, :F].set(p["bo"])
    bias = bias.at[rbias + BI_PW2_B, :F].set(p["pw2_b"])
    bias = bias.at[rbias + BI_DW_B, :F].set(p["dw_b"])

  return {"wa": wa, "wb": wb, "wc": wc, "bias": bias}


def init_dfconformer_params(key):
  keys = jax.random.split(key, N_LAYERS + 2)
  di_w, di_b = _init_linear(keys[0], INPUT_SIZE, FILTERS)
  od_w, od_b = _init_linear(keys[1], FILTERS, OUTPUT_SIZE)
  blocks = [_init_block(keys[2 + i]) for i in range(N_LAYERS)]
  return pack_params(di_w, di_b, od_w, od_b, blocks)


# ----------------------------------------------------------------------------
# Main
# ----------------------------------------------------------------------------

if __name__ == "__main__":
  key = jax.random.PRNGKey(0)
  k_params, k_inp = jax.random.split(key)

  packed = init_dfconformer_params(k_params)

  B, T = 2, 8
  inp = jax.random.normal(k_inp, (B, T, INPUT_SIZE), dtype=jnp.float32)

  out, self_att_maps, cross_att_maps = dfconformer_forward(inp, packed)
  out = jax.block_until_ready(out)
  for m in self_att_maps:
    jax.block_until_ready(m)

  assert out.shape == (B, T, OUTPUT_SIZE)
  assert len(self_att_maps) == N_LAYERS
  assert self_att_maps[0].shape == (B, NUM_HEADS, T, T)
  assert all(c is None for c in cross_att_maps)
  assert bool(jnp.all(jnp.isfinite(out)))
  # exact softmax -> attention rows should sum to 1
  row_sums = jnp.sum(self_att_maps[0], axis=-1)
  assert bool(jnp.all(jnp.abs(row_sums - 1.0) < 1e-3))

  print("KERNEL_OK")
</pallas_src>

<mosaic_0001>
module attributes {stable_mosaic.version = 11 : i64} {
  func.func @_dfconformer_kernel(%arg0: i32, %arg1: memref<16x16xf32, #tpu.memory_space<vmem>>, %arg2: memref<128x512xf32, #tpu.memory_space<vmem>>, %arg3: memref<336x32xf32, #tpu.memory_space<vmem>>, %arg4: memref<1024x32xf32, #tpu.memory_space<vmem>>, %arg5: memref<104x128xf32, #tpu.memory_space<vmem>>, %arg6: memref<16x16xf32, #tpu.memory_space<vmem>>, %arg7: memref<16x128xf32, #tpu.memory_space<vmem>>) attributes {dimension_semantics = [#tpu.dimension_semantics<parallel>], iteration_bounds = array<i64: 1>, scalar_prefetch = 0 : i64, scratch_operands = 0 : i64, tpu.core_type = #tpu.core_type<tc>, window_params = [{transform_indices = @transform_0, window_bounds = array<i64: 16, 16>}, {pipeline_mode = #tpu.pipeline_mode<synchronous>, transform_indices = @transform_1, window_bounds = array<i64: 128, 512>}, {pipeline_mode = #tpu.pipeline_mode<synchronous>, transform_indices = @transform_2, window_bounds = array<i64: 336, 32>}, {pipeline_mode = #tpu.pipeline_mode<synchronous>, transform_indices = @transform_3, window_bounds = array<i64: 1024, 32>}, {pipeline_mode = #tpu.pipeline_mode<synchronous>, transform_indices = @transform_4, window_bounds = array<i64: 104, 128>}, {transform_indices = @transform_5, window_bounds = array<i64: 16, 16>}, {transform_indices = @transform_6, window_bounds = array<i64: 16, 128>}]} {
    %0 = tpu.iota {dimensions = array<i32: 0>} : vector<8x32xi32>
    %c0 = arith.constant 0 : index
    %c0_0 = arith.constant 0 : index
    %1 = vector.load %arg1[%c0, %c0_0] : memref<16x16xf32, #tpu.memory_space<vmem>>, vector<16x16xf32>
    %c0_1 = arith.constant 0 : index
    %c0_2 = arith.constant 0 : index
    %2 = vector.load %arg3[%c0_1, %c0_2] : memref<336x32xf32, #tpu.memory_space<vmem>>, vector<16x32xf32>
    %c0_3 = arith.constant 0 : index
    %c0_4 = arith.constant 0 : index
    %3 = vector.load %arg5[%c0_3, %c0_4] : memref<104x128xf32, #tpu.memory_space<vmem>>, vector<1x32xf32>
    %cst = arith.constant dense<0.000000e+00> : vector<16x32xf32>
    %4 = tpu.matmul %1, %2, %cst {dimension_numbers = #tpu.dot_dimension_numbers<[1], [0], [0], [1], [0, 0, 1, 1], [], []>} : vector<16x16xf32>, vector<16x32xf32>, vector<16x32xf32> -> vector<16x32xf32>
    %5 = vector.broadcast %3 : vector<1x32xf32> to vector<16x32xf32>
    %6 = arith.addf %4, %5 : vector<16x32xf32>
    %c8 = arith.constant 8 : index
    %c0_5 = arith.constant 0 : index
    %7 = vector.load %arg5[%c8, %c0_5] : memref<104x128xf32, #tpu.memory_space<vmem>>, vector<1x32xf32>
    %c14 = arith.constant 14 : index
    %c0_6 = arith.constant 0 : index
    %8 = vector.load %arg5[%c14, %c0_6] : memref<104x128xf32, #tpu.memory_space<vmem>>, vector<1x32xf32>
    %cst_7 = arith.constant dense<0.000000e+00> : vector<16xf32>
    %9 = vector.multi_reduction <add>, %6, %cst_7 [1] : vector<16x32xf32> to vector<16xf32>
    %10 = vector.shape_cast %9 : vector<16xf32> to vector<16x1xf32>
    %cst_8 = arith.constant 3.200000e+01 : f32
    %11 = vector.broadcast %cst_8 : f32 to vector<16x1xf32>
    %12 = arith.divf %10, %11 : vector<16x1xf32>
    %13 = vector.broadcast %12 : vector<16x1xf32> to vector<16x32xf32>
    %14 = arith.subf %6, %13 : vector<16x32xf32>
    %15 = arith.mulf %14, %14 : vector<16x32xf32>
    %cst_9 = arith.constant dense<0.000000e+00> : vector<16xf32>
    %16 = vector.multi_reduction <add>, %15, %cst_9 [1] : vector<16x32xf32> to vector<16xf32>
    %17 = vector.shape_cast %16 : vector<16xf32> to vector<16x1xf32>
    %cst_10 = arith.constant 3.200000e+01 : f32
    %18 = vector.broadcast %cst_10 : f32 to vector<16x1xf32>
    %19 = arith.divf %17, %18 : vector<16x1xf32>
    %20 = vector.broadcast %12 : vector<16x1xf32> to vector<16x32xf32>
    %21 = arith.subf %6, %20 : vector<16x32xf32>
    %cst_11 = arith.constant 9.99999974E-6 : f32
    %22 = vector.broadcast %cst_11 : f32 to vector<16x1xf32>
    %23 = arith.addf %19, %22 : vector<16x1xf32>
    %24 = math.rsqrt %23 : vector<16x1xf32>
    %25 = vector.broadcast %24 : vector<16x1xf32> to vector<16x32xf32>
    %26 = arith.mulf %21, %25 : vector<16x32xf32>
    %27 = vector.broadcast %7 : vector<1x32xf32> to vector<16x32xf32>
    %28 = arith.mulf %26, %27 : vector<16x32xf32>
    %29 = vector.broadcast %8 : vector<1x32xf32> to vector<16x32xf32>
    %30 = arith.addf %28, %29 : vector<16x32xf32>
    %c0_12 = arith.constant 0 : index
    %c0_13 = arith.constant 0 : index
    %31 = vector.load %arg2[%c0_12, %c0_13] : memref<128x512xf32, #tpu.memory_space<vmem>>, vector<32x128xf32>
    %c20 = arith.constant 20 : index
    %c0_14 = arith.constant 0 : index
    %32 = vector.load %arg5[%c20, %c0_14] : memref<104x128xf32, #tpu.memory_space<vmem>>, vector<1x128xf32>
    %cst_15 = arith.constant dense<0.000000e+00> : vector<16x128xf32>
    %33 = tpu.matmul %30, %31, %cst_15 {dimension_numbers = #tpu.dot_dimension_numbers<[1], [0], [0], [1], [0, 0, 1, 1], [], []>} : vector<16x32xf32>, vector<32x128xf32>, vector<16x128xf32> -> vector<16x128xf32>
    %34 = vector.broadcast %32 : vector<1x128xf32> to vector<16x128xf32>
    %35 = arith.addf %33, %34 : vector<16x128xf32>
    %36 = arith.negf %35 : vector<16x128xf32>
    %37 = math.exp %36 : vector<16x128xf32>
    %cst_16 = arith.constant 1.000000e+00 : f32
    %38 = vector.broadcast %cst_16 : f32 to vector<16x128xf32>
    %39 = arith.addf %38, %37 : vector<16x128xf32>
    %40 = arith.divf %38, %39 : vector<16x128xf32>
    %41 = arith.mulf %35, %40 : vector<16x128xf32>
    %c0_17 = arith.constant 0 : index
    %c0_18 = arith.constant 0 : index
    %42 = vector.load %arg4[%c0_17, %c0_18] : memref<1024x32xf32, #tpu.memory_space<vmem>>, vector<128x32xf32>
    %c24 = arith.constant 24 : index
    %c0_19 = arith.constant 0 : index
    %43 = vector.load %arg5[%c24, %c0_19] : memref<104x128xf32, #tpu.memory_space<vmem>>, vector<1x32xf32>
    %cst_20 = arith.constant dense<0.000000e+00> : vector<16x32xf32>
    %44 = tpu.matmul %41, %42, %cst_20 {dimension_numbers = #tpu.dot_dimension_numbers<[1], [0], [0], [1], [0, 0, 1, 1], [], []>} : vector<16x128xf32>, vector<128x32xf32>, vector<16x32xf32> -> vector<16x32xf32>
    %45 = vector.broadcast %43 : vector<1x32xf32> to vector<16x32xf32>
    %46 = arith.addf %44, %45 : vector<16x32xf32>
    %cst_21 = arith.constant 5.000000e-01 : f32
    %47 = vector.broadcast %cst_21 : f32 to vector<16x32xf32>
    %48 = arith.mulf %47, %46 : vector<16x32xf32>
    %49 = arith.addf %6, %48 : vector<16x32xf32>
    %c9 = arith.constant 9 : index
    %c0_22 = arith.constant 0 : index
    %50 = vector.load %arg5[%c9, %c0_22] : memref<104x128xf32, #tpu.memory_space<vmem>>, vector<1x32xf32>
    %c15 = arith.constant 15 : index
    %c0_23 = arith.constant 0 : index
    %51 = vector.load %arg5[%c15, %c0_23] : memref<104x128xf32, #tpu.memory_space<vmem>>, vector<1x32xf32>
    %cst_24 = arith.constant dense<0.000000e+00> : vector<16xf32>
    %52 = vector.multi_reduction <add>, %49, %cst_24 [1] : vector<16x32xf32> to vector<16xf32>
    %53 = vector.shape_cast %52 : vector<16xf32> to vector<16x1xf32>
    %cst_25 = arith.constant 3.200000e+01 : f32
    %54 = vector.broadcast %cst_25 : f32 to vector<16x1xf32>
    %55 = arith.divf %53, %54 : vector<16x1xf32>
    %56 = vector.broadcast %55 : vector<16x1xf32> to vector<16x32xf32>
    %57 = arith.subf %49, %56 : vector<16x32xf32>
    %58 = arith.mulf %57, %57 : vector<16x32xf32>
    %cst_26 = arith.constant dense<0.000000e+00> : vector<16xf32>
    %59 = vector.multi_reduction <add>, %58, %cst_26 [1] : vector<16x32xf32> to vector<16xf32>
    %60 = vector.shape_cast %59 : vector<16xf32> to vector<16x1xf32>
    %cst_27 = arith.constant 3.200000e+01 : f32
    %61 = vector.broadcast %cst_27 : f32 to vector<16x1xf32>
    %62 = arith.divf %60, %61 : vector<16x1xf32>
    %63 = vector.broadcast %55 : vector<16x1xf32> to vector<16x32xf32>
    %64 = arith.subf %49, %63 : vector<16x32xf32>
    %cst_28 = arith.constant 9.99999974E-6 : f32
    %65 = vector.broadcast %cst_28 : f32 to vector<16x1xf32>
    %66 = arith.addf %62, %65 : vector<16x1xf32>
    %67 = math.rsqrt %66 : vector<16x1xf32>
    %68 = vector.broadcast %67 : vector<16x1xf32> to vector<16x32xf32>
    %69 = arith.mulf %64, %68 : vector<16x32xf32>
    %70 = vector.broadcast %50 : vector<1x32xf32> to vector<16x32xf32>
    %71 = arith.mulf %69, %70 : vector<16x32xf32>
    %72 = vector.broadcast %51 : vector<1x32xf32> to vector<16x32xf32>
    %73 = arith.addf %71, %72 : vector<16x32xf32>
    %c0_29 = arith.constant 0 : index
    %c256 = arith.constant 256 : index
    %74 = vector.load %arg2[%c0_29, %c256] : memref<128x512xf32, #tpu.memory_space<vmem>>, vector<32x96xf32>
    %c22 = arith.constant 22 : index
    %c0_30 = arith.constant 0 : index
    %75 = vector.load %arg5[%c22, %c0_30] : memref<104x128xf32, #tpu.memory_space<vmem>>, vector<1x96xf32>
    %cst_31 = arith.constant dense<0.000000e+00> : vector<16x96xf32>
    %76 = tpu.matmul %73, %74, %cst_31 {dimension_numbers = #tpu.dot_dimension_numbers<[1], [0], [0], [1], [0, 0, 1, 1], [], []>} : vector<16x32xf32>, vector<32x96xf32>, vector<16x96xf32> -> vector<16x96xf32>
    %77 = vector.broadcast %75 : vector<1x96xf32> to vector<16x96xf32>
    %78 = arith.addf %76, %77 : vector<16x96xf32>
    %79 = vector.extract_strided_slice %78 {offsets = [0, 0], sizes = [8, 8], strides = [1, 1]} : vector<16x96xf32> to vector<8x8xf32>
    %80 = vector.extract_strided_slice %78 {offsets = [0, 32], sizes = [8, 8], strides = [1, 1]} : vector<16x96xf32> to vector<8x8xf32>
    %cst_32 = arith.constant dense<0.000000e+00> : vector<8x8xf32>
    %81 = tpu.matmul %79, %80, %cst_32 {dimension_numbers = #tpu.dot_dimension_numbers<[1], [1], [0], [0], [0, 0, 1, 0], [], []>} : vector<8x8xf32>, vector<8x8xf32>, vector<8x8xf32> -> vector<8x8xf32>
    %82 = vector.extract_strided_slice %78 {offsets = [0, 8], sizes = [8, 8], strides = [1, 1]} : vector<16x96xf32> to vector<8x8xf32>
    %83 = vector.extract_strided_slice %78 {offsets = [0, 40], sizes = [8, 8], strides = [1, 1]} : vector<16x96xf32> to vector<8x8xf32>
    %cst_33 = arith.constant dense<0.000000e+00> : vector<8x8xf32>
    %84 = tpu.matmul %82, %83, %cst_33 {dimension_numbers = #tpu.dot_dimension_numbers<[1], [1], [0], [0], [0, 0, 1, 0], [], []>} : vector<8x8xf32>, vector<8x8xf32>, vector<8x8xf32> -> vector<8x8xf32>
    %85 = vector.extract_strided_slice %78 {offsets = [0, 16], sizes = [8, 8], strides = [1, 1]} : vector<16x96xf32> to vector<8x8xf32>
    %86 = vector.extract_strided_slice %78 {offsets = [0, 48], sizes = [8, 8], strides = [1, 1]} : vector<16x96xf32> to vector<8x8xf32>
    %cst_34 = arith.constant dense<0.000000e+00> : vector<8x8xf32>
    %87 = tpu.matmul %85, %86, %cst_34 {dimension_numbers = #tpu.dot_dimension_numbers<[1], [1], [0], [0], [0, 0, 1, 0], [], []>} : vector<8x8xf32>, vector<8x8xf32>, vector<8x8xf32> -> vector<8x8xf32>
    %88 = vector.extract_strided_slice %78 {offsets = [0, 24], sizes = [8, 8], strides = [1, 1]} : vector<16x96xf32> to vector<8x8xf32>
    %89 = vector.extract_strided_slice %78 {offsets = [0, 56], sizes = [8, 8], strides = [1, 1]} : vector<16x96xf32> to vector<8x8xf32>
    %cst_35 = arith.constant dense<0.000000e+00> : vector<8x8xf32>
    %90 = tpu.matmul %88, %89, %cst_35 {dimension_numbers = #tpu.dot_dimension_numbers<[1], [1], [0], [0], [0, 0, 1, 0], [], []>} : vector<8x8xf32>, vector<8x8xf32>, vector<8x8xf32> -> vector<8x8xf32>
    %91 = vector.extract_strided_slice %78 {offsets = [8, 0], sizes = [8, 8], strides = [1, 1]} : vector<16x96xf32> to vector<8x8xf32>
    %92 = vector.extract_strided_slice %78 {offsets = [8, 32], sizes = [8, 8], strides = [1, 1]} : vector<16x96xf32> to vector<8x8xf32>
    %cst_36 = arith.constant dense<0.000000e+00> : vector<8x8xf32>
    %93 = tpu.matmul %91, %92, %cst_36 {dimension_numbers = #tpu.dot_dimension_numbers<[1], [1], [0], [0], [0, 0, 1, 0], [], []>} : vector<8x8xf32>, vector<8x8xf32>, vector<8x8xf32> -> vector<8x8xf32>
    %94 = vector.extract_strided_slice %78 {offsets = [8, 8], sizes = [8, 8], strides = [1, 1]} : vector<16x96xf32> to vector<8x8xf32>
    %95 = vector.extract_strided_slice %78 {offsets = [8, 40], sizes = [8, 8], strides = [1, 1]} : vector<16x96xf32> to vector<8x8xf32>
    %cst_37 = arith.constant dense<0.000000e+00> : vector<8x8xf32>
    %96 = tpu.matmul %94, %95, %cst_37 {dimension_numbers = #tpu.dot_dimension_numbers<[1], [1], [0], [0], [0, 0, 1, 0], [], []>} : vector<8x8xf32>, vector<8x8xf32>, vector<8x8xf32> -> vector<8x8xf32>
    %97 = vector.extract_strided_slice %78 {offsets = [8, 16], sizes = [8, 8], strides = [1, 1]} : vector<16x96xf32> to vector<8x8xf32>
    %98 = vector.extract_strided_slice %78 {offsets = [8, 48], sizes = [8, 8], strides = [1, 1]} : vector<16x96xf32> to vector<8x8xf32>
    %cst_38 = arith.constant dense<0.000000e+00> : vector<8x8xf32>
    %99 = tpu.matmul %97, %98, %cst_38 {dimension_numbers = #tpu.dot_dimension_numbers<[1], [1], [0], [0], [0, 0, 1, 0], [], []>} : vector<8x8xf32>, vector<8x8xf32>, vector<8x8xf32> -> vector<8x8xf32>
    %100 = vector.extract_strided_slice %78 {offsets = [8, 24], sizes = [8, 8], strides = [1, 1]} : vector<16x96xf32> to vector<8x8xf32>
    %101 = vector.extract_strided_slice %78 {offsets = [8, 56], sizes = [8, 8], strides = [1, 1]} : vector<16x96xf32> to vector<8x8xf32>
    %cst_39 = arith.constant dense<0.000000e+00> : vector<8x8xf32>
    %102 = tpu.matmul %100, %101, %cst_39 {dimension_numbers = #tpu.dot_dimension_numbers<[1], [1], [0], [0], [0, 0, 1, 0], [], []>} : vector<8x8xf32>, vector<8x8xf32>, vector<8x8xf32> -> vector<8x8xf32>
    %103 = tpu.concatenate %81, %84, %87, %90, %93, %96, %99, %102 in 0 : vector<8x8xf32>, vector<8x8xf32>, vector<8x8xf32>, vector<8x8xf32>, vector<8x8xf32>, vector<8x8xf32>, vector<8x8xf32>, vector<8x8xf32> -> vector<64x8xf32>
    %cst_40 = arith.constant 0.353553385 : f32
    %104 = vector.broadcast %cst_40 : f32 to vector<64x8xf32>
    %105 = arith.mulf %103, %104 : vector<64x8xf32>
    %cst_41 = arith.constant dense<0xFF800000> : vector<64xf32>
    %106 = vector.multi_reduction <maximumf>, %105, %cst_41 [1] : vector<64x8xf32> to vector<64xf32>
    %107 = vector.shape_cast %106 : vector<64xf32> to vector<64x1xf32>
    %108 = vector.broadcast %107 : vector<64x1xf32> to vector<64x8xf32>
    %109 = arith.subf %105, %108 : vector<64x8xf32>
    %110 = math.exp %109 : vector<64x8xf32>
    %cst_42 = arith.constant dense<0.000000e+00> : vector<64xf32>
    %111 = vector.multi_reduction <add>, %110, %cst_42 [1] : vector<64x8xf32> to vector<64xf32>
    %112 = vector.shape_cast %111 : vector<64xf32> to vector<64x1xf32>
    %113 = vector.broadcast %112 : vector<64x1xf32> to vector<64x8xf32>
    %114 = arith.divf %110, %113 : vector<64x8xf32>
    %115 = vector.extract_strided_slice %114 {offsets = [0, 0], sizes = [8, 8], strides = [1, 1]} : vector<64x8xf32> to vector<8x8xf32>
    %116 = vector.extract_strided_slice %78 {offsets = [0, 64], sizes = [8, 8], strides = [1, 1]} : vector<16x96xf32> to vector<8x8xf32>
    %cst_43 = arith.constant dense<0.000000e+00> : vector<8x8xf32>
    %117 = tpu.matmul %115, %116, %cst_43 {dimension_numbers = #tpu.dot_dimension_numbers<[1], [0], [0], [1], [0, 0, 1, 1], [], []>} : vector<8x8xf32>, vector<8x8xf32>, vector<8x8xf32> -> vector<8x8xf32>
    %118 = vector.extract_strided_slice %114 {offsets = [8, 0], sizes = [8, 8], strides = [1, 1]} : vector<64x8xf32> to vector<8x8xf32>
    %119 = vector.extract_strided_slice %78 {offsets = [0, 72], sizes = [8, 8], strides = [1, 1]} : vector<16x96xf32> to vector<8x8xf32>
    %cst_44 = arith.constant dense<0.000000e+00> : vector<8x8xf32>
    %120 = tpu.matmul %118, %119, %cst_44 {dimension_numbers = #tpu.dot_dimension_numbers<[1], [0], [0], [1], [0, 0, 1, 1], [], []>} : vector<8x8xf32>, vector<8x8xf32>, vector<8x8xf32> -> vector<8x8xf32>
    %121 = vector.extract_strided_slice %114 {offsets = [16, 0], sizes = [8, 8], strides = [1, 1]} : vector<64x8xf32> to vector<8x8xf32>
    %122 = vector.extract_strided_slice %78 {offsets = [0, 80], sizes = [8, 8], strides = [1, 1]} : vector<16x96xf32> to vector<8x8xf32>
    %cst_45 = arith.constant dense<0.000000e+00> : vector<8x8xf32>
    %123 = tpu.matmul %121, %122, %cst_45 {dimension_numbers = #tpu.dot_dimension_numbers<[1], [0], [0], [1], [0, 0, 1, 1], [], []>} : vector<8x8xf32>, vector<8x8xf32>, vector<8x8xf32> -> vector<8x8xf32>
    %124 = vector.extract_strided_slice %114 {offsets = [24, 0], sizes = [8, 8], strides = [1, 1]} : vector<64x8xf32> to vector<8x8xf32>
    %125 = vector.extract_strided_slice %78 {offsets = [0, 88], sizes = [8, 8], strides = [1, 1]} : vector<16x96xf32> to vector<8x8xf32>
    %cst_46 = arith.constant dense<0.000000e+00> : vector<8x8xf32>
    %126 = tpu.matmul %124, %125, %cst_46 {dimension_numbers = #tpu.dot_dimension_numbers<[1], [0], [0], [1], [0, 0, 1, 1], [], []>} : vector<8x8xf32>, vector<8x8xf32>, vector<8x8xf32> -> vector<8x8xf32>
    %127 = tpu.concatenate %117, %120, %123, %126 in 1 : vector<8x8xf32>, vector<8x8xf32>, vector<8x8xf32>, vector<8x8xf32> -> vector<8x32xf32>
    %128 = tpu.concatenate %115, %118, %121, %124 in 1 : vector<8x8xf32>, vector<8x8xf32>, vector<8x8xf32>, vector<8x8xf32> -> vector<8x32xf32>
    %129 = vector.extract_strided_slice %114 {offsets = [32, 0], sizes = [8, 8], strides = [1, 1]} : vector<64x8xf32> to vector<8x8xf32>
    %130 = vector.extract_strided_slice %78 {offsets = [8, 64], sizes = [8, 8], strides = [1, 1]} : vector<16x96xf32> to vector<8x8xf32>
    %cst_47 = arith.constant dense<0.000000e+00> : vector<8x8xf32>
    %131 = tpu.matmul %129, %130, %cst_47 {dimension_numbers = #tpu.dot_dimension_numbers<[1], [0], [0], [1], [0, 0, 1, 1], [], []>} : vector<8x8xf32>, vector<8x8xf32>, vector<8x8xf32> -> vector<8x8xf32>
    %132 = vector.extract_strided_slice %114 {offsets = [40, 0], sizes = [8, 8], strides = [1, 1]} : vector<64x8xf32> to vector<8x8xf32>
    %133 = vector.extract_strided_slice %78 {offsets = [8, 72], sizes = [8, 8], strides = [1, 1]} : vector<16x96xf32> to vector<8x8xf32>
    %cst_48 = arith.constant dense<0.000000e+00> : vector<8x8xf32>
    %134 = tpu.matmul %132, %133, %cst_48 {dimension_numbers = #tpu.dot_dimension_numbers<[1], [0], [0], [1], [0, 0, 1, 1], [], []>} : vector<8x8xf32>, vector<8x8xf32>, vector<8x8xf32> -> vector<8x8xf32>
    %135 = vector.extract_strided_slice %114 {offsets = [48, 0], sizes = [8, 8], strides = [1, 1]} : vector<64x8xf32> to vector<8x8xf32>
    %136 = vector.extract_strided_slice %78 {offsets = [8, 80], sizes = [8, 8], strides = [1, 1]} : vector<16x96xf32> to vector<8x8xf32>
    %cst_49 = arith.constant dense<0.000000e+00> : vector<8x8xf32>
    %137 = tpu.matmul %135, %136, %cst_49 {dimension_numbers = #tpu.dot_dimension_numbers<[1], [0], [0], [1], [0, 0, 1, 1], [], []>} : vector<8x8xf32>, vector<8x8xf32>, vector<8x8xf32> -> vector<8x8xf32>
    %138 = vector.extract_strided_slice %114 {offsets = [56, 0], sizes = [8, 8], strides = [1, 1]} : vector<64x8xf32> to vector<8x8xf32>
    %139 = vector.extract_strided_slice %78 {offsets = [8, 88], sizes = [8, 8], strides = [1, 1]} : vector<16x96xf32> to vector<8x8xf32>
    %cst_50 = arith.constant dense<0.000000e+00> : vector<8x8xf32>
    %140 = tpu.matmul %138, %139, %cst_50 {dimension_numbers = #tpu.dot_dimension_numbers<[1], [0], [0], [1], [0, 0, 1, 1], [], []>} : vector<8x8xf32>, vector<8x8xf32>, vector<8x8xf32> -> vector<8x8xf32>
    %141 = tpu.concatenate %131, %134, %137, %140 in 1 : vector<8x8xf32>, vector<8x8xf32>, vector<8x8xf32>, vector<8x8xf32> -> vector<8x32xf32>
    %142 = tpu.concatenate %129, %132, %135, %138 in 1 : vector<8x8xf32>, vector<8x8xf32>, vector<8x8xf32>, vector<8x8xf32> -> vector<8x32xf32>
    %143 = tpu.concatenate %127, %141 in 0 : vector<8x32xf32>, vector<8x32xf32> -> vector<16x32xf32>
    %144 = tpu.concatenate %128, %142 in 0 : vector<8x32xf32>, vector<8x32xf32> -> vector<16x32xf32>
    %c48 = arith.constant 48 : index
    %c0_51 = arith.constant 0 : index
    %145 = vector.load %arg3[%c48, %c0_51] : memref<336x32xf32, #tpu.memory_space<vmem>>, vector<32x32xf32>
    %c26 = arith.constant 26 : index
    %c0_52 = arith.constant 0 : index
    %146 = vector.load %arg5[%c26, %c0_52] : memref<104x128xf32, #tpu.memory_space<vmem>>, vector<1x32xf32>
    %cst_53 = arith.constant dense<0.000000e+00> : vector<16x32xf32>
    %147 = tpu.matmul %143, %145, %cst_53 {dimension_numbers = #tpu.dot_dimension_numbers<[1], [0], [0], [1], [0, 0, 1, 1], [], []>} : vector<16x32xf32>, vector<32x32xf32>, vector<16x32xf32> -> vector<16x32xf32>
    %148 = vector.broadcast %146 : vector<1x32xf32> to vector<16x32xf32>
    %149 = arith.addf %147, %148 : vector<16x32xf32>
    %150 = arith.addf %49, %149 : vector<16x32xf32>
    %c10 = arith.constant 10 : index
    %c0_54 = arith.constant 0 : index
    %151 = vector.load %arg5[%c10, %c0_54] : memref<104x128xf32, #tpu.memory_space<vmem>>, vector<1x32xf32>
    %c16 = arith.constant 16 : index
    %c0_55 = arith.constant 0 : index
    %152 = vector.load %arg5[%c16, %c0_55] : memref<104x128xf32, #tpu.memory_space<vmem>>, vector<1x32xf32>
    %cst_56 = arith.constant dense<0.000000e+00> : vector<16xf32>
    %153 = vector.multi_reduction <add>, %150, %cst_56 [1] : vector<16x32xf32> to vector<16xf32>
    %154 = vector.shape_cast %153 : vector<16xf32> to vector<16x1xf32>
    %cst_57 = arith.constant 3.200000e+01 : f32
    %155 = vector.broadcast %cst_57 : f32 to vector<16x1xf32>
    %156 = arith.divf %154, %155 : vector<16x1xf32>
    %157 = vector.broadcast %156 : vector<16x1xf32> to vector<16x32xf32>
    %158 = arith.subf %150, %157 : vector<16x32xf32>
    %159 = arith.mulf %158, %158 : vector<16x32xf32>
    %cst_58 = arith.constant dense<0.000000e+00> : vector<16xf32>
    %160 = vector.multi_reduction <add>, %159, %cst_58 [1] : vector<16x32xf32> to vector<16xf32>
    %161 = vector.shape_cast %160 : vector<16xf32> to vector<16x1xf32>
    %cst_59 = arith.constant 3.200000e+01 : f32
    %162 = vector.broadcast %cst_59 : f32 to vector<16x1xf32>
    %163 = arith.divf %161, %162 : vector<16x1xf32>
    %164 = vector.broadcast %156 : vector<16x1xf32> to vector<16x32xf32>
    %165 = arith.subf %150, %164 : vector<16x32xf32>
    %cst_60 = arith.constant 9.99999974E-6 : f32
    %166 = vector.broadcast %cst_60 : f32 to vector<16x1xf32>
    %167 = arith.addf %163, %166 : vector<16x1xf32>
    %168 = math.rsqrt %167 : vector<16x1xf32>
    %169 = vector.broadcast %168 : vector<16x1xf32> to vector<16x32xf32>
    %170 = arith.mulf %165, %169 : vector<16x32xf32>
    %171 = vector.broadcast %151 : vector<1x32xf32> to vector<16x32xf32>
    %172 = arith.mulf %170, %171 : vector<16x32xf32>
    %173 = vector.broadcast %152 : vector<1x32xf32> to vector<16x32xf32>
    %174 = arith.addf %172, %173 : vector<16x32xf32>
    %c0_61 = arith.constant 0 : index
    %c384 = arith.constant 384 : index
    %175 = vector.load %arg2[%c0_61, %c384] : memref<128x512xf32, #tpu.memory_space<vmem>>, vector<32x64xf32>
    %c23 = arith.constant 23 : index
    %c0_62 = arith.constant 0 : index
    %176 = vector.load %arg5[%c23, %c0_62] : memref<104x128xf32, #tpu.memory_space<vmem>>, vector<1x64xf32>
    %cst_63 = arith.constant dense<0.000000e+00> : vector<16x64xf32>
    %177 = tpu.matmul %174, %175, %cst_63 {dimension_numbers = #tpu.dot_dimension_numbers<[1], [0], [0], [1], [0, 0, 1, 1], [], []>} : vector<16x32xf32>, vector<32x64xf32>, vector<16x64xf32> -> vector<16x64xf32>
    %178 = vector.broadcast %176 : vector<1x64xf32> to vector<16x64xf32>
    %179 = arith.addf %177, %178 : vector<16x64xf32>
    %180 = vector.extract_strided_slice %179 {offsets = [0, 0], sizes = [16, 32], strides = [1, 1]} : vector<16x64xf32> to vector<16x32xf32>
    %181 = vector.extract_strided_slice %179 {offsets = [0, 32], sizes = [16, 32], strides = [1, 1]} : vector<16x64xf32> to vector<16x32xf32>
    %182 = arith.negf %181 : vector<16x32xf32>
    %183 = math.exp %182 : vector<16x32xf32>
    %cst_64 = arith.constant 1.000000e+00 : f32
    %184 = vector.broadcast %cst_64 : f32 to vector<16x32xf32>
    %185 = arith.addf %184, %183 : vector<16x32xf32>
    %186 = arith.divf %184, %185 : vector<16x32xf32>
    %187 = arith.mulf %180, %186 : vector<16x32xf32>
    %c112 = arith.constant 112 : index
    %c0_65 = arith.constant 0 : index
    %188 = vector.load %arg3[%c112, %c0_65] : memref<336x32xf32, #tpu.memory_space<vmem>>, vector<3x32xf32>
    %c28 = arith.constant 28 : index
    %c0_66 = arith.constant 0 : index
    %189 = vector.load %arg5[%c28, %c0_66] : memref<104x128xf32, #tpu.memory_space<vmem>>, vector<1x32xf32>
    %190 = vector.extract_strided_slice %187 {offsets = [0, 0], sizes = [8, 32], strides = [1, 1]} : vector<16x32xf32> to vector<8x32xf32>
    %191 = vector.extract_strided_slice %188 {offsets = [0, 0], sizes = [1, 32], strides = [1, 1]} : vector<3x32xf32> to vector<1x32xf32>
    %c1_i32 = arith.constant 1 : i32
    %192 = tpu.dynamic_rotate %190 by %c1_i32 dim 0 : vector<8x32xf32>, i32 -> vector<8x32xf32>
    %c1_i32_67 = arith.constant 1 : i32
    %193 = vector.broadcast %c1_i32_67 : i32 to vector<8x32xi32>
    %194 = arith.cmpi sge, %0, %193 : vector<8x32xi32>
    %cst_68 = arith.constant 0.000000e+00 : f32
    %195 = vector.broadcast %cst_68 : f32 to vector<8x32xf32>
    %196 = arith.select %194, %192, %195 : vector<8x32xi1>, vector<8x32xf32>
    %197 = vector.broadcast %191 : vector<1x32xf32> to vector<8x32xf32>
    %198 = arith.mulf %196, %197 : vector<8x32xf32>
    %199 = vector.extract_strided_slice %188 {offsets = [1, 0], sizes = [1, 32], strides = [1, 1]} : vector<3x32xf32> to vector<1x32xf32>
    %200 = vector.broadcast %199 : vector<1x32xf32> to vector<8x32xf32>
    %201 = arith.mulf %190, %200 : vector<8x32xf32>
    %202 = vector.extract_strided_slice %188 {offsets = [2, 0], sizes = [1, 32], strides = [1, 1]} : vector<3x32xf32> to vector<1x32xf32>
    %c7_i32 = arith.constant 7 : i32
    %203 = tpu.dynamic_rotate %190 by %c7_i32 dim 0 : vector<8x32xf32>, i32 -> vector<8x32xf32>
    %c7_i32_69 = arith.constant 7 : i32
    %204 = vector.broadcast %c7_i32_69 : i32 to vector<8x32xi32>
    %205 = arith.cmpi slt, %0, %204 : vector<8x32xi32>
    %cst_70 = arith.constant 0.000000e+00 : f32
    %206 = vector.broadcast %cst_70 : f32 to vector<8x32xf32>
    %207 = arith.select %205, %203, %206 : vector<8x32xi1>, vector<8x32xf32>
    %208 = vector.broadcast %202 : vector<1x32xf32> to vector<8x32xf32>
    %209 = arith.mulf %207, %208 : vector<8x32xf32>
    %cst_71 = arith.constant 0.000000e+00 : f32
    %210 = vector.broadcast %cst_71 : f32 to vector<8x32xf32>
    %211 = arith.addf %210, %198 : vector<8x32xf32>
    %212 = arith.addf %211, %201 : vector<8x32xf32>
    %213 = arith.addf %212, %209 : vector<8x32xf32>
    %214 = vector.extract_strided_slice %187 {offsets = [8, 0], sizes = [8, 32], strides = [1, 1]} : vector<16x32xf32> to vector<8x32xf32>
    %215 = vector.extract_strided_slice %188 {offsets = [0, 0], sizes = [1, 32], strides = [1, 1]} : vector<3x32xf32> to vector<1x32xf32>
    %c1_i32_72 = arith.constant 1 : i32
    %216 = tpu.dynamic_rotate %214 by %c1_i32_72 dim 0 : vector<8x32xf32>, i32 -> vector<8x32xf32>
    %c1_i32_73 = arith.constant 1 : i32
    %217 = vector.broadcast %c1_i32_73 : i32 to vector<8x32xi32>
    %218 = arith.cmpi sge, %0, %217 : vector<8x32xi32>
    %cst_74 = arith.constant 0.000000e+00 : f32
    %219 = vector.broadcast %cst_74 : f32 to vector<8x32xf32>
    %220 = arith.select %218, %216, %219 : vector<8x32xi1>, vector<8x32xf32>
    %221 = vector.broadcast %215 : vector<1x32xf32> to vector<8x32xf32>
    %222 = arith.mulf %220, %221 : vector<8x32xf32>
    %223 = vector.extract_strided_slice %188 {offsets = [1, 0], sizes = [1, 32], strides = [1, 1]} : vector<3x32xf32> to vector<1x32xf32>
    %224 = vector.broadcast %223 : vector<1x32xf32> to vector<8x32xf32>
    %225 = arith.mulf %214, %224 : vector<8x32xf32>
    %226 = vector.extract_strided_slice %188 {offsets = [2, 0], sizes = [1, 32], strides = [1, 1]} : vector<3x32xf32> to vector<1x32xf32>
    %c7_i32_75 = arith.constant 7 : i32
    %227 = tpu.dynamic_rotate %214 by %c7_i32_75 dim 0 : vector<8x32xf32>, i32 -> vector<8x32xf32>
    %c7_i32_76 = arith.constant 7 : i32
    %228 = vector.broadcast %c7_i32_76 : i32 to vector<8x32xi32>
    %229 = arith.cmpi slt, %0, %228 : vector<8x32xi32>
    %cst_77 = arith.constant 0.000000e+00 : f32
    %230 = vector.broadcast %cst_77 : f32 to vector<8x32xf32>
    %231 = arith.select %229, %227, %230 : vector<8x32xi1>, vector<8x32xf32>
    %232 = vector.broadcast %226 : vector<1x32xf32> to vector<8x32xf32>
    %233 = arith.mulf %231, %232 : vector<8x32xf32>
    %cst_78 = arith.constant 0.000000e+00 : f32
    %234 = vector.broadcast %cst_78 : f32 to vector<8x32xf32>
    %235 = arith.addf %234, %222 : vector<8x32xf32>
    %236 = arith.addf %235, %225 : vector<8x32xf32>
    %237 = arith.addf %236, %233 : vector<8x32xf32>
    %238 = tpu.concatenate %213, %237 in 0 : vector<8x32xf32>, vector<8x32xf32> -> vector<16x32xf32>
    %239 = vector.broadcast %189 : vector<1x32xf32> to vector<16x32xf32>
    %240 = arith.addf %238, %239 : vector<16x32xf32>
    %c13 = arith.constant 13 : index
    %c0_79 = arith.constant 0 : index
    %241 = vector.load %arg5[%c13, %c0_79] : memref<104x128xf32, #tpu.memory_space<vmem>>, vector<1x32xf32>
    %c19 = arith.constant 19 : index
    %c0_80 = arith.constant 0 : index
    %242 = vector.load %arg5[%c19, %c0_80] : memref<104x128xf32, #tpu.memory_space<vmem>>, vector<1x32xf32>
    %cst_81 = arith.constant 0.999994993 : f32
    %243 = vector.broadcast %cst_81 : f32 to vector<1x32xf32>
    %244 = arith.mulf %241, %243 : vector<1x32xf32>
    %245 = vector.broadcast %244 : vector<1x32xf32> to vector<16x32xf32>
    %246 = arith.mulf %240, %245 : vector<16x32xf32>
    %247 = vector.broadcast %242 : vector<1x32xf32> to vector<16x32xf32>
    %248 = arith.addf %246, %247 : vector<16x32xf32>
    %249 = arith.negf %248 : vector<16x32xf32>
    %250 = math.exp %249 : vector<16x32xf32>
    %cst_82 = arith.constant 1.000000e+00 : f32
    %251 = vector.broadcast %cst_82 : f32 to vector<16x32xf32>
    %252 = arith.addf %251, %250 : vector<16x32xf32>
    %253 = arith.divf %251, %252 : vector<16x32xf32>
    %254 = arith.mulf %248, %253 : vector<16x32xf32>
    %c80 = arith.constant 80 : index
    %c0_83 = arith.constant 0 : index
    %255 = vector.load %arg3[%c80, %c0_83] : memref<336x32xf32, #tpu.memory_space<vmem>>, vector<32x32xf32>
    %c27 = arith.constant 27 : index
    %c0_84 = arith.constant 0 : index
    %256 = vector.load %arg5[%c27, %c0_84] : memref<104x128xf32, #tpu.memory_space<vmem>>, vector<1x32xf32>
    %cst_85 = arith.constant dense<0.000000e+00> : vector<16x32xf32>
    %257 = tpu.matmul %254, %255, %cst_85 {dimension_numbers = #tpu.dot_dimension_numbers<[1], [0], [0], [1], [0, 0, 1, 1], [], []>} : vector<16x32xf32>, vector<32x32xf32>, vector<16x32xf32> -> vector<16x32xf32>
    %258 = vector.broadcast %256 : vector<1x32xf32> to vector<16x32xf32>
    %259 = arith.addf %257, %258 : vector<16x32xf32>
    %260 = arith.addf %150, %259 : vector<16x32xf32>
    %c11 = arith.constant 11 : index
    %c0_86 = arith.constant 0 : index
    %261 = vector.load %arg5[%c11, %c0_86] : memref<104x128xf32, #tpu.memory_space<vmem>>, vector<1x32xf32>
    %c17 = arith.constant 17 : index
    %c0_87 = arith.constant 0 : index
    %262 = vector.load %arg5[%c17, %c0_87] : memref<104x128xf32, #tpu.memory_space<vmem>>, vector<1x32xf32>
    %cst_88 = arith.constant dense<0.000000e+00> : vector<16xf32>
    %263 = vector.multi_reduction <add>, %260, %cst_88 [1] : vector<16x32xf32> to vector<16xf32>
    %264 = vector.shape_cast %263 : vector<16xf32> to vector<16x1xf32>
    %cst_89 = arith.constant 3.200000e+01 : f32
    %265 = vector.broadcast %cst_89 : f32 to vector<16x1xf32>
    %266 = arith.divf %264, %265 : vector<16x1xf32>
    %267 = vector.broadcast %266 : vector<16x1xf32> to vector<16x32xf32>
    %268 = arith.subf %260, %267 : vector<16x32xf32>
    %269 = arith.mulf %268, %268 : vector<16x32xf32>
    %cst_90 = arith.constant dense<0.000000e+00> : vector<16xf32>
    %270 = vector.multi_reduction <add>, %269, %cst_90 [1] : vector<16x32xf32> to vector<16xf32>
    %271 = vector.shape_cast %270 : vector<16xf32> to vector<16x1xf32>
    %cst_91 = arith.constant 3.200000e+01 : f32
    %272 = vector.broadcast %cst_91 : f32 to vector<16x1xf32>
    %273 = arith.divf %271, %272 : vector<16x1xf32>
    %274 = vector.broadcast %266 : vector<16x1xf32> to vector<16x32xf32>
    %275 = arith.subf %260, %274 : vector<16x32xf32>
    %cst_92 = arith.constant 9.99999974E-6 : f32
    %276 = vector.broadcast %cst_92 : f32 to vector<16x1xf32>
    %277 = arith.addf %273, %276 : vector<16x1xf32>
    %278 = math.rsqrt %277 : vector<16x1xf32>
    %279 = vector.broadcast %278 : vector<16x1xf32> to vector<16x32xf32>
    %280 = arith.mulf %275, %279 : vector<16x32xf32>
    %281 = vector.broadcast %261 : vector<1x32xf32> to vector<16x32xf32>
    %282 = arith.mulf %280, %281 : vector<16x32xf32>
    %283 = vector.broadcast %262 : vector<1x32xf32> to vector<16x32xf32>
    %284 = arith.addf %282, %283 : vector<16x32xf32>
    %c0_93 = arith.constant 0 : index
    %c128 = arith.constant 128 : index
    %285 = vector.load %arg2[%c0_93, %c128] : memref<128x512xf32, #tpu.memory_space<vmem>>, vector<32x128xf32>
    %c21 = arith.constant 21 : index
    %c0_94 = arith.constant 0 : index
    %286 = vector.load %arg5[%c21, %c0_94] : memref<104x128xf32, #tpu.memory_space<vmem>>, vector<1x128xf32>
    %cst_95 = arith.constant dense<0.000000e+00> : vector<16x128xf32>
    %287 = tpu.matmul %284, %285, %cst_95 {dimension_numbers = #tpu.dot_dimension_numbers<[1], [0], [0], [1], [0, 0, 1, 1], [], []>} : vector<16x32xf32>, vector<32x128xf32>, vector<16x128xf32> -> vector<16x128xf32>
    %288 = vector.broadcast %286 : vector<1x128xf32> to vector<16x128xf32>
    %289 = arith.addf %287, %288 : vector<16x128xf32>
    %290 = arith.negf %289 : vector<16x128xf32>
    %291 = math.exp %290 : vector<16x128xf32>
    %cst_96 = arith.constant 1.000000e+00 : f32
    %292 = vector.broadcast %cst_96 : f32 to vector<16x128xf32>
    %293 = arith.addf %292, %291 : vector<16x128xf32>
    %294 = arith.divf %292, %293 : vector<16x128xf32>
    %295 = arith.mulf %289, %294 : vector<16x128xf32>
    %c128_97 = arith.constant 128 : index
    %c0_98 = arith.constant 0 : index
    %296 = vector.load %arg4[%c128_97, %c0_98] : memref<1024x32xf32, #tpu.memory_space<vmem>>, vector<128x32xf32>
    %c25 = arith.constant 25 : index
    %c0_99 = arith.constant 0 : index
    %297 = vector.load %arg5[%c25, %c0_99] : memref<104x128xf32, #tpu.memory_space<vmem>>, vector<1x32xf32>
    %cst_100 = arith.constant dense<0.000000e+00> : vector<16x32xf32>
    %298 = tpu.matmul %295, %296, %cst_100 {dimension_numbers = #tpu.dot_dimension_numbers<[1], [0], [0], [1], [0, 0, 1, 1], [], []>} : vector<16x128xf32>, vector<128x32xf32>, vector<16x32xf32> -> vector<16x32xf32>
    %299 = vector.broadcast %297 : vector<1x32xf32> to vector<16x32xf32>
    %300 = arith.addf %298, %299 : vector<16x32xf32>
    %cst_101 = arith.constant 5.000000e-01 : f32
    %301 = vector.broadcast %cst_101 : f32 to vector<16x32xf32>
    %302 = arith.mulf %301, %300 : vector<16x32xf32>
    %303 = arith.addf %260, %302 : vector<16x32xf32>
    %c12 = arith.constant 12 : index
    %c0_102 = arith.constant 0 : index
    %304 = vector.load %arg5[%c12, %c0_102] : memref<104x128xf32, #tpu.memory_space<vmem>>, vector<1x32xf32>
    %c18 = arith.constant 18 : index
    %c0_103 = arith.constant 0 : index
    %305 = vector.load %arg5[%c18, %c0_103] : memref<104x128xf32, #tpu.memory_space<vmem>>, vector<1x32xf32>
    %cst_104 = arith.constant dense<0.000000e+00> : vector<16xf32>
    %306 = vector.multi_reduction <add>, %303, %cst_104 [1] : vector<16x32xf32> to vector<16xf32>
    %307 = vector.shape_cast %306 : vector<16xf32> to vector<16x1xf32>
    %cst_105 = arith.constant 3.200000e+01 : f32
    %308 = vector.broadcast %cst_105 : f32 to vector<16x1xf32>
    %309 = arith.divf %307, %308 : vector<16x1xf32>
    %310 = vector.broadcast %309 : vector<16x1xf32> to vector<16x32xf32>
    %311 = arith.subf %303, %310 : vector<16x32xf32>
    %312 = arith.mulf %311, %311 : vector<16x32xf32>
    %cst_106 = arith.constant dense<0.000000e+00> : vector<16xf32>
    %313 = vector.multi_reduction <add>, %312, %cst_106 [1] : vector<16x32xf32> to vector<16xf32>
    %314 = vector.shape_cast %313 : vector<16xf32> to vector<16x1xf32>
    %cst_107 = arith.constant 3.200000e+01 : f32
    %315 = vector.broadcast %cst_107 : f32 to vector<16x1xf32>
    %316 = arith.divf %314, %315 : vector<16x1xf32>
    %317 = vector.broadcast %309 : vector<16x1xf32> to vector<16x32xf32>
    %318 = arith.subf %303, %317 : vector<16x32xf32>
    %cst_108 = arith.constant 9.99999974E-6 : f32
    %319 = vector.broadcast %cst_108 : f32 to vector<16x1xf32>
    %320 = arith.addf %316, %319 : vector<16x1xf32>
    %321 = math.rsqrt %320 : vector<16x1xf32>
    %322 = vector.broadcast %321 : vector<16x1xf32> to vector<16x32xf32>
    %323 = arith.mulf %318, %322 : vector<16x32xf32>
    %324 = vector.broadcast %304 : vector<1x32xf32> to vector<16x32xf32>
    %325 = arith.mulf %323, %324 : vector<16x32xf32>
    %326 = vector.broadcast %305 : vector<1x32xf32> to vector<16x32xf32>
    %327 = arith.addf %325, %326 : vector<16x32xf32>
    %328 = arith.addf %6, %327 : vector<16x32xf32>
    %c32 = arith.constant 32 : index
    %c0_109 = arith.constant 0 : index
    %329 = vector.load %arg5[%c32, %c0_109] : memref<104x128xf32, #tpu.memory_space<vmem>>, vector<1x32xf32>
    %c38 = arith.constant 38 : index
    %c0_110 = arith.constant 0 : index
    %330 = vector.load %arg5[%c38, %c0_110] : memref<104x128xf32, #tpu.memory_space<vmem>>, vector<1x32xf32>
    %cst_111 = arith.constant dense<0.000000e+00> : vector<16xf32>
    %331 = vector.multi_reduction <add>, %328, %cst_111 [1] : vector<16x32xf32> to vector<16xf32>
    %332 = vector.shape_cast %331 : vector<16xf32> to vector<16x1xf32>
    %cst_112 = arith.constant 3.200000e+01 : f32
    %333 = vector.broadcast %cst_112 : f32 to vector<16x1xf32>
    %334 = arith.divf %332, %333 : vector<16x1xf32>
    %335 = vector.broadcast %334 : vector<16x1xf32> to vector<16x32xf32>
    %336 = arith.subf %328, %335 : vector<16x32xf32>
    %337 = arith.mulf %336, %336 : vector<16x32xf32>
    %cst_113 = arith.constant dense<0.000000e+00> : vector<16xf32>
    %338 = vector.multi_reduction <add>, %337, %cst_113 [1] : vector<16x32xf32> to vector<16xf32>
    %339 = vector.shape_cast %338 : vector<16xf32> to vector<16x1xf32>
    %cst_114 = arith.constant 3.200000e+01 : f32
    %340 = vector.broadcast %cst_114 : f32 to vector<16x1xf32>
    %341 = arith.divf %339, %340 : vector<16x1xf32>
    %342 = vector.broadcast %334 : vector<16x1xf32> to vector<16x32xf32>
    %343 = arith.subf %328, %342 : vector<16x32xf32>
    %cst_115 = arith.constant 9.99999974E-6 : f32
    %344 = vector.broadcast %cst_115 : f32 to vector<16x1xf32>
    %345 = arith.addf %341, %344 : vector<16x1xf32>
    %346 = math.rsqrt %345 : vector<16x1xf32>
    %347 = vector.broadcast %346 : vector<16x1xf32> to vector<16x32xf32>
    %348 = arith.mulf %343, %347 : vector<16x32xf32>
    %349 = vector.broadcast %329 : vector<1x32xf32> to vector<16x32xf32>
    %350 = arith.mulf %348, %349 : vector<16x32xf32>
    %351 = vector.broadcast %330 : vector<1x32xf32> to vector<16x32xf32>
    %352 = arith.addf %350, %351 : vector<16x32xf32>
    %c32_116 = arith.constant 32 : index
    %c0_117 = arith.constant 0 : index
    %353 = vector.load %arg2[%c32_116, %c0_117] : memref<128x512xf32, #tpu.memory_space<vmem>>, vector<32x128xf32>
    %c44 = arith.constant 44 : index
    %c0_118 = arith.constant 0 : index
    %354 = vector.load %arg5[%c44, %c0_118] : memref<104x128xf32, #tpu.memory_space<vmem>>, vector<1x128xf32>
    %cst_119 = arith.constant dense<0.000000e+00> : vector<16x128xf32>
    %355 = tpu.matmul %352, %353, %cst_119 {dimension_numbers = #tpu.dot_dimension_numbers<[1], [0], [0], [1], [0, 0, 1, 1], [], []>} : vector<16x32xf32>, vector<32x128xf32>, vector<16x128xf32> -> vector<16x128xf32>
    %356 = vector.broadcast %354 : vector<1x128xf32> to vector<16x128xf32>
    %357 = arith.addf %355, %356 : vector<16x128xf32>
    %358 = arith.negf %357 : vector<16x128xf32>
    %359 = math.exp %358 : vector<16x128xf32>
    %cst_120 = arith.constant 1.000000e+00 : f32
    %360 = vector.broadcast %cst_120 : f32 to vector<16x128xf32>
    %361 = arith.addf %360, %359 : vector<16x128xf32>
    %362 = arith.divf %360, %361 : vector<16x128xf32>
    %363 = arith.mulf %357, %362 : vector<16x128xf32>
    %c256_121 = arith.constant 256 : index
    %c0_122 = arith.constant 0 : index
    %364 = vector.load %arg4[%c256_121, %c0_122] : memref<1024x32xf32, #tpu.memory_space<vmem>>, vector<128x32xf32>
    %c48_123 = arith.constant 48 : index
    %c0_124 = arith.constant 0 : index
    %365 = vector.load %arg5[%c48_123, %c0_124] : memref<104x128xf32, #tpu.memory_space<vmem>>, vector<1x32xf32>
    %cst_125 = arith.constant dense<0.000000e+00> : vector<16x32xf32>
    %366 = tpu.matmul %363, %364, %cst_125 {dimension_numbers = #tpu.dot_dimension_numbers<[1], [0], [0], [1], [0, 0, 1, 1], [], []>} : vector<16x128xf32>, vector<128x32xf32>, vector<16x32xf32> -> vector<16x32xf32>
    %367 = vector.broadcast %365 : vector<1x32xf32> to vector<16x32xf32>
    %368 = arith.addf %366, %367 : vector<16x32xf32>
    %cst_126 = arith.constant 5.000000e-01 : f32
    %369 = vector.broadcast %cst_126 : f32 to vector<16x32xf32>
    %370 = arith.mulf %369, %368 : vector<16x32xf32>
    %371 = arith.addf %328, %370 : vector<16x32xf32>
    %c33 = arith.constant 33 : index
    %c0_127 = arith.constant 0 : index
    %372 = vector.load %arg5[%c33, %c0_127] : memref<104x128xf32, #tpu.memory_space<vmem>>, vector<1x32xf32>
    %c39 = arith.constant 39 : index
    %c0_128 = arith.constant 0 : index
    %373 = vector.load %arg5[%c39, %c0_128] : memref<104x128xf32, #tpu.memory_space<vmem>>, vector<1x32xf32>
    %cst_129 = arith.constant dense<0.000000e+00> : vector<16xf32>
    %374 = vector.multi_reduction <add>, %371, %cst_129 [1] : vector<16x32xf32> to vector<16xf32>
    %375 = vector.shape_cast %374 : vector<16xf32> to vector<16x1xf32>
    %cst_130 = arith.constant 3.200000e+01 : f32
    %376 = vector.broadcast %cst_130 : f32 to vector<16x1xf32>
    %377 = arith.divf %375, %376 : vector<16x1xf32>
    %378 = vector.broadcast %377 : vector<16x1xf32> to vector<16x32xf32>
    %379 = arith.subf %371, %378 : vector<16x32xf32>
    %380 = arith.mulf %379, %379 : vector<16x32xf32>
    %cst_131 = arith.constant dense<0.000000e+00> : vector<16xf32>
    %381 = vector.multi_reduction <add>, %380, %cst_131 [1] : vector<16x32xf32> to vector<16xf32>
    %382 = vector.shape_cast %381 : vector<16xf32> to vector<16x1xf32>
    %cst_132 = arith.constant 3.200000e+01 : f32
    %383 = vector.broadcast %cst_132 : f32 to vector<16x1xf32>
    %384 = arith.divf %382, %383 : vector<16x1xf32>
    %385 = vector.broadcast %377 : vector<16x1xf32> to vector<16x32xf32>
    %386 = arith.subf %371, %385 : vector<16x32xf32>
    %cst_133 = arith.constant 9.99999974E-6 : f32
    %387 = vector.broadcast %cst_133 : f32 to vector<16x1xf32>
    %388 = arith.addf %384, %387 : vector<16x1xf32>
    %389 = math.rsqrt %388 : vector<16x1xf32>
    %390 = vector.broadcast %389 : vector<16x1xf32> to vector<16x32xf32>
    %391 = arith.mulf %386, %390 : vector<16x32xf32>
    %392 = vector.broadcast %372 : vector<1x32xf32> to vector<16x32xf32>
    %393 = arith.mulf %391, %392 : vector<16x32xf32>
    %394 = vector.broadcast %373 : vector<1x32xf32> to vector<16x32xf32>
    %395 = arith.addf %393, %394 : vector<16x32xf32>
    %c32_134 = arith.constant 32 : index
    %c256_135 = arith.constant 256 : index
    %396 = vector.load %arg2[%c32_134, %c256_135] : memref<128x512xf32, #tpu.memory_space<vmem>>, vector<32x96xf32>
    %c46 = arith.constant 46 : index
    %c0_136 = arith.constant 0 : index
    %397 = vector.load %arg5[%c46, %c0_136] : memref<104x128xf32, #tpu.memory_space<vmem>>, vector<1x96xf32>
    %cst_137 = arith.constant dense<0.000000e+00> : vector<16x96xf32>
    %398 = tpu.matmul %395, %396, %cst_137 {dimension_numbers = #tpu.dot_dimension_numbers<[1], [0], [0], [1], [0, 0, 1, 1], [], []>} : vector<16x32xf32>, vector<32x96xf32>, vector<16x96xf32> -> vector<16x96xf32>
    %399 = vector.broadcast %397 : vector<1x96xf32> to vector<16x96xf32>
    %400 = arith.addf %398, %399 : vector<16x96xf32>
    %401 = vector.extract_strided_slice %400 {offsets = [0, 0], sizes = [8, 8], strides = [1, 1]} : vector<16x96xf32> to vector<8x8xf32>
    %402 = vector.extract_strided_slice %400 {offsets = [0, 32], sizes = [8, 8], strides = [1, 1]} : vector<16x96xf32> to vector<8x8xf32>
    %cst_138 = arith.constant dense<0.000000e+00> : vector<8x8xf32>
    %403 = tpu.matmul %401, %402, %cst_138 {dimension_numbers = #tpu.dot_dimension_numbers<[1], [1], [0], [0], [0, 0, 1, 0], [], []>} : vector<8x8xf32>, vector<8x8xf32>, vector<8x8xf32> -> vector<8x8xf32>
    %404 = vector.extract_strided_slice %400 {offsets = [0, 8], sizes = [8, 8], strides = [1, 1]} : vector<16x96xf32> to vector<8x8xf32>
    %405 = vector.extract_strided_slice %400 {offsets = [0, 40], sizes = [8, 8], strides = [1, 1]} : vector<16x96xf32> to vector<8x8xf32>
    %cst_139 = arith.constant dense<0.000000e+00> : vector<8x8xf32>
    %406 = tpu.matmul %404, %405, %cst_139 {dimension_numbers = #tpu.dot_dimension_numbers<[1], [1], [0], [0], [0, 0, 1, 0], [], []>} : vector<8x8xf32>, vector<8x8xf32>, vector<8x8xf32> -> vector<8x8xf32>
    %407 = vector.extract_strided_slice %400 {offsets = [0, 16], sizes = [8, 8], strides = [1, 1]} : vector<16x96xf32> to vector<8x8xf32>
    %408 = vector.extract_strided_slice %400 {offsets = [0, 48], sizes = [8, 8], strides = [1, 1]} : vector<16x96xf32> to vector<8x8xf32>
    %cst_140 = arith.constant dense<0.000000e+00> : vector<8x8xf32>
    %409 = tpu.matmul %407, %408, %cst_140 {dimension_numbers = #tpu.dot_dimension_numbers<[1], [1], [0], [0], [0, 0, 1, 0], [], []>} : vector<8x8xf32>, vector<8x8xf32>, vector<8x8xf32> -> vector<8x8xf32>
    %410 = vector.extract_strided_slice %400 {offsets = [0, 24], sizes = [8, 8], strides = [1, 1]} : vector<16x96xf32> to vector<8x8xf32>
    %411 = vector.extract_strided_slice %400 {offsets = [0, 56], sizes = [8, 8], strides = [1, 1]} : vector<16x96xf32> to vector<8x8xf32>
    %cst_141 = arith.constant dense<0.000000e+00> : vector<8x8xf32>
    %412 = tpu.matmul %410, %411, %cst_141 {dimension_numbers = #tpu.dot_dimension_numbers<[1], [1], [0], [0], [0, 0, 1, 0], [], []>} : vector<8x8xf32>, vector<8x8xf32>, vector<8x8xf32> -> vector<8x8xf32>
    %413 = vector.extract_strided_slice %400 {offsets = [8, 0], sizes = [8, 8], strides = [1, 1]} : vector<16x96xf32> to vector<8x8xf32>
    %414 = vector.extract_strided_slice %400 {offsets = [8, 32], sizes = [8, 8], strides = [1, 1]} : vector<16x96xf32> to vector<8x8xf32>
    %cst_142 = arith.constant dense<0.000000e+00> : vector<8x8xf32>
    %415 = tpu.matmul %413, %414, %cst_142 {dimension_numbers = #tpu.dot_dimension_numbers<[1], [1], [0], [0], [0, 0, 1, 0], [], []>} : vector<8x8xf32>, vector<8x8xf32>, vector<8x8xf32> -> vector<8x8xf32>
    %416 = vector.extract_strided_slice %400 {offsets = [8, 8], sizes = [8, 8], strides = [1, 1]} : vector<16x96xf32> to vector<8x8xf32>
    %417 = vector.extract_strided_slice %400 {offsets = [8, 40], sizes = [8, 8], strides = [1, 1]} : vector<16x96xf32> to vector<8x8xf32>
    %cst_143 = arith.constant dense<0.000000e+00> : vector<8x8xf32>
    %418 = tpu.matmul %416, %417, %cst_143 {dimension_numbers = #tpu.dot_dimension_numbers<[1], [1], [0], [0], [0, 0, 1, 0], [], []>} : vector<8x8xf32>, vector<8x8xf32>, vector<8x8xf32> -> vector<8x8xf32>
    %419 = vector.extract_strided_slice %400 {offsets = [8, 16], sizes = [8, 8], strides = [1, 1]} : vector<16x96xf32> to vector<8x8xf32>
    %420 = vector.extract_strided_slice %400 {offsets = [8, 48], sizes = [8, 8], strides = [1, 1]} : vector<16x96xf32> to vector<8x8xf32>
    %cst_144 = arith.constant dense<0.000000e+00> : vector<8x8xf32>
    %421 = tpu.matmul %419, %420, %cst_144 {dimension_numbers = #tpu.dot_dimension_numbers<[1], [1], [0], [0], [0, 0, 1, 0], [], []>} : vector<8x8xf32>, vector<8x8xf32>, vector<8x8xf32> -> vector<8x8xf32>
    %422 = vector.extract_strided_slice %400 {offsets = [8, 24], sizes = [8, 8], strides = [1, 1]} : vector<16x96xf32> to vector<8x8xf32>
    %423 = vector.extract_strided_slice %400 {offsets = [8, 56], sizes = [8, 8], strides = [1, 1]} : vector<16x96xf32> to vector<8x8xf32>
    %cst_145 = arith.constant dense<0.000000e+00> : vector<8x8xf32>
    %424 = tpu.matmul %422, %423, %cst_145 {dimension_numbers = #tpu.dot_dimension_numbers<[1], [1], [0], [0], [0, 0, 1, 0], [], []>} : vector<8x8xf32>, vector<8x8xf32>, vector<8x8xf32> -> vector<8x8xf32>
    %425 = tpu.concatenate %403, %406, %409, %412, %415, %418, %421, %424 in 0 : vector<8x8xf32>, vector<8x8xf32>, vector<8x8xf32>, vector<8x8xf32>, vector<8x8xf32>, vector<8x8xf32>, vector<8x8xf32>, vector<8x8xf32> -> vector<64x8xf32>
    %cst_146 = arith.constant 0.353553385 : f32
    %426 = vector.broadcast %cst_146 : f32 to vector<64x8xf32>
    %427 = arith.mulf %425, %426 : vector<64x8xf32>
    %cst_147 = arith.constant dense<0xFF800000> : vector<64xf32>
    %428 = vector.multi_reduction <maximumf>, %427, %cst_147 [1] : vector<64x8xf32> to vector<64xf32>
    %429 = vector.shape_cast %428 : vector<64xf32> to vector<64x1xf32>
    %430 = vector.broadcast %429 : vector<64x1xf32> to vector<64x8xf32>
    %431 = arith.subf %427, %430 : vector<64x8xf32>
    %432 = math.exp %431 : vector<64x8xf32>
    %cst_148 = arith.constant dense<0.000000e+00> : vector<64xf32>
    %433 = vector.multi_reduction <add>, %432, %cst_148 [1] : vector<64x8xf32> to vector<64xf32>
    %434 = vector.shape_cast %433 : vector<64xf32> to vector<64x1xf32>
    %435 = vector.broadcast %434 : vector<64x1xf32> to vector<64x8xf32>
    %436 = arith.divf %432, %435 : vector<64x8xf32>
    %437 = vector.extract_strided_slice %436 {offsets = [0, 0], sizes = [8, 8], strides = [1, 1]} : vector<64x8xf32> to vector<8x8xf32>
    %438 = vector.extract_strided_slice %400 {offsets = [0, 64], sizes = [8, 8], strides = [1, 1]} : vector<16x96xf32> to vector<8x8xf32>
    %cst_149 = arith.constant dense<0.000000e+00> : vector<8x8xf32>
    %439 = tpu.matmul %437, %438, %cst_149 {dimension_numbers = #tpu.dot_dimension_numbers<[1], [0], [0], [1], [0, 0, 1, 1], [], []>} : vector<8x8xf32>, vector<8x8xf32>, vector<8x8xf32> -> vector<8x8xf32>
    %440 = vector.extract_strided_slice %436 {offsets = [8, 0], sizes = [8, 8], strides = [1, 1]} : vector<64x8xf32> to vector<8x8xf32>
    %441 = vector.extract_strided_slice %400 {offsets = [0, 72], sizes = [8, 8], strides = [1, 1]} : vector<16x96xf32> to vector<8x8xf32>
    %cst_150 = arith.constant dense<0.000000e+00> : vector<8x8xf32>
    %442 = tpu.matmul %440, %441, %cst_150 {dimension_numbers = #tpu.dot_dimension_numbers<[1], [0], [0], [1], [0, 0, 1, 1], [], []>} : vector<8x8xf32>, vector<8x8xf32>, vector<8x8xf32> -> vector<8x8xf32>
    %443 = vector.extract_strided_slice %436 {offsets = [16, 0], sizes = [8, 8], strides = [1, 1]} : vector<64x8xf32> to vector<8x8xf32>
    %444 = vector.extract_strided_slice %400 {offsets = [0, 80], sizes = [8, 8], strides = [1, 1]} : vector<16x96xf32> to vector<8x8xf32>
    %cst_151 = arith.constant dense<0.000000e+00> : vector<8x8xf32>
    %445 = tpu.matmul %443, %444, %cst_151 {dimension_numbers = #tpu.dot_dimension_numbers<[1], [0], [0], [1], [0, 0, 1, 1], [], []>} : vector<8x8xf32>, vector<8x8xf32>, vector<8x8xf32> -> vector<8x8xf32>
    %446 = vector.extract_strided_slice %436 {offsets = [24, 0], sizes = [8, 8], strides = [1, 1]} : vector<64x8xf32> to vector<8x8xf32>
    %447 = vector.extract_strided_slice %400 {offsets = [0, 88], sizes = [8, 8], strides = [1, 1]} : vector<16x96xf32> to vector<8x8xf32>
    %cst_152 = arith.constant dense<0.000000e+00> : vector<8x8xf32>
    %448 = tpu.matmul %446, %447, %cst_152 {dimension_numbers = #tpu.dot_dimension_numbers<[1], [0], [0], [1], [0, 0, 1, 1], [], []>} : vector<8x8xf32>, vector<8x8xf32>, vector<8x8xf32> -> vector<8x8xf32>
    %449 = tpu.concatenate %439, %442, %445, %448 in 1 : vector<8x8xf32>, vector<8x8xf32>, vector<8x8xf32>, vector<8x8xf32> -> vector<8x32xf32>
    %450 = tpu.concatenate %437, %440, %443, %446 in 1 : vector<8x8xf32>, vector<8x8xf32>, vector<8x8xf32>, vector<8x8xf32> -> vector<8x32xf32>
    %451 = vector.extract_strided_slice %436 {offsets = [32, 0], sizes = [8, 8], strides = [1, 1]} : vector<64x8xf32> to vector<8x8xf32>
    %452 = vector.extract_strided_slice %400 {offsets = [8, 64], sizes = [8, 8], strides = [1, 1]} : vector<16x96xf32> to vector<8x8xf32>
    %cst_153 = arith.constant dense<0.000000e+00> : vector<8x8xf32>
    %453 = tpu.matmul %451, %452, %cst_153 {dimension_numbers = #tpu.dot_dimension_numbers<[1], [0], [0], [1], [0, 0, 1, 1], [], []>} : vector<8x8xf32>, vector<8x8xf32>, vector<8x8xf32> -> vector<8x8xf32>
    %454 = vector.extract_strided_slice %436 {offsets = [40, 0], sizes = [8, 8], strides = [1, 1]} : vector<64x8xf32> to vector<8x8xf32>
    %455 = vector.extract_strided_slice %400 {offsets = [8, 72], sizes = [8, 8], strides = [1, 1]} : vector<16x96xf32> to vector<8x8xf32>
    %cst_154 = arith.constant dense<0.000000e+00> : vector<8x8xf32>
    %456 = tpu.matmul %454, %455, %cst_154 {dimension_numbers = #tpu.dot_dimension_numbers<[1], [0], [0], [1], [0, 0, 1, 1], [], []>} : vector<8x8xf32>, vector<8x8xf32>, vector<8x8xf32> -> vector<8x8xf32>
    %457 = vector.extract_strided_slice %436 {offsets = [48, 0], sizes = [8, 8], strides = [1, 1]} : vector<64x8xf32> to vector<8x8xf32>
    %458 = vector.extract_strided_slice %400 {offsets = [8, 80], sizes = [8, 8], strides = [1, 1]} : vector<16x96xf32> to vector<8x8xf32>
    %cst_155 = arith.constant dense<0.000000e+00> : vector<8x8xf32>
    %459 = tpu.matmul %457, %458, %cst_155 {dimension_numbers = #tpu.dot_dimension_numbers<[1], [0], [0], [1], [0, 0, 1, 1], [], []>} : vector<8x8xf32>, vector<8x8xf32>, vector<8x8xf32> -> vector<8x8xf32>
    %460 = vector.extract_strided_slice %436 {offsets = [56, 0], sizes = [8, 8], strides = [1, 1]} : vector<64x8xf32> to vector<8x8xf32>
    %461 = vector.extract_strided_slice %400 {offsets = [8, 88], sizes = [8, 8], strides = [1, 1]} : vector<16x96xf32> to vector<8x8xf32>
    %cst_156 = arith.constant dense<0.000000e+00> : vector<8x8xf32>
    %462 = tpu.matmul %460, %461, %cst_156 {dimension_numbers = #tpu.dot_dimension_numbers<[1], [0], [0], [1], [0, 0, 1, 1], [], []>} : vector<8x8xf32>, vector<8x8xf32>, vector<8x8xf32> -> vector<8x8xf32>
    %463 = tpu.concatenate %453, %456, %459, %462 in 1 : vector<8x8xf32>, vector<8x8xf32>, vector<8x8xf32>, vector<8x8xf32> -> vector<8x32xf32>
    %464 = tpu.concatenate %451, %454, %457, %460 in 1 : vector<8x8xf32>, vector<8x8xf32>, vector<8x8xf32>, vector<8x8xf32> -> vector<8x32xf32>
    %465 = tpu.concatenate %449, %463 in 0 : vector<8x32xf32>, vector<8x32xf32> -> vector<16x32xf32>
    %466 = tpu.concatenate %450, %464 in 0 : vector<8x32xf32>, vector<8x32xf32> -> vector<16x32xf32>
    %c120 = arith.constant 120 : index
    %c0_157 = arith.constant 0 : index
    %467 = vector.load %arg3[%c120, %c0_157] : memref<336x32xf32, #tpu.memory_space<vmem>>, vector<32x32xf32>
    %c50 = arith.constant 50 : index
    %c0_158 = arith.constant 0 : index
    %468 = vector.load %arg5[%c50, %c0_158] : memref<104x128xf32, #tpu.memory_space<vmem>>, vector<1x32xf32>
    %cst_159 = arith.constant dense<0.000000e+00> : vector<16x32xf32>
    %469 = tpu.matmul %465, %467, %cst_159 {dimension_numbers = #tpu.dot_dimension_numbers<[1], [0], [0], [1], [0, 0, 1, 1], [], []>} : vector<16x32xf32>, vector<32x32xf32>, vector<16x32xf32> -> vector<16x32xf32>
    %470 = vector.broadcast %468 : vector<1x32xf32> to vector<16x32xf32>
    %471 = arith.addf %469, %470 : vector<16x32xf32>
    %472 = arith.addf %371, %471 : vector<16x32xf32>
    %c34 = arith.constant 34 : index
    %c0_160 = arith.constant 0 : index
    %473 = vector.load %arg5[%c34, %c0_160] : memref<104x128xf32, #tpu.memory_space<vmem>>, vector<1x32xf32>
    %c40 = arith.constant 40 : index
    %c0_161 = arith.constant 0 : index
    %474 = vector.load %arg5[%c40, %c0_161] : memref<104x128xf32, #tpu.memory_space<vmem>>, vector<1x32xf32>
    %cst_162 = arith.constant dense<0.000000e+00> : vector<16xf32>
    %475 = vector.multi_reduction <add>, %472, %cst_162 [1] : vector<16x32xf32> to vector<16xf32>
    %476 = vector.shape_cast %475 : vector<16xf32> to vector<16x1xf32>
    %cst_163 = arith.constant 3.200000e+01 : f32
    %477 = vector.broadcast %cst_163 : f32 to vector<16x1xf32>
    %478 = arith.divf %476, %477 : vector<16x1xf32>
    %479 = vector.broadcast %478 : vector<16x1xf32> to vector<16x32xf32>
    %480 = arith.subf %472, %479 : vector<16x32xf32>
    %481 = arith.mulf %480, %480 : vector<16x32xf32>
    %cst_164 = arith.constant dense<0.000000e+00> : vector<16xf32>
    %482 = vector.multi_reduction <add>, %481, %cst_164 [1] : vector<16x32xf32> to vector<16xf32>
    %483 = vector.shape_cast %482 : vector<16xf32> to vector<16x1xf32>
    %cst_165 = arith.constant 3.200000e+01 : f32
    %484 = vector.broadcast %cst_165 : f32 to vector<16x1xf32>
    %485 = arith.divf %483, %484 : vector<16x1xf32>
    %486 = vector.broadcast %478 : vector<16x1xf32> to vector<16x32xf32>
    %487 = arith.subf %472, %486 : vector<16x32xf32>
    %cst_166 = arith.constant 9.99999974E-6 : f32
    %488 = vector.broadcast %cst_166 : f32 to vector<16x1xf32>
    %489 = arith.addf %485, %488 : vector<16x1xf32>
    %490 = math.rsqrt %489 : vector<16x1xf32>
    %491 = vector.broadcast %490 : vector<16x1xf32> to vector<16x32xf32>
    %492 = arith.mulf %487, %491 : vector<16x32xf32>
    %493 = vector.broadcast %473 : vector<1x32xf32> to vector<16x32xf32>
    %494 = arith.mulf %492, %493 : vector<16x32xf32>
    %495 = vector.broadcast %474 : vector<1x32xf32> to vector<16x32xf32>
    %496 = arith.addf %494, %495 : vector<16x32xf32>
    %c32_167 = arith.constant 32 : index
    %c384_168 = arith.constant 384 : index
    %497 = vector.load %arg2[%c32_167, %c384_168] : memref<128x512xf32, #tpu.memory_space<vmem>>, vector<32x64xf32>
    %c47 = arith.constant 47 : index
    %c0_169 = arith.constant 0 : index
    %498 = vector.load %arg5[%c47, %c0_169] : memref<104x128xf32, #tpu.memory_space<vmem>>, vector<1x64xf32>
    %cst_170 = arith.constant dense<0.000000e+00> : vector<16x64xf32>
    %499 = tpu.matmul %496, %497, %cst_170 {dimension_numbers = #tpu.dot_dimension_numbers<[1], [0], [0], [1], [0, 0, 1, 1], [], []>} : vector<16x32xf32>, vector<32x64xf32>, vector<16x64xf32> -> vector<16x64xf32>
    %500 = vector.broadcast %498 : vector<1x64xf32> to vector<16x64xf32>
    %501 = arith.addf %499, %500 : vector<16x64xf32>
    %502 = vector.extract_strided_slice %501 {offsets = [0, 0], sizes = [16, 32], strides = [1, 1]} : vector<16x64xf32> to vector<16x32xf32>
    %503 = vector.extract_strided_slice %501 {offsets = [0, 32], sizes = [16, 32], strides = [1, 1]} : vector<16x64xf32> to vector<16x32xf32>
    %504 = arith.negf %503 : vector<16x32xf32>
    %505 = math.exp %504 : vector<16x32xf32>
    %cst_171 = arith.constant 1.000000e+00 : f32
    %506 = vector.broadcast %cst_171 : f32 to vector<16x32xf32>
    %507 = arith.addf %506, %505 : vector<16x32xf32>
    %508 = arith.divf %506, %507 : vector<16x32xf32>
    %509 = arith.mulf %502, %508 : vector<16x32xf32>
    %c184 = arith.constant 184 : index
    %c0_172 = arith.constant 0 : index
    %510 = vector.load %arg3[%c184, %c0_172] : memref<336x32xf32, #tpu.memory_space<vmem>>, vector<3x32xf32>
    %c52 = arith.constant 52 : index
    %c0_173 = arith.constant 0 : index
    %511 = vector.load %arg5[%c52, %c0_173] : memref<104x128xf32, #tpu.memory_space<vmem>>, vector<1x32xf32>
    %512 = vector.extract_strided_slice %509 {offsets = [0, 0], sizes = [8, 32], strides = [1, 1]} : vector<16x32xf32> to vector<8x32xf32>
    %513 = vector.extract_strided_slice %510 {offsets = [0, 0], sizes = [1, 32], strides = [1, 1]} : vector<3x32xf32> to vector<1x32xf32>
    %c2_i32 = arith.constant 2 : i32
    %514 = tpu.dynamic_rotate %512 by %c2_i32 dim 0 : vector<8x32xf32>, i32 -> vector<8x32xf32>
    %c2_i32_174 = arith.constant 2 : i32
    %515 = vector.broadcast %c2_i32_174 : i32 to vector<8x32xi32>
    %516 = arith.cmpi sge, %0, %515 : vector<8x32xi32>
    %cst_175 = arith.constant 0.000000e+00 : f32
    %517 = vector.broadcast %cst_175 : f32 to vector<8x32xf32>
    %518 = arith.select %516, %514, %517 : vector<8x32xi1>, vector<8x32xf32>
    %519 = vector.broadcast %513 : vector<1x32xf32> to vector<8x32xf32>
    %520 = arith.mulf %518, %519 : vector<8x32xf32>
    %521 = vector.extract_strided_slice %510 {offsets = [1, 0], sizes = [1, 32], strides = [1, 1]} : vector<3x32xf32> to vector<1x32xf32>
    %522 = vector.broadcast %521 : vector<1x32xf32> to vector<8x32xf32>
    %523 = arith.mulf %512, %522 : vector<8x32xf32>
    %524 = vector.extract_strided_slice %510 {offsets = [2, 0], sizes = [1, 32], strides = [1, 1]} : vector<3x32xf32> to vector<1x32xf32>
    %c6_i32 = arith.constant 6 : i32
    %525 = tpu.dynamic_rotate %512 by %c6_i32 dim 0 : vector<8x32xf32>, i32 -> vector<8x32xf32>
    %c6_i32_176 = arith.constant 6 : i32
    %526 = vector.broadcast %c6_i32_176 : i32 to vector<8x32xi32>
    %527 = arith.cmpi slt, %0, %526 : vector<8x32xi32>
    %cst_177 = arith.constant 0.000000e+00 : f32
    %528 = vector.broadcast %cst_177 : f32 to vector<8x32xf32>
    %529 = arith.select %527, %525, %528 : vector<8x32xi1>, vector<8x32xf32>
    %530 = vector.broadcast %524 : vector<1x32xf32> to vector<8x32xf32>
    %531 = arith.mulf %529, %530 : vector<8x32xf32>
    %cst_178 = arith.constant 0.000000e+00 : f32
    %532 = vector.broadcast %cst_178 : f32 to vector<8x32xf32>
    %533 = arith.addf %532, %520 : vector<8x32xf32>
    %534 = arith.addf %533, %523 : vector<8x32xf32>
    %535 = arith.addf %534, %531 : vector<8x32xf32>
    %536 = vector.extract_strided_slice %509 {offsets = [8, 0], sizes = [8, 32], strides = [1, 1]} : vector<16x32xf32> to vector<8x32xf32>
    %537 = vector.extract_strided_slice %510 {offsets = [0, 0], sizes = [1, 32], strides = [1, 1]} : vector<3x32xf32> to vector<1x32xf32>
    %c2_i32_179 = arith.constant 2 : i32
    %538 = tpu.dynamic_rotate %536 by %c2_i32_179 dim 0 : vector<8x32xf32>, i32 -> vector<8x32xf32>
    %c2_i32_180 = arith.constant 2 : i32
    %539 = vector.broadcast %c2_i32_180 : i32 to vector<8x32xi32>
    %540 = arith.cmpi sge, %0, %539 : vector<8x32xi32>
    %cst_181 = arith.constant 0.000000e+00 : f32
    %541 = vector.broadcast %cst_181 : f32 to vector<8x32xf32>
    %542 = arith.select %540, %538, %541 : vector<8x32xi1>, vector<8x32xf32>
    %543 = vector.broadcast %537 : vector<1x32xf32> to vector<8x32xf32>
    %544 = arith.mulf %542, %543 : vector<8x32xf32>
    %545 = vector.extract_strided_slice %510 {offsets = [1, 0], sizes = [1, 32], strides = [1, 1]} : vector<3x32xf32> to vector<1x32xf32>
    %546 = vector.broadcast %545 : vector<1x32xf32> to vector<8x32xf32>
    %547 = arith.mulf %536, %546 : vector<8x32xf32>
    %548 = vector.extract_strided_slice %510 {offsets = [2, 0], sizes = [1, 32], strides = [1, 1]} : vector<3x32xf32> to vector<1x32xf32>
    %c6_i32_182 = arith.constant 6 : i32
    %549 = tpu.dynamic_rotate %536 by %c6_i32_182 dim 0 : vector<8x32xf32>, i32 -> vector<8x32xf32>
    %c6_i32_183 = arith.constant 6 : i32
    %550 = vector.broadcast %c6_i32_183 : i32 to vector<8x32xi32>
    %551 = arith.cmpi slt, %0, %550 : vector<8x32xi32>
    %cst_184 = arith.constant 0.000000e+00 : f32
    %552 = vector.broadcast %cst_184 : f32 to vector<8x32xf32>
    %553 = arith.select %551, %549, %552 : vector<8x32xi1>, vector<8x32xf32>
    %554 = vector.broadcast %548 : vector<1x32xf32> to vector<8x32xf32>
    %555 = arith.mulf %553, %554 : vector<8x32xf32>
    %cst_185 = arith.constant 0.000000e+00 : f32
    %556 = vector.broadcast %cst_185 : f32 to vector<8x32xf32>
    %557 = arith.addf %556, %544 : vector<8x32xf32>
    %558 = arith.addf %557, %547 : vector<8x32xf32>
    %559 = arith.addf %558, %555 : vector<8x32xf32>
    %560 = tpu.concatenate %535, %559 in 0 : vector<8x32xf32>, vector<8x32xf32> -> vector<16x32xf32>
    %561 = vector.broadcast %511 : vector<1x32xf32> to vector<16x32xf32>
    %562 = arith.addf %560, %561 : vector<16x32xf32>
    %c37 = arith.constant 37 : index
    %c0_186 = arith.constant 0 : index
    %563 = vector.load %arg5[%c37, %c0_186] : memref<104x128xf32, #tpu.memory_space<vmem>>, vector<1x32xf32>
    %c43 = arith.constant 43 : index
    %c0_187 = arith.constant 0 : index
    %564 = vector.load %arg5[%c43, %c0_187] : memref<104x128xf32, #tpu.memory_space<vmem>>, vector<1x32xf32>
    %cst_188 = arith.constant 0.999994993 : f32
    %565 = vector.broadcast %cst_188 : f32 to vector<1x32xf32>
    %566 = arith.mulf %563, %565 : vector<1x32xf32>
    %567 = vector.broadcast %566 : vector<1x32xf32> to vector<16x32xf32>
    %568 = arith.mulf %562, %567 : vector<16x32xf32>
    %569 = vector.broadcast %564 : vector<1x32xf32> to vector<16x32xf32>
    %570 = arith.addf %568, %569 : vector<16x32xf32>
    %571 = arith.negf %570 : vector<16x32xf32>
    %572 = math.exp %571 : vector<16x32xf32>
    %cst_189 = arith.constant 1.000000e+00 : f32
    %573 = vector.broadcast %cst_189 : f32 to vector<16x32xf32>
    %574 = arith.addf %573, %572 : vector<16x32xf32>
    %575 = arith.divf %573, %574 : vector<16x32xf32>
    %576 = arith.mulf %570, %575 : vector<16x32xf32>
    %c152 = arith.constant 152 : index
    %c0_190 = arith.constant 0 : index
    %577 = vector.load %arg3[%c152, %c0_190] : memref<336x32xf32, #tpu.memory_space<vmem>>, vector<32x32xf32>
    %c51 = arith.constant 51 : index
    %c0_191 = arith.constant 0 : index
    %578 = vector.load %arg5[%c51, %c0_191] : memref<104x128xf32, #tpu.memory_space<vmem>>, vector<1x32xf32>
    %cst_192 = arith.constant dense<0.000000e+00> : vector<16x32xf32>
    %579 = tpu.matmul %576, %577, %cst_192 {dimension_numbers = #tpu.dot_dimension_numbers<[1], [0], [0], [1], [0, 0, 1, 1], [], []>} : vector<16x32xf32>, vector<32x32xf32>, vector<16x32xf32> -> vector<16x32xf32>
    %580 = vector.broadcast %578 : vector<1x32xf32> to vector<16x32xf32>
    %581 = arith.addf %579, %580 : vector<16x32xf32>
    %582 = arith.addf %472, %581 : vector<16x32xf32>
    %c35 = arith.constant 35 : index
    %c0_193 = arith.constant 0 : index
    %583 = vector.load %arg5[%c35, %c0_193] : memref<104x128xf32, #tpu.memory_space<vmem>>, vector<1x32xf32>
    %c41 = arith.constant 41 : index
    %c0_194 = arith.constant 0 : index
    %584 = vector.load %arg5[%c41, %c0_194] : memref<104x128xf32, #tpu.memory_space<vmem>>, vector<1x32xf32>
    %cst_195 = arith.constant dense<0.000000e+00> : vector<16xf32>
    %585 = vector.multi_reduction <add>, %582, %cst_195 [1] : vector<16x32xf32> to vector<16xf32>
    %586 = vector.shape_cast %585 : vector<16xf32> to vector<16x1xf32>
    %cst_196 = arith.constant 3.200000e+01 : f32
    %587 = vector.broadcast %cst_196 : f32 to vector<16x1xf32>
    %588 = arith.divf %586, %587 : vector<16x1xf32>
    %589 = vector.broadcast %588 : vector<16x1xf32> to vector<16x32xf32>
    %590 = arith.subf %582, %589 : vector<16x32xf32>
    %591 = arith.mulf %590, %590 : vector<16x32xf32>
    %cst_197 = arith.constant dense<0.000000e+00> : vector<16xf32>
    %592 = vector.multi_reduction <add>, %591, %cst_197 [1] : vector<16x32xf32> to vector<16xf32>
    %593 = vector.shape_cast %592 : vector<16xf32> to vector<16x1xf32>
    %cst_198 = arith.constant 3.200000e+01 : f32
    %594 = vector.broadcast %cst_198 : f32 to vector<16x1xf32>
    %595 = arith.divf %593, %594 : vector<16x1xf32>
    %596 = vector.broadcast %588 : vector<16x1xf32> to vector<16x32xf32>
    %597 = arith.subf %582, %596 : vector<16x32xf32>
    %cst_199 = arith.constant 9.99999974E-6 : f32
    %598 = vector.broadcast %cst_199 : f32 to vector<16x1xf32>
    %599 = arith.addf %595, %598 : vector<16x1xf32>
    %600 = math.rsqrt %599 : vector<16x1xf32>
    %601 = vector.broadcast %600 : vector<16x1xf32> to vector<16x32xf32>
    %602 = arith.mulf %597, %601 : vector<16x32xf32>
    %603 = vector.broadcast %583 : vector<1x32xf32> to vector<16x32xf32>
    %604 = arith.mulf %602, %603 : vector<16x32xf32>
    %605 = vector.broadcast %584 : vector<1x32xf32> to vector<16x32xf32>
    %606 = arith.addf %604, %605 : vector<16x32xf32>
    %c32_200 = arith.constant 32 : index
    %c128_201 = arith.constant 128 : index
    %607 = vector.load %arg2[%c32_200, %c128_201] : memref<128x512xf32, #tpu.memory_space<vmem>>, vector<32x128xf32>
    %c45 = arith.constant 45 : index
    %c0_202 = arith.constant 0 : index
    %608 = vector.load %arg5[%c45, %c0_202] : memref<104x128xf32, #tpu.memory_space<vmem>>, vector<1x128xf32>
    %cst_203 = arith.constant dense<0.000000e+00> : vector<16x128xf32>
    %609 = tpu.matmul %606, %607, %cst_203 {dimension_numbers = #tpu.dot_dimension_numbers<[1], [0], [0], [1], [0, 0, 1, 1], [], []>} : vector<16x32xf32>, vector<32x128xf32>, vector<16x128xf32> -> vector<16x128xf32>
    %610 = vector.broadcast %608 : vector<1x128xf32> to vector<16x128xf32>
    %611 = arith.addf %609, %610 : vector<16x128xf32>
    %612 = arith.negf %611 : vector<16x128xf32>
    %613 = math.exp %612 : vector<16x128xf32>
    %cst_204 = arith.constant 1.000000e+00 : f32
    %614 = vector.broadcast %cst_204 : f32 to vector<16x128xf32>
    %615 = arith.addf %614, %613 : vector<16x128xf32>
    %616 = arith.divf %614, %615 : vector<16x128xf32>
    %617 = arith.mulf %611, %616 : vector<16x128xf32>
    %c384_205 = arith.constant 384 : index
    %c0_206 = arith.constant 0 : index
    %618 = vector.load %arg4[%c384_205, %c0_206] : memref<1024x32xf32, #tpu.memory_space<vmem>>, vector<128x32xf32>
    %c49 = arith.constant 49 : index
    %c0_207 = arith.constant 0 : index
    %619 = vector.load %arg5[%c49, %c0_207] : memref<104x128xf32, #tpu.memory_space<vmem>>, vector<1x32xf32>
    %cst_208 = arith.constant dense<0.000000e+00> : vector<16x32xf32>
    %620 = tpu.matmul %617, %618, %cst_208 {dimension_numbers = #tpu.dot_dimension_numbers<[1], [0], [0], [1], [0, 0, 1, 1], [], []>} : vector<16x128xf32>, vector<128x32xf32>, vector<16x32xf32> -> vector<16x32xf32>
    %621 = vector.broadcast %619 : vector<1x32xf32> to vector<16x32xf32>
    %622 = arith.addf %620, %621 : vector<16x32xf32>
    %cst_209 = arith.constant 5.000000e-01 : f32
    %623 = vector.broadcast %cst_209 : f32 to vector<16x32xf32>
    %624 = arith.mulf %623, %622 : vector<16x32xf32>
    %625 = arith.addf %582, %624 : vector<16x32xf32>
    %c36 = arith.constant 36 : index
    %c0_210 = arith.constant 0 : index
    %626 = vector.load %arg5[%c36, %c0_210] : memref<104x128xf32, #tpu.memory_space<vmem>>, vector<1x32xf32>
    %c42 = arith.constant 42 : index
    %c0_211 = arith.constant 0 : index
    %627 = vector.load %arg5[%c42, %c0_211] : memref<104x128xf32, #tpu.memory_space<vmem>>, vector<1x32xf32>
    %cst_212 = arith.constant dense<0.000000e+00> : vector<16xf32>
    %628 = vector.multi_reduction <add>, %625, %cst_212 [1] : vector<16x32xf32> to vector<16xf32>
    %629 = vector.shape_cast %628 : vector<16xf32> to vector<16x1xf32>
    %cst_213 = arith.constant 3.200000e+01 : f32
    %630 = vector.broadcast %cst_213 : f32 to vector<16x1xf32>
    %631 = arith.divf %629, %630 : vector<16x1xf32>
    %632 = vector.broadcast %631 : vector<16x1xf32> to vector<16x32xf32>
    %633 = arith.subf %625, %632 : vector<16x32xf32>
    %634 = arith.mulf %633, %633 : vector<16x32xf32>
    %cst_214 = arith.constant dense<0.000000e+00> : vector<16xf32>
    %635 = vector.multi_reduction <add>, %634, %cst_214 [1] : vector<16x32xf32> to vector<16xf32>
    %636 = vector.shape_cast %635 : vector<16xf32> to vector<16x1xf32>
    %cst_215 = arith.constant 3.200000e+01 : f32
    %637 = vector.broadcast %cst_215 : f32 to vector<16x1xf32>
    %638 = arith.divf %636, %637 : vector<16x1xf32>
    %639 = vector.broadcast %631 : vector<16x1xf32> to vector<16x32xf32>
    %640 = arith.subf %625, %639 : vector<16x32xf32>
    %cst_216 = arith.constant 9.99999974E-6 : f32
    %641 = vector.broadcast %cst_216 : f32 to vector<16x1xf32>
    %642 = arith.addf %638, %641 : vector<16x1xf32>
    %643 = math.rsqrt %642 : vector<16x1xf32>
    %644 = vector.broadcast %643 : vector<16x1xf32> to vector<16x32xf32>
    %645 = arith.mulf %640, %644 : vector<16x32xf32>
    %646 = vector.broadcast %626 : vector<1x32xf32> to vector<16x32xf32>
    %647 = arith.mulf %645, %646 : vector<16x32xf32>
    %648 = vector.broadcast %627 : vector<1x32xf32> to vector<16x32xf32>
    %649 = arith.addf %647, %648 : vector<16x32xf32>
    %650 = arith.addf %328, %649 : vector<16x32xf32>
    %c56 = arith.constant 56 : index
    %c0_217 = arith.constant 0 : index
    %651 = vector.load %arg5[%c56, %c0_217] : memref<104x128xf32, #tpu.memory_space<vmem>>, vector<1x32xf32>
    %c62 = arith.constant 62 : index
    %c0_218 = arith.constant 0 : index
    %652 = vector.load %arg5[%c62, %c0_218] : memref<104x128xf32, #tpu.memory_space<vmem>>, vector<1x32xf32>
    %cst_219 = arith.constant dense<0.000000e+00> : vector<16xf32>
    %653 = vector.multi_reduction <add>, %650, %cst_219 [1] : vector<16x32xf32> to vector<16xf32>
    %654 = vector.shape_cast %653 : vector<16xf32> to vector<16x1xf32>
    %cst_220 = arith.constant 3.200000e+01 : f32
    %655 = vector.broadcast %cst_220 : f32 to vector<16x1xf32>
    %656 = arith.divf %654, %655 : vector<16x1xf32>
    %657 = vector.broadcast %656 : vector<16x1xf32> to vector<16x32xf32>
    %658 = arith.subf %650, %657 : vector<16x32xf32>
    %659 = arith.mulf %658, %658 : vector<16x32xf32>
    %cst_221 = arith.constant dense<0.000000e+00> : vector<16xf32>
    %660 = vector.multi_reduction <add>, %659, %cst_221 [1] : vector<16x32xf32> to vector<16xf32>
    %661 = vector.shape_cast %660 : vector<16xf32> to vector<16x1xf32>
    %cst_222 = arith.constant 3.200000e+01 : f32
    %662 = vector.broadcast %cst_222 : f32 to vector<16x1xf32>
    %663 = arith.divf %661, %662 : vector<16x1xf32>
    %664 = vector.broadcast %656 : vector<16x1xf32> to vector<16x32xf32>
    %665 = arith.subf %650, %664 : vector<16x32xf32>
    %cst_223 = arith.constant 9.99999974E-6 : f32
    %666 = vector.broadcast %cst_223 : f32 to vector<16x1xf32>
    %667 = arith.addf %663, %666 : vector<16x1xf32>
    %668 = math.rsqrt %667 : vector<16x1xf32>
    %669 = vector.broadcast %668 : vector<16x1xf32> to vector<16x32xf32>
    %670 = arith.mulf %665, %669 : vector<16x32xf32>
    %671 = vector.broadcast %651 : vector<1x32xf32> to vector<16x32xf32>
    %672 = arith.mulf %670, %671 : vector<16x32xf32>
    %673 = vector.broadcast %652 : vector<1x32xf32> to vector<16x32xf32>
    %674 = arith.addf %672, %673 : vector<16x32xf32>
    %c64 = arith.constant 64 : index
    %c0_224 = arith.constant 0 : index
    %675 = vector.load %arg2[%c64, %c0_224] : memref<128x512xf32, #tpu.memory_space<vmem>>, vector<32x128xf32>
    %c68 = arith.constant 68 : index
    %c0_225 = arith.constant 0 : index
    %676 = vector.load %arg5[%c68, %c0_225] : memref<104x128xf32, #tpu.memory_space<vmem>>, vector<1x128xf32>
    %cst_226 = arith.constant dense<0.000000e+00> : vector<16x128xf32>
    %677 = tpu.matmul %674, %675, %cst_226 {dimension_numbers = #tpu.dot_dimension_numbers<[1], [0], [0], [1], [0, 0, 1, 1], [], []>} : vector<16x32xf32>, vector<32x128xf32>, vector<16x128xf32> -> vector<16x128xf32>
    %678 = vector.broadcast %676 : vector<1x128xf32> to vector<16x128xf32>
    %679 = arith.addf %677, %678 : vector<16x128xf32>
    %680 = arith.negf %679 : vector<16x128xf32>
    %681 = math.exp %680 : vector<16x128xf32>
    %cst_227 = arith.constant 1.000000e+00 : f32
    %682 = vector.broadcast %cst_227 : f32 to vector<16x128xf32>
    %683 = arith.addf %682, %681 : vector<16x128xf32>
    %684 = arith.divf %682, %683 : vector<16x128xf32>
    %685 = arith.mulf %679, %684 : vector<16x128xf32>
    %c512 = arith.constant 512 : index
    %c0_228 = arith.constant 0 : index
    %686 = vector.load %arg4[%c512, %c0_228] : memref<1024x32xf32, #tpu.memory_space<vmem>>, vector<128x32xf32>
    %c72 = arith.constant 72 : index
    %c0_229 = arith.constant 0 : index
    %687 = vector.load %arg5[%c72, %c0_229] : memref<104x128xf32, #tpu.memory_space<vmem>>, vector<1x32xf32>
    %cst_230 = arith.constant dense<0.000000e+00> : vector<16x32xf32>
    %688 = tpu.matmul %685, %686, %cst_230 {dimension_numbers = #tpu.dot_dimension_numbers<[1], [0], [0], [1], [0, 0, 1, 1], [], []>} : vector<16x128xf32>, vector<128x32xf32>, vector<16x32xf32> -> vector<16x32xf32>
    %689 = vector.broadcast %687 : vector<1x32xf32> to vector<16x32xf32>
    %690 = arith.addf %688, %689 : vector<16x32xf32>
    %cst_231 = arith.constant 5.000000e-01 : f32
    %691 = vector.broadcast %cst_231 : f32 to vector<16x32xf32>
    %692 = arith.mulf %691, %690 : vector<16x32xf32>
    %693 = arith.addf %650, %692 : vector<16x32xf32>
    %c57 = arith.constant 57 : index
    %c0_232 = arith.constant 0 : index
    %694 = vector.load %arg5[%c57, %c0_232] : memref<104x128xf32, #tpu.memory_space<vmem>>, vector<1x32xf32>
    %c63 = arith.constant 63 : index
    %c0_233 = arith.constant 0 : index
    %695 = vector.load %arg5[%c63, %c0_233] : memref<104x128xf32, #tpu.memory_space<vmem>>, vector<1x32xf32>
    %cst_234 = arith.constant dense<0.000000e+00> : vector<16xf32>
    %696 = vector.multi_reduction <add>, %693, %cst_234 [1] : vector<16x32xf32> to vector<16xf32>
    %697 = vector.shape_cast %696 : vector<16xf32> to vector<16x1xf32>
    %cst_235 = arith.constant 3.200000e+01 : f32
    %698 = vector.broadcast %cst_235 : f32 to vector<16x1xf32>
    %699 = arith.divf %697, %698 : vector<16x1xf32>
    %700 = vector.broadcast %699 : vector<16x1xf32> to vector<16x32xf32>
    %701 = arith.subf %693, %700 : vector<16x32xf32>
    %702 = arith.mulf %701, %701 : vector<16x32xf32>
    %cst_236 = arith.constant dense<0.000000e+00> : vector<16xf32>
    %703 = vector.multi_reduction <add>, %702, %cst_236 [1] : vector<16x32xf32> to vector<16xf32>
    %704 = vector.shape_cast %703 : vector<16xf32> to vector<16x1xf32>
    %cst_237 = arith.constant 3.200000e+01 : f32
    %705 = vector.broadcast %cst_237 : f32 to vector<16x1xf32>
    %706 = arith.divf %704, %705 : vector<16x1xf32>
    %707 = vector.broadcast %699 : vector<16x1xf32> to vector<16x32xf32>
    %708 = arith.subf %693, %707 : vector<16x32xf32>
    %cst_238 = arith.constant 9.99999974E-6 : f32
    %709 = vector.broadcast %cst_238 : f32 to vector<16x1xf32>
    %710 = arith.addf %706, %709 : vector<16x1xf32>
    %711 = math.rsqrt %710 : vector<16x1xf32>
    %712 = vector.broadcast %711 : vector<16x1xf32> to vector<16x32xf32>
    %713 = arith.mulf %708, %712 : vector<16x32xf32>
    %714 = vector.broadcast %694 : vector<1x32xf32> to vector<16x32xf32>
    %715 = arith.mulf %713, %714 : vector<16x32xf32>
    %716 = vector.broadcast %695 : vector<1x32xf32> to vector<16x32xf32>
    %717 = arith.addf %715, %716 : vector<16x32xf32>
    %c64_239 = arith.constant 64 : index
    %c256_240 = arith.constant 256 : index
    %718 = vector.load %arg2[%c64_239, %c256_240] : memref<128x512xf32, #tpu.memory_space<vmem>>, vector<32x96xf32>
    %c70 = arith.constant 70 : index
    %c0_241 = arith.constant 0 : index
    %719 = vector.load %arg5[%c70, %c0_241] : memref<104x128xf32, #tpu.memory_space<vmem>>, vector<1x96xf32>
    %cst_242 = arith.constant dense<0.000000e+00> : vector<16x96xf32>
    %720 = tpu.matmul %717, %718, %cst_242 {dimension_numbers = #tpu.dot_dimension_numbers<[1], [0], [0], [1], [0, 0, 1, 1], [], []>} : vector<16x32xf32>, vector<32x96xf32>, vector<16x96xf32> -> vector<16x96xf32>
    %721 = vector.broadcast %719 : vector<1x96xf32> to vector<16x96xf32>
    %722 = arith.addf %720, %721 : vector<16x96xf32>
    %723 = vector.extract_strided_slice %722 {offsets = [0, 0], sizes = [8, 8], strides = [1, 1]} : vector<16x96xf32> to vector<8x8xf32>
    %724 = vector.extract_strided_slice %722 {offsets = [0, 32], sizes = [8, 8], strides = [1, 1]} : vector<16x96xf32> to vector<8x8xf32>
    %cst_243 = arith.constant dense<0.000000e+00> : vector<8x8xf32>
    %725 = tpu.matmul %723, %724, %cst_243 {dimension_numbers = #tpu.dot_dimension_numbers<[1], [1], [0], [0], [0, 0, 1, 0], [], []>} : vector<8x8xf32>, vector<8x8xf32>, vector<8x8xf32> -> vector<8x8xf32>
    %726 = vector.extract_strided_slice %722 {offsets = [0, 8], sizes = [8, 8], strides = [1, 1]} : vector<16x96xf32> to vector<8x8xf32>
    %727 = vector.extract_strided_slice %722 {offsets = [0, 40], sizes = [8, 8], strides = [1, 1]} : vector<16x96xf32> to vector<8x8xf32>
    %cst_244 = arith.constant dense<0.000000e+00> : vector<8x8xf32>
    %728 = tpu.matmul %726, %727, %cst_244 {dimension_numbers = #tpu.dot_dimension_numbers<[1], [1], [0], [0], [0, 0, 1, 0], [], []>} : vector<8x8xf32>, vector<8x8xf32>, vector<8x8xf32> -> vector<8x8xf32>
    %729 = vector.extract_strided_slice %722 {offsets = [0, 16], sizes = [8, 8], strides = [1, 1]} : vector<16x96xf32> to vector<8x8xf32>
    %730 = vector.extract_strided_slice %722 {offsets = [0, 48], sizes = [8, 8], strides = [1, 1]} : vector<16x96xf32> to vector<8x8xf32>
    %cst_245 = arith.constant dense<0.000000e+00> : vector<8x8xf32>
    %731 = tpu.matmul %729, %730, %cst_245 {dimension_numbers = #tpu.dot_dimension_numbers<[1], [1], [0], [0], [0, 0, 1, 0], [], []>} : vector<8x8xf32>, vector<8x8xf32>, vector<8x8xf32> -> vector<8x8xf32>
    %732 = vector.extract_strided_slice %722 {offsets = [0, 24], sizes = [8, 8], strides = [1, 1]} : vector<16x96xf32> to vector<8x8xf32>
    %733 = vector.extract_strided_slice %722 {offsets = [0, 56], sizes = [8, 8], strides = [1, 1]} : vector<16x96xf32> to vector<8x8xf32>
    %cst_246 = arith.constant dense<0.000000e+00> : vector<8x8xf32>
    %734 = tpu.matmul %732, %733, %cst_246 {dimension_numbers = #tpu.dot_dimension_numbers<[1], [1], [0], [0], [0, 0, 1, 0], [], []>} : vector<8x8xf32>, vector<8x8xf32>, vector<8x8xf32> -> vector<8x8xf32>
    %735 = vector.extract_strided_slice %722 {offsets = [8, 0], sizes = [8, 8], strides = [1, 1]} : vector<16x96xf32> to vector<8x8xf32>
    %736 = vector.extract_strided_slice %722 {offsets = [8, 32], sizes = [8, 8], strides = [1, 1]} : vector<16x96xf32> to vector<8x8xf32>
    %cst_247 = arith.constant dense<0.000000e+00> : vector<8x8xf32>
    %737 = tpu.matmul %735, %736, %cst_247 {dimension_numbers = #tpu.dot_dimension_numbers<[1], [1], [0], [0], [0, 0, 1, 0], [], []>} : vector<8x8xf32>, vector<8x8xf32>, vector<8x8xf32> -> vector<8x8xf32>
    %738 = vector.extract_strided_slice %722 {offsets = [8, 8], sizes = [8, 8], strides = [1, 1]} : vector<16x96xf32> to vector<8x8xf32>
    %739 = vector.extract_strided_slice %722 {offsets = [8, 40], sizes = [8, 8], strides = [1, 1]} : vector<16x96xf32> to vector<8x8xf32>
    %cst_248 = arith.constant dense<0.000000e+00> : vector<8x8xf32>
    %740 = tpu.matmul %738, %739, %cst_248 {dimension_numbers = #tpu.dot_dimension_numbers<[1], [1], [0], [0], [0, 0, 1, 0], [], []>} : vector<8x8xf32>, vector<8x8xf32>, vector<8x8xf32> -> vector<8x8xf32>
    %741 = vector.extract_strided_slice %722 {offsets = [8, 16], sizes = [8, 8], strides = [1, 1]} : vector<16x96xf32> to vector<8x8xf32>
    %742 = vector.extract_strided_slice %722 {offsets = [8, 48], sizes = [8, 8], strides = [1, 1]} : vector<16x96xf32> to vector<8x8xf32>
    %cst_249 = arith.constant dense<0.000000e+00> : vector<8x8xf32>
    %743 = tpu.matmul %741, %742, %cst_249 {dimension_numbers = #tpu.dot_dimension_numbers<[1], [1], [0], [0], [0, 0, 1, 0], [], []>} : vector<8x8xf32>, vector<8x8xf32>, vector<8x8xf32> -> vector<8x8xf32>
    %744 = vector.extract_strided_slice %722 {offsets = [8, 24], sizes = [8, 8], strides = [1, 1]} : vector<16x96xf32> to vector<8x8xf32>
    %745 = vector.extract_strided_slice %722 {offsets = [8, 56], sizes = [8, 8], strides = [1, 1]} : vector<16x96xf32> to vector<8x8xf32>
    %cst_250 = arith.constant dense<0.000000e+00> : vector<8x8xf32>
    %746 = tpu.matmul %744, %745, %cst_250 {dimension_numbers = #tpu.dot_dimension_numbers<[1], [1], [0], [0], [0, 0, 1, 0], [], []>} : vector<8x8xf32>, vector<8x8xf32>, vector<8x8xf32> -> vector<8x8xf32>
    %747 = tpu.concatenate %725, %728, %731, %734, %737, %740, %743, %746 in 0 : vector<8x8xf32>, vector<8x8xf32>, vector<8x8xf32>, vector<8x8xf32>, vector<8x8xf32>, vector<8x8xf32>, vector<8x8xf32>, vector<8x8xf32> -> vector<64x8xf32>
    %cst_251 = arith.constant 0.353553385 : f32
    %748 = vector.broadcast %cst_251 : f32 to vector<64x8xf32>
    %749 = arith.mulf %747, %748 : vector<64x8xf32>
    %cst_252 = arith.constant dense<0xFF800000> : vector<64xf32>
    %750 = vector.multi_reduction <maximumf>, %749, %cst_252 [1] : vector<64x8xf32> to vector<64xf32>
    %751 = vector.shape_cast %750 : vector<64xf32> to vector<64x1xf32>
    %752 = vector.broadcast %751 : vector<64x1xf32> to vector<64x8xf32>
    %753 = arith.subf %749, %752 : vector<64x8xf32>
    %754 = math.exp %753 : vector<64x8xf32>
    %cst_253 = arith.constant dense<0.000000e+00> : vector<64xf32>
    %755 = vector.multi_reduction <add>, %754, %cst_253 [1] : vector<64x8xf32> to vector<64xf32>
    %756 = vector.shape_cast %755 : vector<64xf32> to vector<64x1xf32>
    %757 = vector.broadcast %756 : vector<64x1xf32> to vector<64x8xf32>
    %758 = arith.divf %754, %757 : vector<64x8xf32>
    %759 = vector.extract_strided_slice %758 {offsets = [0, 0], sizes = [8, 8], strides = [1, 1]} : vector<64x8xf32> to vector<8x8xf32>
    %760 = vector.extract_strided_slice %722 {offsets = [0, 64], sizes = [8, 8], strides = [1, 1]} : vector<16x96xf32> to vector<8x8xf32>
    %cst_254 = arith.constant dense<0.000000e+00> : vector<8x8xf32>
    %761 = tpu.matmul %759, %760, %cst_254 {dimension_numbers = #tpu.dot_dimension_numbers<[1], [0], [0], [1], [0, 0, 1, 1], [], []>} : vector<8x8xf32>, vector<8x8xf32>, vector<8x8xf32> -> vector<8x8xf32>
    %762 = vector.extract_strided_slice %758 {offsets = [8, 0], sizes = [8, 8], strides = [1, 1]} : vector<64x8xf32> to vector<8x8xf32>
    %763 = vector.extract_strided_slice %722 {offsets = [0, 72], sizes = [8, 8], strides = [1, 1]} : vector<16x96xf32> to vector<8x8xf32>
    %cst_255 = arith.constant dense<0.000000e+00> : vector<8x8xf32>
    %764 = tpu.matmul %762, %763, %cst_255 {dimension_numbers = #tpu.dot_dimension_numbers<[1], [0], [0], [1], [0, 0, 1, 1], [], []>} : vector<8x8xf32>, vector<8x8xf32>, vector<8x8xf32> -> vector<8x8xf32>
    %765 = vector.extract_strided_slice %758 {offsets = [16, 0], sizes = [8, 8], strides = [1, 1]} : vector<64x8xf32> to vector<8x8xf32>
    %766 = vector.extract_strided_slice %722 {offsets = [0, 80], sizes = [8, 8], strides = [1, 1]} : vector<16x96xf32> to vector<8x8xf32>
    %cst_256 = arith.constant dense<0.000000e+00> : vector<8x8xf32>
    %767 = tpu.matmul %765, %766, %cst_256 {dimension_numbers = #tpu.dot_dimension_numbers<[1], [0], [0], [1], [0, 0, 1, 1], [], []>} : vector<8x8xf32>, vector<8x8xf32>, vector<8x8xf32> -> vector<8x8xf32>
    %768 = vector.extract_strided_slice %758 {offsets = [24, 0], sizes = [8, 8], strides = [1, 1]} : vector<64x8xf32> to vector<8x8xf32>
    %769 = vector.extract_strided_slice %722 {offsets = [0, 88], sizes = [8, 8], strides = [1, 1]} : vector<16x96xf32> to vector<8x8xf32>
    %cst_257 = arith.constant dense<0.000000e+00> : vector<8x8xf32>
    %770 = tpu.matmul %768, %769, %cst_257 {dimension_numbers = #tpu.dot_dimension_numbers<[1], [0], [0], [1], [0, 0, 1, 1], [], []>} : vector<8x8xf32>, vector<8x8xf32>, vector<8x8xf32> -> vector<8x8xf32>
    %771 = tpu.concatenate %761, %764, %767, %770 in 1 : vector<8x8xf32>, vector<8x8xf32>, vector<8x8xf32>, vector<8x8xf32> -> vector<8x32xf32>
    %772 = tpu.concatenate %759, %762, %765, %768 in 1 : vector<8x8xf32>, vector<8x8xf32>, vector<8x8xf32>, vector<8x8xf32> -> vector<8x32xf32>
    %773 = vector.extract_strided_slice %758 {offsets = [32, 0], sizes = [8, 8], strides = [1, 1]} : vector<64x8xf32> to vector<8x8xf32>
    %774 = vector.extract_strided_slice %722 {offsets = [8, 64], sizes = [8, 8], strides = [1, 1]} : vector<16x96xf32> to vector<8x8xf32>
    %cst_258 = arith.constant dense<0.000000e+00> : vector<8x8xf32>
    %775 = tpu.matmul %773, %774, %cst_258 {dimension_numbers = #tpu.dot_dimension_numbers<[1], [0], [0], [1], [0, 0, 1, 1], [], []>} : vector<8x8xf32>, vector<8x8xf32>, vector<8x8xf32> -> vector<8x8xf32>
    %776 = vector.extract_strided_slice %758 {offsets = [40, 0], sizes = [8, 8], strides = [1, 1]} : vector<64x8xf32> to vector<8x8xf32>
    %777 = vector.extract_strided_slice %722 {offsets = [8, 72], sizes = [8, 8], strides = [1, 1]} : vector<16x96xf32> to vector<8x8xf32>
    %cst_259 = arith.constant dense<0.000000e+00> : vector<8x8xf32>
    %778 = tpu.matmul %776, %777, %cst_259 {dimension_numbers = #tpu.dot_dimension_numbers<[1], [0], [0], [1], [0, 0, 1, 1], [], []>} : vector<8x8xf32>, vector<8x8xf32>, vector<8x8xf32> -> vector<8x8xf32>
    %779 = vector.extract_strided_slice %758 {offsets = [48, 0], sizes = [8, 8], strides = [1, 1]} : vector<64x8xf32> to vector<8x8xf32>
    %780 = vector.extract_strided_slice %722 {offsets = [8, 80], sizes = [8, 8], strides = [1, 1]} : vector<16x96xf32> to vector<8x8xf32>
    %cst_260 = arith.constant dense<0.000000e+00> : vector<8x8xf32>
    %781 = tpu.matmul %779, %780, %cst_260 {dimension_numbers = #tpu.dot_dimension_numbers<[1], [0], [0], [1], [0, 0, 1, 1], [], []>} : vector<8x8xf32>, vector<8x8xf32>, vector<8x8xf32> -> vector<8x8xf32>
    %782 = vector.extract_strided_slice %758 {offsets = [56, 0], sizes = [8, 8], strides = [1, 1]} : vector<64x8xf32> to vector<8x8xf32>
    %783 = vector.extract_strided_slice %722 {offsets = [8, 88], sizes = [8, 8], strides = [1, 1]} : vector<16x96xf32> to vector<8x8xf32>
    %cst_261 = arith.constant dense<0.000000e+00> : vector<8x8xf32>
    %784 = tpu.matmul %782, %783, %cst_261 {dimension_numbers = #tpu.dot_dimension_numbers<[1], [0], [0], [1], [0, 0, 1, 1], [], []>} : vector<8x8xf32>, vector<8x8xf32>, vector<8x8xf32> -> vector<8x8xf32>
    %785 = tpu.concatenate %775, %778, %781, %784 in 1 : vector<8x8xf32>, vector<8x8xf32>, vector<8x8xf32>, vector<8x8xf32> -> vector<8x32xf32>
    %786 = tpu.concatenate %773, %776, %779, %782 in 1 : vector<8x8xf32>, vector<8x8xf32>, vector<8x8xf32>, vector<8x8xf32> -> vector<8x32xf32>
    %787 = tpu.concatenate %771, %785 in 0 : vector<8x32xf32>, vector<8x32xf32> -> vector<16x32xf32>
    %788 = tpu.concatenate %772, %786 in 0 : vector<8x32xf32>, vector<8x32xf32> -> vector<16x32xf32>
    %c192 = arith.constant 192 : index
    %c0_262 = arith.constant 0 : index
    %789 = vector.load %arg3[%c192, %c0_262] : memref<336x32xf32, #tpu.memory_space<vmem>>, vector<32x32xf32>
    %c74 = arith.constant 74 : index
    %c0_263 = arith.constant 0 : index
    %790 = vector.load %arg5[%c74, %c0_263] : memref<104x128xf32, #tpu.memory_space<vmem>>, vector<1x32xf32>
    %cst_264 = arith.constant dense<0.000000e+00> : vector<16x32xf32>
    %791 = tpu.matmul %787, %789, %cst_264 {dimension_numbers = #tpu.dot_dimension_numbers<[1], [0], [0], [1], [0, 0, 1, 1], [], []>} : vector<16x32xf32>, vector<32x32xf32>, vector<16x32xf32> -> vector<16x32xf32>
    %792 = vector.broadcast %790 : vector<1x32xf32> to vector<16x32xf32>
    %793 = arith.addf %791, %792 : vector<16x32xf32>
    %794 = arith.addf %693, %793 : vector<16x32xf32>
    %c58 = arith.constant 58 : index
    %c0_265 = arith.constant 0 : index
    %795 = vector.load %arg5[%c58, %c0_265] : memref<104x128xf32, #tpu.memory_space<vmem>>, vector<1x32xf32>
    %c64_266 = arith.constant 64 : index
    %c0_267 = arith.constant 0 : index
    %796 = vector.load %arg5[%c64_266, %c0_267] : memref<104x128xf32, #tpu.memory_space<vmem>>, vector<1x32xf32>
    %cst_268 = arith.constant dense<0.000000e+00> : vector<16xf32>
    %797 = vector.multi_reduction <add>, %794, %cst_268 [1] : vector<16x32xf32> to vector<16xf32>
    %798 = vector.shape_cast %797 : vector<16xf32> to vector<16x1xf32>
    %cst_269 = arith.constant 3.200000e+01 : f32
    %799 = vector.broadcast %cst_269 : f32 to vector<16x1xf32>
    %800 = arith.divf %798, %799 : vector<16x1xf32>
    %801 = vector.broadcast %800 : vector<16x1xf32> to vector<16x32xf32>
    %802 = arith.subf %794, %801 : vector<16x32xf32>
    %803 = arith.mulf %802, %802 : vector<16x32xf32>
    %cst_270 = arith.constant dense<0.000000e+00> : vector<16xf32>
    %804 = vector.multi_reduction <add>, %803, %cst_270 [1] : vector<16x32xf32> to vector<16xf32>
    %805 = vector.shape_cast %804 : vector<16xf32> to vector<16x1xf32>
    %cst_271 = arith.constant 3.200000e+01 : f32
    %806 = vector.broadcast %cst_271 : f32 to vector<16x1xf32>
    %807 = arith.divf %805, %806 : vector<16x1xf32>
    %808 = vector.broadcast %800 : vector<16x1xf32> to vector<16x32xf32>
    %809 = arith.subf %794, %808 : vector<16x32xf32>
    %cst_272 = arith.constant 9.99999974E-6 : f32
    %810 = vector.broadcast %cst_272 : f32 to vector<16x1xf32>
    %811 = arith.addf %807, %810 : vector<16x1xf32>
    %812 = math.rsqrt %811 : vector<16x1xf32>
    %813 = vector.broadcast %812 : vector<16x1xf32> to vector<16x32xf32>
    %814 = arith.mulf %809, %813 : vector<16x32xf32>
    %815 = vector.broadcast %795 : vector<1x32xf32> to vector<16x32xf32>
    %816 = arith.mulf %814, %815 : vector<16x32xf32>
    %817 = vector.broadcast %796 : vector<1x32xf32> to vector<16x32xf32>
    %818 = arith.addf %816, %817 : vector<16x32xf32>
    %c64_273 = arith.constant 64 : index
    %c384_274 = arith.constant 384 : index
    %819 = vector.load %arg2[%c64_273, %c384_274] : memref<128x512xf32, #tpu.memory_space<vmem>>, vector<32x64xf32>
    %c71 = arith.constant 71 : index
    %c0_275 = arith.constant 0 : index
    %820 = vector.load %arg5[%c71, %c0_275] : memref<104x128xf32, #tpu.memory_space<vmem>>, vector<1x64xf32>
    %cst_276 = arith.constant dense<0.000000e+00> : vector<16x64xf32>
    %821 = tpu.matmul %818, %819, %cst_276 {dimension_numbers = #tpu.dot_dimension_numbers<[1], [0], [0], [1], [0, 0, 1, 1], [], []>} : vector<16x32xf32>, vector<32x64xf32>, vector<16x64xf32> -> vector<16x64xf32>
    %822 = vector.broadcast %820 : vector<1x64xf32> to vector<16x64xf32>
    %823 = arith.addf %821, %822 : vector<16x64xf32>
    %824 = vector.extract_strided_slice %823 {offsets = [0, 0], sizes = [16, 32], strides = [1, 1]} : vector<16x64xf32> to vector<16x32xf32>
    %825 = vector.extract_strided_slice %823 {offsets = [0, 32], sizes = [16, 32], strides = [1, 1]} : vector<16x64xf32> to vector<16x32xf32>
    %826 = arith.negf %825 : vector<16x32xf32>
    %827 = math.exp %826 : vector<16x32xf32>
    %cst_277 = arith.constant 1.000000e+00 : f32
    %828 = vector.broadcast %cst_277 : f32 to vector<16x32xf32>
    %829 = arith.addf %828, %827 : vector<16x32xf32>
    %830 = arith.divf %828, %829 : vector<16x32xf32>
    %831 = arith.mulf %824, %830 : vector<16x32xf32>
    %c256_278 = arith.constant 256 : index
    %c0_279 = arith.constant 0 : index
    %832 = vector.load %arg3[%c256_278, %c0_279] : memref<336x32xf32, #tpu.memory_space<vmem>>, vector<3x32xf32>
    %c76 = arith.constant 76 : index
    %c0_280 = arith.constant 0 : index
    %833 = vector.load %arg5[%c76, %c0_280] : memref<104x128xf32, #tpu.memory_space<vmem>>, vector<1x32xf32>
    %834 = vector.extract_strided_slice %831 {offsets = [0, 0], sizes = [8, 32], strides = [1, 1]} : vector<16x32xf32> to vector<8x32xf32>
    %835 = vector.extract_strided_slice %832 {offsets = [0, 0], sizes = [1, 32], strides = [1, 1]} : vector<3x32xf32> to vector<1x32xf32>
    %c4_i32 = arith.constant 4 : i32
    %836 = tpu.dynamic_rotate %834 by %c4_i32 dim 0 : vector<8x32xf32>, i32 -> vector<8x32xf32>
    %c4_i32_281 = arith.constant 4 : i32
    %837 = vector.broadcast %c4_i32_281 : i32 to vector<8x32xi32>
    %838 = arith.cmpi sge, %0, %837 : vector<8x32xi32>
    %cst_282 = arith.constant 0.000000e+00 : f32
    %839 = vector.broadcast %cst_282 : f32 to vector<8x32xf32>
    %840 = arith.select %838, %836, %839 : vector<8x32xi1>, vector<8x32xf32>
    %841 = vector.broadcast %835 : vector<1x32xf32> to vector<8x32xf32>
    %842 = arith.mulf %840, %841 : vector<8x32xf32>
    %843 = vector.extract_strided_slice %832 {offsets = [1, 0], sizes = [1, 32], strides = [1, 1]} : vector<3x32xf32> to vector<1x32xf32>
    %844 = vector.broadcast %843 : vector<1x32xf32> to vector<8x32xf32>
    %845 = arith.mulf %834, %844 : vector<8x32xf32>
    %846 = vector.extract_strided_slice %832 {offsets = [2, 0], sizes = [1, 32], strides = [1, 1]} : vector<3x32xf32> to vector<1x32xf32>
    %c4_i32_283 = arith.constant 4 : i32
    %847 = tpu.dynamic_rotate %834 by %c4_i32_283 dim 0 : vector<8x32xf32>, i32 -> vector<8x32xf32>
    %c4_i32_284 = arith.constant 4 : i32
    %848 = vector.broadcast %c4_i32_284 : i32 to vector<8x32xi32>
    %849 = arith.cmpi slt, %0, %848 : vector<8x32xi32>
    %cst_285 = arith.constant 0.000000e+00 : f32
    %850 = vector.broadcast %cst_285 : f32 to vector<8x32xf32>
    %851 = arith.select %849, %847, %850 : vector<8x32xi1>, vector<8x32xf32>
    %852 = vector.broadcast %846 : vector<1x32xf32> to vector<8x32xf32>
    %853 = arith.mulf %851, %852 : vector<8x32xf32>
    %cst_286 = arith.constant 0.000000e+00 : f32
    %854 = vector.broadcast %cst_286 : f32 to vector<8x32xf32>
    %855 = arith.addf %854, %842 : vector<8x32xf32>
    %856 = arith.addf %855, %845 : vector<8x32xf32>
    %857 = arith.addf %856, %853 : vector<8x32xf32>
    %858 = vector.extract_strided_slice %831 {offsets = [8, 0], sizes = [8, 32], strides = [1, 1]} : vector<16x32xf32> to vector<8x32xf32>
    %859 = vector.extract_strided_slice %832 {offsets = [0, 0], sizes = [1, 32], strides = [1, 1]} : vector<3x32xf32> to vector<1x32xf32>
    %c4_i32_287 = arith.constant 4 : i32
    %860 = tpu.dynamic_rotate %858 by %c4_i32_287 dim 0 : vector<8x32xf32>, i32 -> vector<8x32xf32>
    %c4_i32_288 = arith.constant 4 : i32
    %861 = vector.broadcast %c4_i32_288 : i32 to vector<8x32xi32>
    %862 = arith.cmpi sge, %0, %861 : vector<8x32xi32>
    %cst_289 = arith.constant 0.000000e+00 : f32
    %863 = vector.broadcast %cst_289 : f32 to vector<8x32xf32>
    %864 = arith.select %862, %860, %863 : vector<8x32xi1>, vector<8x32xf32>
    %865 = vector.broadcast %859 : vector<1x32xf32> to vector<8x32xf32>
    %866 = arith.mulf %864, %865 : vector<8x32xf32>
    %867 = vector.extract_strided_slice %832 {offsets = [1, 0], sizes = [1, 32], strides = [1, 1]} : vector<3x32xf32> to vector<1x32xf32>
    %868 = vector.broadcast %867 : vector<1x32xf32> to vector<8x32xf32>
    %869 = arith.mulf %858, %868 : vector<8x32xf32>
    %870 = vector.extract_strided_slice %832 {offsets = [2, 0], sizes = [1, 32], strides = [1, 1]} : vector<3x32xf32> to vector<1x32xf32>
    %c4_i32_290 = arith.constant 4 : i32
    %871 = tpu.dynamic_rotate %858 by %c4_i32_290 dim 0 : vector<8x32xf32>, i32 -> vector<8x32xf32>
    %c4_i32_291 = arith.constant 4 : i32
    %872 = vector.broadcast %c4_i32_291 : i32 to vector<8x32xi32>
    %873 = arith.cmpi slt, %0, %872 : vector<8x32xi32>
    %cst_292 = arith.constant 0.000000e+00 : f32
    %874 = vector.broadcast %cst_292 : f32 to vector<8x32xf32>
    %875 = arith.select %873, %871, %874 : vector<8x32xi1>, vector<8x32xf32>
    %876 = vector.broadcast %870 : vector<1x32xf32> to vector<8x32xf32>
    %877 = arith.mulf %875, %876 : vector<8x32xf32>
    %cst_293 = arith.constant 0.000000e+00 : f32
    %878 = vector.broadcast %cst_293 : f32 to vector<8x32xf32>
    %879 = arith.addf %878, %866 : vector<8x32xf32>
    %880 = arith.addf %879, %869 : vector<8x32xf32>
    %881 = arith.addf %880, %877 : vector<8x32xf32>
    %882 = tpu.concatenate %857, %881 in 0 : vector<8x32xf32>, vector<8x32xf32> -> vector<16x32xf32>
    %883 = vector.broadcast %833 : vector<1x32xf32> to vector<16x32xf32>
    %884 = arith.addf %882, %883 : vector<16x32xf32>
    %c61 = arith.constant 61 : index
    %c0_294 = arith.constant 0 : index
    %885 = vector.load %arg5[%c61, %c0_294] : memref<104x128xf32, #tpu.memory_space<vmem>>, vector<1x32xf32>
    %c67 = arith.constant 67 : index
    %c0_295 = arith.constant 0 : index
    %886 = vector.load %arg5[%c67, %c0_295] : memref<104x128xf32, #tpu.memory_space<vmem>>, vector<1x32xf32>
    %cst_296 = arith.constant 0.999994993 : f32
    %887 = vector.broadcast %cst_296 : f32 to vector<1x32xf32>
    %888 = arith.mulf %885, %887 : vector<1x32xf32>
    %889 = vector.broadcast %888 : vector<1x32xf32> to vector<16x32xf32>
    %890 = arith.mulf %884, %889 : vector<16x32xf32>
    %891 = vector.broadcast %886 : vector<1x32xf32> to vector<16x32xf32>
    %892 = arith.addf %890, %891 : vector<16x32xf32>
    %893 = arith.negf %892 : vector<16x32xf32>
    %894 = math.exp %893 : vector<16x32xf32>
    %cst_297 = arith.constant 1.000000e+00 : f32
    %895 = vector.broadcast %cst_297 : f32 to vector<16x32xf32>
    %896 = arith.addf %895, %894 : vector<16x32xf32>
    %897 = arith.divf %895, %896 : vector<16x32xf32>
    %898 = arith.mulf %892, %897 : vector<16x32xf32>
    %c224 = arith.constant 224 : index
    %c0_298 = arith.constant 0 : index
    %899 = vector.load %arg3[%c224, %c0_298] : memref<336x32xf32, #tpu.memory_space<vmem>>, vector<32x32xf32>
    %c75 = arith.constant 75 : index
    %c0_299 = arith.constant 0 : index
    %900 = vector.load %arg5[%c75, %c0_299] : memref<104x128xf32, #tpu.memory_space<vmem>>, vector<1x32xf32>
    %cst_300 = arith.constant dense<0.000000e+00> : vector<16x32xf32>
    %901 = tpu.matmul %898, %899, %cst_300 {dimension_numbers = #tpu.dot_dimension_numbers<[1], [0], [0], [1], [0, 0, 1, 1], [], []>} : vector<16x32xf32>, vector<32x32xf32>, vector<16x32xf32> -> vector<16x32xf32>
    %902 = vector.broadcast %900 : vector<1x32xf32> to vector<16x32xf32>
    %903 = arith.addf %901, %902 : vector<16x32xf32>
    %904 = arith.addf %794, %903 : vector<16x32xf32>
    %c59 = arith.constant 59 : index
    %c0_301 = arith.constant 0 : index
    %905 = vector.load %arg5[%c59, %c0_301] : memref<104x128xf32, #tpu.memory_space<vmem>>, vector<1x32xf32>
    %c65 = arith.constant 65 : index
    %c0_302 = arith.constant 0 : index
    %906 = vector.load %arg5[%c65, %c0_302] : memref<104x128xf32, #tpu.memory_space<vmem>>, vector<1x32xf32>
    %cst_303 = arith.constant dense<0.000000e+00> : vector<16xf32>
    %907 = vector.multi_reduction <add>, %904, %cst_303 [1] : vector<16x32xf32> to vector<16xf32>
    %908 = vector.shape_cast %907 : vector<16xf32> to vector<16x1xf32>
    %cst_304 = arith.constant 3.200000e+01 : f32
    %909 = vector.broadcast %cst_304 : f32 to vector<16x1xf32>
    %910 = arith.divf %908, %909 : vector<16x1xf32>
    %911 = vector.broadcast %910 : vector<16x1xf32> to vector<16x32xf32>
    %912 = arith.subf %904, %911 : vector<16x32xf32>
    %913 = arith.mulf %912, %912 : vector<16x32xf32>
    %cst_305 = arith.constant dense<0.000000e+00> : vector<16xf32>
    %914 = vector.multi_reduction <add>, %913, %cst_305 [1] : vector<16x32xf32> to vector<16xf32>
    %915 = vector.shape_cast %914 : vector<16xf32> to vector<16x1xf32>
    %cst_306 = arith.constant 3.200000e+01 : f32
    %916 = vector.broadcast %cst_306 : f32 to vector<16x1xf32>
    %917 = arith.divf %915, %916 : vector<16x1xf32>
    %918 = vector.broadcast %910 : vector<16x1xf32> to vector<16x32xf32>
    %919 = arith.subf %904, %918 : vector<16x32xf32>
    %cst_307 = arith.constant 9.99999974E-6 : f32
    %920 = vector.broadcast %cst_307 : f32 to vector<16x1xf32>
    %921 = arith.addf %917, %920 : vector<16x1xf32>
    %922 = math.rsqrt %921 : vector<16x1xf32>
    %923 = vector.broadcast %922 : vector<16x1xf32> to vector<16x32xf32>
    %924 = arith.mulf %919, %923 : vector<16x32xf32>
    %925 = vector.broadcast %905 : vector<1x32xf32> to vector<16x32xf32>
    %926 = arith.mulf %924, %925 : vector<16x32xf32>
    %927 = vector.broadcast %906 : vector<1x32xf32> to vector<16x32xf32>
    %928 = arith.addf %926, %927 : vector<16x32xf32>
    %c64_308 = arith.constant 64 : index
    %c128_309 = arith.constant 128 : index
    %929 = vector.load %arg2[%c64_308, %c128_309] : memref<128x512xf32, #tpu.memory_space<vmem>>, vector<32x128xf32>
    %c69 = arith.constant 69 : index
    %c0_310 = arith.constant 0 : index
    %930 = vector.load %arg5[%c69, %c0_310] : memref<104x128xf32, #tpu.memory_space<vmem>>, vector<1x128xf32>
    %cst_311 = arith.constant dense<0.000000e+00> : vector<16x128xf32>
    %931 = tpu.matmul %928, %929, %cst_311 {dimension_numbers = #tpu.dot_dimension_numbers<[1], [0], [0], [1], [0, 0, 1, 1], [], []>} : vector<16x32xf32>, vector<32x128xf32>, vector<16x128xf32> -> vector<16x128xf32>
    %932 = vector.broadcast %930 : vector<1x128xf32> to vector<16x128xf32>
    %933 = arith.addf %931, %932 : vector<16x128xf32>
    %934 = arith.negf %933 : vector<16x128xf32>
    %935 = math.exp %934 : vector<16x128xf32>
    %cst_312 = arith.constant 1.000000e+00 : f32
    %936 = vector.broadcast %cst_312 : f32 to vector<16x128xf32>
    %937 = arith.addf %936, %935 : vector<16x128xf32>
    %938 = arith.divf %936, %937 : vector<16x128xf32>
    %939 = arith.mulf %933, %938 : vector<16x128xf32>
    %c640 = arith.constant 640 : index
    %c0_313 = arith.constant 0 : index
    %940 = vector.load %arg4[%c640, %c0_313] : memref<1024x32xf32, #tpu.memory_space<vmem>>, vector<128x32xf32>
    %c73 = arith.constant 73 : index
    %c0_314 = arith.constant 0 : index
    %941 = vector.load %arg5[%c73, %c0_314] : memref<104x128xf32, #tpu.memory_space<vmem>>, vector<1x32xf32>
    %cst_315 = arith.constant dense<0.000000e+00> : vector<16x32xf32>
    %942 = tpu.matmul %939, %940, %cst_315 {dimension_numbers = #tpu.dot_dimension_numbers<[1], [0], [0], [1], [0, 0, 1, 1], [], []>} : vector<16x128xf32>, vector<128x32xf32>, vector<16x32xf32> -> vector<16x32xf32>
    %943 = vector.broadcast %941 : vector<1x32xf32> to vector<16x32xf32>
    %944 = arith.addf %942, %943 : vector<16x32xf32>
    %cst_316 = arith.constant 5.000000e-01 : f32
    %945 = vector.broadcast %cst_316 : f32 to vector<16x32xf32>
    %946 = arith.mulf %945, %944 : vector<16x32xf32>
    %947 = arith.addf %904, %946 : vector<16x32xf32>
    %c60 = arith.constant 60 : index
    %c0_317 = arith.constant 0 : index
    %948 = vector.load %arg5[%c60, %c0_317] : memref<104x128xf32, #tpu.memory_space<vmem>>, vector<1x32xf32>
    %c66 = arith.constant 66 : index
    %c0_318 = arith.constant 0 : index
    %949 = vector.load %arg5[%c66, %c0_318] : memref<104x128xf32, #tpu.memory_space<vmem>>, vector<1x32xf32>
    %cst_319 = arith.constant dense<0.000000e+00> : vector<16xf32>
    %950 = vector.multi_reduction <add>, %947, %cst_319 [1] : vector<16x32xf32> to vector<16xf32>
    %951 = vector.shape_cast %950 : vector<16xf32> to vector<16x1xf32>
    %cst_320 = arith.constant 3.200000e+01 : f32
    %952 = vector.broadcast %cst_320 : f32 to vector<16x1xf32>
    %953 = arith.divf %951, %952 : vector<16x1xf32>
    %954 = vector.broadcast %953 : vector<16x1xf32> to vector<16x32xf32>
    %955 = arith.subf %947, %954 : vector<16x32xf32>
    %956 = arith.mulf %955, %955 : vector<16x32xf32>
    %cst_321 = arith.constant dense<0.000000e+00> : vector<16xf32>
    %957 = vector.multi_reduction <add>, %956, %cst_321 [1] : vector<16x32xf32> to vector<16xf32>
    %958 = vector.shape_cast %957 : vector<16xf32> to vector<16x1xf32>
    %cst_322 = arith.constant 3.200000e+01 : f32
    %959 = vector.broadcast %cst_322 : f32 to vector<16x1xf32>
    %960 = arith.divf %958, %959 : vector<16x1xf32>
    %961 = vector.broadcast %953 : vector<16x1xf32> to vector<16x32xf32>
    %962 = arith.subf %947, %961 : vector<16x32xf32>
    %cst_323 = arith.constant 9.99999974E-6 : f32
    %963 = vector.broadcast %cst_323 : f32 to vector<16x1xf32>
    %964 = arith.addf %960, %963 : vector<16x1xf32>
    %965 = math.rsqrt %964 : vector<16x1xf32>
    %966 = vector.broadcast %965 : vector<16x1xf32> to vector<16x32xf32>
    %967 = arith.mulf %962, %966 : vector<16x32xf32>
    %968 = vector.broadcast %948 : vector<1x32xf32> to vector<16x32xf32>
    %969 = arith.mulf %967, %968 : vector<16x32xf32>
    %970 = vector.broadcast %949 : vector<1x32xf32> to vector<16x32xf32>
    %971 = arith.addf %969, %970 : vector<16x32xf32>
    %972 = arith.addf %650, %971 : vector<16x32xf32>
    %c80_324 = arith.constant 80 : index
    %c0_325 = arith.constant 0 : index
    %973 = vector.load %arg5[%c80_324, %c0_325] : memref<104x128xf32, #tpu.memory_space<vmem>>, vector<1x32xf32>
    %c86 = arith.constant 86 : index
    %c0_326 = arith.constant 0 : index
    %974 = vector.load %arg5[%c86, %c0_326] : memref<104x128xf32, #tpu.memory_space<vmem>>, vector<1x32xf32>
    %cst_327 = arith.constant dense<0.000000e+00> : vector<16xf32>
    %975 = vector.multi_reduction <add>, %972, %cst_327 [1] : vector<16x32xf32> to vector<16xf32>
    %976 = vector.shape_cast %975 : vector<16xf32> to vector<16x1xf32>
    %cst_328 = arith.constant 3.200000e+01 : f32
    %977 = vector.broadcast %cst_328 : f32 to vector<16x1xf32>
    %978 = arith.divf %976, %977 : vector<16x1xf32>
    %979 = vector.broadcast %978 : vector<16x1xf32> to vector<16x32xf32>
    %980 = arith.subf %972, %979 : vector<16x32xf32>
    %981 = arith.mulf %980, %980 : vector<16x32xf32>
    %cst_329 = arith.constant dense<0.000000e+00> : vector<16xf32>
    %982 = vector.multi_reduction <add>, %981, %cst_329 [1] : vector<16x32xf32> to vector<16xf32>
    %983 = vector.shape_cast %982 : vector<16xf32> to vector<16x1xf32>
    %cst_330 = arith.constant 3.200000e+01 : f32
    %984 = vector.broadcast %cst_330 : f32 to vector<16x1xf32>
    %985 = arith.divf %983, %984 : vector<16x1xf32>
    %986 = vector.broadcast %978 : vector<16x1xf32> to vector<16x32xf32>
    %987 = arith.subf %972, %986 : vector<16x32xf32>
    %cst_331 = arith.constant 9.99999974E-6 : f32
    %988 = vector.broadcast %cst_331 : f32 to vector<16x1xf32>
    %989 = arith.addf %985, %988 : vector<16x1xf32>
    %990 = math.rsqrt %989 : vector<16x1xf32>
    %991 = vector.broadcast %990 : vector<16x1xf32> to vector<16x32xf32>
    %992 = arith.mulf %987, %991 : vector<16x32xf32>
    %993 = vector.broadcast %973 : vector<1x32xf32> to vector<16x32xf32>
    %994 = arith.mulf %992, %993 : vector<16x32xf32>
    %995 = vector.broadcast %974 : vector<1x32xf32> to vector<16x32xf32>
    %996 = arith.addf %994, %995 : vector<16x32xf32>
    %c96 = arith.constant 96 : index
    %c0_332 = arith.constant 0 : index
    %997 = vector.load %arg2[%c96, %c0_332] : memref<128x512xf32, #tpu.memory_space<vmem>>, vector<32x128xf32>
    %c92 = arith.constant 92 : index
    %c0_333 = arith.constant 0 : index
    %998 = vector.load %arg5[%c92, %c0_333] : memref<104x128xf32, #tpu.memory_space<vmem>>, vector<1x128xf32>
    %cst_334 = arith.constant dense<0.000000e+00> : vector<16x128xf32>
    %999 = tpu.matmul %996, %997, %cst_334 {dimension_numbers = #tpu.dot_dimension_numbers<[1], [0], [0], [1], [0, 0, 1, 1], [], []>} : vector<16x32xf32>, vector<32x128xf32>, vector<16x128xf32> -> vector<16x128xf32>
    %1000 = vector.broadcast %998 : vector<1x128xf32> to vector<16x128xf32>
    %1001 = arith.addf %999, %1000 : vector<16x128xf32>
    %1002 = arith.negf %1001 : vector<16x128xf32>
    %1003 = math.exp %1002 : vector<16x128xf32>
    %cst_335 = arith.constant 1.000000e+00 : f32
    %1004 = vector.broadcast %cst_335 : f32 to vector<16x128xf32>
    %1005 = arith.addf %1004, %1003 : vector<16x128xf32>
    %1006 = arith.divf %1004, %1005 : vector<16x128xf32>
    %1007 = arith.mulf %1001, %1006 : vector<16x128xf32>
    %c768 = arith.constant 768 : index
    %c0_336 = arith.constant 0 : index
    %1008 = vector.load %arg4[%c768, %c0_336] : memref<1024x32xf32, #tpu.memory_space<vmem>>, vector<128x32xf32>
    %c96_337 = arith.constant 96 : index
    %c0_338 = arith.constant 0 : index
    %1009 = vector.load %arg5[%c96_337, %c0_338] : memref<104x128xf32, #tpu.memory_space<vmem>>, vector<1x32xf32>
    %cst_339 = arith.constant dense<0.000000e+00> : vector<16x32xf32>
    %1010 = tpu.matmul %1007, %1008, %cst_339 {dimension_numbers = #tpu.dot_dimension_numbers<[1], [0], [0], [1], [0, 0, 1, 1], [], []>} : vector<16x128xf32>, vector<128x32xf32>, vector<16x32xf32> -> vector<16x32xf32>
    %1011 = vector.broadcast %1009 : vector<1x32xf32> to vector<16x32xf32>
    %1012 = arith.addf %1010, %1011 : vector<16x32xf32>
    %cst_340 = arith.constant 5.000000e-01 : f32
    %1013 = vector.broadcast %cst_340 : f32 to vector<16x32xf32>
    %1014 = arith.mulf %1013, %1012 : vector<16x32xf32>
    %1015 = arith.addf %972, %1014 : vector<16x32xf32>
    %c81 = arith.constant 81 : index
    %c0_341 = arith.constant 0 : index
    %1016 = vector.load %arg5[%c81, %c0_341] : memref<104x128xf32, #tpu.memory_space<vmem>>, vector<1x32xf32>
    %c87 = arith.constant 87 : index
    %c0_342 = arith.constant 0 : index
    %1017 = vector.load %arg5[%c87, %c0_342] : memref<104x128xf32, #tpu.memory_space<vmem>>, vector<1x32xf32>
    %cst_343 = arith.constant dense<0.000000e+00> : vector<16xf32>
    %1018 = vector.multi_reduction <add>, %1015, %cst_343 [1] : vector<16x32xf32> to vector<16xf32>
    %1019 = vector.shape_cast %1018 : vector<16xf32> to vector<16x1xf32>
    %cst_344 = arith.constant 3.200000e+01 : f32
    %1020 = vector.broadcast %cst_344 : f32 to vector<16x1xf32>
    %1021 = arith.divf %1019, %1020 : vector<16x1xf32>
    %1022 = vector.broadcast %1021 : vector<16x1xf32> to vector<16x32xf32>
    %1023 = arith.subf %1015, %1022 : vector<16x32xf32>
    %1024 = arith.mulf %1023, %1023 : vector<16x32xf32>
    %cst_345 = arith.constant dense<0.000000e+00> : vector<16xf32>
    %1025 = vector.multi_reduction <add>, %1024, %cst_345 [1] : vector<16x32xf32> to vector<16xf32>
    %1026 = vector.shape_cast %1025 : vector<16xf32> to vector<16x1xf32>
    %cst_346 = arith.constant 3.200000e+01 : f32
    %1027 = vector.broadcast %cst_346 : f32 to vector<16x1xf32>
    %1028 = arith.divf %1026, %1027 : vector<16x1xf32>
    %1029 = vector.broadcast %1021 : vector<16x1xf32> to vector<16x32xf32>
    %1030 = arith.subf %1015, %1029 : vector<16x32xf32>
    %cst_347 = arith.constant 9.99999974E-6 : f32
    %1031 = vector.broadcast %cst_347 : f32 to vector<16x1xf32>
    %1032 = arith.addf %1028, %1031 : vector<16x1xf32>
    %1033 = math.rsqrt %1032 : vector<16x1xf32>
    %1034 = vector.broadcast %1033 : vector<16x1xf32> to vector<16x32xf32>
    %1035 = arith.mulf %1030, %1034 : vector<16x32xf32>
    %1036 = vector.broadcast %1016 : vector<1x32xf32> to vector<16x32xf32>
    %1037 = arith.mulf %1035, %1036 : vector<16x32xf32>
    %1038 = vector.broadcast %1017 : vector<1x32xf32> to vector<16x32xf32>
    %1039 = arith.addf %1037, %1038 : vector<16x32xf32>
    %c96_348 = arith.constant 96 : index
    %c256_349 = arith.constant 256 : index
    %1040 = vector.load %arg2[%c96_348, %c256_349] : memref<128x512xf32, #tpu.memory_space<vmem>>, vector<32x96xf32>
    %c94 = arith.constant 94 : index
    %c0_350 = arith.constant 0 : index
    %1041 = vector.load %arg5[%c94, %c0_350] : memref<104x128xf32, #tpu.memory_space<vmem>>, vector<1x96xf32>
    %cst_351 = arith.constant dense<0.000000e+00> : vector<16x96xf32>
    %1042 = tpu.matmul %1039, %1040, %cst_351 {dimension_numbers = #tpu.dot_dimension_numbers<[1], [0], [0], [1], [0, 0, 1, 1], [], []>} : vector<16x32xf32>, vector<32x96xf32>, vector<16x96xf32> -> vector<16x96xf32>
    %1043 = vector.broadcast %1041 : vector<1x96xf32> to vector<16x96xf32>
    %1044 = arith.addf %1042, %1043 : vector<16x96xf32>
    %1045 = vector.extract_strided_slice %1044 {offsets = [0, 0], sizes = [8, 8], strides = [1, 1]} : vector<16x96xf32> to vector<8x8xf32>
    %1046 = vector.extract_strided_slice %1044 {offsets = [0, 32], sizes = [8, 8], strides = [1, 1]} : vector<16x96xf32> to vector<8x8xf32>
    %cst_352 = arith.constant dense<0.000000e+00> : vector<8x8xf32>
    %1047 = tpu.matmul %1045, %1046, %cst_352 {dimension_numbers = #tpu.dot_dimension_numbers<[1], [1], [0], [0], [0, 0, 1, 0], [], []>} : vector<8x8xf32>, vector<8x8xf32>, vector<8x8xf32> -> vector<8x8xf32>
    %1048 = vector.extract_strided_slice %1044 {offsets = [0, 8], sizes = [8, 8], strides = [1, 1]} : vector<16x96xf32> to vector<8x8xf32>
    %1049 = vector.extract_strided_slice %1044 {offsets = [0, 40], sizes = [8, 8], strides = [1, 1]} : vector<16x96xf32> to vector<8x8xf32>
    %cst_353 = arith.constant dense<0.000000e+00> : vector<8x8xf32>
    %1050 = tpu.matmul %1048, %1049, %cst_353 {dimension_numbers = #tpu.dot_dimension_numbers<[1], [1], [0], [0], [0, 0, 1, 0], [], []>} : vector<8x8xf32>, vector<8x8xf32>, vector<8x8xf32> -> vector<8x8xf32>
    %1051 = vector.extract_strided_slice %1044 {offsets = [0, 16], sizes = [8, 8], strides = [1, 1]} : vector<16x96xf32> to vector<8x8xf32>
    %1052 = vector.extract_strided_slice %1044 {offsets = [0, 48], sizes = [8, 8], strides = [1, 1]} : vector<16x96xf32> to vector<8x8xf32>
    %cst_354 = arith.constant dense<0.000000e+00> : vector<8x8xf32>
    %1053 = tpu.matmul %1051, %1052, %cst_354 {dimension_numbers = #tpu.dot_dimension_numbers<[1], [1], [0], [0], [0, 0, 1, 0], [], []>} : vector<8x8xf32>, vector<8x8xf32>, vector<8x8xf32> -> vector<8x8xf32>
    %1054 = vector.extract_strided_slice %1044 {offsets = [0, 24], sizes = [8, 8], strides = [1, 1]} : vector<16x96xf32> to vector<8x8xf32>
    %1055 = vector.extract_strided_slice %1044 {offsets = [0, 56], sizes = [8, 8], strides = [1, 1]} : vector<16x96xf32> to vector<8x8xf32>
    %cst_355 = arith.constant dense<0.000000e+00> : vector<8x8xf32>
    %1056 = tpu.matmul %1054, %1055, %cst_355 {dimension_numbers = #tpu.dot_dimension_numbers<[1], [1], [0], [0], [0, 0, 1, 0], [], []>} : vector<8x8xf32>, vector<8x8xf32>, vector<8x8xf32> -> vector<8x8xf32>
    %1057 = vector.extract_strided_slice %1044 {offsets = [8, 0], sizes = [8, 8], strides = [1, 1]} : vector<16x96xf32> to vector<8x8xf32>
    %1058 = vector.extract_strided_slice %1044 {offsets = [8, 32], sizes = [8, 8], strides = [1, 1]} : vector<16x96xf32> to vector<8x8xf32>
    %cst_356 = arith.constant dense<0.000000e+00> : vector<8x8xf32>
    %1059 = tpu.matmul %1057, %1058, %cst_356 {dimension_numbers = #tpu.dot_dimension_numbers<[1], [1], [0], [0], [0, 0, 1, 0], [], []>} : vector<8x8xf32>, vector<8x8xf32>, vector<8x8xf32> -> vector<8x8xf32>
    %1060 = vector.extract_strided_slice %1044 {offsets = [8, 8], sizes = [8, 8], strides = [1, 1]} : vector<16x96xf32> to vector<8x8xf32>
    %1061 = vector.extract_strided_slice %1044 {offsets = [8, 40], sizes = [8, 8], strides = [1, 1]} : vector<16x96xf32> to vector<8x8xf32>
    %cst_357 = arith.constant dense<0.000000e+00> : vector<8x8xf32>
    %1062 = tpu.matmul %1060, %1061, %cst_357 {dimension_numbers = #tpu.dot_dimension_numbers<[1], [1], [0], [0], [0, 0, 1, 0], [], []>} : vector<8x8xf32>, vector<8x8xf32>, vector<8x8xf32> -> vector<8x8xf32>
    %1063 = vector.extract_strided_slice %1044 {offsets = [8, 16], sizes = [8, 8], strides = [1, 1]} : vector<16x96xf32> to vector<8x8xf32>
    %1064 = vector.extract_strided_slice %1044 {offsets = [8, 48], sizes = [8, 8], strides = [1, 1]} : vector<16x96xf32> to vector<8x8xf32>
    %cst_358 = arith.constant dense<0.000000e+00> : vector<8x8xf32>
    %1065 = tpu.matmul %1063, %1064, %cst_358 {dimension_numbers = #tpu.dot_dimension_numbers<[1], [1], [0], [0], [0, 0, 1, 0], [], []>} : vector<8x8xf32>, vector<8x8xf32>, vector<8x8xf32> -> vector<8x8xf32>
    %1066 = vector.extract_strided_slice %1044 {offsets = [8, 24], sizes = [8, 8], strides = [1, 1]} : vector<16x96xf32> to vector<8x8xf32>
    %1067 = vector.extract_strided_slice %1044 {offsets = [8, 56], sizes = [8, 8], strides = [1, 1]} : vector<16x96xf32> to vector<8x8xf32>
    %cst_359 = arith.constant dense<0.000000e+00> : vector<8x8xf32>
    %1068 = tpu.matmul %1066, %1067, %cst_359 {dimension_numbers = #tpu.dot_dimension_numbers<[1], [1], [0], [0], [0, 0, 1, 0], [], []>} : vector<8x8xf32>, vector<8x8xf32>, vector<8x8xf32> -> vector<8x8xf32>
    %1069 = tpu.concatenate %1047, %1050, %1053, %1056, %1059, %1062, %1065, %1068 in 0 : vector<8x8xf32>, vector<8x8xf32>, vector<8x8xf32>, vector<8x8xf32>, vector<8x8xf32>, vector<8x8xf32>, vector<8x8xf32>, vector<8x8xf32> -> vector<64x8xf32>
    %cst_360 = arith.constant 0.353553385 : f32
    %1070 = vector.broadcast %cst_360 : f32 to vector<64x8xf32>
    %1071 = arith.mulf %1069, %1070 : vector<64x8xf32>
    %cst_361 = arith.constant dense<0xFF800000> : vector<64xf32>
    %1072 = vector.multi_reduction <maximumf>, %1071, %cst_361 [1] : vector<64x8xf32> to vector<64xf32>
    %1073 = vector.shape_cast %1072 : vector<64xf32> to vector<64x1xf32>
    %1074 = vector.broadcast %1073 : vector<64x1xf32> to vector<64x8xf32>
    %1075 = arith.subf %1071, %1074 : vector<64x8xf32>
    %1076 = math.exp %1075 : vector<64x8xf32>
    %cst_362 = arith.constant dense<0.000000e+00> : vector<64xf32>
    %1077 = vector.multi_reduction <add>, %1076, %cst_362 [1] : vector<64x8xf32> to vector<64xf32>
    %1078 = vector.shape_cast %1077 : vector<64xf32> to vector<64x1xf32>
    %1079 = vector.broadcast %1078 : vector<64x1xf32> to vector<64x8xf32>
    %1080 = arith.divf %1076, %1079 : vector<64x8xf32>
    %1081 = vector.extract_strided_slice %1080 {offsets = [0, 0], sizes = [8, 8], strides = [1, 1]} : vector<64x8xf32> to vector<8x8xf32>
    %1082 = vector.extract_strided_slice %1044 {offsets = [0, 64], sizes = [8, 8], strides = [1, 1]} : vector<16x96xf32> to vector<8x8xf32>
    %cst_363 = arith.constant dense<0.000000e+00> : vector<8x8xf32>
    %1083 = tpu.matmul %1081, %1082, %cst_363 {dimension_numbers = #tpu.dot_dimension_numbers<[1], [0], [0], [1], [0, 0, 1, 1], [], []>} : vector<8x8xf32>, vector<8x8xf32>, vector<8x8xf32> -> vector<8x8xf32>
    %1084 = vector.extract_strided_slice %1080 {offsets = [8, 0], sizes = [8, 8], strides = [1, 1]} : vector<64x8xf32> to vector<8x8xf32>
    %1085 = vector.extract_strided_slice %1044 {offsets = [0, 72], sizes = [8, 8], strides = [1, 1]} : vector<16x96xf32> to vector<8x8xf32>
    %cst_364 = arith.constant dense<0.000000e+00> : vector<8x8xf32>
    %1086 = tpu.matmul %1084, %1085, %cst_364 {dimension_numbers = #tpu.dot_dimension_numbers<[1], [0], [0], [1], [0, 0, 1, 1], [], []>} : vector<8x8xf32>, vector<8x8xf32>, vector<8x8xf32> -> vector<8x8xf32>
    %1087 = vector.extract_strided_slice %1080 {offsets = [16, 0], sizes = [8, 8], strides = [1, 1]} : vector<64x8xf32> to vector<8x8xf32>
    %1088 = vector.extract_strided_slice %1044 {offsets = [0, 80], sizes = [8, 8], strides = [1, 1]} : vector<16x96xf32> to vector<8x8xf32>
    %cst_365 = arith.constant dense<0.000000e+00> : vector<8x8xf32>
    %1089 = tpu.matmul %1087, %1088, %cst_365 {dimension_numbers = #tpu.dot_dimension_numbers<[1], [0], [0], [1], [0, 0, 1, 1], [], []>} : vector<8x8xf32>, vector<8x8xf32>, vector<8x8xf32> -> vector<8x8xf32>
    %1090 = vector.extract_strided_slice %1080 {offsets = [24, 0], sizes = [8, 8], strides = [1, 1]} : vector<64x8xf32> to vector<8x8xf32>
    %1091 = vector.extract_strided_slice %1044 {offsets = [0, 88], sizes = [8, 8], strides = [1, 1]} : vector<16x96xf32> to vector<8x8xf32>
    %cst_366 = arith.constant dense<0.000000e+00> : vector<8x8xf32>
    %1092 = tpu.matmul %1090, %1091, %cst_366 {dimension_numbers = #tpu.dot_dimension_numbers<[1], [0], [0], [1], [0, 0, 1, 1], [], []>} : vector<8x8xf32>, vector<8x8xf32>, vector<8x8xf32> -> vector<8x8xf32>
    %1093 = tpu.concatenate %1083, %1086, %1089, %1092 in 1 : vector<8x8xf32>, vector<8x8xf32>, vector<8x8xf32>, vector<8x8xf32> -> vector<8x32xf32>
    %1094 = tpu.concatenate %1081, %1084, %1087, %1090 in 1 : vector<8x8xf32>, vector<8x8xf32>, vector<8x8xf32>, vector<8x8xf32> -> vector<8x32xf32>
    %1095 = vector.extract_strided_slice %1080 {offsets = [32, 0], sizes = [8, 8], strides = [1, 1]} : vector<64x8xf32> to vector<8x8xf32>
    %1096 = vector.extract_strided_slice %1044 {offsets = [8, 64], sizes = [8, 8], strides = [1, 1]} : vector<16x96xf32> to vector<8x8xf32>
    %cst_367 = arith.constant dense<0.000000e+00> : vector<8x8xf32>
    %1097 = tpu.matmul %1095, %1096, %cst_367 {dimension_numbers = #tpu.dot_dimension_numbers<[1], [0], [0], [1], [0, 0, 1, 1], [], []>} : vector<8x8xf32>, vector<8x8xf32>, vector<8x8xf32> -> vector<8x8xf32>
    %1098 = vector.extract_strided_slice %1080 {offsets = [40, 0], sizes = [8, 8], strides = [1, 1]} : vector<64x8xf32> to vector<8x8xf32>
    %1099 = vector.extract_strided_slice %1044 {offsets = [8, 72], sizes = [8, 8], strides = [1, 1]} : vector<16x96xf32> to vector<8x8xf32>
    %cst_368 = arith.constant dense<0.000000e+00> : vector<8x8xf32>
    %1100 = tpu.matmul %1098, %1099, %cst_368 {dimension_numbers = #tpu.dot_dimension_numbers<[1], [0], [0], [1], [0, 0, 1, 1], [], []>} : vector<8x8xf32>, vector<8x8xf32>, vector<8x8xf32> -> vector<8x8xf32>
    %1101 = vector.extract_strided_slice %1080 {offsets = [48, 0], sizes = [8, 8], strides = [1, 1]} : vector<64x8xf32> to vector<8x8xf32>
    %1102 = vector.extract_strided_slice %1044 {offsets = [8, 80], sizes = [8, 8], strides = [1, 1]} : vector<16x96xf32> to vector<8x8xf32>
    %cst_369 = arith.constant dense<0.000000e+00> : vector<8x8xf32>
    %1103 = tpu.matmul %1101, %1102, %cst_369 {dimension_numbers = #tpu.dot_dimension_numbers<[1], [0], [0], [1], [0, 0, 1, 1], [], []>} : vector<8x8xf32>, vector<8x8xf32>, vector<8x8xf32> -> vector<8x8xf32>
    %1104 = vector.extract_strided_slice %1080 {offsets = [56, 0], sizes = [8, 8], strides = [1, 1]} : vector<64x8xf32> to vector<8x8xf32>
    %1105 = vector.extract_strided_slice %1044 {offsets = [8, 88], sizes = [8, 8], strides = [1, 1]} : vector<16x96xf32> to vector<8x8xf32>
    %cst_370 = arith.constant dense<0.000000e+00> : vector<8x8xf32>
    %1106 = tpu.matmul %1104, %1105, %cst_370 {dimension_numbers = #tpu.dot_dimension_numbers<[1], [0], [0], [1], [0, 0, 1, 1], [], []>} : vector<8x8xf32>, vector<8x8xf32>, vector<8x8xf32> -> vector<8x8xf32>
    %1107 = tpu.concatenate %1097, %1100, %1103, %1106 in 1 : vector<8x8xf32>, vector<8x8xf32>, vector<8x8xf32>, vector<8x8xf32> -> vector<8x32xf32>
    %1108 = tpu.concatenate %1095, %1098, %1101, %1104 in 1 : vector<8x8xf32>, vector<8x8xf32>, vector<8x8xf32>, vector<8x8xf32> -> vector<8x32xf32>
    %1109 = tpu.concatenate %1093, %1107 in 0 : vector<8x32xf32>, vector<8x32xf32> -> vector<16x32xf32>
    %1110 = tpu.concatenate %1094, %1108 in 0 : vector<8x32xf32>, vector<8x32xf32> -> vector<16x32xf32>
    %c264 = arith.constant 264 : index
    %c0_371 = arith.constant 0 : index
    %1111 = vector.load %arg3[%c264, %c0_371] : memref<336x32xf32, #tpu.memory_space<vmem>>, vector<32x32xf32>
    %c98 = arith.constant 98 : index
    %c0_372 = arith.constant 0 : index
    %1112 = vector.load %arg5[%c98, %c0_372] : memref<104x128xf32, #tpu.memory_space<vmem>>, vector<1x32xf32>
    %cst_373 = arith.constant dense<0.000000e+00> : vector<16x32xf32>
    %1113 = tpu.matmul %1109, %1111, %cst_373 {dimension_numbers = #tpu.dot_dimension_numbers<[1], [0], [0], [1], [0, 0, 1, 1], [], []>} : vector<16x32xf32>, vector<32x32xf32>, vector<16x32xf32> -> vector<16x32xf32>
    %1114 = vector.broadcast %1112 : vector<1x32xf32> to vector<16x32xf32>
    %1115 = arith.addf %1113, %1114 : vector<16x32xf32>
    %1116 = arith.addf %1015, %1115 : vector<16x32xf32>
    %c82 = arith.constant 82 : index
    %c0_374 = arith.constant 0 : index
    %1117 = vector.load %arg5[%c82, %c0_374] : memref<104x128xf32, #tpu.memory_space<vmem>>, vector<1x32xf32>
    %c88 = arith.constant 88 : index
    %c0_375 = arith.constant 0 : index
    %1118 = vector.load %arg5[%c88, %c0_375] : memref<104x128xf32, #tpu.memory_space<vmem>>, vector<1x32xf32>
    %cst_376 = arith.constant dense<0.000000e+00> : vector<16xf32>
    %1119 = vector.multi_reduction <add>, %1116, %cst_376 [1] : vector<16x32xf32> to vector<16xf32>
    %1120 = vector.shape_cast %1119 : vector<16xf32> to vector<16x1xf32>
    %cst_377 = arith.constant 3.200000e+01 : f32
    %1121 = vector.broadcast %cst_377 : f32 to vector<16x1xf32>
    %1122 = arith.divf %1120, %1121 : vector<16x1xf32>
    %1123 = vector.broadcast %1122 : vector<16x1xf32> to vector<16x32xf32>
    %1124 = arith.subf %1116, %1123 : vector<16x32xf32>
    %1125 = arith.mulf %1124, %1124 : vector<16x32xf32>
    %cst_378 = arith.constant dense<0.000000e+00> : vector<16xf32>
    %1126 = vector.multi_reduction <add>, %1125, %cst_378 [1] : vector<16x32xf32> to vector<16xf32>
    %1127 = vector.shape_cast %1126 : vector<16xf32> to vector<16x1xf32>
    %cst_379 = arith.constant 3.200000e+01 : f32
    %1128 = vector.broadcast %cst_379 : f32 to vector<16x1xf32>
    %1129 = arith.divf %1127, %1128 : vector<16x1xf32>
    %1130 = vector.broadcast %1122 : vector<16x1xf32> to vector<16x32xf32>
    %1131 = arith.subf %1116, %1130 : vector<16x32xf32>
    %cst_380 = arith.constant 9.99999974E-6 : f32
    %1132 = vector.broadcast %cst_380 : f32 to vector<16x1xf32>
    %1133 = arith.addf %1129, %1132 : vector<16x1xf32>
    %1134 = math.rsqrt %1133 : vector<16x1xf32>
    %1135 = vector.broadcast %1134 : vector<16x1xf32> to vector<16x32xf32>
    %1136 = arith.mulf %1131, %1135 : vector<16x32xf32>
    %1137 = vector.broadcast %1117 : vector<1x32xf32> to vector<16x32xf32>
    %1138 = arith.mulf %1136, %1137 : vector<16x32xf32>
    %1139 = vector.broadcast %1118 : vector<1x32xf32> to vector<16x32xf32>
    %1140 = arith.addf %1138, %1139 : vector<16x32xf32>
    %c96_381 = arith.constant 96 : index
    %c384_382 = arith.constant 384 : index
    %1141 = vector.load %arg2[%c96_381, %c384_382] : memref<128x512xf32, #tpu.memory_space<vmem>>, vector<32x64xf32>
    %c95 = arith.constant 95 : index
    %c0_383 = arith.constant 0 : index
    %1142 = vector.load %arg5[%c95, %c0_383] : memref<104x128xf32, #tpu.memory_space<vmem>>, vector<1x64xf32>
    %cst_384 = arith.constant dense<0.000000e+00> : vector<16x64xf32>
    %1143 = tpu.matmul %1140, %1141, %cst_384 {dimension_numbers = #tpu.dot_dimension_numbers<[1], [0], [0], [1], [0, 0, 1, 1], [], []>} : vector<16x32xf32>, vector<32x64xf32>, vector<16x64xf32> -> vector<16x64xf32>
    %1144 = vector.broadcast %1142 : vector<1x64xf32> to vector<16x64xf32>
    %1145 = arith.addf %1143, %1144 : vector<16x64xf32>
    %1146 = vector.extract_strided_slice %1145 {offsets = [0, 0], sizes = [16, 32], strides = [1, 1]} : vector<16x64xf32> to vector<16x32xf32>
    %1147 = vector.extract_strided_slice %1145 {offsets = [0, 32], sizes = [16, 32], strides = [1, 1]} : vector<16x64xf32> to vector<16x32xf32>
    %1148 = arith.negf %1147 : vector<16x32xf32>
    %1149 = math.exp %1148 : vector<16x32xf32>
    %cst_385 = arith.constant 1.000000e+00 : f32
    %1150 = vector.broadcast %cst_385 : f32 to vector<16x32xf32>
    %1151 = arith.addf %1150, %1149 : vector<16x32xf32>
    %1152 = arith.divf %1150, %1151 : vector<16x32xf32>
    %1153 = arith.mulf %1146, %1152 : vector<16x32xf32>
    %c328 = arith.constant 328 : index
    %c0_386 = arith.constant 0 : index
    %1154 = vector.load %arg3[%c328, %c0_386] : memref<336x32xf32, #tpu.memory_space<vmem>>, vector<3x32xf32>
    %c100 = arith.constant 100 : index
    %c0_387 = arith.constant 0 : index
    %1155 = vector.load %arg5[%c100, %c0_387] : memref<104x128xf32, #tpu.memory_space<vmem>>, vector<1x32xf32>
    %1156 = vector.extract_strided_slice %1153 {offsets = [0, 0], sizes = [8, 32], strides = [1, 1]} : vector<16x32xf32> to vector<8x32xf32>
    %1157 = vector.extract_strided_slice %1154 {offsets = [1, 0], sizes = [1, 32], strides = [1, 1]} : vector<3x32xf32> to vector<1x32xf32>
    %1158 = vector.broadcast %1157 : vector<1x32xf32> to vector<8x32xf32>
    %1159 = arith.mulf %1156, %1158 : vector<8x32xf32>
    %cst_388 = arith.constant 0.000000e+00 : f32
    %1160 = vector.broadcast %cst_388 : f32 to vector<8x32xf32>
    %1161 = arith.addf %1160, %1159 : vector<8x32xf32>
    %1162 = vector.extract_strided_slice %1153 {offsets = [8, 0], sizes = [8, 32], strides = [1, 1]} : vector<16x32xf32> to vector<8x32xf32>
    %1163 = vector.extract_strided_slice %1154 {offsets = [1, 0], sizes = [1, 32], strides = [1, 1]} : vector<3x32xf32> to vector<1x32xf32>
    %1164 = vector.broadcast %1163 : vector<1x32xf32> to vector<8x32xf32>
    %1165 = arith.mulf %1162, %1164 : vector<8x32xf32>
    %cst_389 = arith.constant 0.000000e+00 : f32
    %1166 = vector.broadcast %cst_389 : f32 to vector<8x32xf32>
    %1167 = arith.addf %1166, %1165 : vector<8x32xf32>
    %1168 = tpu.concatenate %1161, %1167 in 0 : vector<8x32xf32>, vector<8x32xf32> -> vector<16x32xf32>
    %1169 = vector.broadcast %1155 : vector<1x32xf32> to vector<16x32xf32>
    %1170 = arith.addf %1168, %1169 : vector<16x32xf32>
    %c85 = arith.constant 85 : index
    %c0_390 = arith.constant 0 : index
    %1171 = vector.load %arg5[%c85, %c0_390] : memref<104x128xf32, #tpu.memory_space<vmem>>, vector<1x32xf32>
    %c91 = arith.constant 91 : index
    %c0_391 = arith.constant 0 : index
    %1172 = vector.load %arg5[%c91, %c0_391] : memref<104x128xf32, #tpu.memory_space<vmem>>, vector<1x32xf32>
    %cst_392 = arith.constant 0.999994993 : f32
    %1173 = vector.broadcast %cst_392 : f32 to vector<1x32xf32>
    %1174 = arith.mulf %1171, %1173 : vector<1x32xf32>
    %1175 = vector.broadcast %1174 : vector<1x32xf32> to vector<16x32xf32>
    %1176 = arith.mulf %1170, %1175 : vector<16x32xf32>
    %1177 = vector.broadcast %1172 : vector<1x32xf32> to vector<16x32xf32>
    %1178 = arith.addf %1176, %1177 : vector<16x32xf32>
    %1179 = arith.negf %1178 : vector<16x32xf32>
    %1180 = math.exp %1179 : vector<16x32xf32>
    %cst_393 = arith.constant 1.000000e+00 : f32
    %1181 = vector.broadcast %cst_393 : f32 to vector<16x32xf32>
    %1182 = arith.addf %1181, %1180 : vector<16x32xf32>
    %1183 = arith.divf %1181, %1182 : vector<16x32xf32>
    %1184 = arith.mulf %1178, %1183 : vector<16x32xf32>
    %c296 = arith.constant 296 : index
    %c0_394 = arith.constant 0 : index
    %1185 = vector.load %arg3[%c296, %c0_394] : memref<336x32xf32, #tpu.memory_space<vmem>>, vector<32x32xf32>
    %c99 = arith.constant 99 : index
    %c0_395 = arith.constant 0 : index
    %1186 = vector.load %arg5[%c99, %c0_395] : memref<104x128xf32, #tpu.memory_space<vmem>>, vector<1x32xf32>
    %cst_396 = arith.constant dense<0.000000e+00> : vector<16x32xf32>
    %1187 = tpu.matmul %1184, %1185, %cst_396 {dimension_numbers = #tpu.dot_dimension_numbers<[1], [0], [0], [1], [0, 0, 1, 1], [], []>} : vector<16x32xf32>, vector<32x32xf32>, vector<16x32xf32> -> vector<16x32xf32>
    %1188 = vector.broadcast %1186 : vector<1x32xf32> to vector<16x32xf32>
    %1189 = arith.addf %1187, %1188 : vector<16x32xf32>
    %1190 = arith.addf %1116, %1189 : vector<16x32xf32>
    %c83 = arith.constant 83 : index
    %c0_397 = arith.constant 0 : index
    %1191 = vector.load %arg5[%c83, %c0_397] : memref<104x128xf32, #tpu.memory_space<vmem>>, vector<1x32xf32>
    %c89 = arith.constant 89 : index
    %c0_398 = arith.constant 0 : index
    %1192 = vector.load %arg5[%c89, %c0_398] : memref<104x128xf32, #tpu.memory_space<vmem>>, vector<1x32xf32>
    %cst_399 = arith.constant dense<0.000000e+00> : vector<16xf32>
    %1193 = vector.multi_reduction <add>, %1190, %cst_399 [1] : vector<16x32xf32> to vector<16xf32>
    %1194 = vector.shape_cast %1193 : vector<16xf32> to vector<16x1xf32>
    %cst_400 = arith.constant 3.200000e+01 : f32
    %1195 = vector.broadcast %cst_400 : f32 to vector<16x1xf32>
    %1196 = arith.divf %1194, %1195 : vector<16x1xf32>
    %1197 = vector.broadcast %1196 : vector<16x1xf32> to vector<16x32xf32>
    %1198 = arith.subf %1190, %1197 : vector<16x32xf32>
    %1199 = arith.mulf %1198, %1198 : vector<16x32xf32>
    %cst_401 = arith.constant dense<0.000000e+00> : vector<16xf32>
    %1200 = vector.multi_reduction <add>, %1199, %cst_401 [1] : vector<16x32xf32> to vector<16xf32>
    %1201 = vector.shape_cast %1200 : vector<16xf32> to vector<16x1xf32>
    %cst_402 = arith.constant 3.200000e+01 : f32
    %1202 = vector.broadcast %cst_402 : f32 to vector<16x1xf32>
    %1203 = arith.divf %1201, %1202 : vector<16x1xf32>
    %1204 = vector.broadcast %1196 : vector<16x1xf32> to vector<16x32xf32>
    %1205 = arith.subf %1190, %1204 : vector<16x32xf32>
    %cst_403 = arith.constant 9.99999974E-6 : f32
    %1206 = vector.broadcast %cst_403 : f32 to vector<16x1xf32>
    %1207 = arith.addf %1203, %1206 : vector<16x1xf32>
    %1208 = math.rsqrt %1207 : vector<16x1xf32>
    %1209 = vector.broadcast %1208 : vector<16x1xf32> to vector<16x32xf32>
    %1210 = arith.mulf %1205, %1209 : vector<16x32xf32>
    %1211 = vector.broadcast %1191 : vector<1x32xf32> to vector<16x32xf32>
    %1212 = arith.mulf %1210, %1211 : vector<16x32xf32>
    %1213 = vector.broadcast %1192 : vector<1x32xf32> to vector<16x32xf32>
    %1214 = arith.addf %1212, %1213 : vector<16x32xf32>
    %c96_404 = arith.constant 96 : index
    %c128_405 = arith.constant 128 : index
    %1215 = vector.load %arg2[%c96_404, %c128_405] : memref<128x512xf32, #tpu.memory_space<vmem>>, vector<32x128xf32>
    %c93 = arith.constant 93 : index
    %c0_406 = arith.constant 0 : index
    %1216 = vector.load %arg5[%c93, %c0_406] : memref<104x128xf32, #tpu.memory_space<vmem>>, vector<1x128xf32>
    %cst_407 = arith.constant dense<0.000000e+00> : vector<16x128xf32>
    %1217 = tpu.matmul %1214, %1215, %cst_407 {dimension_numbers = #tpu.dot_dimension_numbers<[1], [0], [0], [1], [0, 0, 1, 1], [], []>} : vector<16x32xf32>, vector<32x128xf32>, vector<16x128xf32> -> vector<16x128xf32>
    %1218 = vector.broadcast %1216 : vector<1x128xf32> to vector<16x128xf32>
    %1219 = arith.addf %1217, %1218 : vector<16x128xf32>
    %1220 = arith.negf %1219 : vector<16x128xf32>
    %1221 = math.exp %1220 : vector<16x128xf32>
    %cst_408 = arith.constant 1.000000e+00 : f32
    %1222 = vector.broadcast %cst_408 : f32 to vector<16x128xf32>
    %1223 = arith.addf %1222, %1221 : vector<16x128xf32>
    %1224 = arith.divf %1222, %1223 : vector<16x128xf32>
    %1225 = arith.mulf %1219, %1224 : vector<16x128xf32>
    %c896 = arith.constant 896 : index
    %c0_409 = arith.constant 0 : index
    %1226 = vector.load %arg4[%c896, %c0_409] : memref<1024x32xf32, #tpu.memory_space<vmem>>, vector<128x32xf32>
    %c97 = arith.constant 97 : index
    %c0_410 = arith.constant 0 : index
    %1227 = vector.load %arg5[%c97, %c0_410] : memref<104x128xf32, #tpu.memory_space<vmem>>, vector<1x32xf32>
    %cst_411 = arith.constant dense<0.000000e+00> : vector<16x32xf32>
    %1228 = tpu.matmul %1225, %1226, %cst_411 {dimension_numbers = #tpu.dot_dimension_numbers<[1], [0], [0], [1], [0, 0, 1, 1], [], []>} : vector<16x128xf32>, vector<128x32xf32>, vector<16x32xf32> -> vector<16x32xf32>
    %1229 = vector.broadcast %1227 : vector<1x32xf32> to vector<16x32xf32>
    %1230 = arith.addf %1228, %1229 : vector<16x32xf32>
    %cst_412 = arith.constant 5.000000e-01 : f32
    %1231 = vector.broadcast %cst_412 : f32 to vector<16x32xf32>
    %1232 = arith.mulf %1231, %1230 : vector<16x32xf32>
    %1233 = arith.addf %1190, %1232 : vector<16x32xf32>
    %c84 = arith.constant 84 : index
    %c0_413 = arith.constant 0 : index
    %1234 = vector.load %arg5[%c84, %c0_413] : memref<104x128xf32, #tpu.memory_space<vmem>>, vector<1x32xf32>
    %c90 = arith.constant 90 : index
    %c0_414 = arith.constant 0 : index
    %1235 = vector.load %arg5[%c90, %c0_414] : memref<104x128xf32, #tpu.memory_space<vmem>>, vector<1x32xf32>
    %cst_415 = arith.constant dense<0.000000e+00> : vector<16xf32>
    %1236 = vector.multi_reduction <add>, %1233, %cst_415 [1] : vector<16x32xf32> to vector<16xf32>
    %1237 = vector.shape_cast %1236 : vector<16xf32> to vector<16x1xf32>
    %cst_416 = arith.constant 3.200000e+01 : f32
    %1238 = vector.broadcast %cst_416 : f32 to vector<16x1xf32>
    %1239 = arith.divf %1237, %1238 : vector<16x1xf32>
    %1240 = vector.broadcast %1239 : vector<16x1xf32> to vector<16x32xf32>
    %1241 = arith.subf %1233, %1240 : vector<16x32xf32>
    %1242 = arith.mulf %1241, %1241 : vector<16x32xf32>
    %cst_417 = arith.constant dense<0.000000e+00> : vector<16xf32>
    %1243 = vector.multi_reduction <add>, %1242, %cst_417 [1] : vector<16x32xf32> to vector<16xf32>
    %1244 = vector.shape_cast %1243 : vector<16xf32> to vector<16x1xf32>
    %cst_418 = arith.constant 3.200000e+01 : f32
    %1245 = vector.broadcast %cst_418 : f32 to vector<16x1xf32>
    %1246 = arith.divf %1244, %1245 : vector<16x1xf32>
    %1247 = vector.broadcast %1239 : vector<16x1xf32> to vector<16x32xf32>
    %1248 = arith.subf %1233, %1247 : vector<16x32xf32>
    %cst_419 = arith.constant 9.99999974E-6 : f32
    %1249 = vector.broadcast %cst_419 : f32 to vector<16x1xf32>
    %1250 = arith.addf %1246, %1249 : vector<16x1xf32>
    %1251 = math.rsqrt %1250 : vector<16x1xf32>
    %1252 = vector.broadcast %1251 : vector<16x1xf32> to vector<16x32xf32>
    %1253 = arith.mulf %1248, %1252 : vector<16x32xf32>
    %1254 = vector.broadcast %1234 : vector<1x32xf32> to vector<16x32xf32>
    %1255 = arith.mulf %1253, %1254 : vector<16x32xf32>
    %1256 = vector.broadcast %1235 : vector<1x32xf32> to vector<16x32xf32>
    %1257 = arith.addf %1255, %1256 : vector<16x32xf32>
    %1258 = arith.addf %972, %1257 : vector<16x32xf32>
    %1259 = tpu.concatenate %144, %466, %788, %1110 in 1 : vector<16x32xf32>, vector<16x32xf32>, vector<16x32xf32>, vector<16x32xf32> -> vector<16x128xf32>
    %c0_420 = arith.constant 0 : index
    %c0_421 = arith.constant 0 : index
    %1260 = vector.load %arg7[%c0_420, %c0_421] : memref<16x128xf32, #tpu.memory_space<vmem>>, vector<16x128xf32>
    tpu.vector_store %arg7[%c0_420, %c0_421], %1259 {strides = array<i32>} : memref<16x128xf32, #tpu.memory_space<vmem>>, vector<16x128xf32>,
    %c16_422 = arith.constant 16 : index
    %c0_423 = arith.constant 0 : index
    %1261 = vector.load %arg3[%c16_422, %c0_423] : memref<336x32xf32, #tpu.memory_space<vmem>>, vector<32x16xf32>
    %c1 = arith.constant 1 : index
    %c0_424 = arith.constant 0 : index
    %1262 = vector.load %arg5[%c1, %c0_424] : memref<104x128xf32, #tpu.memory_space<vmem>>, vector<1x16xf32>
    %cst_425 = arith.constant dense<0.000000e+00> : vector<16x16xf32>
    %1263 = tpu.matmul %1258, %1261, %cst_425 {dimension_numbers = #tpu.dot_dimension_numbers<[1], [0], [0], [1], [0, 0, 1, 1], [], []>} : vector<16x32xf32>, vector<32x16xf32>, vector<16x16xf32> -> vector<16x16xf32>
    %1264 = vector.broadcast %1262 : vector<1x16xf32> to vector<16x16xf32>
    %1265 = arith.addf %1263, %1264 : vector<16x16xf32>
    %c0_426 = arith.constant 0 : index
    %c0_427 = arith.constant 0 : index
    %1266 = vector.load %arg6[%c0_426, %c0_427] : memref<16x16xf32, #tpu.memory_space<vmem>>, vector<16x16xf32>
    tpu.vector_store %arg6[%c0_426, %c0_427], %1265 {strides = array<i32>} : memref<16x16xf32, #tpu.memory_space<vmem>>, vector<16x16xf32>,
    return
  }
  func.func @transform_0(%arg0: i32) -> (i32, i32) {
    %c0_i32 = arith.constant 0 : i32
    %c0_i32_0 = arith.constant 0 : i32
    return %arg0, %c0_i32 : i32, i32
  }
  func.func @transform_1(%arg0: i32) -> (i32, i32) {
    %c0_i32 = arith.constant 0 : i32
    %c0_i32_0 = arith.constant 0 : i32
    %c0_i32_1 = arith.constant 0 : i32
    return %c0_i32, %c0_i32_0 : i32, i32
  }
  func.func @transform_2(%arg0: i32) -> (i32, i32) {
    %c0_i32 = arith.constant 0 : i32
    %c0_i32_0 = arith.constant 0 : i32
    %c0_i32_1 = arith.constant 0 : i32
    return %c0_i32, %c0_i32_0 : i32, i32
  }
  func.func @transform_3(%arg0: i32) -> (i32, i32) {
    %c0_i32 = arith.constant 0 : i32
    %c0_i32_0 = arith.constant 0 : i32
    %c0_i32_1 = arith.constant 0 : i32
    return %c0_i32, %c0_i32_0 : i32, i32
  }
  func.func @transform_4(%arg0: i32) -> (i32, i32) {
    %c0_i32 = arith.constant 0 : i32
    %c0_i32_0 = arith.constant 0 : i32
    %c0_i32_1 = arith.constant 0 : i32
    return %c0_i32, %c0_i32_0 : i32, i32
  }
  func.func @transform_5(%arg0: i32) -> (i32, i32) {
    %c0_i32 = arith.constant 0 : i32
    %c0_i32_0 = arith.constant 0 : i32
    return %arg0, %c0_i32 : i32, i32
  }
  func.func @transform_6(%arg0: i32) -> (i32, i32) {
    %c0_i32 = arith.constant 0 : i32
    %c0_i32_0 = arith.constant 0 : i32
    return %arg0, %c0_i32 : i32, i32
  }
}

</mosaic_0001>

<bundles_post_ra>
// kernel: tpu_custom_call.1
= control target key start
LH: loop header
LB: loop body
LE: loop exit
PB: predicated region body
PF: predicated region fallthrough
CT: control target
= control target key end

     0   :  { %12 = vsyncpa [#allocation3], 0  ;;  %vm35_vm0 = vcmask 130048   ;;  %s14713_s0 = inlined_call_operand.vmem [shape: f32[16,16], index: 0, kind: input, shape index: {}]   ;;  %s14714_s1 = inlined_call_operand.vmem [shape: f32[128,512], index: 1, kind: input, shape index: {}]   ;;  %s14715_s2 = inlined_call_operand.vmem [shape: f32[336,32], index: 2, kind: input, shape index: {}]   ;;  %s14716_s3 = inlined_call_operand.vmem [shape: f32[1024,32], index: 3, kind: input, shape index: {}]   ;;  %s14717_s4 = inlined_call_operand.vmem [shape: f32[104,128], index: 4, kind: input, shape index: {}]   ;;  %s14718_s5 = inlined_call_operand.hbm [shape: f32[16,16], index: 5, kind: output, shape index: {0}]   ;;  %s14719_s6 = inlined_call_operand.hbm [shape: f32[16,128], index: 6, kind: output, shape index: {1}]  }
   0x1   :  { %v28_v0 = vld [vmem:[%s14715_s2] sm:$0xff]  ;;  %v29_v1 = vld [vmem:[%s14715_s2 + $0x8] sm:$0xff] }
   0x2   :  { %v26_v2 = vld [vmem:[%s14713_s0] sm:$0xff]  ;;  %v11609_v3 = vpack.c.bf16 %v29_v1, %v28_v0 }
   0x3   :  { %10731 = vmatprep.mubr.msk.f32.mxu0 %vm35_vm0, %v26_v2 }
   0x4   :  { %13 = vsyncpa [#allocation5], 0  ;;  %11610 = vmatprep.subr.bf16.mxu0 %v11609_v3  ;;  %v27_v4 = vld [vmem:[%s14713_s0 + $0x8] sm:$0xff]  ;;  %v10039_v5 = vld [vmem:[%s14717_s4] ss:$0 sm:$0xff]  ;;  %vm119_vm1 = vcmask 261120  }
   0x5   :  { %11612 = vmatpush3.bf16.msra.mxu0 %v11609_v3  ;;  %v159_v22 = vld [vmem:[%s14714_s1] sm:$0xff]  ;;  %v10042_v35 = vld [vmem:[%s14717_s4 + $0x8] ss:$0 sm:$0xff]  ;;  %v10043_v37 = vld [vmem:[%s14717_s4 + $0xe] ss:$0 sm:$0xff]  ;;  %vm12474_vm2 = vmmov 0  }
   0x6   :  { %v160_v23 = vld [vmem:[%s14714_s1 + $0x20] sm:$0xff]  ;;  %v264_v45 = vld [vmem:[%s14716_s3 + $0x8] sm:$0xff]  ;;  %v265_v47 = vld [vmem:[%s14716_s3 + $0x10] sm:$0xff]  ;;  %s12475_s18 = smov 96   ;;  %s12476_s19 = smov 88   ;;  %vm496_vm3 = vcmask 64512  }
   0x7   :  { %v161_v24 = vld [vmem:[%s14714_s1 + $0x40] sm:$0xff]  ;;  %v11613_v25 = vpack.c.bf16 %v160_v23, %v159_v22  ;;  %v266_v48 = vld [vmem:[%s14716_s3 + $0x18] sm:$0xff]  ;;  %v268_v51 = vld [vmem:[%s14716_s3 + $0x28] sm:$0xff]  ;;  %s12477_s20 = smov 120   ;;  %s12478_s21 = smov 112   ;;  %vm1530_vm4 = vcmask 195584  }
   0x8   :  { %10732 = vmatmul.mubr.msk.f32.vlgmr.msra.gmra.mrb[0].mxu0 %vm35_vm0, %v27_v4  ;;  %v162_v26 = vld [vmem:[%s14714_s1 + $0x60] sm:$0xff]  ;;  %v11625_v49 = vpack.c.bf16 %v266_v48, %v265_v47  ;;  %v269_v53 = vld [vmem:[%s14716_s3 + $0x30] sm:$0xff]  ;;  %v270_v54 = vld [vmem:[%s14716_s3 + $0x38] sm:$0xff]  ;;  %s12479_s22 = smov 80   ;;  %s12480_s23 = smov 104   ;;  %vm9907_vm11 = vcmask 523264  }
   0x9   :  { %v11617_v27 = vpack.c.bf16 %v162_v26, %v161_v24  ;;  %11614 = vmatprep.subr.bf16.mxu0 %v11613_v25  ;;  %v263_v44 = vld [vmem:[%s14716_s3] sm:$0xff]  ;;  %v11633_v55 = vpack.c.bf16 %v270_v54, %v269_v53  ;;  %v272_v57 = vld [vmem:[%s14716_s3 + $0x48] sm:$0xff]  ;;  %v273_v59 = vld [vmem:[%s14716_s3 + $0x50] sm:$0xff]  ;;  %s12481_s24 = smov 72   ;;  %s12482_s25 = smov 56   ;;  %vm9910_vm12 = vcmask 785408  }
   0xa   :  { %11616 = vmatpush3.bf16.msra.mxu0 %v11613_v25  ;;  %v11621_v46 = vpack.c.bf16 %v264_v45, %v263_v44  ;;  %v267_v50 = vld [vmem:[%s14716_s3 + $0x20] sm:$0xff]  ;;  %v274_v60 = vld [vmem:[%s14716_s3 + $0x58] sm:$0xff]  ;;  %v276_v63 = vld [vmem:[%s14716_s3 + $0x68] sm:$0xff]  ;;  %s12483_s26 = smov 48   ;;  %s12484_s27 = smov 64  }
   0xb   :  { %11618 = vmatprep.subr.bf16.mxu0 %v11617_v27  ;;  %v11629_v52 = vpack.c.bf16 %v268_v51, %v267_v50  ;;  %v271_v56 = vld [vmem:[%s14716_s3 + $0x40] sm:$0xff]  ;;  %v11641_v61 = vpack.c.bf16 %v274_v60, %v273_v59  ;;  %v277_v1 = vld [vmem:[%s14716_s3 + $0x70] sm:$0xff]  ;;  %v278_v2 = vld [vmem:[%s14716_s3 + $0x78] sm:$0xff]  ;;  %s12485_s28 = smov 40   ;;  %s12486_s29 = smov 16  }
   0xc   :  { %v11637_v58 = vpack.c.bf16 %v272_v57, %v271_v56  ;;  %v275_v62 = vld [vmem:[%s14716_s3 + $0x60] sm:$0xff]  ;;  %v11649_v3 = vpack.c.bf16 %v278_v2, %v277_v1  ;;  %v10044_v4 = vld [vmem:[%s14717_s4 + $0x14] ss:$0 sm:$0xff]  ;;  %v10051_v59 = vld [vmem:[%s14717_s4 + $0xf] ss:$0 sm:$0xff]  ;;  %s12487_s13 = smov 8  }
   0xd   :  { %v11645_v0 = vpack.c.bf16 %v276_v63, %v275_v62  ;;  %v405_v44 = vld [vmem:[%s14714_s1 + $0x50] sm:$0xff]  ;;  %s12488_s14 = smov 24  }
   0xe   :  { %11620 = vmatpush3.bf16.msra.mxu0 %v11617_v27  ;;  %v10052_v1 = vld [vmem:[%s14717_s4 + $0x16] ss:$0 sm:$0xff] }
   0xf   :  { %11622 = vmatprep.subr.bf16.mxu0 %v11621_v46 }
  0xdb   :  { %v10733_v6 = vpop.f32.mrb[0].mxu0 }
  0xdc   :  { %v108_v7 = vpop.f32.mrb[1].mxu0  ;;  %v12547_v9 = vadd.f32 %v10733_v6, %v10039_v5 }
  0xdd   :  { %v12545_v8 = vadd.f32 %v10039_v5, %v108_v7 }
  0xde   :  { %v123_v11 = vsel %vm119_vm1, %v12547_v9, 0.0 }
  0xdf   :  { %v120_v10 = vsel %vm119_vm1, %v12545_v8, 0.0 }
  0xe0   :  { %121 = vadd.xlane.f32.xlu0 %v120_v10 }
  0xe4   :  { %124 = vadd.xlane.f32.xlu0 %v123_v11 }
 0x16d   :  { %v122_v12 = vpop.xlane.xlu0 %121 }
 0x16e   :  { %v127_v13 = vmul.f32 0.03125, %v122_v12 }
 0x170   :  { %v129_v14 = vsub.f32 %v12545_v8, %v127_v13 }
 0x171   :  { %v125_v15 = vpop.xlane.xlu0 %124 }
 0x172   :  { %v128_v16 = vmul.f32 0.03125, %v125_v15  ;;  %v131_v17 = vmul.f32 %v129_v14, %v129_v14 }
 0x174   :  { %v130_v18 = vsub.f32 %v12547_v9, %v128_v16  ;;  %v133_v19 = vsel %vm119_vm1, %v131_v17, 0.0 }
 0x175   :  { %134 = vadd.xlane.f32.xlu1 %v133_v19 }
 0x176   :  { %v132_v20 = vmul.f32 %v130_v18, %v130_v18 }
 0x178   :  { %v136_v21 = vsel %vm119_vm1, %v132_v20, 0.0 }
 0x179   :  { %137 = vadd.xlane.f32.xlu1 %v136_v21  ;;  %v10049_v21 = vld [vmem:[%s14717_s4 + $0x18] ss:$0 sm:$0xff] }
 0x202   :  { %v135_v28 = vpop.xlane.xlu1 %134 }
 0x203   :  { %v139_v29 = vmul.f32 0.03125, %v135_v28 }
 0x205   :  { %v141_v30 = vadd.f32 1e-05, %v139_v29 }
 0x206   :  { %v138_v31 = vpop.xlane.xlu1 %137 }
 0x207   :  { %12089 = vrsqrt.f32 %v141_v30  ;;  %v140_v32 = vmul.f32 0.03125, %v138_v31 }
 0x209   :  { %v142_v33 = vadd.f32 1e-05, %v140_v32 }
 0x20b   :  { %12091 = vrsqrt.f32 %v142_v33 }
 0x211   :  { %v12090_v34 = vpop.eup %12089 }
 0x212   :  { %v145_v36 = vmul.f32 %v12090_v34, %v129_v14 }
 0x214   :  { %v151_v38 = vmul.f32 %v10042_v35, %v145_v36 }
 0x215   :  { %v12092_v39 = vpop.eup %12091 }
 0x216   :  { %v146_v40 = vmul.f32 %v12092_v39, %v130_v18  ;;  %v157_v41 = vadd.f32 %v10043_v37, %v151_v38 }
 0x218   :  { %v152_v42 = vmul.f32 %v10042_v35, %v146_v40  ;;  %10742 = vmatprep.mubr.msk.f32.mxu0 %vm119_vm1, %v157_v41 }
 0x21a   :  { %v158_v43 = vadd.f32 %v10043_v37, %v152_v42  ;;  %v403_v42 = vld [vmem:[%s14714_s1 + $0x10] sm:$0xff] }
 0x21c   :  { %10743 = vmatmul.mubr.msk.f32.vlgmr.msra.gmra.mrb[2].mxu0 %vm119_vm1, %v158_v43  ;;  %v404_v43 = vld [vmem:[%s14714_s1 + $0x30] sm:$0xff] }
 0x21d   :  { %11624 = vmatpush3.bf16.msra.mxu0 %v11621_v46  ;;  %v11653_v45 = vpack.c.bf16 %v404_v43, %v403_v42  ;;  %v406_v46 = vld [vmem:[%s14714_s1 + $0x70] sm:$0xff] }
 0x21e   :  { %11626 = vmatprep.subr.bf16.mxu0 %v11625_v49  ;;  %v11657_v47 = vpack.c.bf16 %v406_v46, %v405_v44 }
 0x21f   :  { %11654 = vmatprep.subr.bf16.mxu1 %v11653_v45 }
 0x220   :  { %11656 = vmatpush3.bf16.msra.mxu1 %v11653_v45 }
 0x221   :  { %11628 = vmatpush3.bf16.msra.mxu0 %v11625_v49  ;;  %11658 = vmatprep.subr.bf16.mxu1 %v11657_v47 }
 0x222   :  { %11630 = vmatprep.subr.bf16.mxu0 %v11629_v52 }
 0x224   :  { %11660 = vmatpush3.bf16.msra.mxu1 %v11657_v47 }
 0x225   :  { %11632 = vmatpush3.bf16.msra.mxu0 %v11629_v52 }
 0x226   :  { %11634 = vmatprep.subr.bf16.mxu0 %v11633_v55 }
 0x229   :  { %11636 = vmatpush3.bf16.msra.mxu0 %v11633_v55  ;;  %v10050_v55 = vld [vmem:[%s14717_s4 + $0x9] ss:$0 sm:$0xff] }
 0x22a   :  { %11638 = vmatprep.subr.bf16.mxu0 %v11637_v58 }
 0x22d   :  { %11640 = vmatpush3.bf16.msra.mxu0 %v11637_v58 }
 0x22e   :  { %11642 = vmatprep.subr.bf16.mxu0 %v11641_v61 }
 0x231   :  { %11644 = vmatpush3.bf16.msra.mxu0 %v11641_v61 }
 0x232   :  { %11646 = vmatprep.subr.bf16.mxu0 %v11645_v0 }
 0x235   :  { %11648 = vmatpush3.bf16.msra.mxu0 %v11645_v0  ;;  %v12473_v0 = vmov 0.0  }
 0x236   :  { %11650 = vmatprep.subr.bf16.mxu0 %v11649_v3  ;;  %10791 = vmatprep.subr.mxu1 %v12473_v0 }
 0x239   :  { %11652 = vmatpush3.bf16.msra.mxu0 %v11649_v3 }
 0x23a   :  { %10816 = vmatprep.subr.mxu0 %v12473_v0 }
 0x2ef   :  { %v10744_v5 = vpop.f32.mrb[2].mxu0 }
 0x2f0   :  { %v246_v6 = vadd.f32 %v10744_v5, %v10044_v4  ;;  %v240_v7 = vpop.f32.mrb[3].mxu0 }
 0x2f1   :  { %v241_v10 = vadd.f32 %v10044_v4, %v240_v7 }
 0x2f2   :  { %v10048_v11 = vmul.f32 -1.442695, %v246_v6 }
 0x2f3   :  { %v10047_v12 = vmul.f32 -1.442695, %v241_v10 }
 0x2f4   :  { %12093 = vpow2.f32 %v10048_v11 }
 0x2f5   :  { %12095 = vpow2.f32 %v10047_v12 }
 0x2fe   :  { %v12094_v13 = vpop.eup %12093 }
 0x2ff   :  { %v12096_v14 = vpop.eup %12095  ;;  %v256_v15 = vadd.f32 1.0, %v12094_v13 }
 0x300   :  { %v255_v16 = vadd.f32 1.0, %v12096_v14 }
 0x301   :  { %12097 = vrcp.f32 %v256_v15 }
 0x302   :  { %12099 = vrcp.f32 %v255_v16 }
 0x30b   :  { %v12098_v17 = vpop.eup %12097 }
 0x30c   :  { %v12100_v18 = vpop.eup %12099  ;;  %v262_v20 = vmul.f32 %v12098_v17, %v246_v6 }
 0x30d   :  { %v261_v19 = vmul.f32 %v12100_v18, %v241_v10 }
 0x30f   :  { %10777 = vmatprep.mubr.f32.mxu0 %v261_v19 }
 0x310   :  { %10778 = vmatmul.mubr.f32.vlgmr.msra.gmra.mrb[4].mxu0 %v262_v20 }
 0x311   :  { %10818 = vmatprep.mubr.msk.f32.mxu0 %vm12474_vm2, %v12473_v0 }
 0x3e3   :  { %v10779_v22 = vpop.f32.mrb[4].mxu0 }
 0x3e4   :  { %v356_v23 = vadd.f32 %v10779_v22, %v10049_v21  ;;  %v350_v24 = vpop.f32.mrb[5].mxu0 }
 0x3e5   :  { %v351_v25 = vadd.f32 %v10049_v21, %v350_v24 }
 0x3e6   :  { %v360_v26 = vmul.f32 0.5, %v356_v23 }
 0x3e7   :  { %v359_v27 = vmul.f32 0.5, %v351_v25 }
 0x3e8   :  { %v12632_v28 = vadd.f32 %v360_v26, %v12547_v9 }
 0x3e9   :  { %v12635_v29 = vadd.f32 %v359_v27, %v12545_v8 }
 0x3ea   :  { %v368_v30 = vsel %vm119_vm1, %v12632_v28, 0.0 }
 0x3eb   :  { %369 = vadd.xlane.f32.xlu1 %v368_v30  ;;  %v365_v31 = vsel %vm119_vm1, %v12635_v29, 0.0 }
 0x3ec   :  { %366 = vadd.xlane.f32.xlu0 %v365_v31 }
 0x478   :  { %v370_v32 = vpop.xlane.xlu1 %369 }
 0x479   :  { %v372_v33 = vmul.f32 0.03125, %v370_v32  ;;  %v367_v34 = vpop.xlane.xlu0 %366 }
 0x47a   :  { %v371_v35 = vmul.f32 0.03125, %v367_v34 }
 0x47b   :  { %v374_v36 = vsub.f32 %v12632_v28, %v372_v33 }
 0x47c   :  { %v373_v37 = vsub.f32 %v12635_v29, %v371_v35 }
 0x47d   :  { %v376_v38 = vmul.f32 %v374_v36, %v374_v36 }
 0x47e   :  { %v375_v39 = vmul.f32 %v373_v37, %v373_v37 }
 0x47f   :  { %v380_v40 = vsel %vm119_vm1, %v376_v38, 0.0 }
 0x480   :  { %381 = vadd.xlane.f32.xlu1 %v380_v40  ;;  %v377_v41 = vsel %vm119_vm1, %v375_v39, 0.0 }
 0x481   :  { %378 = vadd.xlane.f32.xlu0 %v377_v41 }
 0x50d   :  { %v382_v48 = vpop.xlane.xlu1 %381 }
 0x50e   :  { %v384_v49 = vmul.f32 0.03125, %v382_v48  ;;  %v379_v50 = vpop.xlane.xlu0 %378 }
 0x50f   :  { %v383_v51 = vmul.f32 0.03125, %v379_v50 }
 0x510   :  { %v386_v52 = vadd.f32 1e-05, %v384_v49 }
 0x511   :  { %v385_v53 = vadd.f32 1e-05, %v383_v51 }
 0x512   :  { %12101 = vrsqrt.f32 %v386_v52 }
 0x513   :  { %12103 = vrsqrt.f32 %v385_v53 }
 0x51c   :  { %v12102_v54 = vpop.eup %12101 }
 0x51d   :  { %v12104_v56 = vpop.eup %12103  ;;  %v390_v57 = vmul.f32 %v12102_v54, %v374_v36 }
 0x51e   :  { %v389_v58 = vmul.f32 %v12104_v56, %v373_v37 }
 0x51f   :  { %v396_v60 = vmul.f32 %v10050_v55, %v390_v57 }
 0x520   :  { %v395_v61 = vmul.f32 %v10050_v55, %v389_v58 }
 0x521   :  { %v402_v63 = vadd.f32 %v10051_v59, %v396_v60 }
 0x522   :  { %v401_v62 = vadd.f32 %v10051_v59, %v395_v61 }
 0x524   :  { %10788 = vmatprep.mubr.msk.f32.mxu1 %vm119_vm1, %v401_v62 }
 0x525   :  { %10789 = vmatmul.mubr.msk.f32.vlgmr.msra.gmra.mrb[0].mxu1 %vm119_vm1, %v402_v63 }
 0x526   :  { %10793 = vmatprep.mubr.msk.f32.mxu1 %vm12474_vm2, %v12473_v0 }
 0x5f8   :  { %v10790_v2 = vpop.f32.mrb[0].mxu1 }
 0x5f9   :  { %v12674_v3 = vadd.f32 %v10790_v2, %v10052_v1  ;;  %v484_v4 = vpop.f32.mrb[1].mxu1 }
 0x5fa   :  { %v12676_v5 = vadd.f32 %v10052_v1, %v484_v4 }
 0x5fb   :  { %806 = vrot.lane.b32.xlu1 %v12674_v3, %s12475_s18 }
 0x5fc   :  { %494 = vrot.lane.b32.xlu0 %v12676_v5, %s12475_s18 }
 0x5ff   :  { %573 = vrot.lane.b32.xlu1 %v12676_v5, %s12476_s19 }
 0x600   :  { %884 = vrot.lane.b32.xlu0 %v12674_v3, %s12476_s19 }
 0x603   :  { %571 = vrot.lane.b32.xlu1 %v12676_v5, %s12477_s20 }
 0x604   :  { %649 = vrot.lane.b32.xlu0 %v12676_v5, %s12478_s21 }
 0x607   :  { %651 = vrot.lane.b32.xlu1 %v12676_v5, %s12479_s22 }
 0x608   :  { %727 = vrot.lane.b32.xlu0 %v12676_v5, %s12480_s23 }
 0x60b   :  { %729 = vrot.lane.b32.xlu1 %v12676_v5, %s12481_s24 }
 0x60c   :  { %962 = vrot.lane.b32.xlu0 %v12674_v3, %s12479_s22 }
 0x60f   :  { %882 = vrot.lane.b32.xlu1 %v12674_v3, %s12477_s20 }
 0x610   :  { %960 = vrot.lane.b32.xlu0 %v12674_v3, %s12478_s21 }
 0x613   :  { %1040 = vrot.lane.b32.xlu1 %v12674_v3, %s12481_s24 }
 0x617   :  { %1038 = vrot.lane.b32.xlu1 %v12674_v3, %s12480_s23 }
 0x66d   :  { %v807_v6 = vpop.permute.xlu1 %806 }
 0x66e   :  { %v495_v7 = vpop.permute.xlu0 %494 }
 0x66f   :  { %10792 = vmatpush3.xpose.msk.msra.mxu1 %vm496_vm3, %v495_v7 }
 0x670   :  { %10796 = vmatprep.subr.mxu1 %v12473_v0 }
 0x671   :  { %v574_v10 = vpop.permute.xlu1 %573 }
 0x672   :  { %10794 = vmatmul.mubr.msk.f32.vlgmr.msra.gmra.mrb[2].mxu1 %vm496_vm3, %v12676_v5  ;;  %v885_v11 = vpop.permute.xlu0 %884 }
 0x673   :  { %10797 = vmatpush3.xpose.msk.msra.mxu1 %vm496_vm3, %v574_v10  ;;  %10817 = vmatpush3.xpose.msk.msra.mxu0 %vm496_vm3, %v885_v11 }
 0x674   :  { %10798 = vmatprep.mubr.msk.f32.mxu1 %vm12474_vm2, %v12473_v0  ;;  %10801 = vmatprep.subr.mxu1 %v12473_v0 }
 0x675   :  { %v572_v12 = vpop.permute.xlu1 %571  ;;  %10826 = vmatprep.subr.mxu0 %v12473_v0 }
 0x676   :  { %10799 = vmatmul.mubr.msk.f32.vlgmr.msra.gmra.mrb[4].mxu1 %vm496_vm3, %v572_v12  ;;  %v650_v13 = vpop.permute.xlu0 %649 }
 0x677   :  { %10803 = vmatprep.mubr.msk.f32.mxu1 %vm12474_vm2, %v12473_v0 }
 0x679   :  { %v652_v14 = vpop.permute.xlu1 %651 }
 0x67a   :  { %10802 = vmatpush3.xpose.msk.msra.mxu1 %vm496_vm3, %v652_v14  ;;  %v728_v15 = vpop.permute.xlu0 %727 }
 0x67b   :  { %10806 = vmatprep.subr.mxu1 %v12473_v0 }
 0x67d   :  { %v730_v16 = vpop.permute.xlu1 %729  ;;  %10804 = vmatmul.mubr.msk.f32.vlgmr.msra.gmra.mrb[6].mxu1 %vm496_vm3, %v650_v13 }
 0x67e   :  { %10807 = vmatpush3.xpose.msk.msra.mxu1 %vm496_vm3, %v730_v16  ;;  %10808 = vmatprep.mubr.msk.f32.mxu1 %vm12474_vm2, %v12473_v0  ;;  %v963_v18 = vpop.permute.xlu0 %962 }
 0x67f   :  { %10811 = vmatprep.subr.mxu1 %v12473_v0 }
 0x681   :  { %v883_v17 = vpop.permute.xlu1 %882  ;;  %10809 = vmatmul.mubr.msk.f32.vlgmr.msra.gmra.mrb[8].mxu1 %vm496_vm3, %v728_v15 }
 0x682   :  { %10812 = vmatpush3.xpose.msk.msra.mxu1 %vm496_vm3, %v807_v6  ;;  %10819 = vmatmul.mubr.msk.f32.vlgmr.msra.gmra.mrb[6].mxu0 %vm496_vm3, %v883_v17  ;;  %v961_v20 = vpop.permute.xlu0 %960 }
 0x683   :  { %10813 = vmatprep.mubr.msk.f32.mxu1 %vm12474_vm2, %v12473_v0  ;;  %10821 = vmatprep.subr.mxu1 %v12473_v0 }
 0x684   :  { %10828 = vmatprep.mubr.msk.f32.mxu0 %vm12474_vm2, %v12473_v0 }
 0x685   :  { %v1041_v19 = vpop.permute.xlu1 %1040  ;;  %10814 = vmatmul.mubr.msk.f32.vlgmr.msra.gmra.mrb[10].mxu1 %vm496_vm3, %v12674_v3 }
 0x686   :  { %10822 = vmatpush3.xpose.msk.msra.mxu1 %vm496_vm3, %v963_v18  ;;  %10827 = vmatpush3.xpose.msk.msra.mxu0 %vm496_vm3, %v1041_v19 }
 0x687   :  { %10823 = vmatprep.mubr.msk.f32.mxu1 %vm12474_vm2, %v12473_v0  ;;  %10831 = vmatprep.subr.mxu1 %v12473_v0 }
 0x688   :  { %10836 = vmatprep.subr.mxu0 %v12473_v0 }
 0x689   :  { %v1039_v21 = vpop.permute.xlu1 %1038  ;;  %10824 = vmatmul.mubr.msk.f32.vlgmr.msra.gmra.mrb[12].mxu1 %vm496_vm3, %v961_v20 }
 0x68a   :  { %10829 = vmatmul.mubr.msk.f32.vlgmr.msra.gmra.mrb[8].mxu0 %vm496_vm3, %v1039_v21  ;;  %10833 = vmatprep.mubr.msk.f32.mxu1 %vm12474_vm2, %v12473_v0 }
 0x68b   :  { %10838 = vmatprep.mubr.msk.f32.mxu0 %vm12474_vm2, %v12473_v0 }
 0x745   :  { %v567_v22 = vpop.f32.mrb[2].mxu1 }
 0x746   :  { %v1116_v23 = vmul.f32 0.35355338, %v567_v22  ;;  %v10795_v24 = vpop.f32.mrb[3].mxu1 }
 0x748   :  { %v1124_v25 = vsel %vm496_vm3, %v1116_v23, -inf }
 0x749   :  { %1125 = vmax.xlane.f32.xlu0 %v1124_v25  ;;  %v645_v26 = vpop.f32.mrb[4].mxu1 }
 0x74a   :  { %v12749_v27 = vmul.f32 0.35355338, %v645_v26  ;;  %v10800_v30 = vpop.f32.mrb[5].mxu1 }
 0x74c   :  { %v1127_v31 = vsel %vm496_vm3, %v12749_v27, -inf }
 0x74d   :  { %1128 = vmax.xlane.f32.xlu1 %v1127_v31 }
 0x750   :  { %v723_v32 = vpop.f32.mrb[6].mxu1 }
 0x751   :  { %v1118_v33 = vmul.f32 0.35355338, %v723_v32  ;;  %v10805_v34 = vpop.f32.mrb[7].mxu1 }
 0x753   :  { %v1130_v35 = vsel %vm496_vm3, %v1118_v33, -inf }
 0x754   :  { %1131 = vmax.xlane.f32.xlu0 %v1130_v35  ;;  %v801_v36 = vpop.f32.mrb[8].mxu1 }
 0x755   :  { %v12754_v37 = vmul.f32 0.35355338, %v801_v36  ;;  %v10810_v38 = vpop.f32.mrb[9].mxu1  ;;  %v956_v39 = vpop.f32.mrb[6].mxu0 }
 0x756   :  { %v1121_v40 = vmul.f32 0.35355338, %v956_v39  ;;  %v10820_v41 = vpop.f32.mrb[7].mxu0 }
 0x757   :  { %v1133_v42 = vsel %vm496_vm3, %v12754_v37, -inf }
 0x758   :  { %1134 = vmax.xlane.f32.xlu0 %v1133_v42  ;;  %v878_v43 = vpop.f32.mrb[10].mxu1  ;;  %v1139_v44 = vsel %vm496_vm3, %v1121_v40, -inf }
 0x759   :  { %v1120_v45 = vmul.f32 0.35355338, %v878_v43  ;;  %1140 = vmax.xlane.f32.xlu1 %v1139_v44  ;;  %v10815_v46 = vpop.f32.mrb[11].mxu1 }
 0x75b   :  { %v1136_v47 = vsel %vm496_vm3, %v1120_v45, -inf }
 0x75c   :  { %1137 = vmax.xlane.f32.xlu0 %v1136_v47  ;;  %v1034_v48 = vpop.f32.mrb[12].mxu1 }
 0x75d   :  { %v1122_v49 = vmul.f32 0.35355338, %v1034_v48  ;;  %v10825_v50 = vpop.f32.mrb[13].mxu1  ;;  %v1112_v51 = vpop.f32.mrb[8].mxu0 }
 0x75e   :  { %v1123_v52 = vmul.f32 0.35355338, %v1112_v51  ;;  %v10830_v53 = vpop.f32.mrb[9].mxu0 }
 0x75f   :  { %v1142_v54 = vsel %vm496_vm3, %v1122_v49, -inf }
 0x760   :  { %1143 = vmax.xlane.f32.xlu0 %v1142_v54  ;;  %v1145_v55 = vsel %vm496_vm3, %v1123_v52, -inf }
 0x761   :  { %1146 = vmax.xlane.f32.xlu1 %v1145_v55 }
 0x772   :  { %1288 = vrot.lane.b32.xlu1 %v12676_v5, %s12482_s25 }
 0x776   :  { %1364 = vrot.lane.b32.xlu1 %v12676_v5, %s12483_s26  ;;  %1212 = vrot.lane.b32.xlu0 %v12676_v5, %s12484_s27 }
 0x77a   :  { %1440 = vrot.lane.b32.xlu1 %v12676_v5, %s12485_s28  ;;  %1544 = vrot.lane.b32.xlu0 %v12674_v3, %s12484_s27 }
 0x77e   :  { %1620 = vrot.lane.b32.xlu1 %v12674_v3, %s12482_s25 }
 0x7d6   :  { %v1126_v56 = vpop.xlane.xlu0 %1125 }
 0x7d7   :  { %v1148_v57 = vsub.f32 %v1116_v23, %v1126_v56 }
 0x7d9   :  { %v1156_v58 = vmul.f32 1.442695, %v1148_v57 }
 0x7da   :  { %v1129_v60 = vpop.xlane.xlu1 %1128 }
 0x7db   :  { %12105 = vpow2.f32 %v1156_v58  ;;  %v1149_v12 = vsub.f32 %v12749_v27, %v1129_v60 }
 0x7dd   :  { %v1158_v19 = vmul.f32 1.442695, %v1149_v12 }
 0x7e1   :  { %v1132_v59 = vpop.xlane.xlu0 %1131 }
 0x7e2   :  { %v1150_v61 = vsub.f32 %v1118_v33, %v1132_v59 }
 0x7e4   :  { %v1160_v62 = vmul.f32 1.442695, %v1150_v61 }
 0x7e5   :  { %v12774_v63 = vpop.eup %12105  ;;  %v1135_v1 = vpop.xlane.xlu0 %1134 }
 0x7e6   :  { %12107 = vpow2.f32 %v1160_v62  ;;  %v1141_v2 = vpop.xlane.xlu1 %1140  ;;  %v1172_v4 = vsel %vm496_vm3, %v12774_v63, 0.0  ;;  %v1151_v20 = vsub.f32 %v12754_v37, %v1135_v1 }
 0x7e7   :  { %v1153_v5 = vsub.f32 %v1121_v40, %v1141_v2  ;;  %1173 = vadd.xlane.f32.xlu0 %v1172_v4 }
 0x7e8   :  { %v1162_v26 = vmul.f32 1.442695, %v1151_v20  ;;  %v1877_v20 = vld [vmem:[%s14715_s2 + $0x40] sm:$0xff] }
 0x7e9   :  { %v1166_v6 = vmul.f32 1.442695, %v1153_v5  ;;  %v1138_v7 = vpop.xlane.xlu0 %1137 }
 0x7ea   :  { %v1152_v10 = vsub.f32 %v1120_v45, %v1138_v7 }
 0x7eb   :  { %12109 = vpow2.f32 %v1166_v6 }
 0x7ec   :  { %v1164_v11 = vmul.f32 1.442695, %v1152_v10 }
 0x7ed   :  { %v1144_v13 = vpop.xlane.xlu0 %1143 }
 0x7ee   :  { %12111 = vpow2.f32 %v1164_v11  ;;  %v1154_v14 = vsub.f32 %v1122_v49, %v1144_v13  ;;  %v1147_v15 = vpop.xlane.xlu1 %1146 }
 0x7ef   :  { %v1155_v16 = vsub.f32 %v1123_v52, %v1147_v15  ;;  %v1875_v15 = vld [vmem:[%s14715_s2 + $0x30] sm:$0xff] }
 0x7f0   :  { %v12108_v17 = vpop.eup %12107  ;;  %v1168_v18 = vmul.f32 1.442695, %v1154_v14 }
 0x7f1   :  { %v1170_v21 = vmul.f32 1.442695, %v1155_v16  ;;  %v1213_v22 = vpop.permute.xlu0 %1212  ;;  %v1178_v23 = vsel %vm496_vm3, %v12108_v17, 0.0  ;;  %v1876_v16 = vld [vmem:[%s14715_s2 + $0x38] sm:$0xff] }
 0x7f2   :  { %12113 = vpow2.f32 %v1168_v18  ;;  %v1289_v24 = vpop.permute.xlu1 %1288  ;;  %1179 = vadd.xlane.f32.xlu0 %v1178_v23  ;;  %10832 = vmatpush3.msra.mxu1 %v1213_v22 }
 0x7f3   :  { %12115 = vpow2.f32 %v1170_v21  ;;  %10837 = vmatpush3.msra.mxu0 %v1289_v24  ;;  %10841 = vmatprep.subr.mxu1 %v12473_v0  ;;  %v1878_v21 = vld [vmem:[%s14715_s2 + $0x48] sm:$0xff] }
 0x7f4   :  { %10846 = vmatprep.subr.mxu0 %v12473_v0  ;;  %12117 = vpow2.f32 %v1158_v19  ;;  %v11665_v22 = vpack.c.bf16 %v1878_v21, %v1877_v20 }
 0x7f5   :  { %v12783_v25 = vpop.eup %12109  ;;  %12119 = vpow2.f32 %v1162_v26  ;;  %v1545_v40 = vpop.permute.xlu0 %1544 }
 0x7f6   :  { %v1187_v27 = vsel %vm496_vm3, %v12783_v25, 0.0  ;;  %v1365_v42 = vpop.permute.xlu1 %1364 }
 0x7f7   :  { %1188 = vadd.xlane.f32.xlu1 %v1187_v27 }
 0x7f8   :  { %v12112_v30 = vpop.eup %12111 }
 0x7f9   :  { %v1184_v31 = vsel %vm496_vm3, %v12112_v30, 0.0 }
 0x7fa   :  { %1185 = vadd.xlane.f32.xlu0 %v1184_v31  ;;  %v1441_v43 = vpop.permute.xlu1 %1440 }
 0x7fc   :  { %v12114_v32 = vpop.eup %12113 }
 0x7fd   :  { %v12788_v33 = vpop.eup %12115  ;;  %v1190_v34 = vsel %vm496_vm3, %v12114_v32, 0.0 }
 0x7fe   :  { %1191 = vadd.xlane.f32.xlu0 %v1190_v34  ;;  %v1193_v35 = vsel %vm496_vm3, %v12788_v33, 0.0  ;;  %v12118_v36 = vpop.eup %12117  ;;  %v1621_v47 = vpop.permute.xlu1 %1620 }
 0x7ff   :  { %1194 = vadd.xlane.f32.xlu1 %v1193_v35  ;;  %v1175_v37 = vsel %vm496_vm3, %v12118_v36, 0.0  ;;  %v12120_v38 = vpop.eup %12119 }
 0x800   :  { %v1181_v39 = vsel %vm496_vm3, %v12120_v38, 0.0 }
 0x803   :  { %1176 = vadd.xlane.f32.xlu1 %v1175_v37 }
 0x807   :  { %1182 = vadd.xlane.f32.xlu1 %v1181_v39 }
 0x814   :  { %1696 = vrot.lane.b32.xlu0 %v12674_v3, %s12483_s26 }
 0x818   :  { %1772 = vrot.lane.b32.xlu1 %v12674_v3, %s12485_s28 }
 0x874   :  { %v1174_v41 = vpop.xlane.xlu0 %1173 }
 0x875   :  { %12121 = vrcp.f32 %v1174_v41 }
 0x87f   :  { %v12122_v44 = vpop.eup %12121  ;;  %v1180_v45 = vpop.xlane.xlu0 %1179 }
 0x880   :  { %12123 = vrcp.f32 %v1180_v45  ;;  %v12800_v46 = vmul.f32 %v12122_v44, %v12774_v63  ;;  %v10079_v45 = vld [vmem:[%s14717_s4 + $0x1a] ss:$0 sm:$0xff] }
 0x882   :  { %10834 = vmatmul.mubr.msk.f32.vlgmr.msra.gmra.mrb[14].mxu1 %vm496_vm3, %v12800_v46 }
 0x883   :  { %10842 = vmatpush3.msra.mxu1 %v1365_v42  ;;  %10843 = vmatprep.mubr.msk.f32.mxu1 %vm12474_vm2, %v12473_v0 }
 0x884   :  { %10851 = vmatprep.subr.mxu1 %v12473_v0  ;;  %v1189_v48 = vpop.xlane.xlu1 %1188 }
 0x887   :  { %v1186_v3 = vpop.xlane.xlu0 %1185 }
 0x888   :  { %12125 = vrcp.f32 %v1186_v3 }
 0x88a   :  { %v12124_v49 = vpop.eup %12123 }
 0x88b   :  { %v1192_v50 = vpop.xlane.xlu0 %1191  ;;  %v12807_v51 = vmul.f32 %v12124_v49, %v12108_v17  ;;  %v11661_v17 = vpack.c.bf16 %v1876_v16, %v1875_v15 }
 0x88c   :  { %12127 = vrcp.f32 %v1192_v50  ;;  %v1195_v52 = vpop.xlane.xlu1 %1194 }
 0x88d   :  { %10844 = vmatmul.mubr.msk.f32.vlgmr.msra.gmra.mrb[16].mxu1 %vm496_vm3, %v12807_v51 }
 0x88e   :  { %10852 = vmatpush3.msra.mxu1 %v1545_v40  ;;  %10853 = vmatprep.mubr.msk.f32.mxu1 %vm12474_vm2, %v12473_v0 }
 0x88f   :  { %10861 = vmatprep.subr.mxu1 %v12473_v0  ;;  %v1697_v57 = vpop.permute.xlu0 %1696 }
 0x890   :  { %v1177_v53 = vpop.xlane.xlu1 %1176 }
 0x891   :  { %12129 = vrcp.f32 %v1177_v53 }
 0x892   :  { %v12126_v54 = vpop.eup %12125 }
 0x893   :  { %v12814_v55 = vmul.f32 %v12126_v54, %v12112_v30 }
 0x894   :  { %v1183_v56 = vpop.xlane.xlu1 %1182 }
 0x895   :  { %12131 = vrcp.f32 %v1183_v56  ;;  %10854 = vmatmul.mubr.msk.f32.vlgmr.msra.gmra.mrb[18].mxu1 %vm496_vm3, %v12814_v55 }
 0x896   :  { %v12128_v58 = vpop.eup %12127  ;;  %10862 = vmatpush3.msra.mxu1 %v1697_v57  ;;  %10863 = vmatprep.mubr.msk.f32.mxu1 %vm12474_vm2, %v12473_v0  ;;  %12133 = vrcp.f32 %v1189_v48 }
 0x897   :  { %v12820_v59 = vmul.f32 %v12128_v58, %v12114_v32  ;;  %12135 = vrcp.f32 %v1195_v52  ;;  %11662 = vmatprep.subr.bf16.mxu1 %v11661_v17 }
 0x898   :  { %v1773_v5 = vpop.permute.xlu1 %1772 }
 0x899   :  { %10864 = vmatmul.mubr.msk.f32.vlgmr.msra.gmra.mrb[20].mxu1 %vm496_vm3, %v12820_v59 }
 0x89a   :  { %11664 = vmatpush3.bf16.msra.mxu1 %v11661_v17 }
 0x89b   :  { %v12130_v60 = vpop.eup %12129  ;;  %11666 = vmatprep.subr.bf16.mxu1 %v11665_v22 }
 0x89c   :  { %v12824_v61 = vmul.f32 %v12130_v60, %v12118_v36 }
 0x89e   :  { %10839 = vmatmul.mubr.msk.f32.vlgmr.msra.gmra.mrb[10].mxu0 %vm496_vm3, %v12824_v61  ;;  %11668 = vmatpush3.bf16.msra.mxu1 %v11665_v22  ;;  %v10082_v22 = vld [vmem:[%s14717_s4 + $0xa] ss:$0 sm:$0xff] }
 0x89f   :  { %v12132_v62 = vpop.eup %12131  ;;  %10847 = vmatpush3.msra.mxu0 %v1441_v43  ;;  %10848 = vmatprep.mubr.msk.f32.mxu0 %vm12474_vm2, %v12473_v0 }
 0x8a0   :  { %10856 = vmatprep.subr.mxu0 %v12473_v0  ;;  %v12831_v63 = vmul.f32 %v12132_v62, %v12120_v38  ;;  %v12134_v1 = vpop.eup %12133 }
 0x8a1   :  { %v12839_v2 = vmul.f32 %v12134_v1, %v12783_v25  ;;  %v12136_v4 = vpop.eup %12135 }
 0x8a2   :  { %10849 = vmatmul.mubr.msk.f32.vlgmr.msra.gmra.mrb[12].mxu0 %vm496_vm3, %v12831_v63  ;;  %v12846_v6 = vmul.f32 %v12136_v4, %v12788_v33 }
 0x8a3   :  { %10857 = vmatpush3.msra.mxu0 %v1621_v47  ;;  %10858 = vmatprep.mubr.msk.f32.mxu0 %vm12474_vm2, %v12473_v0 }
 0x8a4   :  { %10866 = vmatprep.subr.mxu0 %v12473_v0 }
 0x8a6   :  { %10859 = vmatmul.mubr.msk.f32.vlgmr.msra.gmra.mrb[14].mxu0 %vm496_vm3, %v12839_v2 }
 0x8a7   :  { %10867 = vmatpush3.msra.mxu0 %v1773_v5  ;;  %10868 = vmatprep.mubr.msk.f32.mxu0 %vm12474_vm2, %v12473_v0 }
 0x8aa   :  { %10869 = vmatmul.mubr.msk.f32.vlgmr.msra.gmra.mrb[16].mxu0 %vm496_vm3, %v12846_v6 }
 0x955   :  { %v1284_v7 = vpop.f32.mrb[14].mxu1 }
 0x956   :  { %v10835_v10 = vpop.f32.mrb[15].mxu1 }
 0x957   :  { %v2008_v10 = vld [vmem:[%s14714_s1 + $0x38] sm:$0xff] }
 0x960   :  { %v1436_v11 = vpop.f32.mrb[16].mxu1 }
 0x961   :  { %1521 = vrot.lane.b32.xlu1 %v1436_v11, %s12486_s29  ;;  %v10845_v12 = vpop.f32.mrb[17].mxu1  ;;  %v2009_v11 = vld [vmem:[%s14714_s1 + $0x58] sm:$0xff] }
 0x968   :  { %v1616_v13 = vpop.f32.mrb[18].mxu1 }
 0x969   :  { %v10855_v14 = vpop.f32.mrb[19].mxu1 }
 0x96c   :  { %v1768_v18 = vpop.f32.mrb[20].mxu1 }
 0x96d   :  { %v10865_v19 = vpop.f32.mrb[21].mxu1 }
 0x971   :  { %v1360_v23 = vpop.f32.mrb[10].mxu0 }
 0x972   :  { %v10840_v24 = vpop.f32.mrb[11].mxu0  ;;  %1517 = vrot.lane.b32.xlu0 %v1360_v23, %s12487_s13 }
 0x973   :  { %v10083_v24 = vld [vmem:[%s14717_s4 + $0x10] ss:$0 sm:$0xff] }
 0x975   :  { %v1512_v25 = vpop.f32.mrb[12].mxu0 }
 0x976   :  { %v10850_v26 = vpop.f32.mrb[13].mxu0  ;;  %1525 = vrot.lane.b32.xlu1 %v1512_v25, %s12488_s14 }
 0x979   :  { %v1692_v27 = vpop.f32.mrb[14].mxu0 }
 0x97a   :  { %v10860_v30 = vpop.f32.mrb[15].mxu0  ;;  %1849 = vrot.lane.b32.xlu0 %v1692_v27, %s12487_s13 }
 0x97d   :  { %v1844_v31 = vpop.f32.mrb[16].mxu0 }
 0x97e   :  { %v10870_v32 = vpop.f32.mrb[17].mxu0  ;;  %1857 = vrot.lane.b32.xlu1 %v1844_v31, %s12488_s14  ;;  %1853 = vrot.lane.b32.xlu0 %v1768_v18, %s12486_s29 }
 0x9d3   :  { %v1522_v33 = vpop.permute.xlu1 %1521 }
 0x9e4   :  { %v1518_v34 = vpop.permute.xlu0 %1517 }
 0x9e5   :  { %v1528_v35 = vsel %vm496_vm3, %v1284_v7, %v1518_v34  ;;  %v2007_v7 = vld [vmem:[%s14714_s1 + $0x18] sm:$0xff] }
 0x9e6   :  { %v1529_v37 = vsel %vm35_vm0, %v1528_v35, %v1522_v33  ;;  %v11669_v12 = vpack.c.bf16 %v2008_v10, %v2007_v7  ;;  %v10084_v33 = vld [vmem:[%s14717_s4 + $0x17] ss:$0 sm:$0xff] }
 0x9e8   :  { %v1526_v36 = vpop.permute.xlu1 %1525  ;;  %11670 = vmatprep.subr.bf16.mxu0 %v11669_v12 }
 0x9e9   :  { %v1531_v38 = vsel %vm1530_vm4, %v1529_v37, %v1526_v36  ;;  %11672 = vmatpush3.bf16.msra.mxu0 %v11669_v12 }
 0x9ea   :  { %10879 = vmatprep.mubr.msk.f32.mxu1 %vm119_vm1, %v1531_v38 }
 0x9ec   :  { %v1850_v39 = vpop.permute.xlu0 %1849 }
 0x9ed   :  { %v1860_v40 = vsel %vm496_vm3, %v1616_v13, %v1850_v39  ;;  %v2010_v13 = vld [vmem:[%s14714_s1 + $0x78] sm:$0xff] }
 0x9ee   :  { %v11673_v14 = vpack.c.bf16 %v2010_v13, %v2009_v11  ;;  %v2161_v11 = vld [vmem:[%s14717_s4 + $0xd] sm:$0x1] }
 0x9f0   :  { %v1858_v41 = vpop.permute.xlu1 %1857  ;;  %v1854_v42 = vpop.permute.xlu0 %1853  ;;  %11674 = vmatprep.subr.bf16.mxu0 %v11673_v14 }
 0x9f1   :  { %v1861_v43 = vsel %vm35_vm0, %v1860_v40, %v1854_v42  ;;  %11676 = vmatpush3.bf16.msra.mxu0 %v11673_v14 }
 0x9f2   :  { %v1862_v44 = vsel %vm1530_vm4, %v1861_v43, %v1858_v41 }
 0x9f3   :  { %10880 = vmatmul.mubr.msk.f32.vlgmr.msra.gmra.mrb[22].mxu1 %vm119_vm1, %v1862_v44 }
 0xac6   :  { %v10881_v47 = vpop.f32.mrb[22].mxu1 }
 0xac7   :  { %v1962_v3 = vadd.f32 %v10881_v47, %v10079_v45  ;;  %v1956_v48 = vpop.f32.mrb[23].mxu1  ;;  %v2191_v47 = vld [vmem:[%s14715_s2 + $0x58] sm:$0xff] }
 0xac8   :  { %v1957_v49 = vadd.f32 %v10079_v45, %v1956_v48  ;;  %v2190_v45 = vld [vmem:[%s14715_s2 + $0x50] sm:$0xff] }
 0xac9   :  { %v12880_v50 = vadd.f32 %v1962_v3, %v12632_v28  ;;  %v2192_v3 = vld [vmem:[%s14715_s2 + $0x60] sm:$0xff] }
 0xaca   :  { %v12883_v52 = vadd.f32 %v1957_v49, %v12635_v29  ;;  %v11677_v49 = vpack.c.bf16 %v2191_v47, %v2190_v45 }
 0xacb   :  { %v1972_v53 = vsel %vm119_vm1, %v12880_v50, 0.0 }
 0xacc   :  { %1973 = vadd.xlane.f32.xlu1 %v1972_v53  ;;  %v1969_v54 = vsel %vm119_vm1, %v12883_v52, 0.0  ;;  %v2193_v53 = vld [vmem:[%s14715_s2 + $0x68] sm:$0xff]  ;;  %11678 = vmatprep.subr.bf16.mxu1 %v11677_v49 }
 0xacd   :  { %1970 = vadd.xlane.f32.xlu0 %v1969_v54  ;;  %v11681_v54 = vpack.c.bf16 %v2193_v53, %v2192_v3  ;;  %11680 = vmatpush3.bf16.msra.mxu1 %v11677_v49 }
 0xacf   :  { %11682 = vmatprep.subr.bf16.mxu1 %v11681_v54 }
 0xad1   :  { %11684 = vmatpush3.bf16.msra.mxu1 %v11681_v54 }
 0xb59   :  { %v1974_v56 = vpop.xlane.xlu1 %1973 }
 0xb5a   :  { %v1976_v57 = vmul.f32 0.03125, %v1974_v56  ;;  %v1971_v58 = vpop.xlane.xlu0 %1970  ;;  %v24_v56 = vlaneseq }
 0xb5b   :  { %v1975_v60 = vmul.f32 0.03125, %v1971_v58 }
 0xb5c   :  { %v1978_v62 = vsub.f32 %v12880_v50, %v1976_v57  ;;  %v12930_v57 = vshrl.u32 %v24_v56, 7 }
 0xb5d   :  { %v1977_v28 = vsub.f32 %v12883_v52, %v1975_v60 }
 0xb5e   :  { %v1980_v4 = vmul.f32 %v1978_v62, %v1978_v62  ;;  %v12933_v58 = vsub.s32 0, %v12930_v57  ;;  %v12936_v60 = vsub.s32 1, %v12930_v57  ;;  %vm2122_vm5 = vcmp.ge.s32.totalorder %v12930_v57, 1 }
 0xb5f   :  { %v1979_v1 = vmul.f32 %v1977_v28, %v1977_v28  ;;  %vm2135_vm6 = vcmp.lt.s32.totalorder %v12930_v57, 7  ;;  %vm4569_vm7 = vcmp.ge.s32.totalorder %v12930_v57, 2  ;;  %vm4582_vm8 = vcmp.lt.s32.totalorder %v12930_v57, 6 }
 0xb60   :  { %v1984_v5 = vsel %vm119_vm1, %v1980_v4, 0.0  ;;  %vm7016_vm9 = vcmp.ge.s32.totalorder %v12930_v57, 4  ;;  %vm7028_vm10 = vcmp.lt.s32.totalorder %v12930_v57, 4 }
 0xb61   :  { %v1981_v29 = vsel %vm119_vm1, %v1979_v1, 0.0  ;;  %v12942_v1 = vsub.s32 2, %v12930_v57  ;;  %v10218_v57 = vld [vmem:[%s14717_s4 + $0x43] ss:$0 sm:$0xff] }
 0xb62   :  { %1982 = vadd.xlane.f32.xlu0 %v1981_v29 }
 0xb66   :  { %1985 = vadd.xlane.f32.xlu0 %v1984_v5 }
 0xbef   :  { %v1983_v15 = vpop.xlane.xlu0 %1982 }
 0xbf0   :  { %v1987_v16 = vmul.f32 0.03125, %v1983_v15 }
 0xbf2   :  { %v1989_v17 = vadd.f32 1e-05, %v1987_v16 }
 0xbf3   :  { %v1986_v18 = vpop.xlane.xlu0 %1985 }
 0xbf4   :  { %12137 = vrsqrt.f32 %v1989_v17  ;;  %v1988_v19 = vmul.f32 0.03125, %v1986_v18 }
 0xbf6   :  { %v1990_v20 = vadd.f32 1e-05, %v1988_v19  ;;  %v2163_v19 = vmul.f32 0.999995, %v2161_v11 }
 0xbf8   :  { %12139 = vrsqrt.f32 %v1990_v20 }
 0xbfe   :  { %v12138_v21 = vpop.eup %12137 }
 0xbff   :  { %v1993_v23 = vmul.f32 %v12138_v21, %v1977_v28 }
 0xc01   :  { %v1999_v25 = vmul.f32 %v10082_v22, %v1993_v23 }
 0xc02   :  { %v12140_v26 = vpop.eup %12139 }
 0xc03   :  { %v1994_v27 = vmul.f32 %v12140_v26, %v1978_v62  ;;  %v2005_v30 = vadd.f32 %v10083_v24, %v1999_v25  ;;  %v2119_v62 = vld [vmem:[%s14715_s2 + $0x70] sm:$0x7] }
 0xc04   :  { %v2127_v5 = vrot.slane %v2119_v62, %v12933_v58  ;;  %v2132_v7 = vrot.slane %v2119_v62, %v12936_v60  ;;  %v2140_v14 = vrot.slane %v2119_v62, %v12942_v1  ;;  %v10093_v62 = vld [vmem:[%s14717_s4 + $0x1b] ss:$0 sm:$0xff] }
 0xc05   :  { %v2000_v31 = vmul.f32 %v10082_v22, %v1994_v27  ;;  %10890 = vmatprep.mubr.msk.f32.mxu0 %vm119_vm1, %v2005_v30  ;;  %v10089_v30 = vld [vmem:[%s14717_s4 + $0x1c] ss:$0 sm:$0xff] }
 0xc07   :  { %v2006_v32 = vadd.f32 %v10083_v24, %v2000_v31 }
 0xc09   :  { %10891 = vmatmul.mubr.msk.f32.vlgmr.msra.gmra.mrb[18].mxu0 %vm119_vm1, %v2006_v32 }
 0xcdc   :  { %v10892_v34 = vpop.f32.mrb[18].mxu0 }
 0xcdd   :  { %v2094_v35 = vadd.f32 %v10892_v34, %v10084_v33  ;;  %v2088_v36 = vpop.f32.mrb[19].mxu0  ;;  %v2167_v34 = vrot.slane %v2163_v19, %v12933_v58 }
 0xcde   :  { %v2089_v37 = vadd.f32 %v10084_v33, %v2088_v36 }
 0xcdf   :  { %v10088_v38 = vmul.f32 -1.442695, %v2094_v35 }
 0xce0   :  { %v10087_v39 = vmul.f32 -1.442695, %v2089_v37 }
 0xce1   :  { %12141 = vpow2.f32 %v10088_v38  ;;  %v10090_v38 = vld [vmem:[%s14717_s4 + $0x13] ss:$0 sm:$0xff] }
 0xce2   :  { %12143 = vpow2.f32 %v10087_v39 }
 0xceb   :  { %v12142_v40 = vpop.eup %12141 }
 0xcec   :  { %v12144_v41 = vpop.eup %12143  ;;  %v2104_v42 = vadd.f32 1.0, %v12142_v40 }
 0xced   :  { %v2103_v43 = vadd.f32 1.0, %v12144_v41 }
 0xcee   :  { %12145 = vrcp.f32 %v2104_v42 }
 0xcef   :  { %12147 = vrcp.f32 %v2103_v43 }
 0xcf8   :  { %v12146_v44 = vpop.eup %12145 }
 0xcf9   :  { %v12148_v48 = vpop.eup %12147  ;;  %2113 = vrot.lane.b32.xlu1 %v12146_v44, %s12475_s18 }
 0xcfa   :  { %2111 = vrot.lane.b32.xlu0 %v12148_v48, %s12475_s18 }
 0xd6b   :  { %v2114_v28 = vpop.permute.xlu1 %2113 }
 0xd6c   :  { %v2118_v29 = vmul.f32 %v2114_v28, %v2094_v35  ;;  %v2112_v4 = vpop.permute.xlu0 %2111 }
 0xd6d   :  { %v2117_v10 = vmul.f32 %v2112_v4, %v2089_v37 }
 0xd6e   :  { %v2145_v12 = vrot.slane %v2118_v29, 7  ;;  %v2149_v13 = vrot.slane %v2118_v29, 1  ;;  %v2148_v21 = vmul.f32 %v2132_v7, %v2118_v29 }
 0xd6f   :  { %v2121_v15 = vrot.slane %v2117_v10, 7  ;;  %v2134_v16 = vrot.slane %v2117_v10, 1  ;;  %v2133_v25 = vmul.f32 %v2132_v7, %v2117_v10 }
 0xd70   :  { %v2146_v17 = vsel %vm2122_vm5, %v2145_v12, 0.0  ;;  %v2150_v18 = vsel %vm2135_vm6, %v2149_v13, 0.0 }
 0xd71   :  { %v2147_v20 = vmul.f32 %v2146_v17, %v2127_v5  ;;  %v2123_v22 = vsel %vm2122_vm5, %v2121_v15, 0.0  ;;  %v2136_v23 = vsel %vm2135_vm6, %v2134_v16, 0.0  ;;  %v2151_v26 = vmul.f32 %v2150_v18, %v2140_v14 }
 0xd72   :  { %v2128_v24 = vmul.f32 %v2127_v5, %v2123_v22  ;;  %v2141_v31 = vmul.f32 %v2140_v14, %v2136_v23  ;;  %v2323_v22 = vld [vmem:[%s14714_s1 + $0x28] sm:$0xff] }
 0xd73   :  { %v2153_v27 = vadd.f32 %v2148_v21, %v2147_v20  ;;  %v2322_v21 = vld [vmem:[%s14714_s1 + $0x8] sm:$0xff] }
 0xd74   :  { %v2143_v32 = vadd.f32 %v2133_v25, %v2128_v24  ;;  %v2324_v23 = vld [vmem:[%s14714_s1 + $0x48] sm:$0xff]  ;;  %v11685_v24 = vpack.c.bf16 %v2323_v22, %v2322_v21 }
 0xd75   :  { %v2154_v33 = vadd.f32 %v2153_v27, %v2151_v26  ;;  %v2325_v25 = vld [vmem:[%s14714_s1 + $0x68] sm:$0xff] }
 0xd76   :  { %v2144_v35 = vadd.f32 %v2143_v32, %v2141_v31  ;;  %v11689_v26 = vpack.c.bf16 %v2325_v25, %v2324_v23  ;;  %11686 = vmatprep.subr.bf16.mxu0 %v11685_v24 }
 0xd77   :  { %v2160_v36 = vadd.f32 %v10089_v30, %v2154_v33  ;;  %11688 = vmatpush3.bf16.msra.mxu0 %v11685_v24 }
 0xd78   :  { %v2159_v37 = vadd.f32 %v10089_v30, %v2144_v35  ;;  %11690 = vmatprep.subr.bf16.mxu0 %v11689_v26 }
 0xd79   :  { %v2169_v39 = vmul.f32 %v2167_v34, %v2160_v36  ;;  %v10096_v36 = vld [vmem:[%s14717_s4 + $0xb] ss:$0 sm:$0xff] }
 0xd7a   :  { %v2168_v40 = vmul.f32 %v2167_v34, %v2159_v37 }
 0xd7b   :  { %v2175_v41 = vadd.f32 %v10090_v38, %v2169_v39  ;;  %11692 = vmatpush3.bf16.msra.mxu0 %v11689_v26 }
 0xd7c   :  { %v2174_v42 = vadd.f32 %v10090_v38, %v2168_v40  ;;  %v10097_v40 = vld [vmem:[%s14717_s4 + $0x11] ss:$0 sm:$0xff] }
 0xd7d   :  { %v10092_v43 = vmul.f32 -1.442695, %v2175_v41 }
 0xd7e   :  { %v10091_v44 = vmul.f32 -1.442695, %v2174_v42 }
 0xd7f   :  { %12149 = vpow2.f32 %v10092_v43 }
 0xd80   :  { %12151 = vpow2.f32 %v10091_v44 }
 0xd89   :  { %v12150_v45 = vpop.eup %12149 }
 0xd8a   :  { %v12152_v47 = vpop.eup %12151  ;;  %v2183_v3 = vadd.f32 1.0, %v12150_v45  ;;  %v2426_v45 = vld [vmem:[%s14716_s3 + $0x80] sm:$0xff] }
 0xd8b   :  { %v2182_v48 = vadd.f32 1.0, %v12152_v47  ;;  %v2427_v47 = vld [vmem:[%s14716_s3 + $0x88] sm:$0xff] }
 0xd8c   :  { %12153 = vrcp.f32 %v2183_v3  ;;  %v11693_v3 = vpack.c.bf16 %v2427_v47, %v2426_v45 }
 0xd8d   :  { %12155 = vrcp.f32 %v2182_v48  ;;  %v2428_v48 = vld [vmem:[%s14716_s3 + $0x90] sm:$0xff] }
 0xd8e   :  { %11694 = vmatprep.subr.bf16.mxu1 %v11693_v3 }
 0xd96   :  { %v12154_v49 = vpop.eup %12153 }
 0xd97   :  { %v12156_v53 = vpop.eup %12155  ;;  %v2189_v56 = vmul.f32 %v12154_v49, %v2175_v41  ;;  %v2429_v49 = vld [vmem:[%s14716_s3 + $0x98] sm:$0xff] }
 0xd98   :  { %v2188_v54 = vmul.f32 %v12156_v53, %v2174_v42  ;;  %v11697_v53 = vpack.c.bf16 %v2429_v49, %v2428_v48 }
 0xd9a   :  { %10901 = vmatprep.mubr.msk.f32.mxu1 %vm119_vm1, %v2188_v54  ;;  %v2430_v54 = vld [vmem:[%s14716_s3 + $0xa0] sm:$0xff] }
 0xd9b   :  { %10902 = vmatmul.mubr.msk.f32.vlgmr.msra.gmra.mrb[24].mxu1 %vm119_vm1, %v2189_v56  ;;  %v2431_v56 = vld [vmem:[%s14716_s3 + $0xa8] sm:$0xff] }
 0xd9c   :  { %11696 = vmatpush3.bf16.msra.mxu1 %v11693_v3 }
 0xd9d   :  { %11698 = vmatprep.subr.bf16.mxu1 %v11697_v53 }
 0xda0   :  { %11700 = vmatpush3.bf16.msra.mxu1 %v11697_v53 }
 0xe6e   :  { %v10903_v28 = vpop.f32.mrb[24].mxu1 }
 0xe6f   :  { %v2277_v29 = vadd.f32 %v10903_v28, %v10093_v62  ;;  %v2271_v4 = vpop.f32.mrb[25].mxu1  ;;  %v2432_v28 = vld [vmem:[%s14716_s3 + $0xb0] sm:$0xff] }
 0xe70   :  { %v2272_v5 = vadd.f32 %v10093_v62, %v2271_v4  ;;  %v11701_v62 = vpack.c.bf16 %v2431_v56, %v2430_v54 }
 0xe71   :  { %v12969_v7 = vadd.f32 %v2277_v29, %v12880_v50  ;;  %v2433_v29 = vld [vmem:[%s14716_s3 + $0xb8] sm:$0xff] }
 0xe72   :  { %v12972_v10 = vadd.f32 %v2272_v5, %v12883_v52  ;;  %11702 = vmatprep.subr.bf16.mxu1 %v11701_v62  ;;  %v11705_v4 = vpack.c.bf16 %v2433_v29, %v2432_v28  ;;  %v2434_v5 = vld [vmem:[%s14716_s3 + $0xc0] sm:$0xff] }
 0xe73   :  { %v2287_v11 = vsel %vm119_vm1, %v12969_v7, 0.0  ;;  %11704 = vmatpush3.bf16.msra.mxu1 %v11701_v62 }
 0xe74   :  { %2288 = vadd.xlane.f32.xlu0 %v2287_v11  ;;  %v2284_v12 = vsel %vm119_vm1, %v12972_v10, 0.0  ;;  %11706 = vmatprep.subr.bf16.mxu1 %v11705_v4  ;;  %v2435_v11 = vld [vmem:[%s14716_s3 + $0xc8] sm:$0xff] }
 0xe75   :  { %2285 = vadd.xlane.f32.xlu1 %v2284_v12  ;;  %v11709_v12 = vpack.c.bf16 %v2435_v11, %v2434_v5 }
 0xe77   :  { %11708 = vmatpush3.bf16.msra.mxu1 %v11705_v4 }
 0xe78   :  { %11710 = vmatprep.subr.bf16.mxu1 %v11709_v12 }
 0xe7b   :  { %11712 = vmatpush3.bf16.msra.mxu1 %v11709_v12 }
 0xf01   :  { %v2289_v13 = vpop.xlane.xlu0 %2288 }
 0xf02   :  { %v2291_v14 = vmul.f32 0.03125, %v2289_v13  ;;  %v2286_v15 = vpop.xlane.xlu1 %2285  ;;  %v2436_v13 = vld [vmem:[%s14716_s3 + $0xd0] sm:$0xff] }
 0xf03   :  { %v2290_v16 = vmul.f32 0.03125, %v2286_v15 }
 0xf04   :  { %v2293_v17 = vsub.f32 %v12969_v7, %v2291_v14  ;;  %v2437_v14 = vld [vmem:[%s14716_s3 + $0xd8] sm:$0xff] }
 0xf05   :  { %v2292_v50 = vsub.f32 %v12972_v10, %v2290_v16  ;;  %v11713_v15 = vpack.c.bf16 %v2437_v14, %v2436_v13  ;;  %v2438_v16 = vld [vmem:[%s14716_s3 + $0xe0] sm:$0xff] }
 0xf06   :  { %v2295_v18 = vmul.f32 %v2293_v17, %v2293_v17 }
 0xf07   :  { %v2294_v19 = vmul.f32 %v2292_v50, %v2292_v50  ;;  %11714 = vmatprep.subr.bf16.mxu1 %v11713_v15 }
 0xf08   :  { %v2299_v52 = vsel %vm119_vm1, %v2295_v18, 0.0  ;;  %11716 = vmatpush3.bf16.msra.mxu1 %v11713_v15  ;;  %v2440_v18 = vld [vmem:[%s14716_s3 + $0xf0] sm:$0xff] }
 0xf09   :  { %2300 = vadd.xlane.f32.xlu1 %v2299_v52  ;;  %v2296_v20 = vsel %vm119_vm1, %v2294_v19, 0.0  ;;  %v2441_v19 = vld [vmem:[%s14716_s3 + $0xf8] sm:$0xff] }
 0xf0a   :  { %2297 = vadd.xlane.f32.xlu0 %v2296_v20  ;;  %v11721_v52 = vpack.c.bf16 %v2441_v19, %v2440_v18  ;;  %v10098_v20 = vld [vmem:[%s14717_s4 + $0x15] ss:$0 sm:$0xff]  ;;  %v10105_v19 = vld [vmem:[%s14717_s4 + $0x12] ss:$0 sm:$0xff] }
 0xf96   :  { %v2301_v27 = vpop.xlane.xlu1 %2300 }
 0xf97   :  { %v2303_v30 = vmul.f32 0.03125, %v2301_v27  ;;  %v2298_v31 = vpop.xlane.xlu0 %2297 }
 0xf98   :  { %v2302_v32 = vmul.f32 0.03125, %v2298_v31 }
 0xf99   :  { %v2305_v33 = vadd.f32 1e-05, %v2303_v30 }
 0xf9a   :  { %v2304_v34 = vadd.f32 1e-05, %v2302_v32 }
 0xf9b   :  { %12157 = vrsqrt.f32 %v2305_v33 }
 0xf9c   :  { %12159 = vrsqrt.f32 %v2304_v34 }
 0xfa5   :  { %v12158_v35 = vpop.eup %12157 }
 0xfa6   :  { %v12160_v37 = vpop.eup %12159  ;;  %v2309_v38 = vmul.f32 %v12158_v35, %v2293_v17  ;;  %v2439_v17 = vld [vmem:[%s14716_s3 + $0xe8] sm:$0xff] }
 0xfa7   :  { %v2308_v39 = vmul.f32 %v12160_v37, %v2292_v50  ;;  %v11717_v50 = vpack.c.bf16 %v2439_v17, %v2438_v16  ;;  %v10103_v37 = vld [vmem:[%s14717_s4 + $0x19] ss:$0 sm:$0xff]  ;;  %v10104_v16 = vld [vmem:[%s14717_s4 + $0xc] ss:$0 sm:$0xff] }
 0xfa8   :  { %v2315_v41 = vmul.f32 %v10096_v36, %v2309_v38 }
 0xfa9   :  { %v2314_v42 = vmul.f32 %v10096_v36, %v2308_v39  ;;  %11718 = vmatprep.subr.bf16.mxu1 %v11717_v50 }
 0xfaa   :  { %v2321_v44 = vadd.f32 %v10097_v40, %v2315_v41  ;;  %11720 = vmatpush3.bf16.msra.mxu1 %v11717_v50 }
 0xfab   :  { %v2320_v43 = vadd.f32 %v10097_v40, %v2314_v42  ;;  %11722 = vmatprep.subr.bf16.mxu1 %v11721_v52 }
 0xfad   :  { %10912 = vmatprep.mubr.msk.f32.mxu0 %vm119_vm1, %v2320_v43 }
 0xfae   :  { %10913 = vmatmul.mubr.msk.f32.vlgmr.msra.gmra.mrb[20].mxu0 %vm119_vm1, %v2321_v44  ;;  %11724 = vmatpush3.bf16.msra.mxu1 %v11721_v52 }
0x1081   :  { %v10914_v21 = vpop.f32.mrb[20].mxu0 }
0x1082   :  { %v2409_v22 = vadd.f32 %v10914_v21, %v10098_v20  ;;  %v2403_v23 = vpop.f32.mrb[21].mxu0 }
0x1083   :  { %v2404_v24 = vadd.f32 %v10098_v20, %v2403_v23 }
0x1084   :  { %v10102_v25 = vmul.f32 -1.442695, %v2409_v22 }
0x1085   :  { %v10101_v26 = vmul.f32 -1.442695, %v2404_v24 }
0x1086   :  { %12161 = vpow2.f32 %v10102_v25 }
0x1087   :  { %12163 = vpow2.f32 %v10101_v26 }
0x1090   :  { %v12162_v27 = vpop.eup %12161 }
0x1091   :  { %v12164_v30 = vpop.eup %12163  ;;  %v2419_v31 = vadd.f32 1.0, %v12162_v27 }
0x1092   :  { %v2418_v32 = vadd.f32 1.0, %v12164_v30 }
0x1093   :  { %12165 = vrcp.f32 %v2419_v31 }
0x1094   :  { %12167 = vrcp.f32 %v2418_v32 }
0x109d   :  { %v12166_v33 = vpop.eup %12165 }
0x109e   :  { %v12168_v34 = vpop.eup %12167  ;;  %v2425_v36 = vmul.f32 %v12166_v33, %v2409_v22 }
0x109f   :  { %v2424_v35 = vmul.f32 %v12168_v34, %v2404_v24 }
0x10a1   :  { %10947 = vmatprep.mubr.f32.mxu1 %v2424_v35 }
0x10a2   :  { %10948 = vmatmul.mubr.f32.vlgmr.msra.gmra.mrb[26].mxu1 %v2425_v36 }
0x1175   :  { %v10949_v38 = vpop.f32.mrb[26].mxu1 }
0x1176   :  { %v2519_v39 = vadd.f32 %v10949_v38, %v10103_v37  ;;  %v2513_v40 = vpop.f32.mrb[27].mxu1  ;;  %v2609_v38 = vld [vmem:[%s14714_s1 + $0xa0] sm:$0xff] }
0x1177   :  { %v2514_v41 = vadd.f32 %v10103_v37, %v2513_v40  ;;  %v2608_v37 = vld [vmem:[%s14714_s1 + $0x80] sm:$0xff] }
0x1178   :  { %v2523_v42 = vmul.f32 0.5, %v2519_v39  ;;  %v2610_v39 = vld [vmem:[%s14714_s1 + $0xc0] sm:$0xff]  ;;  %v11725_v40 = vpack.c.bf16 %v2609_v38, %v2608_v37 }
0x1179   :  { %v2522_v43 = vmul.f32 0.5, %v2514_v41  ;;  %v2611_v41 = vld [vmem:[%s14714_s1 + $0xe0] sm:$0xff] }
0x117a   :  { %v2525_v44 = vadd.f32 %v2523_v42, %v12969_v7  ;;  %v11729_v42 = vpack.c.bf16 %v2611_v41, %v2610_v39  ;;  %11726 = vmatprep.subr.bf16.mxu0 %v11725_v40 }
0x117b   :  { %v2524_v45 = vadd.f32 %v2522_v43, %v12972_v10  ;;  %11728 = vmatpush3.bf16.msra.mxu0 %v11725_v40 }
0x117c   :  { %v2531_v47 = vsel %vm119_vm1, %v2525_v44, 0.0  ;;  %11730 = vmatprep.subr.bf16.mxu0 %v11729_v42 }
0x117d   :  { %2532 = vadd.xlane.f32.xlu1 %v2531_v47  ;;  %v2528_v3 = vsel %vm119_vm1, %v2524_v45, 0.0 }
0x117e   :  { %2529 = vadd.xlane.f32.xlu0 %v2528_v3 }
0x117f   :  { %11732 = vmatpush3.bf16.msra.mxu0 %v11729_v42 }
0x120a   :  { %v2533_v48 = vpop.xlane.xlu1 %2532 }
0x120b   :  { %v2535_v49 = vmul.f32 0.03125, %v2533_v48  ;;  %v2530_v53 = vpop.xlane.xlu0 %2529 }
0x120c   :  { %v2534_v54 = vmul.f32 0.03125, %v2530_v53  ;;  %v10106_v53 = vld [vmem:[%s14717_s4 + $0x20] ss:$0 sm:$0xff] }
0x120d   :  { %v2537_v56 = vsub.f32 %v2525_v44, %v2535_v49 }
0x120e   :  { %v2536_v62 = vsub.f32 %v2524_v45, %v2534_v54 }
0x120f   :  { %v2539_v28 = vmul.f32 %v2537_v56, %v2537_v56 }
0x1210   :  { %v2538_v29 = vmul.f32 %v2536_v62, %v2536_v62 }
0x1211   :  { %v2543_v4 = vsel %vm119_vm1, %v2539_v28, 0.0  ;;  %v10107_v28 = vld [vmem:[%s14717_s4 + $0x26] ss:$0 sm:$0xff] }
0x1212   :  { %2544 = vadd.xlane.f32.xlu1 %v2543_v4  ;;  %v2540_v7 = vsel %vm119_vm1, %v2538_v29, 0.0 }
0x1213   :  { %2541 = vadd.xlane.f32.xlu0 %v2540_v7 }
0x129f   :  { %v2545_v10 = vpop.xlane.xlu1 %2544 }
0x12a0   :  { %v2547_v5 = vmul.f32 0.03125, %v2545_v10  ;;  %v2542_v11 = vpop.xlane.xlu0 %2541 }
0x12a1   :  { %v2546_v12 = vmul.f32 0.03125, %v2542_v11  ;;  %v2713_v11 = vld [vmem:[%s14716_s3 + $0x108] sm:$0xff] }
0x12a2   :  { %v2549_v13 = vadd.f32 1e-05, %v2547_v5  ;;  %v2712_v5 = vld [vmem:[%s14716_s3 + $0x100] sm:$0xff] }
0x12a3   :  { %v2548_v14 = vadd.f32 1e-05, %v2546_v12  ;;  %v11733_v12 = vpack.c.bf16 %v2713_v11, %v2712_v5 }
0x12a4   :  { %12169 = vrsqrt.f32 %v2549_v13  ;;  %v2714_v13 = vld [vmem:[%s14716_s3 + $0x110] sm:$0xff] }
0x12a5   :  { %12171 = vrsqrt.f32 %v2548_v14  ;;  %11734 = vmatprep.subr.bf16.mxu0 %v11733_v12  ;;  %v2715_v14 = vld [vmem:[%s14716_s3 + $0x118] sm:$0xff] }
0x12ae   :  { %v12170_v15 = vpop.eup %12169 }
0x12af   :  { %v12172_v17 = vpop.eup %12171  ;;  %v2553_v50 = vmul.f32 %v12170_v15, %v2537_v56  ;;  %v11737_v15 = vpack.c.bf16 %v2715_v14, %v2714_v13 }
0x12b0   :  { %v2552_v18 = vmul.f32 %v12172_v17, %v2536_v62  ;;  %v2717_v17 = vld [vmem:[%s14716_s3 + $0x128] sm:$0xff] }
0x12b1   :  { %v2559_v52 = vmul.f32 %v10104_v16, %v2553_v50 }
0x12b2   :  { %v2558_v20 = vmul.f32 %v10104_v16, %v2552_v18  ;;  %v2716_v16 = vld [vmem:[%s14716_s3 + $0x120] sm:$0xff]  ;;  %v2718_v18 = vld [vmem:[%s14716_s3 + $0x130] sm:$0xff] }
0x12b3   :  { %v2565_v21 = vadd.f32 %v10105_v19, %v2559_v52  ;;  %v11741_v50 = vpack.c.bf16 %v2717_v17, %v2716_v16 }
0x12b4   :  { %v2564_v22 = vadd.f32 %v10105_v19, %v2558_v20  ;;  %v2719_v19 = vld [vmem:[%s14716_s3 + $0x138] sm:$0xff]  ;;  %v2720_v20 = vld [vmem:[%s14716_s3 + $0x140] sm:$0xff] }
0x12b5   :  { %v13069_v23 = vadd.f32 %v2565_v21, %v12547_v9  ;;  %v11745_v52 = vpack.c.bf16 %v2719_v19, %v2718_v18  ;;  %v2721_v21 = vld [vmem:[%s14716_s3 + $0x148] sm:$0xff] }
0x12b6   :  { %v13072_v24 = vadd.f32 %v2564_v22, %v12545_v8  ;;  %v11749_v22 = vpack.c.bf16 %v2721_v21, %v2720_v20  ;;  %v2853_v20 = vld [vmem:[%s14714_s1 + $0xb0] sm:$0xff] }
0x12b7   :  { %v2573_v25 = vsel %vm119_vm1, %v13069_v23, 0.0  ;;  %v2854_v21 = vld [vmem:[%s14714_s1 + $0xd0] sm:$0xff] }
0x12b8   :  { %2574 = vadd.xlane.f32.xlu1 %v2573_v25  ;;  %v2570_v26 = vsel %vm119_vm1, %v13072_v24, 0.0  ;;  %v2722_v25 = vld [vmem:[%s14716_s3 + $0x150] sm:$0xff] }
0x12b9   :  { %2571 = vadd.xlane.f32.xlu0 %v2570_v26  ;;  %v2723_v26 = vld [vmem:[%s14716_s3 + $0x158] sm:$0xff] }
0x1345   :  { %v2575_v27 = vpop.xlane.xlu1 %2574 }
0x1346   :  { %v2577_v30 = vmul.f32 0.03125, %v2575_v27  ;;  %v2572_v31 = vpop.xlane.xlu0 %2571  ;;  %v11753_v27 = vpack.c.bf16 %v2723_v26, %v2722_v25  ;;  %v2855_v25 = vld [vmem:[%s14714_s1 + $0xf0] sm:$0xff] }
0x1347   :  { %v2576_v32 = vmul.f32 0.03125, %v2572_v31  ;;  %v2725_v31 = vld [vmem:[%s14716_s3 + $0x168] sm:$0xff]  ;;  %v11769_v26 = vpack.c.bf16 %v2855_v25, %v2854_v21 }
0x1348   :  { %v2579_v33 = vsub.f32 %v13069_v23, %v2577_v30  ;;  %v2724_v30 = vld [vmem:[%s14716_s3 + $0x160] sm:$0xff] }
0x1349   :  { %v2578_v9 = vsub.f32 %v13072_v24, %v2576_v32  ;;  %v11757_v32 = vpack.c.bf16 %v2725_v31, %v2724_v30 }
0x134a   :  { %v2581_v34 = vmul.f32 %v2579_v33, %v2579_v33 }
0x134b   :  { %v2580_v35 = vmul.f32 %v2578_v9, %v2578_v9 }
0x134c   :  { %v2585_v8 = vsel %vm119_vm1, %v2581_v34, 0.0 }
0x134d   :  { %2586 = vadd.xlane.f32.xlu1 %v2585_v8  ;;  %v2582_v36 = vsel %vm119_vm1, %v2580_v35, 0.0  ;;  %v10108_v35 = vld [vmem:[%s14717_s4 + $0x2c] ss:$0 sm:$0xff] }
0x134e   :  { %2583 = vadd.xlane.f32.xlu0 %v2582_v36 }
0x13da   :  { %v2587_v43 = vpop.xlane.xlu1 %2586 }
0x13db   :  { %v2589_v44 = vmul.f32 0.03125, %v2587_v43  ;;  %v2584_v45 = vpop.xlane.xlu0 %2583 }
0x13dc   :  { %v2588_v47 = vmul.f32 0.03125, %v2584_v45 }
0x13dd   :  { %v2591_v3 = vadd.f32 1e-05, %v2589_v44 }
0x13de   :  { %v2590_v48 = vadd.f32 1e-05, %v2588_v47 }
0x13df   :  { %12173 = vrsqrt.f32 %v2591_v3 }
0x13e0   :  { %12175 = vrsqrt.f32 %v2590_v48 }
0x13e9   :  { %v12174_v49 = vpop.eup %12173 }
0x13ea   :  { %v12176_v54 = vpop.eup %12175  ;;  %v2595_v56 = vmul.f32 %v12174_v49, %v2579_v33  ;;  %v2726_v33 = vld [vmem:[%s14716_s3 + $0x170] sm:$0xff] }
0x13eb   :  { %v2594_v62 = vmul.f32 %v12176_v54, %v2578_v9  ;;  %v2727_v9 = vld [vmem:[%s14716_s3 + $0x178] sm:$0xff]  ;;  %v10113_v49 = vld [vmem:[%s14717_s4 + $0x30] ss:$0 sm:$0xff] }
0x13ec   :  { %v2601_v29 = vmul.f32 %v10106_v53, %v2595_v56  ;;  %v11761_v34 = vpack.c.bf16 %v2727_v9, %v2726_v33 }
0x13ed   :  { %v2600_v4 = vmul.f32 %v10106_v53, %v2594_v62 }
0x13ee   :  { %v2607_v10 = vadd.f32 %v10107_v28, %v2601_v29 }
0x13ef   :  { %v2606_v7 = vadd.f32 %v10107_v28, %v2600_v4 }
0x13f1   :  { %10958 = vmatprep.mubr.msk.f32.mxu0 %vm119_vm1, %v2606_v7 }
0x13f2   :  { %10959 = vmatmul.mubr.msk.f32.vlgmr.msra.gmra.mrb[22].mxu0 %vm119_vm1, %v2607_v10 }
0x13f3   :  { %11736 = vmatpush3.bf16.msra.mxu0 %v11733_v12 }
0x13f4   :  { %11738 = vmatprep.subr.bf16.mxu0 %v11737_v15 }
0x13f7   :  { %11740 = vmatpush3.bf16.msra.mxu0 %v11737_v15 }
0x13f8   :  { %11742 = vmatprep.subr.bf16.mxu0 %v11741_v50 }
0x13fb   :  { %11744 = vmatpush3.bf16.msra.mxu0 %v11741_v50 }
0x13fc   :  { %11746 = vmatprep.subr.bf16.mxu0 %v11745_v52 }
0x13ff   :  { %11748 = vmatpush3.bf16.msra.mxu0 %v11745_v52  ;;  %v2852_v52 = vld [vmem:[%s14714_s1 + $0x90] sm:$0xff] }
0x1400   :  { %11750 = vmatprep.subr.bf16.mxu0 %v11749_v22 }
0x1403   :  { %11752 = vmatpush3.bf16.msra.mxu0 %v11749_v22  ;;  %v11765_v22 = vpack.c.bf16 %v2853_v20, %v2852_v52 }
0x1404   :  { %11754 = vmatprep.subr.bf16.mxu0 %v11753_v27 }
0x1405   :  { %11766 = vmatprep.subr.bf16.mxu1 %v11765_v22 }
0x1406   :  { %11768 = vmatpush3.bf16.msra.mxu1 %v11765_v22 }
0x1407   :  { %11756 = vmatpush3.bf16.msra.mxu0 %v11753_v27  ;;  %11770 = vmatprep.subr.bf16.mxu1 %v11769_v26 }
0x1408   :  { %11758 = vmatprep.subr.bf16.mxu0 %v11757_v32 }
0x140a   :  { %11772 = vmatpush3.bf16.msra.mxu1 %v11769_v26 }
0x140b   :  { %11760 = vmatpush3.bf16.msra.mxu0 %v11757_v32  ;;  %11007 = vmatprep.subr.mxu1 %v12473_v0 }
0x140c   :  { %11762 = vmatprep.subr.bf16.mxu0 %v11761_v34 }
0x140f   :  { %11764 = vmatpush3.bf16.msra.mxu0 %v11761_v34 }
0x1410   :  { %11012 = vmatprep.subr.mxu0 %v12473_v0 }
0x14c5   :  { %v10960_v8 = vpop.f32.mrb[22].mxu0 }
0x14c6   :  { %v2695_v36 = vadd.f32 %v10960_v8, %v10108_v35  ;;  %v2689_v37 = vpop.f32.mrb[23].mxu0 }
0x14c7   :  { %v2690_v38 = vadd.f32 %v10108_v35, %v2689_v37  ;;  %v10114_v35 = vld [vmem:[%s14717_s4 + $0x21] ss:$0 sm:$0xff] }
0x14c8   :  { %v10112_v39 = vmul.f32 -1.442695, %v2695_v36 }
0x14c9   :  { %v10111_v40 = vmul.f32 -1.442695, %v2690_v38 }
0x14ca   :  { %12177 = vpow2.f32 %v10112_v39 }
0x14cb   :  { %12179 = vpow2.f32 %v10111_v40 }
0x14d4   :  { %v12178_v41 = vpop.eup %12177 }
0x14d5   :  { %v12180_v42 = vpop.eup %12179  ;;  %v2705_v43 = vadd.f32 1.0, %v12178_v41 }
0x14d6   :  { %v2704_v44 = vadd.f32 1.0, %v12180_v42 }
0x14d7   :  { %12181 = vrcp.f32 %v2705_v43  ;;  %v10116_v43 = vld [vmem:[%s14717_s4 + $0x2e] ss:$0 sm:$0xff] }
0x14d8   :  { %12183 = vrcp.f32 %v2704_v44 }
0x14e1   :  { %v12182_v45 = vpop.eup %12181 }
0x14e2   :  { %v12184_v47 = vpop.eup %12183  ;;  %v2711_v48 = vmul.f32 %v12182_v45, %v2695_v36 }
0x14e3   :  { %v2710_v3 = vmul.f32 %v12184_v47, %v2690_v38  ;;  %v10115_v38 = vld [vmem:[%s14717_s4 + $0x27] ss:$0 sm:$0xff] }
0x14e5   :  { %10993 = vmatprep.mubr.f32.mxu0 %v2710_v3 }
0x14e6   :  { %10994 = vmatmul.mubr.f32.vlgmr.msra.gmra.mrb[24].mxu0 %v2711_v48 }
0x14e7   :  { %11014 = vmatprep.mubr.msk.f32.mxu0 %vm12474_vm2, %v12473_v0 }
0x15b9   :  { %v10995_v53 = vpop.f32.mrb[24].mxu0 }
0x15ba   :  { %v2805_v54 = vadd.f32 %v10995_v53, %v10113_v49  ;;  %v2799_v56 = vpop.f32.mrb[25].mxu0 }
0x15bb   :  { %v2800_v62 = vadd.f32 %v10113_v49, %v2799_v56 }
0x15bc   :  { %v2809_v28 = vmul.f32 0.5, %v2805_v54 }
0x15bd   :  { %v2808_v29 = vmul.f32 0.5, %v2800_v62 }
0x15be   :  { %v13160_v4 = vadd.f32 %v2809_v28, %v13069_v23 }
0x15bf   :  { %v13163_v7 = vadd.f32 %v2808_v29, %v13072_v24 }
0x15c0   :  { %v2817_v10 = vsel %vm119_vm1, %v13160_v4, 0.0 }
0x15c1   :  { %2818 = vadd.xlane.f32.xlu1 %v2817_v10  ;;  %v2814_v5 = vsel %vm119_vm1, %v13163_v7, 0.0 }
0x15c2   :  { %2815 = vadd.xlane.f32.xlu0 %v2814_v5 }
0x164e   :  { %v2819_v11 = vpop.xlane.xlu1 %2818 }
0x164f   :  { %v2821_v12 = vmul.f32 0.03125, %v2819_v11  ;;  %v2816_v13 = vpop.xlane.xlu0 %2815 }
0x1650   :  { %v2820_v14 = vmul.f32 0.03125, %v2816_v13 }
0x1651   :  { %v2823_v15 = vsub.f32 %v13160_v4, %v2821_v12 }
0x1652   :  { %v2822_v16 = vsub.f32 %v13163_v7, %v2820_v14 }
0x1653   :  { %v2825_v17 = vmul.f32 %v2823_v15, %v2823_v15 }
0x1654   :  { %v2824_v50 = vmul.f32 %v2822_v16, %v2822_v16 }
0x1655   :  { %v2829_v18 = vsel %vm119_vm1, %v2825_v17, 0.0 }
0x1656   :  { %2830 = vadd.xlane.f32.xlu1 %v2829_v18  ;;  %v2826_v19 = vsel %vm119_vm1, %v2824_v50, 0.0 }
0x1657   :  { %2827 = vadd.xlane.f32.xlu0 %v2826_v19 }
0x16e3   :  { %v2831_v27 = vpop.xlane.xlu1 %2830 }
0x16e4   :  { %v2833_v30 = vmul.f32 0.03125, %v2831_v27  ;;  %v2828_v31 = vpop.xlane.xlu0 %2827 }
0x16e5   :  { %v2832_v32 = vmul.f32 0.03125, %v2828_v31 }
0x16e6   :  { %v2835_v33 = vadd.f32 1e-05, %v2833_v30 }
0x16e7   :  { %v2834_v9 = vadd.f32 1e-05, %v2832_v32 }
0x16e8   :  { %12185 = vrsqrt.f32 %v2835_v33 }
0x16e9   :  { %12187 = vrsqrt.f32 %v2834_v9 }
0x16f2   :  { %v12186_v34 = vpop.eup %12185 }
0x16f3   :  { %v12188_v8 = vpop.eup %12187  ;;  %v2839_v36 = vmul.f32 %v12186_v34, %v2823_v15 }
0x16f4   :  { %v2838_v37 = vmul.f32 %v12188_v8, %v2822_v16 }
0x16f5   :  { %v2845_v39 = vmul.f32 %v10114_v35, %v2839_v36 }
0x16f6   :  { %v2844_v40 = vmul.f32 %v10114_v35, %v2838_v37 }
0x16f7   :  { %v2851_v42 = vadd.f32 %v10115_v38, %v2845_v39 }
0x16f8   :  { %v2850_v41 = vadd.f32 %v10115_v38, %v2844_v40 }
0x16fa   :  { %11004 = vmatprep.mubr.msk.f32.mxu1 %vm119_vm1, %v2850_v41 }
0x16fb   :  { %11005 = vmatmul.mubr.msk.f32.vlgmr.msra.gmra.mrb[28].mxu1 %vm119_vm1, %v2851_v42 }
0x16fc   :  { %11009 = vmatprep.mubr.msk.f32.mxu1 %vm12474_vm2, %v12473_v0 }
0x17ce   :  { %v11006_v44 = vpop.f32.mrb[28].mxu1 }
0x17cf   :  { %v13199_v45 = vadd.f32 %v11006_v44, %v10116_v43  ;;  %v2933_v47 = vpop.f32.mrb[29].mxu1 }
0x17d0   :  { %v13205_v3 = vadd.f32 %v10116_v43, %v2933_v47 }
0x17d1   :  { %3332 = vrot.lane.b32.xlu0 %v13199_v45, %s12476_s19  ;;  %3254 = vrot.lane.b32.xlu1 %v13199_v45, %s12475_s18 }
0x17d5   :  { %3021 = vrot.lane.b32.xlu1 %v13205_v3, %s12476_s19  ;;  %2943 = vrot.lane.b32.xlu0 %v13205_v3, %s12475_s18 }
0x17d9   :  { %3019 = vrot.lane.b32.xlu1 %v13205_v3, %s12477_s20  ;;  %3177 = vrot.lane.b32.xlu0 %v13205_v3, %s12481_s24 }
0x17dd   :  { %3099 = vrot.lane.b32.xlu1 %v13205_v3, %s12479_s22  ;;  %3175 = vrot.lane.b32.xlu0 %v13205_v3, %s12480_s23 }
0x17e1   :  { %3097 = vrot.lane.b32.xlu1 %v13205_v3, %s12478_s21  ;;  %3410 = vrot.lane.b32.xlu0 %v13199_v45, %s12479_s22 }
0x17e5   :  { %3330 = vrot.lane.b32.xlu1 %v13199_v45, %s12477_s20  ;;  %3408 = vrot.lane.b32.xlu0 %v13199_v45, %s12478_s21 }
0x17e9   :  { %3488 = vrot.lane.b32.xlu1 %v13199_v45, %s12481_s24 }
0x17ed   :  { %3486 = vrot.lane.b32.xlu1 %v13199_v45, %s12480_s23 }
0x1843   :  { %v3333_v48 = vpop.permute.xlu0 %3332  ;;  %v3255_v49 = vpop.permute.xlu1 %3254 }
0x1847   :  { %v3022_v53 = vpop.permute.xlu1 %3021  ;;  %v2944_v54 = vpop.permute.xlu0 %2943 }
0x1848   :  { %11008 = vmatpush3.xpose.msk.msra.mxu1 %vm496_vm3, %v2944_v54  ;;  %11013 = vmatpush3.xpose.msk.msra.mxu0 %vm496_vm3, %v3022_v53 }
0x1849   :  { %11022 = vmatprep.subr.mxu0 %v12473_v0  ;;  %11017 = vmatprep.subr.mxu1 %v12473_v0 }
0x184b   :  { %v3020_v56 = vpop.permute.xlu1 %3019  ;;  %11010 = vmatmul.mubr.msk.f32.vlgmr.msra.gmra.mrb[30].mxu1 %vm496_vm3, %v13205_v3  ;;  %v3178_v62 = vpop.permute.xlu0 %3177 }
0x184c   :  { %11015 = vmatmul.mubr.msk.f32.vlgmr.msra.gmra.mrb[26].mxu0 %vm496_vm3, %v3020_v56  ;;  %11019 = vmatprep.mubr.msk.f32.mxu1 %vm12474_vm2, %v12473_v0 }
0x184d   :  { %11023 = vmatpush3.xpose.msk.msra.mxu0 %vm496_vm3, %v3178_v62  ;;  %11024 = vmatprep.mubr.msk.f32.mxu0 %vm12474_vm2, %v12473_v0 }
0x184e   :  { %11032 = vmatprep.subr.mxu0 %v12473_v0 }
0x184f   :  { %v3100_v28 = vpop.permute.xlu1 %3099  ;;  %v3176_v29 = vpop.permute.xlu0 %3175 }
0x1850   :  { %11018 = vmatpush3.xpose.msk.msra.mxu1 %vm496_vm3, %v3100_v28  ;;  %11025 = vmatmul.mubr.msk.f32.vlgmr.msra.gmra.mrb[28].mxu0 %vm496_vm3, %v3176_v29 }
0x1851   :  { %11033 = vmatpush3.xpose.msk.msra.mxu0 %vm496_vm3, %v3333_v48  ;;  %11027 = vmatprep.subr.mxu1 %v12473_v0 }
0x1852   :  { %11034 = vmatprep.mubr.msk.f32.mxu0 %vm12474_vm2, %v12473_v0  ;;  %11042 = vmatprep.subr.mxu0 %v12473_v0 }
0x1853   :  { %v3098_v10 = vpop.permute.xlu1 %3097  ;;  %v3411_v5 = vpop.permute.xlu0 %3410 }
0x1854   :  { %11020 = vmatmul.mubr.msk.f32.vlgmr.msra.gmra.mrb[32].mxu1 %vm496_vm3, %v3098_v10 }
0x1855   :  { %11028 = vmatpush3.xpose.msk.msra.mxu1 %vm496_vm3, %v3255_v49  ;;  %11029 = vmatprep.mubr.msk.f32.mxu1 %vm12474_vm2, %v12473_v0 }
0x1856   :  { %11037 = vmatprep.subr.mxu1 %v12473_v0 }
0x1857   :  { %v3331_v11 = vpop.permute.xlu1 %3330  ;;  %v3409_v12 = vpop.permute.xlu0 %3408 }
0x1858   :  { %11030 = vmatmul.mubr.msk.f32.vlgmr.msra.gmra.mrb[34].mxu1 %vm496_vm3, %v13199_v45  ;;  %11035 = vmatmul.mubr.msk.f32.vlgmr.msra.gmra.mrb[30].mxu0 %vm496_vm3, %v3331_v11 }
0x1859   :  { %11038 = vmatpush3.xpose.msk.msra.mxu1 %vm496_vm3, %v3411_v5  ;;  %11039 = vmatprep.mubr.msk.f32.mxu1 %vm12474_vm2, %v12473_v0 }
0x185a   :  { %11044 = vmatprep.mubr.msk.f32.mxu0 %vm12474_vm2, %v12473_v0  ;;  %11047 = vmatprep.subr.mxu1 %v12473_v0 }
0x185b   :  { %v3489_v13 = vpop.permute.xlu1 %3488 }
0x185c   :  { %11040 = vmatmul.mubr.msk.f32.vlgmr.msra.gmra.mrb[36].mxu1 %vm496_vm3, %v3409_v12  ;;  %11043 = vmatpush3.xpose.msk.msra.mxu0 %vm496_vm3, %v3489_v13 }
0x185d   :  { %11052 = vmatprep.subr.mxu0 %v12473_v0  ;;  %11049 = vmatprep.mubr.msk.f32.mxu1 %vm12474_vm2, %v12473_v0 }
0x185f   :  { %v3487_v14 = vpop.permute.xlu1 %3486 }
0x1860   :  { %11045 = vmatmul.mubr.msk.f32.vlgmr.msra.gmra.mrb[32].mxu0 %vm496_vm3, %v3487_v14 }
0x1861   :  { %11054 = vmatprep.mubr.msk.f32.mxu0 %vm12474_vm2, %v12473_v0 }
0x191e   :  { %v3015_v15 = vpop.f32.mrb[30].mxu1 }
0x191f   :  { %v3564_v16 = vmul.f32 0.35355338, %v3015_v15  ;;  %v11011_v17 = vpop.f32.mrb[31].mxu1  ;;  %v3093_v50 = vpop.f32.mrb[26].mxu0 }
0x1920   :  { %v3565_v18 = vmul.f32 0.35355338, %v3093_v50  ;;  %v11016_v19 = vpop.f32.mrb[27].mxu0 }
0x1921   :  { %v3572_v52 = vsel %vm496_vm3, %v3564_v16, -inf }
0x1922   :  { %3573 = vmax.xlane.f32.xlu0 %v3572_v52  ;;  %v3575_v20 = vsel %vm496_vm3, %v3565_v18, -inf }
0x1923   :  { %3576 = vmax.xlane.f32.xlu1 %v3575_v20  ;;  %v3249_v21 = vpop.f32.mrb[28].mxu0 }
0x1924   :  { %v11026_v22 = vpop.f32.mrb[29].mxu0  ;;  %v3567_v30 = vmul.f32 0.35355338, %v3249_v21 }
0x1926   :  { %v3581_v36 = vsel %vm496_vm3, %v3567_v30, -inf }
0x1927   :  { %v3171_v25 = vpop.f32.mrb[32].mxu1 }
0x1928   :  { %v3566_v26 = vmul.f32 0.35355338, %v3171_v25  ;;  %v11021_v27 = vpop.f32.mrb[33].mxu1 }
0x192a   :  { %v3578_v31 = vsel %vm496_vm3, %v3566_v26, -inf }
0x192b   :  { %3579 = vmax.xlane.f32.xlu0 %v3578_v31  ;;  %v3326_v32 = vpop.f32.mrb[34].mxu1  ;;  %v3404_v33 = vpop.f32.mrb[30].mxu0 }
0x192c   :  { %v3569_v9 = vmul.f32 0.35355338, %v3404_v33  ;;  %v11031_v34 = vpop.f32.mrb[35].mxu1  ;;  %v11036_v35 = vpop.f32.mrb[31].mxu0  ;;  %v3568_v8 = vmul.f32 0.35355338, %v3326_v32 }
0x192e   :  { %v3587_v37 = vsel %vm496_vm3, %v3569_v9, -inf  ;;  %v3584_v41 = vsel %vm496_vm3, %v3568_v8, -inf }
0x192f   :  { %3582 = vmax.xlane.f32.xlu0 %v3581_v36  ;;  %3588 = vmax.xlane.f32.xlu1 %v3587_v37  ;;  %v3482_v38 = vpop.f32.mrb[36].mxu1 }
0x1930   :  { %v11041_v39 = vpop.f32.mrb[37].mxu1  ;;  %v3570_v40 = vmul.f32 0.35355338, %v3482_v38 }
0x1932   :  { %v3590_v48 = vsel %vm496_vm3, %v3570_v40, -inf }
0x1933   :  { %3585 = vmax.xlane.f32.xlu0 %v3584_v41  ;;  %v3560_v42 = vpop.f32.mrb[32].mxu0 }
0x1934   :  { %v3571_v43 = vmul.f32 0.35355338, %v3560_v42  ;;  %v11046_v44 = vpop.f32.mrb[33].mxu0 }
0x1936   :  { %v3593_v47 = vsel %vm496_vm3, %v3571_v43, -inf }
0x1937   :  { %3594 = vmax.xlane.f32.xlu1 %v3593_v47  ;;  %3591 = vmax.xlane.f32.xlu0 %v3590_v48 }
0x1948   :  { %3736 = vrot.lane.b32.xlu1 %v13205_v3, %s12482_s25 }
0x194c   :  { %3812 = vrot.lane.b32.xlu1 %v13205_v3, %s12483_s26 }
0x194d   :  { %3660 = vrot.lane.b32.xlu0 %v13205_v3, %s12484_s27 }
0x1950   :  { %3888 = vrot.lane.b32.xlu1 %v13205_v3, %s12485_s28 }
0x1951   :  { %3991 = vrot.lane.b32.xlu0 %v13199_v45, %s12484_s27 }
0x1954   :  { %4067 = vrot.lane.b32.xlu1 %v13199_v45, %s12482_s25 }
0x19af   :  { %v3574_v49 = vpop.xlane.xlu0 %3573 }
0x19b0   :  { %v3596_v53 = vsub.f32 %v3564_v16, %v3574_v49  ;;  %v3577_v54 = vpop.xlane.xlu1 %3576 }
0x19b1   :  { %v3597_v56 = vsub.f32 %v3565_v18, %v3577_v54 }
0x19b2   :  { %v3604_v62 = vmul.f32 1.442695, %v3596_v53 }
0x19b3   :  { %v3606_v28 = vmul.f32 1.442695, %v3597_v56 }
0x19b4   :  { %12189 = vpow2.f32 %v3604_v62 }
0x19b5   :  { %12191 = vpow2.f32 %v3606_v28 }
0x19b8   :  { %v3580_v29 = vpop.xlane.xlu0 %3579 }
0x19b9   :  { %v3598_v10 = vsub.f32 %v3566_v26, %v3580_v29 }
0x19bb   :  { %v3608_v5 = vmul.f32 1.442695, %v3598_v10 }
0x19bc   :  { %v3589_v11 = vpop.xlane.xlu1 %3588  ;;  %v3583_v12 = vpop.xlane.xlu0 %3582 }
0x19bd   :  { %12193 = vpow2.f32 %v3608_v5  ;;  %v3601_v3 = vsub.f32 %v3569_v9, %v3589_v11  ;;  %v3599_v13 = vsub.f32 %v3567_v30, %v3583_v12 }
0x19be   :  { %v12190_v14 = vpop.eup %12189 }
0x19bf   :  { %v12192_v15 = vpop.eup %12191  ;;  %v3610_v17 = vmul.f32 1.442695, %v3599_v13  ;;  %v3620_v50 = vsel %vm496_vm3, %v12190_v14, 0.0  ;;  %v3614_v16 = vmul.f32 1.442695, %v3601_v3 }
0x19c0   :  { %3621 = vadd.xlane.f32.xlu0 %v3620_v50  ;;  %v3586_v18 = vpop.xlane.xlu0 %3585  ;;  %v3623_v19 = vsel %vm496_vm3, %v12192_v15, 0.0 }
0x19c1   :  { %v3600_v52 = vsub.f32 %v3568_v8, %v3586_v18  ;;  %3624 = vadd.xlane.f32.xlu1 %v3623_v19  ;;  %12195 = vpow2.f32 %v3610_v17 }
0x19c2   :  { %12197 = vpow2.f32 %v3614_v16 }
0x19c3   :  { %v3612_v20 = vmul.f32 1.442695, %v3600_v52 }
0x19c4   :  { %v3595_v21 = vpop.xlane.xlu1 %3594  ;;  %v3592_v22 = vpop.xlane.xlu0 %3591 }
0x19c5   :  { %12199 = vpow2.f32 %v3612_v20  ;;  %v3603_v25 = vsub.f32 %v3571_v43, %v3595_v21  ;;  %v3602_v26 = vsub.f32 %v3570_v40, %v3592_v22 }
0x19c7   :  { %v12194_v27 = vpop.eup %12193  ;;  %v3618_v30 = vmul.f32 1.442695, %v3603_v25  ;;  %v3616_v31 = vmul.f32 1.442695, %v3602_v26 }
0x19c8   :  { %v3737_v32 = vpop.permute.xlu1 %3736  ;;  %v3661_v33 = vpop.permute.xlu0 %3660  ;;  %v3626_v9 = vsel %vm496_vm3, %v12194_v27, 0.0 }
0x19c9   :  { %12201 = vpow2.f32 %v3618_v30  ;;  %11053 = vmatpush3.msra.mxu0 %v3737_v32  ;;  %3627 = vadd.xlane.f32.xlu0 %v3626_v9  ;;  %v4322_v32 = vld [vmem:[%s14715_s2 + $0x78] sm:$0xff] }
0x19ca   :  { %12203 = vpow2.f32 %v3616_v31  ;;  %11048 = vmatpush3.msra.mxu1 %v3661_v33  ;;  %11062 = vmatprep.subr.mxu0 %v12473_v0  ;;  %v4323_v33 = vld [vmem:[%s14715_s2 + $0x80] sm:$0xff] }
0x19cb   :  { %11057 = vmatprep.subr.mxu1 %v12473_v0  ;;  %v12196_v34 = vpop.eup %12195  ;;  %v11773_v9 = vpack.c.bf16 %v4323_v33, %v4322_v32 }
0x19cc   :  { %v3629_v35 = vsel %vm496_vm3, %v12196_v34, 0.0  ;;  %v12198_v8 = vpop.eup %12197  ;;  %v3813_v43 = vpop.permute.xlu1 %3812 }
0x19cd   :  { %3630 = vadd.xlane.f32.xlu1 %v3629_v35  ;;  %v3635_v38 = vsel %vm496_vm3, %v12198_v8, 0.0  ;;  %v3992_v47 = vpop.permute.xlu0 %3991  ;;  %v4325_v35 = vld [vmem:[%s14715_s2 + $0x90] sm:$0xff] }
0x19cf   :  { %v12200_v36 = vpop.eup %12199 }
0x19d0   :  { %v3632_v37 = vsel %vm496_vm3, %v12200_v36, 0.0  ;;  %v3889_v44 = vpop.permute.xlu1 %3888 }
0x19d1   :  { %3633 = vadd.xlane.f32.xlu0 %v3632_v37  ;;  %3636 = vadd.xlane.f32.xlu1 %v3635_v38 }
0x19d3   :  { %v13301_v39 = vpop.eup %12201 }
0x19d4   :  { %v13303_v40 = vpop.eup %12203  ;;  %v3641_v41 = vsel %vm496_vm3, %v13301_v39, 0.0  ;;  %v4068_v48 = vpop.permute.xlu1 %4067 }
0x19d5   :  { %v3638_v42 = vsel %vm496_vm3, %v13303_v40, 0.0  ;;  %3642 = vadd.xlane.f32.xlu1 %v3641_v41 }
0x19d6   :  { %3639 = vadd.xlane.f32.xlu0 %v3638_v42 }
0x19e6   :  { %4219 = vrot.lane.b32.xlu1 %v13199_v45, %s12485_s28 }
0x19ec   :  { %4143 = vrot.lane.b32.xlu0 %v13199_v45, %s12483_s26 }
0x1a4d   :  { %v3622_v49 = vpop.xlane.xlu0 %3621 }
0x1a4e   :  { %12205 = vrcp.f32 %v3622_v49  ;;  %v3625_v53 = vpop.xlane.xlu1 %3624 }
0x1a4f   :  { %12207 = vrcp.f32 %v3625_v53 }
0x1a56   :  { %v3628_v54 = vpop.xlane.xlu0 %3627 }
0x1a57   :  { %12209 = vrcp.f32 %v3628_v54 }
0x1a58   :  { %v12206_v56 = vpop.eup %12205 }
0x1a59   :  { %v12208_v62 = vpop.eup %12207  ;;  %v13313_v28 = vmul.f32 %v12206_v56, %v12190_v14 }
0x1a5a   :  { %v13315_v29 = vmul.f32 %v12208_v62, %v12192_v15  ;;  %v3631_v10 = vpop.xlane.xlu1 %3630 }
0x1a5b   :  { %11050 = vmatmul.mubr.msk.f32.vlgmr.msra.gmra.mrb[38].mxu1 %vm496_vm3, %v13313_v28  ;;  %12211 = vrcp.f32 %v3631_v10 }
0x1a5c   :  { %11058 = vmatpush3.msra.mxu1 %v3813_v43  ;;  %11055 = vmatmul.mubr.msk.f32.vlgmr.msra.gmra.mrb[34].mxu0 %vm496_vm3, %v13315_v29 }
0x1a5d   :  { %11063 = vmatpush3.msra.mxu0 %v3889_v44  ;;  %11059 = vmatprep.mubr.msk.f32.mxu1 %vm12474_vm2, %v12473_v0 }
0x1a5e   :  { %v3634_v45 = vpop.xlane.xlu0 %3633  ;;  %11067 = vmatprep.subr.mxu1 %v12473_v0  ;;  %11064 = vmatprep.mubr.msk.f32.mxu0 %vm12474_vm2, %v12473_v0  ;;  %v3637_v5 = vpop.xlane.xlu1 %3636 }
0x1a5f   :  { %12213 = vrcp.f32 %v3634_v45  ;;  %11072 = vmatprep.subr.mxu0 %v12473_v0 }
0x1a60   :  { %12215 = vrcp.f32 %v3637_v5 }
0x1a61   :  { %v12210_v11 = vpop.eup %12209 }
0x1a62   :  { %v13327_v12 = vmul.f32 %v12210_v11, %v12194_v27  ;;  %v3643_v3 = vpop.xlane.xlu1 %3642 }
0x1a63   :  { %v3640_v13 = vpop.xlane.xlu0 %3639  ;;  %12217 = vrcp.f32 %v3643_v3 }
0x1a64   :  { %11060 = vmatmul.mubr.msk.f32.vlgmr.msra.gmra.mrb[40].mxu1 %vm496_vm3, %v13327_v12  ;;  %12219 = vrcp.f32 %v3640_v13 }
0x1a65   :  { %11068 = vmatpush3.msra.mxu1 %v3992_v47  ;;  %11069 = vmatprep.mubr.msk.f32.mxu1 %vm12474_vm2, %v12473_v0  ;;  %v12212_v14 = vpop.eup %12211 }
0x1a66   :  { %11077 = vmatprep.subr.mxu1 %v12473_v0  ;;  %v13334_v15 = vmul.f32 %v12212_v14, %v12196_v34  ;;  %v4220_v52 = vpop.permute.xlu1 %4219  ;;  %v4324_v34 = vld [vmem:[%s14715_s2 + $0x88] sm:$0xff] }
0x1a67   :  { %v4144_v19 = vpop.permute.xlu0 %4143 }
0x1a68   :  { %11065 = vmatmul.mubr.msk.f32.vlgmr.msra.gmra.mrb[36].mxu0 %vm496_vm3, %v13334_v15 }
0x1a69   :  { %v12214_v17 = vpop.eup %12213  ;;  %11073 = vmatpush3.msra.mxu0 %v4068_v48  ;;  %11074 = vmatprep.mubr.msk.f32.mxu0 %vm12474_vm2, %v12473_v0 }
0x1a6a   :  { %v12216_v50 = vpop.eup %12215  ;;  %v13340_v16 = vmul.f32 %v12214_v17, %v12200_v36  ;;  %11082 = vmatprep.subr.mxu0 %v12473_v0 }
0x1a6b   :  { %v13343_v18 = vmul.f32 %v12216_v50, %v12198_v8  ;;  %v11777_v8 = vpack.c.bf16 %v4325_v35, %v4324_v34  ;;  %v10143_v50 = vld [vmem:[%s14717_s4 + $0x32] ss:$0 sm:$0xff] }
0x1a6c   :  { %11070 = vmatmul.mubr.msk.f32.vlgmr.msra.gmra.mrb[42].mxu1 %vm496_vm3, %v13340_v16 }
0x1a6d   :  { %11075 = vmatmul.mubr.msk.f32.vlgmr.msra.gmra.mrb[38].mxu0 %vm496_vm3, %v13343_v18  ;;  %11078 = vmatpush3.msra.mxu1 %v4144_v19  ;;  %v12218_v20 = vpop.eup %12217 }
0x1a6e   :  { %11083 = vmatpush3.msra.mxu0 %v4220_v52  ;;  %11079 = vmatprep.mubr.msk.f32.mxu1 %vm12474_vm2, %v12473_v0  ;;  %v12220_v21 = vpop.eup %12219  ;;  %v13354_v22 = vmul.f32 %v12218_v20, %v13301_v39 }
0x1a6f   :  { %11084 = vmatprep.mubr.msk.f32.mxu0 %vm12474_vm2, %v12473_v0  ;;  %v13357_v25 = vmul.f32 %v12220_v21, %v13303_v40  ;;  %11774 = vmatprep.subr.bf16.mxu1 %v11773_v9 }
0x1a71   :  { %11085 = vmatmul.mubr.msk.f32.vlgmr.msra.gmra.mrb[40].mxu0 %vm496_vm3, %v13354_v22  ;;  %11080 = vmatmul.mubr.msk.f32.vlgmr.msra.gmra.mrb[44].mxu1 %vm496_vm3, %v13357_v25 }
0x1a72   :  { %11776 = vmatpush3.bf16.msra.mxu1 %v11773_v9 }
0x1a73   :  { %11778 = vmatprep.subr.bf16.mxu1 %v11777_v8 }
0x1a76   :  { %11780 = vmatpush3.bf16.msra.mxu1 %v11777_v8 }
0x1b2e   :  { %v3732_v26 = vpop.f32.mrb[38].mxu1 }
0x1b2f   :  { %v11051_v27 = vpop.f32.mrb[39].mxu1  ;;  %v3808_v30 = vpop.f32.mrb[34].mxu0 }
0x1b30   :  { %v11056_v31 = vpop.f32.mrb[35].mxu0  ;;  %3965 = vrot.lane.b32.xlu0 %v3808_v30, %s12487_s13 }
0x1b37   :  { %v3884_v36 = vpop.f32.mrb[40].mxu1 }
0x1b38   :  { %3969 = vrot.lane.b32.xlu1 %v3884_v36, %s12486_s29  ;;  %v11061_v37 = vpop.f32.mrb[41].mxu1 }
0x1b3b   :  { %v3960_v38 = vpop.f32.mrb[36].mxu0 }
0x1b3c   :  { %v11066_v39 = vpop.f32.mrb[37].mxu0  ;;  %3973 = vrot.lane.b32.xlu1 %v3960_v38, %s12488_s14  ;;  %v4454_v38 = vld [vmem:[%s14714_s1 + $0x98] sm:$0xff] }
0x1b3d   :  { %v4455_v39 = vld [vmem:[%s14714_s1 + $0xb8] sm:$0xff] }
0x1b3f   :  { %v4063_v40 = vpop.f32.mrb[42].mxu1 }
0x1b40   :  { %v4139_v41 = vpop.f32.mrb[38].mxu0  ;;  %v11071_v42 = vpop.f32.mrb[43].mxu1 }
0x1b41   :  { %v11076_v43 = vpop.f32.mrb[39].mxu0  ;;  %4296 = vrot.lane.b32.xlu0 %v4139_v41, %s12487_s13  ;;  %v11781_v41 = vpack.c.bf16 %v4455_v39, %v4454_v38  ;;  %v4457_v42 = vld [vmem:[%s14714_s1 + $0xf8] sm:$0xff]  ;;  %v4640_v38 = vld [vmem:[%s14715_s2 + $0xb0] sm:$0xff] }
0x1b43   :  { %11782 = vmatprep.subr.bf16.mxu0 %v11781_v41 }
0x1b44   :  { %v4291_v44 = vpop.f32.mrb[40].mxu0  ;;  %v4215_v47 = vpop.f32.mrb[44].mxu1  ;;  %11784 = vmatpush3.bf16.msra.mxu0 %v11781_v41 }
0x1b45   :  { %v11086_v48 = vpop.f32.mrb[41].mxu0  ;;  %4304 = vrot.lane.b32.xlu1 %v4291_v44, %s12488_s14  ;;  %4300 = vrot.lane.b32.xlu0 %v4215_v47, %s12486_s29  ;;  %v11081_v49 = vpop.f32.mrb[45].mxu1 }
0x1ba2   :  { %v3966_v54 = vpop.permute.xlu0 %3965 }
0x1ba3   :  { %v3976_v56 = vsel %vm496_vm3, %v3732_v26, %v3966_v54 }
0x1baa   :  { %v3970_v53 = vpop.permute.xlu1 %3969 }
0x1bab   :  { %v3977_v62 = vsel %vm35_vm0, %v3976_v56, %v3970_v53 }
0x1bae   :  { %v3974_v10 = vpop.permute.xlu1 %3973 }
0x1baf   :  { %v3978_v45 = vsel %vm1530_vm4, %v3977_v62, %v3974_v10  ;;  %v10146_v62 = vld [vmem:[%s14717_s4 + $0x22] ss:$0 sm:$0xff] }
0x1bb0   :  { %11095 = vmatprep.mubr.msk.f32.mxu1 %vm119_vm1, %v3978_v45  ;;  %v10147_v45 = vld [vmem:[%s14717_s4 + $0x28] ss:$0 sm:$0xff] }
0x1bb3   :  { %v4297_v5 = vpop.permute.xlu0 %4296 }
0x1bb4   :  { %v4307_v3 = vsel %vm496_vm3, %v4063_v40, %v4297_v5  ;;  %v4456_v40 = vld [vmem:[%s14714_s1 + $0xd8] sm:$0xff] }
0x1bb5   :  { %v11785_v43 = vpack.c.bf16 %v4457_v42, %v4456_v40  ;;  %v4566_v40 = vld [vmem:[%s14715_s2 + $0xb8] sm:$0x7] }
0x1bb7   :  { %v4305_v11 = vpop.permute.xlu1 %4304  ;;  %v4301_v13 = vpop.permute.xlu0 %4300  ;;  %11786 = vmatprep.subr.bf16.mxu0 %v11785_v43 }
0x1bb8   :  { %v4308_v14 = vsel %vm35_vm0, %v4307_v3, %v4301_v13  ;;  %11788 = vmatpush3.bf16.msra.mxu0 %v11785_v43 }
0x1bb9   :  { %v4309_v17 = vsel %vm1530_vm4, %v4308_v14, %v4305_v11 }
0x1bba   :  { %11096 = vmatmul.mubr.msk.f32.vlgmr.msra.gmra.mrb[46].mxu1 %vm119_vm1, %v4309_v17 }
0x1c8d   :  { %v11097_v19 = vpop.f32.mrb[46].mxu1 }
0x1c8e   :  { %v4409_v52 = vadd.f32 %v11097_v19, %v10143_v50  ;;  %v4403_v20 = vpop.f32.mrb[47].mxu1 }
0x1c8f   :  { %v4404_v21 = vadd.f32 %v10143_v50, %v4403_v20  ;;  %v10148_v50 = vld [vmem:[%s14717_s4 + $0x2f] ss:$0 sm:$0xff] }
0x1c90   :  { %v13393_v26 = vadd.f32 %v4409_v52, %v13160_v4 }
0x1c91   :  { %v13396_v27 = vadd.f32 %v4404_v21, %v13163_v7 }
0x1c92   :  { %v4419_v30 = vsel %vm119_vm1, %v13393_v26, 0.0 }
0x1c93   :  { %4420 = vadd.xlane.f32.xlu1 %v4419_v30  ;;  %v4416_v31 = vsel %vm119_vm1, %v13396_v27, 0.0 }
0x1c94   :  { %4417 = vadd.xlane.f32.xlu0 %v4416_v31 }
0x1d20   :  { %v4421_v32 = vpop.xlane.xlu1 %4420 }
0x1d21   :  { %v4423_v33 = vmul.f32 0.03125, %v4421_v32  ;;  %v4418_v9 = vpop.xlane.xlu0 %4417 }
0x1d22   :  { %v4422_v34 = vmul.f32 0.03125, %v4418_v9 }
0x1d23   :  { %v4425_v35 = vsub.f32 %v13393_v26, %v4423_v33 }
0x1d24   :  { %v4424_v4 = vsub.f32 %v13396_v27, %v4422_v34 }
0x1d25   :  { %v4427_v36 = vmul.f32 %v4425_v35, %v4425_v35 }
0x1d26   :  { %v4426_v8 = vmul.f32 %v4424_v4, %v4424_v4 }
0x1d27   :  { %v4431_v37 = vsel %vm119_vm1, %v4427_v36, 0.0 }
0x1d28   :  { %v4428_v7 = vsel %vm119_vm1, %v4426_v8, 0.0  ;;  %v4638_v8 = vld [vmem:[%s14715_s2 + $0xa0] sm:$0xff] }
0x1d29   :  { %4429 = vadd.xlane.f32.xlu0 %v4428_v7  ;;  %v4639_v7 = vld [vmem:[%s14715_s2 + $0xa8] sm:$0xff] }
0x1d2a   :  { %v11793_v39 = vpack.c.bf16 %v4640_v38, %v4639_v7 }
0x1d2d   :  { %4432 = vadd.xlane.f32.xlu0 %v4431_v37 }
0x1db6   :  { %v4430_v44 = vpop.xlane.xlu0 %4429 }
0x1db7   :  { %v4434_v47 = vmul.f32 0.03125, %v4430_v44  ;;  %v4574_v44 = vrot.slane %v4566_v40, %v12933_v58 }
0x1db9   :  { %v4436_v48 = vadd.f32 1e-05, %v4434_v47  ;;  %v4579_v47 = vrot.slane %v4566_v40, %v12936_v60 }
0x1dba   :  { %v4433_v49 = vpop.xlane.xlu0 %4432 }
0x1dbb   :  { %12221 = vrsqrt.f32 %v4436_v48  ;;  %v4435_v53 = vmul.f32 0.03125, %v4433_v49  ;;  %v4608_v49 = vld [vmem:[%s14717_s4 + $0x25] sm:$0x1] }
0x1dbd   :  { %v4437_v54 = vadd.f32 1e-05, %v4435_v53 }
0x1dbf   :  { %12223 = vrsqrt.f32 %v4437_v54 }
0x1dc5   :  { %v12222_v56 = vpop.eup %12221 }
0x1dc6   :  { %v4440_v10 = vmul.f32 %v12222_v56, %v4424_v4  ;;  %v4637_v4 = vld [vmem:[%s14715_s2 + $0x98] sm:$0xff]  ;;  %v4587_v56 = vrot.slane %v4566_v40, %v12942_v1 }
0x1dc7   :  { %v11789_v37 = vpack.c.bf16 %v4638_v8, %v4637_v4  ;;  %v10154_v4 = vld [vmem:[%s14717_s4 + $0x2b] ss:$0 sm:$0xff] }
0x1dc8   :  { %v4446_v5 = vmul.f32 %v10146_v62, %v4440_v10 }
0x1dc9   :  { %v12224_v11 = vpop.eup %12223  ;;  %11790 = vmatprep.subr.bf16.mxu1 %v11789_v37 }
0x1dca   :  { %v4441_v3 = vmul.f32 %v12224_v11, %v4425_v35  ;;  %v4452_v13 = vadd.f32 %v10147_v45, %v4446_v5  ;;  %11792 = vmatpush3.bf16.msra.mxu1 %v11789_v37  ;;  %v4610_v11 = vmul.f32 0.999995, %v4608_v49 }
0x1dcb   :  { %11794 = vmatprep.subr.bf16.mxu1 %v11793_v39 }
0x1dcc   :  { %v4447_v14 = vmul.f32 %v10146_v62, %v4441_v3  ;;  %11106 = vmatprep.mubr.msk.f32.mxu0 %vm119_vm1, %v4452_v13 }
0x1dce   :  { %v4453_v17 = vadd.f32 %v10147_v45, %v4447_v14  ;;  %11796 = vmatpush3.bf16.msra.mxu1 %v11793_v39 }
0x1dd0   :  { %11107 = vmatmul.mubr.msk.f32.vlgmr.msra.gmra.mrb[42].mxu0 %vm119_vm1, %v4453_v17 }
0x1ea3   :  { %v11108_v19 = vpop.f32.mrb[42].mxu0 }
0x1ea4   :  { %v4541_v52 = vadd.f32 %v11108_v19, %v10148_v50  ;;  %v4535_v20 = vpop.f32.mrb[43].mxu0 }
0x1ea5   :  { %v4536_v21 = vadd.f32 %v10148_v50, %v4535_v20 }
0x1ea6   :  { %v10152_v30 = vmul.f32 -1.442695, %v4541_v52 }
0x1ea7   :  { %v10151_v31 = vmul.f32 -1.442695, %v4536_v21 }
0x1ea8   :  { %12225 = vpow2.f32 %v10152_v30 }
0x1ea9   :  { %12227 = vpow2.f32 %v10151_v31 }
0x1eb2   :  { %v12226_v32 = vpop.eup %12225 }
0x1eb3   :  { %v12228_v33 = vpop.eup %12227  ;;  %v4551_v9 = vadd.f32 1.0, %v12226_v32 }
0x1eb4   :  { %v4550_v34 = vadd.f32 1.0, %v12228_v33  ;;  %v4614_v33 = vrot.slane %v4610_v11, %v12933_v58 }
0x1eb5   :  { %12229 = vrcp.f32 %v4551_v9 }
0x1eb6   :  { %12231 = vrcp.f32 %v4550_v34 }
0x1ebf   :  { %v12230_v35 = vpop.eup %12229 }
0x1ec0   :  { %v12232_v36 = vpop.eup %12231  ;;  %4560 = vrot.lane.b32.xlu1 %v12230_v35, %s12475_s18 }
0x1ec1   :  { %4558 = vrot.lane.b32.xlu0 %v12232_v36, %s12475_s18 }
0x1f32   :  { %v4561_v41 = vpop.permute.xlu1 %4560 }
0x1f33   :  { %v4565_v42 = vmul.f32 %v4561_v41, %v4541_v52  ;;  %v4559_v43 = vpop.permute.xlu0 %4558 }
0x1f34   :  { %v4564_v48 = vmul.f32 %v4559_v43, %v4536_v21  ;;  %v10153_v21 = vld [vmem:[%s14717_s4 + $0x34] ss:$0 sm:$0xff] }
0x1f35   :  { %v4592_v53 = vrot.slane %v4565_v42, 6  ;;  %v4596_v54 = vrot.slane %v4565_v42, 2  ;;  %v4595_v13 = vmul.f32 %v4579_v47, %v4565_v42 }
0x1f36   :  { %v4568_v62 = vrot.slane %v4564_v48, 6  ;;  %v4581_v10 = vrot.slane %v4564_v48, 2  ;;  %v4580_v19 = vmul.f32 %v4579_v47, %v4564_v48 }
0x1f37   :  { %v4593_v45 = vsel %vm4569_vm7, %v4592_v53, 0.0  ;;  %v4597_v5 = vsel %vm4582_vm8, %v4596_v54, 0.0  ;;  %v10157_v53 = vld [vmem:[%s14717_s4 + $0x33] ss:$0 sm:$0xff] }
0x1f38   :  { %v4594_v3 = vmul.f32 %v4593_v45, %v4574_v44  ;;  %v4570_v14 = vsel %vm4569_vm7, %v4568_v62, 0.0  ;;  %v4583_v17 = vsel %vm4582_vm8, %v4581_v10, 0.0  ;;  %v4598_v52 = vmul.f32 %v4597_v5, %v4587_v56 }
0x1f39   :  { %v4575_v50 = vmul.f32 %v4574_v44, %v4570_v14  ;;  %v4588_v30 = vmul.f32 %v4587_v56, %v4583_v17 }
0x1f3a   :  { %v4600_v20 = vadd.f32 %v4595_v13, %v4594_v3 }
0x1f3b   :  { %v4590_v31 = vadd.f32 %v4580_v19, %v4575_v50 }
0x1f3c   :  { %v4601_v32 = vadd.f32 %v4600_v20, %v4598_v52 }
0x1f3d   :  { %v4591_v9 = vadd.f32 %v4590_v31, %v4588_v30  ;;  %v4769_v30 = vld [vmem:[%s14714_s1 + $0x88] sm:$0xff] }
0x1f3e   :  { %v4607_v34 = vadd.f32 %v10153_v21, %v4601_v32  ;;  %v4770_v31 = vld [vmem:[%s14714_s1 + $0xa8] sm:$0xff] }
0x1f3f   :  { %v4606_v35 = vadd.f32 %v10153_v21, %v4591_v9  ;;  %v4771_v32 = vld [vmem:[%s14714_s1 + $0xc8] sm:$0xff] }
0x1f40   :  { %v4616_v8 = vmul.f32 %v4614_v33, %v4607_v34  ;;  %v4772_v9 = vld [vmem:[%s14714_s1 + $0xe8] sm:$0xff] }
0x1f41   :  { %v4615_v7 = vmul.f32 %v4614_v33, %v4606_v35  ;;  %v11797_v33 = vpack.c.bf16 %v4770_v31, %v4769_v30  ;;  %v11801_v34 = vpack.c.bf16 %v4772_v9, %v4771_v32  ;;  %v4885_v31 = vld [vmem:[%s14716_s3 + $0x1e0] sm:$0xff]  ;;  %v4886_v32 = vld [vmem:[%s14716_s3 + $0x1e8] sm:$0xff]  ;;  %v4887_v9 = vld [vmem:[%s14716_s3 + $0x1f0] sm:$0xff] }
0x1f42   :  { %v4622_v36 = vadd.f32 %v10154_v4, %v4616_v8 }
0x1f43   :  { %v4621_v37 = vadd.f32 %v10154_v4, %v4615_v7  ;;  %11798 = vmatprep.subr.bf16.mxu0 %v11797_v33 }
0x1f44   :  { %v10156_v38 = vmul.f32 -1.442695, %v4622_v36  ;;  %11800 = vmatpush3.bf16.msra.mxu0 %v11797_v33  ;;  %v11829_v33 = vpack.c.bf16 %v4886_v32, %v4885_v31 }
0x1f45   :  { %v10155_v39 = vmul.f32 -1.442695, %v4621_v37  ;;  %11802 = vmatprep.subr.bf16.mxu0 %v11801_v34 }
0x1f46   :  { %12233 = vpow2.f32 %v10156_v38 }
0x1f47   :  { %12235 = vpow2.f32 %v10155_v39  ;;  %v10160_v39 = vld [vmem:[%s14717_s4 + $0x23] ss:$0 sm:$0xff] }
0x1f48   :  { %11804 = vmatpush3.bf16.msra.mxu0 %v11801_v34  ;;  %v4888_v34 = vld [vmem:[%s14716_s3 + $0x1f8] sm:$0xff] }
0x1f50   :  { %v12234_v40 = vpop.eup %12233 }
0x1f51   :  { %v12236_v41 = vpop.eup %12235  ;;  %v4630_v42 = vadd.f32 1.0, %v12234_v40 }
0x1f52   :  { %v4629_v43 = vadd.f32 1.0, %v12236_v41 }
0x1f53   :  { %12237 = vrcp.f32 %v4630_v42 }
0x1f54   :  { %12239 = vrcp.f32 %v4629_v43  ;;  %v10161_v43 = vld [vmem:[%s14717_s4 + $0x29] ss:$0 sm:$0xff] }
0x1f5d   :  { %v12238_v44 = vpop.eup %12237 }
0x1f5e   :  { %v12240_v47 = vpop.eup %12239  ;;  %v4636_v49 = vmul.f32 %v12238_v44, %v4622_v36 }
0x1f5f   :  { %v4635_v48 = vmul.f32 %v12240_v47, %v4621_v37 }
0x1f61   :  { %11117 = vmatprep.mubr.msk.f32.mxu1 %vm119_vm1, %v4635_v48 }
0x1f62   :  { %11118 = vmatmul.mubr.msk.f32.vlgmr.msra.gmra.mrb[48].mxu1 %vm119_vm1, %v4636_v49 }
0x2035   :  { %v11119_v54 = vpop.f32.mrb[48].mxu1 }
0x2036   :  { %v4724_v56 = vadd.f32 %v11119_v54, %v10157_v53  ;;  %v4718_v62 = vpop.f32.mrb[49].mxu1  ;;  %v4874_v54 = vld [vmem:[%s14716_s3 + $0x188] sm:$0xff] }
0x2037   :  { %v4719_v10 = vadd.f32 %v10157_v53, %v4718_v62  ;;  %v4873_v53 = vld [vmem:[%s14716_s3 + $0x180] sm:$0xff]  ;;  %v4875_v62 = vld [vmem:[%s14716_s3 + $0x190] sm:$0xff] }
0x2038   :  { %v13471_v45 = vadd.f32 %v4724_v56, %v13393_v26  ;;  %v11805_v56 = vpack.c.bf16 %v4874_v54, %v4873_v53  ;;  %v10167_v53 = vld [vmem:[%s14717_s4 + $0x31] ss:$0 sm:$0xff] }
0x2039   :  { %v13474_v5 = vadd.f32 %v4719_v10, %v13396_v27  ;;  %v4876_v10 = vld [vmem:[%s14716_s3 + $0x198] sm:$0xff] }
0x203a   :  { %v4734_v11 = vsel %vm119_vm1, %v13471_v45, 0.0  ;;  %11806 = vmatprep.subr.bf16.mxu1 %v11805_v56 }
0x203b   :  { %4735 = vadd.xlane.f32.xlu0 %v4734_v11  ;;  %v4731_v3 = vsel %vm119_vm1, %v13474_v5, 0.0  ;;  %11808 = vmatpush3.bf16.msra.mxu1 %v11805_v56  ;;  %v11809_v11 = vpack.c.bf16 %v4876_v10, %v4875_v62 }
0x203c   :  { %4732 = vadd.xlane.f32.xlu1 %v4731_v3  ;;  %v4877_v3 = vld [vmem:[%s14716_s3 + $0x1a0] sm:$0xff] }
0x203d   :  { %11810 = vmatprep.subr.bf16.mxu1 %v11809_v11 }
0x203f   :  { %11812 = vmatpush3.bf16.msra.mxu1 %v11809_v11 }
0x20c8   :  { %v4736_v13 = vpop.xlane.xlu0 %4735 }
0x20c9   :  { %v4738_v14 = vmul.f32 0.03125, %v4736_v13  ;;  %v4733_v17 = vpop.xlane.xlu1 %4732  ;;  %v4878_v13 = vld [vmem:[%s14716_s3 + $0x1a8] sm:$0xff] }
0x20ca   :  { %v4737_v50 = vmul.f32 0.03125, %v4733_v17  ;;  %v4879_v17 = vld [vmem:[%s14716_s3 + $0x1b0] sm:$0xff] }
0x20cb   :  { %v4740_v19 = vsub.f32 %v13471_v45, %v4738_v14  ;;  %v11813_v14 = vpack.c.bf16 %v4878_v13, %v4877_v3 }
0x20cc   :  { %v4739_v26 = vsub.f32 %v13474_v5, %v4737_v50  ;;  %v4880_v50 = vld [vmem:[%s14716_s3 + $0x1b8] sm:$0xff] }
0x20cd   :  { %v4742_v52 = vmul.f32 %v4740_v19, %v4740_v19  ;;  %11814 = vmatprep.subr.bf16.mxu1 %v11813_v14 }
0x20ce   :  { %v4741_v20 = vmul.f32 %v4739_v26, %v4739_v26  ;;  %11816 = vmatpush3.bf16.msra.mxu1 %v11813_v14 }
0x20cf   :  { %v4746_v27 = vsel %vm119_vm1, %v4742_v52, 0.0  ;;  %v4882_v52 = vld [vmem:[%s14716_s3 + $0x1c8] sm:$0xff] }
0x20d0   :  { %4747 = vadd.xlane.f32.xlu1 %v4746_v27  ;;  %v4743_v21 = vsel %vm119_vm1, %v4741_v20, 0.0  ;;  %v4883_v27 = vld [vmem:[%s14716_s3 + $0x1d0] sm:$0xff] }
0x20d1   :  { %4744 = vadd.xlane.f32.xlu0 %v4743_v21  ;;  %v4884_v21 = vld [vmem:[%s14716_s3 + $0x1d8] sm:$0xff] }
0x20d2   :  { %v11825_v30 = vpack.c.bf16 %v4884_v21, %v4883_v27 }
0x215d   :  { %v4748_v35 = vpop.xlane.xlu1 %4747 }
0x215e   :  { %v4750_v4 = vmul.f32 0.03125, %v4748_v35  ;;  %v4745_v8 = vpop.xlane.xlu0 %4744  ;;  %v11833_v35 = vpack.c.bf16 %v4888_v34, %v4887_v9 }
0x215f   :  { %v4749_v7 = vmul.f32 0.03125, %v4745_v8 }
0x2160   :  { %v4752_v36 = vadd.f32 1e-05, %v4750_v4  ;;  %v10162_v4 = vld [vmem:[%s14717_s4 + $0x2d] ss:$0 sm:$0xff] }
0x2161   :  { %v4751_v37 = vadd.f32 1e-05, %v4749_v7 }
0x2162   :  { %12241 = vrsqrt.f32 %v4752_v36 }
0x2163   :  { %12243 = vrsqrt.f32 %v4751_v37 }
0x216c   :  { %v12242_v38 = vpop.eup %12241 }
0x216d   :  { %v12244_v40 = vpop.eup %12243  ;;  %v4756_v41 = vmul.f32 %v12242_v38, %v4740_v19  ;;  %v11817_v19 = vpack.c.bf16 %v4880_v50, %v4879_v17 }
0x216e   :  { %v4755_v42 = vmul.f32 %v12244_v40, %v4739_v26  ;;  %v4881_v26 = vld [vmem:[%s14716_s3 + $0x1c0] sm:$0xff] }
0x216f   :  { %v4762_v44 = vmul.f32 %v10160_v39, %v4756_v41  ;;  %11818 = vmatprep.subr.bf16.mxu1 %v11817_v19  ;;  %v11821_v20 = vpack.c.bf16 %v4882_v52, %v4881_v26 }
0x2170   :  { %v4761_v47 = vmul.f32 %v10160_v39, %v4755_v42  ;;  %11820 = vmatpush3.bf16.msra.mxu1 %v11817_v19 }
0x2171   :  { %v4768_v49 = vadd.f32 %v10161_v43, %v4762_v44  ;;  %11822 = vmatprep.subr.bf16.mxu1 %v11821_v20 }
0x2172   :  { %v4767_v48 = vadd.f32 %v10161_v43, %v4761_v47 }
0x2174   :  { %11128 = vmatprep.mubr.msk.f32.mxu0 %vm119_vm1, %v4767_v48  ;;  %11824 = vmatpush3.bf16.msra.mxu1 %v11821_v20 }
0x2175   :  { %11129 = vmatmul.mubr.msk.f32.vlgmr.msra.gmra.mrb[44].mxu0 %vm119_vm1, %v4768_v49  ;;  %11826 = vmatprep.subr.bf16.mxu1 %v11825_v30 }
0x2178   :  { %11828 = vmatpush3.bf16.msra.mxu1 %v11825_v30 }
0x2179   :  { %11830 = vmatprep.subr.bf16.mxu1 %v11829_v33 }
0x217c   :  { %11832 = vmatpush3.bf16.msra.mxu1 %v11829_v33 }
0x217d   :  { %11834 = vmatprep.subr.bf16.mxu1 %v11833_v35 }
0x2180   :  { %11836 = vmatpush3.bf16.msra.mxu1 %v11833_v35 }
0x2248   :  { %v11130_v8 = vpop.f32.mrb[44].mxu0 }
0x2249   :  { %v4856_v7 = vadd.f32 %v11130_v8, %v10162_v4  ;;  %v4850_v36 = vpop.f32.mrb[45].mxu0 }
0x224a   :  { %v4851_v37 = vadd.f32 %v10162_v4, %v4850_v36 }
0x224b   :  { %v10166_v38 = vmul.f32 -1.442695, %v4856_v7 }
0x224c   :  { %v10165_v39 = vmul.f32 -1.442695, %v4851_v37 }
0x224d   :  { %12245 = vpow2.f32 %v10166_v38 }
0x224e   :  { %12247 = vpow2.f32 %v10165_v39  ;;  %v10169_v39 = vld [vmem:[%s14717_s4 + $0x2a] ss:$0 sm:$0xff] }
0x2257   :  { %v12246_v40 = vpop.eup %12245 }
0x2258   :  { %v12248_v41 = vpop.eup %12247  ;;  %v4866_v42 = vadd.f32 1.0, %v12246_v40 }
0x2259   :  { %v4865_v43 = vadd.f32 1.0, %v12248_v41 }
0x225a   :  { %12249 = vrcp.f32 %v4866_v42 }
0x225b   :  { %12251 = vrcp.f32 %v4865_v43 }
0x2264   :  { %v12250_v44 = vpop.eup %12249 }
0x2265   :  { %v12252_v47 = vpop.eup %12251  ;;  %v4872_v49 = vmul.f32 %v12250_v44, %v4856_v7  ;;  %v10168_v7 = vld [vmem:[%s14717_s4 + $0x24] ss:$0 sm:$0xff] }
0x2266   :  { %v4871_v48 = vmul.f32 %v12252_v47, %v4851_v37 }
0x2268   :  { %11163 = vmatprep.mubr.f32.mxu1 %v4871_v48 }
0x2269   :  { %11164 = vmatmul.mubr.f32.vlgmr.msra.gmra.mrb[50].mxu1 %v4872_v49 }
0x233c   :  { %v11165_v54 = vpop.f32.mrb[50].mxu1 }
0x233d   :  { %v4966_v56 = vadd.f32 %v11165_v54, %v10167_v53  ;;  %v4960_v62 = vpop.f32.mrb[51].mxu1 }
0x233e   :  { %v4961_v10 = vadd.f32 %v10167_v53, %v4960_v62 }
0x233f   :  { %v4970_v11 = vmul.f32 0.5, %v4966_v56 }
0x2340   :  { %v4969_v3 = vmul.f32 0.5, %v4961_v10 }
0x2341   :  { %v4972_v13 = vadd.f32 %v4970_v11, %v13471_v45 }
0x2342   :  { %v4971_v14 = vadd.f32 %v4969_v3, %v13474_v5 }
0x2343   :  { %v4978_v17 = vsel %vm119_vm1, %v4972_v13, 0.0 }
0x2344   :  { %4979 = vadd.xlane.f32.xlu1 %v4978_v17  ;;  %v4975_v50 = vsel %vm119_vm1, %v4971_v14, 0.0  ;;  %v5056_v17 = vld [vmem:[%s14714_s1 + $0x120] sm:$0xff] }
0x2345   :  { %4976 = vadd.xlane.f32.xlu0 %v4975_v50  ;;  %v5057_v50 = vld [vmem:[%s14714_s1 + $0x140] sm:$0xff] }
0x23d1   :  { %v4980_v19 = vpop.xlane.xlu1 %4979 }
0x23d2   :  { %v4982_v26 = vmul.f32 0.03125, %v4980_v19  ;;  %v4977_v52 = vpop.xlane.xlu0 %4976 }
0x23d3   :  { %v4981_v20 = vmul.f32 0.03125, %v4977_v52 }
0x23d4   :  { %v4984_v27 = vsub.f32 %v4972_v13, %v4982_v26  ;;  %v5058_v26 = vld [vmem:[%s14714_s1 + $0x160] sm:$0xff] }
0x23d5   :  { %v4983_v21 = vsub.f32 %v4971_v14, %v4981_v20  ;;  %v5055_v14 = vld [vmem:[%s14714_s1 + $0x100] sm:$0xff]  ;;  %v11841_v52 = vpack.c.bf16 %v5058_v26, %v5057_v50  ;;  %v5173_v50 = vld [vmem:[%s14716_s3 + $0x270] sm:$0xff] }
0x23d6   :  { %v4986_v30 = vmul.f32 %v4984_v27, %v4984_v27  ;;  %v11837_v19 = vpack.c.bf16 %v5056_v17, %v5055_v14  ;;  %v5172_v14 = vld [vmem:[%s14716_s3 + $0x268] sm:$0xff] }
0x23d7   :  { %v4985_v31 = vmul.f32 %v4983_v21, %v4983_v21 }
0x23d8   :  { %v4990_v32 = vsel %vm119_vm1, %v4986_v30, 0.0  ;;  %11838 = vmatprep.subr.bf16.mxu0 %v11837_v19 }
0x23d9   :  { %4991 = vadd.xlane.f32.xlu1 %v4990_v32  ;;  %v4987_v45 = vsel %vm119_vm1, %v4985_v31, 0.0  ;;  %11840 = vmatpush3.bf16.msra.mxu0 %v11837_v19  ;;  %v5174_v19 = vld [vmem:[%s14716_s3 + $0x278] sm:$0xff] }
0x23da   :  { %4988 = vadd.xlane.f32.xlu0 %v4987_v45  ;;  %11842 = vmatprep.subr.bf16.mxu0 %v11841_v52  ;;  %v11873_v26 = vpack.c.bf16 %v5174_v19, %v5173_v50  ;;  %v5301_v50 = vld [vmem:[%s14714_s1 + $0x150] sm:$0xff] }
0x23dd   :  { %11844 = vmatpush3.bf16.msra.mxu0 %v11841_v52  ;;  %v10172_v52 = vld [vmem:[%s14717_s4 + $0x44] ss:$0 sm:$0xff] }
0x2466   :  { %v4992_v5 = vpop.xlane.xlu1 %4991 }
0x2467   :  { %v4994_v33 = vmul.f32 0.03125, %v4992_v5  ;;  %v4989_v9 = vpop.xlane.xlu0 %4988  ;;  %v10170_v5 = vld [vmem:[%s14717_s4 + $0x38] ss:$0 sm:$0xff] }
0x2468   :  { %v4993_v34 = vmul.f32 0.03125, %v4989_v9 }
0x2469   :  { %v4996_v35 = vadd.f32 1e-05, %v4994_v33 }
0x246a   :  { %v4995_v4 = vadd.f32 1e-05, %v4993_v34 }
0x246b   :  { %12253 = vrsqrt.f32 %v4996_v35  ;;  %v10171_v35 = vld [vmem:[%s14717_s4 + $0x3e] ss:$0 sm:$0xff] }
0x246c   :  { %12255 = vrsqrt.f32 %v4995_v4 }
0x2475   :  { %v12254_v8 = vpop.eup %12253 }
0x2476   :  { %v12256_v36 = vpop.eup %12255  ;;  %v5000_v37 = vmul.f32 %v12254_v8, %v4984_v27 }
0x2477   :  { %v4999_v38 = vmul.f32 %v12256_v36, %v4983_v21 }
0x2478   :  { %v5006_v40 = vmul.f32 %v10168_v7, %v5000_v37  ;;  %v5159_v37 = vld [vmem:[%s14716_s3 + $0x200] sm:$0xff] }
0x2479   :  { %v5005_v41 = vmul.f32 %v10168_v7, %v4999_v38  ;;  %v5160_v38 = vld [vmem:[%s14716_s3 + $0x208] sm:$0xff] }
0x247a   :  { %v5012_v42 = vadd.f32 %v10169_v39, %v5006_v40  ;;  %v5161_v40 = vld [vmem:[%s14716_s3 + $0x210] sm:$0xff] }
0x247b   :  { %v5011_v43 = vadd.f32 %v10169_v39, %v5005_v41  ;;  %v11845_v39 = vpack.c.bf16 %v5160_v38, %v5159_v37  ;;  %v5162_v41 = vld [vmem:[%s14716_s3 + $0x218] sm:$0xff] }
0x247c   :  { %v13571_v44 = vadd.f32 %v5012_v42, %v13069_v23  ;;  %v11849_v42 = vpack.c.bf16 %v5162_v41, %v5161_v40 }
0x247d   :  { %v13574_v47 = vadd.f32 %v5011_v43, %v13072_v24  ;;  %11846 = vmatprep.subr.bf16.mxu0 %v11845_v39  ;;  %v5163_v43 = vld [vmem:[%s14716_s3 + $0x220] sm:$0xff] }
0x247e   :  { %v5020_v48 = vsel %vm119_vm1, %v13571_v44, 0.0 }
0x247f   :  { %5021 = vadd.xlane.f32.xlu1 %v5020_v48  ;;  %v5017_v49 = vsel %vm119_vm1, %v13574_v47, 0.0  ;;  %v5164_v48 = vld [vmem:[%s14716_s3 + $0x228] sm:$0xff] }
0x2480   :  { %5018 = vadd.xlane.f32.xlu0 %v5017_v49  ;;  %v11853_v49 = vpack.c.bf16 %v5164_v48, %v5163_v43 }
0x250c   :  { %v5022_v53 = vpop.xlane.xlu1 %5021 }
0x250d   :  { %v5024_v54 = vmul.f32 0.03125, %v5022_v53  ;;  %v5019_v56 = vpop.xlane.xlu0 %5018  ;;  %v5165_v53 = vld [vmem:[%s14716_s3 + $0x230] sm:$0xff] }
0x250e   :  { %v5023_v62 = vmul.f32 0.03125, %v5019_v56 }
0x250f   :  { %v5026_v10 = vsub.f32 %v13571_v44, %v5024_v54  ;;  %v5166_v54 = vld [vmem:[%s14716_s3 + $0x238] sm:$0xff] }
0x2510   :  { %v5025_v23 = vsub.f32 %v13574_v47, %v5023_v62  ;;  %v11857_v56 = vpack.c.bf16 %v5166_v54, %v5165_v53  ;;  %v5167_v62 = vld [vmem:[%s14716_s3 + $0x240] sm:$0xff] }
0x2511   :  { %v5028_v11 = vmul.f32 %v5026_v10, %v5026_v10 }
0x2512   :  { %v5027_v3 = vmul.f32 %v5025_v23, %v5025_v23 }
0x2513   :  { %v5032_v24 = vsel %vm119_vm1, %v5028_v11, 0.0  ;;  %v5169_v11 = vld [vmem:[%s14716_s3 + $0x250] sm:$0xff] }
0x2514   :  { %5033 = vadd.xlane.f32.xlu1 %v5032_v24  ;;  %v5029_v13 = vsel %vm119_vm1, %v5027_v3, 0.0  ;;  %v5170_v3 = vld [vmem:[%s14716_s3 + $0x258] sm:$0xff] }
0x2515   :  { %5030 = vadd.xlane.f32.xlu0 %v5029_v13  ;;  %v11865_v24 = vpack.c.bf16 %v5170_v3, %v5169_v11  ;;  %v5171_v13 = vld [vmem:[%s14716_s3 + $0x260] sm:$0xff] }
0x2516   :  { %v11869_v17 = vpack.c.bf16 %v5172_v14, %v5171_v13  ;;  %v5299_v14 = vld [vmem:[%s14714_s1 + $0x110] sm:$0xff] }
0x25a1   :  { %v5034_v20 = vpop.xlane.xlu1 %5033 }
0x25a2   :  { %v5036_v27 = vmul.f32 0.03125, %v5034_v20  ;;  %v5031_v21 = vpop.xlane.xlu0 %5030 }
0x25a3   :  { %v5035_v30 = vmul.f32 0.03125, %v5031_v21 }
0x25a4   :  { %v5038_v31 = vadd.f32 1e-05, %v5036_v27 }
0x25a5   :  { %v5037_v32 = vadd.f32 1e-05, %v5035_v30 }
0x25a6   :  { %12257 = vrsqrt.f32 %v5038_v31 }
0x25a7   :  { %12259 = vrsqrt.f32 %v5037_v32 }
0x25b0   :  { %v12258_v45 = vpop.eup %12257 }
0x25b1   :  { %v12260_v33 = vpop.eup %12259  ;;  %v5042_v9 = vmul.f32 %v12258_v45, %v5026_v10  ;;  %v5168_v10 = vld [vmem:[%s14716_s3 + $0x248] sm:$0xff] }
0x25b2   :  { %v5041_v34 = vmul.f32 %v12260_v33, %v5025_v23  ;;  %v11861_v23 = vpack.c.bf16 %v5168_v10, %v5167_v62 }
0x25b3   :  { %v5048_v4 = vmul.f32 %v10170_v5, %v5042_v9 }
0x25b4   :  { %v5047_v8 = vmul.f32 %v10170_v5, %v5041_v34 }
0x25b5   :  { %v5054_v36 = vadd.f32 %v10171_v35, %v5048_v4 }
0x25b6   :  { %v5053_v7 = vadd.f32 %v10171_v35, %v5047_v8 }
0x25b8   :  { %11174 = vmatprep.mubr.msk.f32.mxu0 %vm119_vm1, %v5053_v7  ;;  %v10177_v7 = vld [vmem:[%s14717_s4 + $0x48] ss:$0 sm:$0xff] }
0x25b9   :  { %11175 = vmatmul.mubr.msk.f32.vlgmr.msra.gmra.mrb[46].mxu0 %vm119_vm1, %v5054_v36 }
0x25ba   :  { %11848 = vmatpush3.bf16.msra.mxu0 %v11845_v39 }
0x25bb   :  { %11850 = vmatprep.subr.bf16.mxu0 %v11849_v42 }
0x25be   :  { %11852 = vmatpush3.bf16.msra.mxu0 %v11849_v42 }
0x25bf   :  { %11854 = vmatprep.subr.bf16.mxu0 %v11853_v49 }
0x25c2   :  { %11856 = vmatpush3.bf16.msra.mxu0 %v11853_v49 }
0x25c3   :  { %11858 = vmatprep.subr.bf16.mxu0 %v11857_v56 }
0x25c6   :  { %11860 = vmatpush3.bf16.msra.mxu0 %v11857_v56 }
0x25c7   :  { %11862 = vmatprep.subr.bf16.mxu0 %v11861_v23 }
0x25ca   :  { %11864 = vmatpush3.bf16.msra.mxu0 %v11861_v23 }
0x25cb   :  { %11866 = vmatprep.subr.bf16.mxu0 %v11865_v24 }
0x25ce   :  { %11868 = vmatpush3.bf16.msra.mxu0 %v11865_v24 }
0x25cf   :  { %11870 = vmatprep.subr.bf16.mxu0 %v11869_v17 }
0x25d2   :  { %11872 = vmatpush3.bf16.msra.mxu0 %v11869_v17  ;;  %v5300_v17 = vld [vmem:[%s14714_s1 + $0x130] sm:$0xff] }
0x25d3   :  { %11874 = vmatprep.subr.bf16.mxu0 %v11873_v26  ;;  %v11877_v19 = vpack.c.bf16 %v5300_v17, %v5299_v14 }
0x25d5   :  { %11878 = vmatprep.subr.bf16.mxu1 %v11877_v19 }
0x25d6   :  { %11876 = vmatpush3.bf16.msra.mxu0 %v11873_v26  ;;  %v5302_v26 = vld [vmem:[%s14714_s1 + $0x170] sm:$0xff]  ;;  %11880 = vmatpush3.bf16.msra.mxu1 %v11877_v19 }
0x25d7   :  { %11228 = vmatprep.subr.mxu0 %v12473_v0 }
0x268c   :  { %v11176_v20 = vpop.f32.mrb[46].mxu0 }
0x268d   :  { %v5142_v27 = vadd.f32 %v11176_v20, %v10172_v52  ;;  %v5136_v21 = vpop.f32.mrb[47].mxu0 }
0x268e   :  { %v5137_v30 = vadd.f32 %v10172_v52, %v5136_v21  ;;  %v11881_v52 = vpack.c.bf16 %v5302_v26, %v5301_v50 }
0x268f   :  { %v10176_v31 = vmul.f32 -1.442695, %v5142_v27 }
0x2690   :  { %v10175_v32 = vmul.f32 -1.442695, %v5137_v30  ;;  %11882 = vmatprep.subr.bf16.mxu1 %v11881_v52 }
0x2691   :  { %12261 = vpow2.f32 %v10176_v31  ;;  %11884 = vmatpush3.bf16.msra.mxu1 %v11881_v52 }
0x2692   :  { %12263 = vpow2.f32 %v10175_v32  ;;  %11223 = vmatprep.subr.mxu1 %v12473_v0 }
0x269b   :  { %v12262_v45 = vpop.eup %12261 }
0x269c   :  { %v12264_v5 = vpop.eup %12263  ;;  %v5152_v33 = vadd.f32 1.0, %v12262_v45 }
0x269d   :  { %v5151_v9 = vadd.f32 1.0, %v12264_v5  ;;  %v10178_v5 = vld [vmem:[%s14717_s4 + $0x39] ss:$0 sm:$0xff] }
0x269e   :  { %12265 = vrcp.f32 %v5152_v33 }
0x269f   :  { %12267 = vrcp.f32 %v5151_v9 }
0x26a8   :  { %v12266_v34 = vpop.eup %12265 }
0x26a9   :  { %v12268_v35 = vpop.eup %12267  ;;  %v5158_v8 = vmul.f32 %v12266_v34, %v5142_v27 }
0x26aa   :  { %v5157_v4 = vmul.f32 %v12268_v35, %v5137_v30  ;;  %v10179_v35 = vld [vmem:[%s14717_s4 + $0x3f] ss:$0 sm:$0xff] }
0x26ac   :  { %11209 = vmatprep.mubr.f32.mxu0 %v5157_v4 }
0x26ad   :  { %11210 = vmatmul.mubr.f32.vlgmr.msra.gmra.mrb[48].mxu0 %v5158_v8 }
0x26ae   :  { %11230 = vmatprep.mubr.msk.f32.mxu0 %vm12474_vm2, %v12473_v0 }
0x2780   :  { %v11211_v36 = vpop.f32.mrb[48].mxu0 }
0x2781   :  { %v5252_v37 = vadd.f32 %v11211_v36, %v10177_v7  ;;  %v5246_v38 = vpop.f32.mrb[49].mxu0 }
0x2782   :  { %v5247_v39 = vadd.f32 %v10177_v7, %v5246_v38 }
0x2783   :  { %v5256_v40 = vmul.f32 0.5, %v5252_v37  ;;  %v10180_v37 = vld [vmem:[%s14717_s4 + $0x46] ss:$0 sm:$0xff] }
0x2784   :  { %v5255_v41 = vmul.f32 0.5, %v5247_v39 }
0x2785   :  { %v13662_v42 = vadd.f32 %v5256_v40, %v13571_v44 }
0x2786   :  { %v13665_v43 = vadd.f32 %v5255_v41, %v13574_v47 }
0x2787   :  { %v5264_v48 = vsel %vm119_vm1, %v13662_v42, 0.0 }
0x2788   :  { %5265 = vadd.xlane.f32.xlu1 %v5264_v48  ;;  %v5261_v49 = vsel %vm119_vm1, %v13665_v43, 0.0 }
0x2789   :  { %5262 = vadd.xlane.f32.xlu0 %v5261_v49 }
0x2815   :  { %v5266_v53 = vpop.xlane.xlu1 %5265 }
0x2816   :  { %v5268_v54 = vmul.f32 0.03125, %v5266_v53  ;;  %v5263_v56 = vpop.xlane.xlu0 %5262 }
0x2817   :  { %v5267_v62 = vmul.f32 0.03125, %v5263_v56 }
0x2818   :  { %v5270_v10 = vsub.f32 %v13662_v42, %v5268_v54 }
0x2819   :  { %v5269_v23 = vsub.f32 %v13665_v43, %v5267_v62 }
0x281a   :  { %v5272_v11 = vmul.f32 %v5270_v10, %v5270_v10 }
0x281b   :  { %v5271_v3 = vmul.f32 %v5269_v23, %v5269_v23 }
0x281c   :  { %v5276_v24 = vsel %vm119_vm1, %v5272_v11, 0.0 }
0x281d   :  { %5277 = vadd.xlane.f32.xlu1 %v5276_v24  ;;  %v5273_v13 = vsel %vm119_vm1, %v5271_v3, 0.0 }
0x281e   :  { %5274 = vadd.xlane.f32.xlu0 %v5273_v13 }
0x28aa   :  { %v5278_v20 = vpop.xlane.xlu1 %5277 }
0x28ab   :  { %v5280_v27 = vmul.f32 0.03125, %v5278_v20  ;;  %v5275_v21 = vpop.xlane.xlu0 %5274 }
0x28ac   :  { %v5279_v30 = vmul.f32 0.03125, %v5275_v21 }
0x28ad   :  { %v5282_v31 = vadd.f32 1e-05, %v5280_v27 }
0x28ae   :  { %v5281_v32 = vadd.f32 1e-05, %v5279_v30 }
0x28af   :  { %12269 = vrsqrt.f32 %v5282_v31 }
0x28b0   :  { %12271 = vrsqrt.f32 %v5281_v32 }
0x28b9   :  { %v12270_v45 = vpop.eup %12269 }
0x28ba   :  { %v12272_v33 = vpop.eup %12271  ;;  %v5286_v9 = vmul.f32 %v12270_v45, %v5270_v10 }
0x28bb   :  { %v5285_v34 = vmul.f32 %v12272_v33, %v5269_v23 }
0x28bc   :  { %v5292_v4 = vmul.f32 %v10178_v5, %v5286_v9 }
0x28bd   :  { %v5291_v8 = vmul.f32 %v10178_v5, %v5285_v34 }
0x28be   :  { %v5298_v36 = vadd.f32 %v10179_v35, %v5292_v4 }
0x28bf   :  { %v5297_v7 = vadd.f32 %v10179_v35, %v5291_v8 }
0x28c1   :  { %11220 = vmatprep.mubr.msk.f32.mxu1 %vm119_vm1, %v5297_v7 }
0x28c2   :  { %11221 = vmatmul.mubr.msk.f32.vlgmr.msra.gmra.mrb[52].mxu1 %vm119_vm1, %v5298_v36 }
0x28c3   :  { %11225 = vmatprep.mubr.msk.f32.mxu1 %vm12474_vm2, %v12473_v0 }
0x2995   :  { %v11222_v38 = vpop.f32.mrb[52].mxu1 }
0x2996   :  { %v13701_v39 = vadd.f32 %v11222_v38, %v10180_v37  ;;  %v5380_v40 = vpop.f32.mrb[53].mxu1 }
0x2997   :  { %v13707_v41 = vadd.f32 %v10180_v37, %v5380_v40 }
0x2998   :  { %5779 = vrot.lane.b32.xlu0 %v13701_v39, %s12476_s19  ;;  %5701 = vrot.lane.b32.xlu1 %v13701_v39, %s12475_s18 }
0x299c   :  { %5468 = vrot.lane.b32.xlu1 %v13707_v41, %s12476_s19  ;;  %5390 = vrot.lane.b32.xlu0 %v13707_v41, %s12475_s18 }
0x29a0   :  { %5466 = vrot.lane.b32.xlu1 %v13707_v41, %s12477_s20  ;;  %5624 = vrot.lane.b32.xlu0 %v13707_v41, %s12481_s24 }
0x29a4   :  { %5546 = vrot.lane.b32.xlu1 %v13707_v41, %s12479_s22  ;;  %5622 = vrot.lane.b32.xlu0 %v13707_v41, %s12480_s23 }
0x29a8   :  { %5544 = vrot.lane.b32.xlu1 %v13707_v41, %s12478_s21  ;;  %5857 = vrot.lane.b32.xlu0 %v13701_v39, %s12479_s22 }
0x29ac   :  { %5777 = vrot.lane.b32.xlu1 %v13701_v39, %s12477_s20  ;;  %5855 = vrot.lane.b32.xlu0 %v13701_v39, %s12478_s21 }
0x29b0   :  { %5935 = vrot.lane.b32.xlu1 %v13701_v39, %s12481_s24 }
0x29b4   :  { %5933 = vrot.lane.b32.xlu1 %v13701_v39, %s12480_s23 }
0x2a0a   :  { %v5780_v48 = vpop.permute.xlu0 %5779  ;;  %v5702_v49 = vpop.permute.xlu1 %5701 }
0x2a0e   :  { %v5469_v53 = vpop.permute.xlu1 %5468  ;;  %v5391_v54 = vpop.permute.xlu0 %5390 }
0x2a0f   :  { %11224 = vmatpush3.xpose.msk.msra.mxu1 %vm496_vm3, %v5391_v54  ;;  %11229 = vmatpush3.xpose.msk.msra.mxu0 %vm496_vm3, %v5469_v53 }
0x2a10   :  { %11238 = vmatprep.subr.mxu0 %v12473_v0  ;;  %11233 = vmatprep.subr.mxu1 %v12473_v0 }
0x2a12   :  { %v5467_v56 = vpop.permute.xlu1 %5466  ;;  %11226 = vmatmul.mubr.msk.f32.vlgmr.msra.gmra.mrb[54].mxu1 %vm496_vm3, %v13707_v41  ;;  %v5625_v62 = vpop.permute.xlu0 %5624 }
0x2a13   :  { %11231 = vmatmul.mubr.msk.f32.vlgmr.msra.gmra.mrb[50].mxu0 %vm496_vm3, %v5467_v56  ;;  %11235 = vmatprep.mubr.msk.f32.mxu1 %vm12474_vm2, %v12473_v0 }
0x2a14   :  { %11239 = vmatpush3.xpose.msk.msra.mxu0 %vm496_vm3, %v5625_v62  ;;  %11240 = vmatprep.mubr.msk.f32.mxu0 %vm12474_vm2, %v12473_v0 }
0x2a15   :  { %11248 = vmatprep.subr.mxu0 %v12473_v0 }
0x2a16   :  { %v5547_v10 = vpop.permute.xlu1 %5546  ;;  %v5623_v23 = vpop.permute.xlu0 %5622 }
0x2a17   :  { %11234 = vmatpush3.xpose.msk.msra.mxu1 %vm496_vm3, %v5547_v10  ;;  %11241 = vmatmul.mubr.msk.f32.vlgmr.msra.gmra.mrb[52].mxu0 %vm496_vm3, %v5623_v23 }
0x2a18   :  { %11249 = vmatpush3.xpose.msk.msra.mxu0 %vm496_vm3, %v5780_v48  ;;  %11243 = vmatprep.subr.mxu1 %v12473_v0 }
0x2a19   :  { %11250 = vmatprep.mubr.msk.f32.mxu0 %vm12474_vm2, %v12473_v0  ;;  %11258 = vmatprep.subr.mxu0 %v12473_v0 }
0x2a1a   :  { %v5545_v11 = vpop.permute.xlu1 %5544  ;;  %v5858_v3 = vpop.permute.xlu0 %5857 }
0x2a1b   :  { %11236 = vmatmul.mubr.msk.f32.vlgmr.msra.gmra.mrb[56].mxu1 %vm496_vm3, %v5545_v11 }
0x2a1c   :  { %11244 = vmatpush3.xpose.msk.msra.mxu1 %vm496_vm3, %v5702_v49  ;;  %11245 = vmatprep.mubr.msk.f32.mxu1 %vm12474_vm2, %v12473_v0 }
0x2a1d   :  { %11253 = vmatprep.subr.mxu1 %v12473_v0 }
0x2a1e   :  { %v5778_v24 = vpop.permute.xlu1 %5777  ;;  %v5856_v13 = vpop.permute.xlu0 %5855 }
0x2a1f   :  { %11246 = vmatmul.mubr.msk.f32.vlgmr.msra.gmra.mrb[58].mxu1 %vm496_vm3, %v13701_v39  ;;  %11251 = vmatmul.mubr.msk.f32.vlgmr.msra.gmra.mrb[54].mxu0 %vm496_vm3, %v5778_v24 }
0x2a20   :  { %11254 = vmatpush3.xpose.msk.msra.mxu1 %vm496_vm3, %v5858_v3  ;;  %11255 = vmatprep.mubr.msk.f32.mxu1 %vm12474_vm2, %v12473_v0 }
0x2a21   :  { %11260 = vmatprep.mubr.msk.f32.mxu0 %vm12474_vm2, %v12473_v0  ;;  %11263 = vmatprep.subr.mxu1 %v12473_v0 }
0x2a22   :  { %v5936_v14 = vpop.permute.xlu1 %5935 }
0x2a23   :  { %11256 = vmatmul.mubr.msk.f32.vlgmr.msra.gmra.mrb[60].mxu1 %vm496_vm3, %v5856_v13  ;;  %11259 = vmatpush3.xpose.msk.msra.mxu0 %vm496_vm3, %v5936_v14 }
0x2a24   :  { %11268 = vmatprep.subr.mxu0 %v12473_v0  ;;  %11265 = vmatprep.mubr.msk.f32.mxu1 %vm12474_vm2, %v12473_v0 }
0x2a26   :  { %v5934_v17 = vpop.permute.xlu1 %5933 }
0x2a27   :  { %11261 = vmatmul.mubr.msk.f32.vlgmr.msra.gmra.mrb[56].mxu0 %vm496_vm3, %v5934_v17 }
0x2a28   :  { %11270 = vmatprep.mubr.msk.f32.mxu0 %vm12474_vm2, %v12473_v0 }
0x2ae5   :  { %v5462_v50 = vpop.f32.mrb[54].mxu1 }
0x2ae6   :  { %v6011_v19 = vmul.f32 0.35355338, %v5462_v50  ;;  %v11227_v26 = vpop.f32.mrb[55].mxu1  ;;  %v5540_v52 = vpop.f32.mrb[50].mxu0 }
0x2ae7   :  { %v6012_v20 = vmul.f32 0.35355338, %v5540_v52  ;;  %v11232_v27 = vpop.f32.mrb[51].mxu0 }
0x2ae8   :  { %v6019_v21 = vsel %vm496_vm3, %v6011_v19, -inf }
0x2ae9   :  { %6020 = vmax.xlane.f32.xlu0 %v6019_v21  ;;  %v6022_v30 = vsel %vm496_vm3, %v6012_v20, -inf }
0x2aea   :  { %6023 = vmax.xlane.f32.xlu1 %v6022_v30  ;;  %v5696_v31 = vpop.f32.mrb[52].mxu0 }
0x2aeb   :  { %v11242_v32 = vpop.f32.mrb[53].mxu0  ;;  %v6014_v9 = vmul.f32 0.35355338, %v5696_v31 }
0x2aed   :  { %v6028_v38 = vsel %vm496_vm3, %v6014_v9, -inf }
0x2aee   :  { %v5618_v45 = vpop.f32.mrb[56].mxu1 }
0x2aef   :  { %v6013_v5 = vmul.f32 0.35355338, %v5618_v45  ;;  %v11237_v33 = vpop.f32.mrb[57].mxu1 }
0x2af1   :  { %v6025_v34 = vsel %vm496_vm3, %v6013_v5, -inf }
0x2af2   :  { %6026 = vmax.xlane.f32.xlu0 %v6025_v34  ;;  %v5773_v35 = vpop.f32.mrb[58].mxu1  ;;  %v5851_v4 = vpop.f32.mrb[54].mxu0 }
0x2af3   :  { %v6016_v8 = vmul.f32 0.35355338, %v5851_v4  ;;  %v11247_v7 = vpop.f32.mrb[59].mxu1  ;;  %v11252_v36 = vpop.f32.mrb[55].mxu0  ;;  %v6015_v37 = vmul.f32 0.35355338, %v5773_v35 }
0x2af5   :  { %v6034_v40 = vsel %vm496_vm3, %v6016_v8, -inf  ;;  %v6031_v54 = vsel %vm496_vm3, %v6015_v37, -inf }
0x2af6   :  { %6029 = vmax.xlane.f32.xlu0 %v6028_v38  ;;  %6035 = vmax.xlane.f32.xlu1 %v6034_v40  ;;  %v5929_v48 = vpop.f32.mrb[60].mxu1 }
0x2af7   :  { %v11257_v49 = vpop.f32.mrb[61].mxu1  ;;  %v6017_v53 = vmul.f32 0.35355338, %v5929_v48 }
0x2af9   :  { %v6037_v11 = vsel %vm496_vm3, %v6017_v53, -inf }
0x2afa   :  { %6032 = vmax.xlane.f32.xlu0 %v6031_v54  ;;  %v6007_v56 = vpop.f32.mrb[56].mxu0 }
0x2afb   :  { %v6018_v62 = vmul.f32 0.35355338, %v6007_v56  ;;  %v11262_v10 = vpop.f32.mrb[57].mxu0 }
0x2afd   :  { %v6040_v23 = vsel %vm496_vm3, %v6018_v62, -inf }
0x2afe   :  { %6041 = vmax.xlane.f32.xlu1 %v6040_v23  ;;  %6038 = vmax.xlane.f32.xlu0 %v6037_v11 }
0x2b0f   :  { %6183 = vrot.lane.b32.xlu1 %v13707_v41, %s12482_s25 }
0x2b13   :  { %6259 = vrot.lane.b32.xlu1 %v13707_v41, %s12483_s26 }
0x2b14   :  { %6107 = vrot.lane.b32.xlu0 %v13707_v41, %s12484_s27 }
0x2b17   :  { %6335 = vrot.lane.b32.xlu1 %v13707_v41, %s12485_s28 }
0x2b18   :  { %6438 = vrot.lane.b32.xlu0 %v13701_v39, %s12484_s27 }
0x2b1b   :  { %6514 = vrot.lane.b32.xlu1 %v13701_v39, %s12482_s25 }
0x2b76   :  { %v6021_v3 = vpop.xlane.xlu0 %6020 }
0x2b77   :  { %v6043_v24 = vsub.f32 %v6011_v19, %v6021_v3  ;;  %v6024_v13 = vpop.xlane.xlu1 %6023 }
0x2b78   :  { %v6044_v14 = vsub.f32 %v6012_v20, %v6024_v13 }
0x2b79   :  { %v6051_v17 = vmul.f32 1.442695, %v6043_v24 }
0x2b7a   :  { %v6053_v50 = vmul.f32 1.442695, %v6044_v14 }
0x2b7b   :  { %12273 = vpow2.f32 %v6051_v17 }
0x2b7c   :  { %12275 = vpow2.f32 %v6053_v50 }
0x2b7f   :  { %v6027_v26 = vpop.xlane.xlu0 %6026 }
0x2b80   :  { %v6045_v52 = vsub.f32 %v6013_v5, %v6027_v26 }
0x2b82   :  { %v6055_v27 = vmul.f32 1.442695, %v6045_v52 }
0x2b83   :  { %v6036_v21 = vpop.xlane.xlu1 %6035  ;;  %v6030_v30 = vpop.xlane.xlu0 %6029 }
0x2b84   :  { %12277 = vpow2.f32 %v6055_v27  ;;  %v6048_v41 = vsub.f32 %v6016_v8, %v6036_v21  ;;  %v6046_v31 = vsub.f32 %v6014_v9, %v6030_v30 }
0x2b85   :  { %v12274_v32 = vpop.eup %12273 }
0x2b86   :  { %v12276_v45 = vpop.eup %12275  ;;  %v6057_v33 = vmul.f32 1.442695, %v6046_v31  ;;  %v6067_v34 = vsel %vm496_vm3, %v12274_v32, 0.0  ;;  %v6061_v19 = vmul.f32 1.442695, %v6048_v41 }
0x2b87   :  { %6068 = vadd.xlane.f32.xlu0 %v6067_v34  ;;  %v6033_v20 = vpop.xlane.xlu0 %6032  ;;  %v6070_v35 = vsel %vm496_vm3, %v12276_v45, 0.0 }
0x2b88   :  { %v6047_v4 = vsub.f32 %v6015_v37, %v6033_v20  ;;  %6071 = vadd.xlane.f32.xlu1 %v6070_v35  ;;  %12279 = vpow2.f32 %v6057_v33 }
0x2b89   :  { %12281 = vpow2.f32 %v6061_v19 }
0x2b8a   :  { %v6059_v5 = vmul.f32 1.442695, %v6047_v4 }
0x2b8b   :  { %v6042_v7 = vpop.xlane.xlu1 %6041  ;;  %v6039_v36 = vpop.xlane.xlu0 %6038 }
0x2b8c   :  { %12283 = vpow2.f32 %v6059_v5  ;;  %v6050_v8 = vsub.f32 %v6018_v62, %v6042_v7  ;;  %v6049_v9 = vsub.f32 %v6017_v53, %v6039_v36 }
0x2b8e   :  { %v12278_v38 = vpop.eup %12277  ;;  %v6065_v40 = vmul.f32 1.442695, %v6050_v8  ;;  %v6063_v48 = vmul.f32 1.442695, %v6049_v9 }
0x2b8f   :  { %v6184_v49 = vpop.permute.xlu1 %6183  ;;  %v6108_v54 = vpop.permute.xlu0 %6107  ;;  %v6073_v56 = vsel %vm496_vm3, %v12278_v38, 0.0 }
0x2b90   :  { %12285 = vpow2.f32 %v6065_v40  ;;  %11269 = vmatpush3.msra.mxu0 %v6184_v49  ;;  %6074 = vadd.xlane.f32.xlu0 %v6073_v56 }
0x2b91   :  { %12287 = vpow2.f32 %v6063_v48  ;;  %11264 = vmatpush3.msra.mxu1 %v6108_v54  ;;  %11278 = vmatprep.subr.mxu0 %v12473_v0 }
0x2b92   :  { %11273 = vmatprep.subr.mxu1 %v12473_v0  ;;  %v12280_v37 = vpop.eup %12279 }
0x2b93   :  { %v6076_v62 = vsel %vm496_vm3, %v12280_v37, 0.0  ;;  %v12282_v53 = vpop.eup %12281  ;;  %v6260_v17 = vpop.permute.xlu1 %6259 }
0x2b94   :  { %6077 = vadd.xlane.f32.xlu1 %v6076_v62  ;;  %v6082_v11 = vsel %vm496_vm3, %v12282_v53, 0.0  ;;  %v6439_v26 = vpop.permute.xlu0 %6438 }
0x2b96   :  { %v12284_v10 = vpop.eup %12283 }
0x2b97   :  { %v6079_v23 = vsel %vm496_vm3, %v12284_v10, 0.0  ;;  %v6336_v50 = vpop.permute.xlu1 %6335 }
0x2b98   :  { %6080 = vadd.xlane.f32.xlu0 %v6079_v23  ;;  %6083 = vadd.xlane.f32.xlu1 %v6082_v11  ;;  %v6769_v11 = vld [vmem:[%s14715_s2 + $0xc0] sm:$0xff] }
0x2b9a   :  { %v13803_v3 = vpop.eup %12285 }
0x2b9b   :  { %v13805_v24 = vpop.eup %12287  ;;  %v6088_v13 = vsel %vm496_vm3, %v13803_v3, 0.0  ;;  %v6515_v52 = vpop.permute.xlu1 %6514 }
0x2b9c   :  { %v6085_v14 = vsel %vm496_vm3, %v13805_v24, 0.0  ;;  %6089 = vadd.xlane.f32.xlu1 %v6088_v13  ;;  %v6771_v13 = vld [vmem:[%s14715_s2 + $0xd0] sm:$0xff] }
0x2b9d   :  { %6086 = vadd.xlane.f32.xlu0 %v6085_v14  ;;  %v6772_v14 = vld [vmem:[%s14715_s2 + $0xd8] sm:$0xff] }
0x2bad   :  { %6666 = vrot.lane.b32.xlu1 %v13701_v39, %s12485_s28 }
0x2bb3   :  { %6590 = vrot.lane.b32.xlu0 %v13701_v39, %s12483_s26 }
0x2c14   :  { %v6069_v27 = vpop.xlane.xlu0 %6068 }
0x2c15   :  { %12289 = vrcp.f32 %v6069_v27  ;;  %v6072_v21 = vpop.xlane.xlu1 %6071 }
0x2c16   :  { %12291 = vrcp.f32 %v6072_v21 }
0x2c1d   :  { %v6075_v30 = vpop.xlane.xlu0 %6074 }
0x2c1e   :  { %12293 = vrcp.f32 %v6075_v30 }
0x2c1f   :  { %v12290_v41 = vpop.eup %12289 }
0x2c20   :  { %v12292_v31 = vpop.eup %12291  ;;  %v13815_v33 = vmul.f32 %v12290_v41, %v12274_v32 }
0x2c21   :  { %v13817_v34 = vmul.f32 %v12292_v31, %v12276_v45  ;;  %v6078_v19 = vpop.xlane.xlu1 %6077 }
0x2c22   :  { %11266 = vmatmul.mubr.msk.f32.vlgmr.msra.gmra.mrb[62].mxu1 %vm496_vm3, %v13815_v33  ;;  %12295 = vrcp.f32 %v6078_v19 }
0x2c23   :  { %11274 = vmatpush3.msra.mxu1 %v6260_v17  ;;  %11271 = vmatmul.mubr.msk.f32.vlgmr.msra.gmra.mrb[58].mxu0 %vm496_vm3, %v13817_v34  ;;  %v11889_v17 = vpack.c.bf16 %v6772_v14, %v6771_v13 }
0x2c24   :  { %11279 = vmatpush3.msra.mxu0 %v6336_v50  ;;  %11275 = vmatprep.mubr.msk.f32.mxu1 %vm12474_vm2, %v12473_v0 }
0x2c25   :  { %v6081_v39 = vpop.xlane.xlu0 %6080  ;;  %11283 = vmatprep.subr.mxu1 %v12473_v0  ;;  %11280 = vmatprep.mubr.msk.f32.mxu0 %vm12474_vm2, %v12473_v0  ;;  %v6084_v32 = vpop.xlane.xlu1 %6083 }
0x2c26   :  { %12297 = vrcp.f32 %v6081_v39  ;;  %11288 = vmatprep.subr.mxu0 %v12473_v0 }
0x2c27   :  { %12299 = vrcp.f32 %v6084_v32 }
0x2c28   :  { %v12294_v45 = vpop.eup %12293 }
0x2c29   :  { %v13829_v20 = vmul.f32 %v12294_v45, %v12278_v38  ;;  %v6090_v35 = vpop.xlane.xlu1 %6089 }
0x2c2a   :  { %v6087_v4 = vpop.xlane.xlu0 %6086  ;;  %12301 = vrcp.f32 %v6090_v35 }
0x2c2b   :  { %11276 = vmatmul.mubr.msk.f32.vlgmr.msra.gmra.mrb[64].mxu1 %vm496_vm3, %v13829_v20  ;;  %12303 = vrcp.f32 %v6087_v4 }
0x2c2c   :  { %11284 = vmatpush3.msra.mxu1 %v6439_v26  ;;  %11285 = vmatprep.mubr.msk.f32.mxu1 %vm12474_vm2, %v12473_v0  ;;  %v12296_v5 = vpop.eup %12295 }
0x2c2d   :  { %11293 = vmatprep.subr.mxu1 %v12473_v0  ;;  %v13836_v7 = vmul.f32 %v12296_v5, %v12280_v37  ;;  %v6667_v48 = vpop.permute.xlu1 %6666 }
0x2c2e   :  { %v6591_v40 = vpop.permute.xlu0 %6590 }
0x2c2f   :  { %11281 = vmatmul.mubr.msk.f32.vlgmr.msra.gmra.mrb[60].mxu0 %vm496_vm3, %v13836_v7 }
0x2c30   :  { %v12298_v36 = vpop.eup %12297  ;;  %11289 = vmatpush3.msra.mxu0 %v6515_v52  ;;  %11290 = vmatprep.mubr.msk.f32.mxu0 %vm12474_vm2, %v12473_v0 }
0x2c31   :  { %v12300_v8 = vpop.eup %12299  ;;  %v13842_v9 = vmul.f32 %v12298_v36, %v12284_v10  ;;  %11298 = vmatprep.subr.mxu0 %v12473_v0 }
0x2c32   :  { %v13845_v38 = vmul.f32 %v12300_v8, %v12282_v53 }
0x2c33   :  { %11286 = vmatmul.mubr.msk.f32.vlgmr.msra.gmra.mrb[66].mxu1 %vm496_vm3, %v13842_v9 }
0x2c34   :  { %11291 = vmatmul.mubr.msk.f32.vlgmr.msra.gmra.mrb[62].mxu0 %vm496_vm3, %v13845_v38  ;;  %11294 = vmatpush3.msra.mxu1 %v6591_v40  ;;  %v12302_v49 = vpop.eup %12301 }
0x2c35   :  { %11299 = vmatpush3.msra.mxu0 %v6667_v48  ;;  %11295 = vmatprep.mubr.msk.f32.mxu1 %vm12474_vm2, %v12473_v0  ;;  %v12304_v54 = vpop.eup %12303  ;;  %v13856_v56 = vmul.f32 %v12302_v49, %v13803_v3  ;;  %v6770_v3 = vld [vmem:[%s14715_s2 + $0xc8] sm:$0xff] }
0x2c36   :  { %11300 = vmatprep.mubr.msk.f32.mxu0 %vm12474_vm2, %v12473_v0  ;;  %v13859_v37 = vmul.f32 %v12304_v54, %v13805_v24  ;;  %v11885_v24 = vpack.c.bf16 %v6770_v3, %v6769_v11 }
0x2c38   :  { %11301 = vmatmul.mubr.msk.f32.vlgmr.msra.gmra.mrb[64].mxu0 %vm496_vm3, %v13856_v56  ;;  %11296 = vmatmul.mubr.msk.f32.vlgmr.msra.gmra.mrb[68].mxu1 %vm496_vm3, %v13859_v37 }
0x2c39   :  { %11886 = vmatprep.subr.bf16.mxu1 %v11885_v24 }
0x2c3a   :  { %11888 = vmatpush3.bf16.msra.mxu1 %v11885_v24 }
0x2c3b   :  { %11890 = vmatprep.subr.bf16.mxu1 %v11889_v17 }
0x2c3e   :  { %11892 = vmatpush3.bf16.msra.mxu1 %v11889_v17 }
0x2cf5   :  { %v6179_v62 = vpop.f32.mrb[62].mxu1 }
0x2cf6   :  { %v11267_v53 = vpop.f32.mrb[63].mxu1  ;;  %v6255_v10 = vpop.f32.mrb[58].mxu0 }
0x2cf7   :  { %v11272_v23 = vpop.f32.mrb[59].mxu0  ;;  %6412 = vrot.lane.b32.xlu0 %v6255_v10, %s12487_s13 }
0x2cfe   :  { %v6331_v50 = vpop.f32.mrb[64].mxu1 }
0x2cff   :  { %6416 = vrot.lane.b32.xlu1 %v6331_v50, %s12486_s29  ;;  %v11277_v26 = vpop.f32.mrb[65].mxu1 }
0x2d02   :  { %v6407_v52 = vpop.f32.mrb[60].mxu0 }
0x2d03   :  { %v11282_v27 = vpop.f32.mrb[61].mxu0  ;;  %6420 = vrot.lane.b32.xlu1 %v6407_v52, %s12488_s14 }
0x2d06   :  { %v6510_v21 = vpop.f32.mrb[66].mxu1 }
0x2d07   :  { %v6586_v30 = vpop.f32.mrb[62].mxu0  ;;  %v11287_v41 = vpop.f32.mrb[67].mxu1 }
0x2d08   :  { %v11292_v31 = vpop.f32.mrb[63].mxu0  ;;  %6743 = vrot.lane.b32.xlu0 %v6586_v30, %s12487_s13 }
0x2d0b   :  { %v6738_v19 = vpop.f32.mrb[64].mxu0  ;;  %v6662_v39 = vpop.f32.mrb[68].mxu1 }
0x2d0c   :  { %v11302_v32 = vpop.f32.mrb[65].mxu0  ;;  %6751 = vrot.lane.b32.xlu1 %v6738_v19, %s12488_s14  ;;  %6747 = vrot.lane.b32.xlu0 %v6662_v39, %s12486_s29  ;;  %v11297_v45 = vpop.f32.mrb[69].mxu1 }
0x2d0d   :  { %v6901_v32 = vld [vmem:[%s14714_s1 + $0x118] sm:$0xff] }
0x2d0e   :  { %v6902_v45 = vld [vmem:[%s14714_s1 + $0x138] sm:$0xff] }
0x2d69   :  { %v6413_v4 = vpop.permute.xlu0 %6412 }
0x2d6a   :  { %v6423_v5 = vsel %vm496_vm3, %v6179_v62, %v6413_v4  ;;  %v10207_v62 = vld [vmem:[%s14717_s4 + $0x4a] ss:$0 sm:$0xff]  ;;  %v11893_v4 = vpack.c.bf16 %v6902_v45, %v6901_v32 }
0x2d6c   :  { %11894 = vmatprep.subr.bf16.mxu0 %v11893_v4 }
0x2d6d   :  { %11896 = vmatpush3.bf16.msra.mxu0 %v11893_v4 }
0x2d71   :  { %v6417_v35 = vpop.permute.xlu1 %6416 }
0x2d72   :  { %v6424_v36 = vsel %vm35_vm0, %v6423_v5, %v6417_v35  ;;  %v6903_v35 = vld [vmem:[%s14714_s1 + $0x158] sm:$0xff] }
0x2d73   :  { %v6904_v5 = vld [vmem:[%s14714_s1 + $0x178] sm:$0xff] }
0x2d75   :  { %v6421_v8 = vpop.permute.xlu1 %6420 }
0x2d76   :  { %v6425_v40 = vsel %vm1530_vm4, %v6424_v36, %v6421_v8  ;;  %v11897_v36 = vpack.c.bf16 %v6904_v5, %v6903_v35  ;;  %v7082_v5 = vld [vmem:[%s14715_s2 + $0xe0] sm:$0xff] }
0x2d77   :  { %11311 = vmatprep.mubr.msk.f32.mxu1 %vm119_vm1, %v6425_v40 }
0x2d78   :  { %11898 = vmatprep.subr.bf16.mxu0 %v11897_v36 }
0x2d79   :  { %11900 = vmatpush3.bf16.msra.mxu0 %v11897_v36  ;;  %v7083_v36 = vld [vmem:[%s14715_s2 + $0xe8] sm:$0xff] }
0x2d7a   :  { %v6744_v48 = vpop.permute.xlu0 %6743 }
0x2d7b   :  { %v6754_v54 = vsel %vm496_vm3, %v6510_v21, %v6744_v48 }
0x2d7e   :  { %v6752_v49 = vpop.permute.xlu1 %6751  ;;  %v6748_v53 = vpop.permute.xlu0 %6747 }
0x2d7f   :  { %v6755_v10 = vsel %vm35_vm0, %v6754_v54, %v6748_v53 }
0x2d80   :  { %v6756_v23 = vsel %vm1530_vm4, %v6755_v10, %v6752_v49 }
0x2d81   :  { %11312 = vmatmul.mubr.msk.f32.vlgmr.msra.gmra.mrb[70].mxu1 %vm119_vm1, %v6756_v23  ;;  %v10210_v23 = vld [vmem:[%s14717_s4 + $0x3a] ss:$0 sm:$0xff] }
0x2e54   :  { %v11313_v11 = vpop.f32.mrb[70].mxu1 }
0x2e55   :  { %v6856_v3 = vadd.f32 %v11313_v11, %v10207_v62  ;;  %v6850_v24 = vpop.f32.mrb[71].mxu1  ;;  %v10211_v11 = vld [vmem:[%s14717_s4 + $0x40] ss:$0 sm:$0xff] }
0x2e56   :  { %v6851_v13 = vadd.f32 %v10207_v62, %v6850_v24 }
0x2e57   :  { %v13895_v14 = vadd.f32 %v6856_v3, %v13662_v42 }
0x2e58   :  { %v13898_v17 = vadd.f32 %v6851_v13, %v13665_v43 }
0x2e59   :  { %v6866_v50 = vsel %vm119_vm1, %v13895_v14, 0.0 }
0x2e5a   :  { %6867 = vadd.xlane.f32.xlu1 %v6866_v50  ;;  %v6863_v26 = vsel %vm119_vm1, %v13898_v17, 0.0 }
0x2e5b   :  { %6864 = vadd.xlane.f32.xlu0 %v6863_v26 }
0x2ee7   :  { %v6868_v52 = vpop.xlane.xlu1 %6867 }
0x2ee8   :  { %v6870_v27 = vmul.f32 0.03125, %v6868_v52  ;;  %v6865_v21 = vpop.xlane.xlu0 %6864 }
0x2ee9   :  { %v6869_v30 = vmul.f32 0.03125, %v6865_v21 }
0x2eea   :  { %v6872_v41 = vsub.f32 %v13895_v14, %v6870_v27  ;;  %v10212_v27 = vld [vmem:[%s14717_s4 + $0x47] ss:$0 sm:$0xff] }
0x2eeb   :  { %v6871_v42 = vsub.f32 %v13898_v17, %v6869_v30 }
0x2eec   :  { %v6874_v19 = vmul.f32 %v6872_v41, %v6872_v41 }
0x2eed   :  { %v6873_v31 = vmul.f32 %v6871_v42, %v6871_v42 }
0x2eee   :  { %v6878_v39 = vsel %vm119_vm1, %v6874_v19, 0.0 }
0x2eef   :  { %v6875_v43 = vsel %vm119_vm1, %v6873_v31, 0.0 }
0x2ef0   :  { %6876 = vadd.xlane.f32.xlu0 %v6875_v43 }
0x2ef4   :  { %6879 = vadd.xlane.f32.xlu0 %v6878_v39 }
0x2f7d   :  { %v6877_v8 = vpop.xlane.xlu0 %6876 }
0x2f7e   :  { %v6881_v40 = vmul.f32 0.03125, %v6877_v8  ;;  %v7084_v8 = vld [vmem:[%s14715_s2 + $0xf0] sm:$0xff] }
0x2f80   :  { %v6883_v48 = vadd.f32 1e-05, %v6881_v40  ;;  %v11901_v40 = vpack.c.bf16 %v7083_v36, %v7082_v5 }
0x2f81   :  { %v6880_v49 = vpop.xlane.xlu0 %6879 }
0x2f82   :  { %12305 = vrsqrt.f32 %v6883_v48  ;;  %v6882_v54 = vmul.f32 0.03125, %v6880_v49  ;;  %v7085_v48 = vld [vmem:[%s14715_s2 + $0xf8] sm:$0xff]  ;;  %11902 = vmatprep.subr.bf16.mxu1 %v11901_v40 }
0x2f83   :  { %v11905_v49 = vpack.c.bf16 %v7085_v48, %v7084_v8  ;;  %11904 = vmatpush3.bf16.msra.mxu1 %v11901_v40 }
0x2f84   :  { %v6884_v53 = vadd.f32 1e-05, %v6882_v54  ;;  %v7013_v54 = vld [vmem:[%s14715_s2 + $0x100] sm:$0x7] }
0x2f85   :  { %11906 = vmatprep.subr.bf16.mxu1 %v11905_v49 }
0x2f86   :  { %12307 = vrsqrt.f32 %v6884_v53 }
0x2f87   :  { %11908 = vmatpush3.bf16.msra.mxu1 %v11905_v49 }
0x2f8c   :  { %v12306_v10 = vpop.eup %12305 }
0x2f8d   :  { %v6887_v62 = vmul.f32 %v12306_v10, %v6871_v42 }
0x2f8f   :  { %v6893_v3 = vmul.f32 %v10210_v23, %v6887_v62  ;;  %v7021_v62 = vrot.slane %v7013_v54, %v12933_v58 }
0x2f90   :  { %v12308_v24 = vpop.eup %12307 }
0x2f91   :  { %v6888_v13 = vmul.f32 %v12308_v24, %v6872_v41  ;;  %v6899_v50 = vadd.f32 %v10211_v11, %v6893_v3  ;;  %v7053_v3 = vld [vmem:[%s14717_s4 + $0x3d] sm:$0x1] }
0x2f93   :  { %v6894_v26 = vmul.f32 %v10210_v23, %v6888_v13  ;;  %11322 = vmatprep.mubr.msk.f32.mxu0 %vm119_vm1, %v6899_v50  ;;  %v7033_v50 = vrot.slane %v7013_v54, %v12942_v1  ;;  %v10217_v1 = vld [vmem:[%s14717_s4 + $0x4c] ss:$0 sm:$0xff] }
0x2f95   :  { %v6900_v52 = vadd.f32 %v10211_v11, %v6894_v26  ;;  %v7026_v11 = vrot.slane %v7013_v54, %v12936_v60 }
0x2f97   :  { %11323 = vmatmul.mubr.msk.f32.vlgmr.msra.gmra.mrb[66].mxu0 %vm119_vm1, %v6900_v52  ;;  %v7055_v52 = vmul.f32 0.999995, %v7053_v3 }
0x306a   :  { %v11324_v21 = vpop.f32.mrb[66].mxu0 }
0x306b   :  { %v6988_v30 = vadd.f32 %v11324_v21, %v10212_v27  ;;  %v6982_v42 = vpop.f32.mrb[67].mxu0 }
0x306c   :  { %v6983_v31 = vadd.f32 %v10212_v27, %v6982_v42 }
0x306d   :  { %v10216_v43 = vmul.f32 -1.442695, %v6988_v30 }
0x306e   :  { %v10215_v19 = vmul.f32 -1.442695, %v6983_v31 }
0x306f   :  { %12309 = vpow2.f32 %v10216_v43 }
0x3070   :  { %12311 = vpow2.f32 %v10215_v19 }
0x3079   :  { %v12310_v41 = vpop.eup %12309 }
0x307a   :  { %v12312_v39 = vpop.eup %12311  ;;  %v6998_v32 = vadd.f32 1.0, %v12310_v41 }
0x307b   :  { %v6997_v45 = vadd.f32 1.0, %v12312_v39 }
0x307c   :  { %12313 = vrcp.f32 %v6998_v32 }
0x307d   :  { %12315 = vrcp.f32 %v6997_v45 }
0x3086   :  { %v12314_v35 = vpop.eup %12313 }
0x3087   :  { %v12316_v4 = vpop.eup %12315  ;;  %7007 = vrot.lane.b32.xlu1 %v12314_v35, %s12475_s18 }
0x3088   :  { %7005 = vrot.lane.b32.xlu0 %v12316_v4, %s12475_s18  ;;  %v7059_v4 = vrot.slane %v7055_v52, %v12933_v58 }
0x30f9   :  { %v7008_v53 = vpop.permute.xlu1 %7007 }
0x30fa   :  { %v7012_v10 = vmul.f32 %v7008_v53, %v6988_v30  ;;  %v7006_v23 = vpop.permute.xlu0 %7005 }
0x30fb   :  { %v7011_v24 = vmul.f32 %v7006_v23, %v6983_v31 }
0x30fc   :  { %v7038_v13 = vrot.slane %v7012_v10, 4  ;;  %v7041_v42 = vmul.f32 %v7026_v11, %v7012_v10 }
0x30fd   :  { %v7015_v26 = vrot.slane %v7011_v24, 4  ;;  %v7027_v39 = vmul.f32 %v7026_v11, %v7011_v24 }
0x30fe   :  { %v7039_v27 = vsel %vm7016_vm9, %v7038_v13, 0.0  ;;  %v7042_v21 = vsel %vm7028_vm10, %v7038_v13, 0.0 }
0x30ff   :  { %v7040_v30 = vmul.f32 %v7039_v27, %v7021_v62  ;;  %v7017_v43 = vsel %vm7016_vm9, %v7015_v26, 0.0  ;;  %v7029_v19 = vsel %vm7028_vm10, %v7015_v26, 0.0  ;;  %v7043_v32 = vmul.f32 %v7042_v21, %v7033_v50  ;;  %v10221_v27 = vld [vmem:[%s14717_s4 + $0x4b] ss:$0 sm:$0xff] }
0x3100   :  { %v7022_v41 = vmul.f32 %v7021_v62, %v7017_v43  ;;  %v7034_v31 = vmul.f32 %v7033_v50, %v7029_v19 }
0x3101   :  { %v7045_v45 = vadd.f32 %v7041_v42, %v7040_v30 }
0x3102   :  { %v7036_v35 = vadd.f32 %v7027_v39, %v7022_v41 }
0x3103   :  { %v7046_v5 = vadd.f32 %v7045_v45, %v7043_v32 }
0x3104   :  { %v7037_v36 = vadd.f32 %v7036_v35, %v7034_v31 }
0x3105   :  { %v7052_v8 = vadd.f32 %v10217_v1, %v7046_v5 }
0x3106   :  { %v7051_v40 = vadd.f32 %v10217_v1, %v7037_v36 }
0x3107   :  { %v7061_v48 = vmul.f32 %v7059_v4, %v7052_v8 }
0x3108   :  { %v7060_v49 = vmul.f32 %v7059_v4, %v7051_v40  ;;  %v7214_v40 = vld [vmem:[%s14714_s1 + $0x108] sm:$0xff] }
0x3109   :  { %v7067_v54 = vadd.f32 %v10218_v57, %v7061_v48  ;;  %v7216_v48 = vld [vmem:[%s14714_s1 + $0x148] sm:$0xff] }
0x310a   :  { %v7066_v53 = vadd.f32 %v10218_v57, %v7060_v49  ;;  %v7215_v57 = vld [vmem:[%s14714_s1 + $0x128] sm:$0xff] }
0x310b   :  { %v10220_v10 = vmul.f32 -1.442695, %v7067_v54  ;;  %v11909_v49 = vpack.c.bf16 %v7215_v57, %v7214_v40  ;;  %v7326_v57 = vld [vmem:[%s14716_s3 + $0x2c0] sm:$0xff] }
0x310c   :  { %v10219_v23 = vmul.f32 -1.442695, %v7066_v53 }
0x310d   :  { %12317 = vpow2.f32 %v10220_v10  ;;  %11910 = vmatprep.subr.bf16.mxu0 %v11909_v49 }
0x310e   :  { %12319 = vpow2.f32 %v10219_v23  ;;  %11912 = vmatpush3.bf16.msra.mxu0 %v11909_v49 }
0x3117   :  { %v12318_v62 = vpop.eup %12317 }
0x3118   :  { %v12320_v11 = vpop.eup %12319  ;;  %v7075_v3 = vadd.f32 1.0, %v12318_v62 }
0x3119   :  { %v7074_v24 = vadd.f32 1.0, %v12320_v11 }
0x311a   :  { %12321 = vrcp.f32 %v7075_v3 }
0x311b   :  { %12323 = vrcp.f32 %v7074_v24 }
0x3124   :  { %v12322_v13 = vpop.eup %12321 }
0x3125   :  { %v12324_v50 = vpop.eup %12323  ;;  %v7081_v52 = vmul.f32 %v12322_v13, %v7067_v54  ;;  %v7217_v54 = vld [vmem:[%s14714_s1 + $0x168] sm:$0xff] }
0x3126   :  { %v7080_v26 = vmul.f32 %v12324_v50, %v7066_v53  ;;  %v11913_v53 = vpack.c.bf16 %v7217_v54, %v7216_v48  ;;  %v10224_v50 = vld [vmem:[%s14717_s4 + $0x3b] ss:$0 sm:$0xff]  ;;  %v7327_v48 = vld [vmem:[%s14716_s3 + $0x2c8] sm:$0xff]  ;;  %v7328_v54 = vld [vmem:[%s14716_s3 + $0x2d0] sm:$0xff] }
0x3127   :  { %v11933_v49 = vpack.c.bf16 %v7327_v48, %v7326_v57 }
0x3128   :  { %11333 = vmatprep.mubr.msk.f32.mxu1 %vm119_vm1, %v7080_v26  ;;  %11914 = vmatprep.subr.bf16.mxu0 %v11913_v53 }
0x3129   :  { %11334 = vmatmul.mubr.msk.f32.vlgmr.msra.gmra.mrb[72].mxu1 %vm119_vm1, %v7081_v52  ;;  %11916 = vmatpush3.bf16.msra.mxu0 %v11913_v53  ;;  %v7329_v53 = vld [vmem:[%s14716_s3 + $0x2d8] sm:$0xff] }
0x31fc   :  { %v11335_v21 = vpop.f32.mrb[72].mxu1 }
0x31fd   :  { %v7169_v30 = vadd.f32 %v11335_v21, %v10221_v27  ;;  %v7163_v42 = vpop.f32.mrb[73].mxu1  ;;  %v10225_v21 = vld [vmem:[%s14717_s4 + $0x41] ss:$0 sm:$0xff] }
0x31fe   :  { %v7164_v43 = vadd.f32 %v10221_v27, %v7163_v42 }
0x31ff   :  { %v13973_v19 = vadd.f32 %v7169_v30, %v13895_v14 }
0x3200   :  { %v13976_v41 = vadd.f32 %v7164_v43, %v13898_v17 }
0x3201   :  { %v7179_v39 = vsel %vm119_vm1, %v13973_v19, 0.0 }
0x3202   :  { %7180 = vadd.xlane.f32.xlu0 %v7179_v39  ;;  %v7176_v32 = vsel %vm119_vm1, %v13976_v41, 0.0 }
0x3203   :  { %7177 = vadd.xlane.f32.xlu1 %v7176_v32  ;;  %v7318_v32 = vld [vmem:[%s14716_s3 + $0x280] sm:$0xff] }
0x328f   :  { %v7181_v45 = vpop.xlane.xlu0 %7180 }
0x3290   :  { %v7183_v1 = vmul.f32 0.03125, %v7181_v45  ;;  %v7178_v31 = vpop.xlane.xlu1 %7177  ;;  %v7319_v45 = vld [vmem:[%s14716_s3 + $0x288] sm:$0xff] }
0x3291   :  { %v7182_v35 = vmul.f32 0.03125, %v7178_v31  ;;  %v7320_v31 = vld [vmem:[%s14716_s3 + $0x290] sm:$0xff] }
0x3292   :  { %v7185_v4 = vsub.f32 %v13973_v19, %v7183_v1  ;;  %v11917_v1 = vpack.c.bf16 %v7319_v45, %v7318_v32 }
0x3293   :  { %v7184_v14 = vsub.f32 %v13976_v41, %v7182_v35  ;;  %v7321_v35 = vld [vmem:[%s14716_s3 + $0x298] sm:$0xff] }
0x3294   :  { %v7187_v5 = vmul.f32 %v7185_v4, %v7185_v4  ;;  %11918 = vmatprep.subr.bf16.mxu1 %v11917_v1 }
0x3295   :  { %v7186_v36 = vmul.f32 %v7184_v14, %v7184_v14  ;;  %11920 = vmatpush3.bf16.msra.mxu1 %v11917_v1 }
0x3296   :  { %v7191_v17 = vsel %vm119_vm1, %v7187_v5, 0.0  ;;  %v7323_v5 = vld [vmem:[%s14716_s3 + $0x2a8] sm:$0xff] }
0x3297   :  { %7192 = vadd.xlane.f32.xlu1 %v7191_v17  ;;  %v7188_v8 = vsel %vm119_vm1, %v7186_v36, 0.0  ;;  %v7324_v17 = vld [vmem:[%s14716_s3 + $0x2b0] sm:$0xff] }
0x3298   :  { %7189 = vadd.xlane.f32.xlu0 %v7188_v8  ;;  %v7325_v8 = vld [vmem:[%s14716_s3 + $0x2b8] sm:$0xff] }
0x3299   :  { %v11929_v40 = vpack.c.bf16 %v7325_v8, %v7324_v17 }
0x3324   :  { %v7193_v10 = vpop.xlane.xlu1 %7192 }
0x3325   :  { %v7195_v23 = vmul.f32 0.03125, %v7193_v10  ;;  %v7190_v62 = vpop.xlane.xlu0 %7189  ;;  %v11937_v10 = vpack.c.bf16 %v7329_v53, %v7328_v54 }
0x3326   :  { %v7194_v11 = vmul.f32 0.03125, %v7190_v62  ;;  %v7331_v62 = vld [vmem:[%s14716_s3 + $0x2e8] sm:$0xff] }
0x3327   :  { %v7197_v3 = vadd.f32 1e-05, %v7195_v23  ;;  %v7330_v23 = vld [vmem:[%s14716_s3 + $0x2e0] sm:$0xff] }
0x3328   :  { %v7196_v24 = vadd.f32 1e-05, %v7194_v11  ;;  %v11941_v11 = vpack.c.bf16 %v7331_v62, %v7330_v23 }
0x3329   :  { %12325 = vrsqrt.f32 %v7197_v3  ;;  %v7332_v3 = vld [vmem:[%s14716_s3 + $0x2f0] sm:$0xff] }
0x332a   :  { %12327 = vrsqrt.f32 %v7196_v24  ;;  %v7333_v24 = vld [vmem:[%s14716_s3 + $0x2f8] sm:$0xff] }
0x3333   :  { %v12326_v13 = vpop.eup %12325 }
0x3334   :  { %v12328_v26 = vpop.eup %12327  ;;  %v7201_v52 = vmul.f32 %v12326_v13, %v7185_v4  ;;  %v11921_v4 = vpack.c.bf16 %v7321_v35, %v7320_v31  ;;  %v11945_v13 = vpack.c.bf16 %v7333_v24, %v7332_v3 }
0x3335   :  { %v7200_v27 = vmul.f32 %v12328_v26, %v7184_v14  ;;  %v7322_v14 = vld [vmem:[%s14716_s3 + $0x2a0] sm:$0xff] }
0x3336   :  { %v7207_v30 = vmul.f32 %v10224_v50, %v7201_v52  ;;  %11922 = vmatprep.subr.bf16.mxu1 %v11921_v4  ;;  %v11925_v36 = vpack.c.bf16 %v7323_v5, %v7322_v14  ;;  %v10231_v14 = vld [vmem:[%s14717_s4 + $0x49] ss:$0 sm:$0xff] }
0x3337   :  { %v7206_v42 = vmul.f32 %v10224_v50, %v7200_v27  ;;  %11924 = vmatpush3.bf16.msra.mxu1 %v11921_v4  ;;  %v10226_v50 = vld [vmem:[%s14717_s4 + $0x45] ss:$0 sm:$0xff] }
0x3338   :  { %v7213_v39 = vadd.f32 %v10225_v21, %v7207_v30  ;;  %11926 = vmatprep.subr.bf16.mxu1 %v11925_v36 }
0x3339   :  { %v7212_v43 = vadd.f32 %v10225_v21, %v7206_v42 }
0x333b   :  { %11344 = vmatprep.mubr.msk.f32.mxu0 %vm119_vm1, %v7212_v43  ;;  %11928 = vmatpush3.bf16.msra.mxu1 %v11925_v36 }
0x333c   :  { %11345 = vmatmul.mubr.msk.f32.vlgmr.msra.gmra.mrb[68].mxu0 %vm119_vm1, %v7213_v39  ;;  %11930 = vmatprep.subr.bf16.mxu1 %v11929_v40 }
0x333f   :  { %11932 = vmatpush3.bf16.msra.mxu1 %v11929_v40 }
0x3340   :  { %11934 = vmatprep.subr.bf16.mxu1 %v11933_v49 }
0x3343   :  { %11936 = vmatpush3.bf16.msra.mxu1 %v11933_v49 }
0x3344   :  { %11938 = vmatprep.subr.bf16.mxu1 %v11937_v10 }
0x3347   :  { %11940 = vmatpush3.bf16.msra.mxu1 %v11937_v10 }
0x3348   :  { %11942 = vmatprep.subr.bf16.mxu1 %v11941_v11 }
0x334b   :  { %11944 = vmatpush3.bf16.msra.mxu1 %v11941_v11 }
0x334c   :  { %11946 = vmatprep.subr.bf16.mxu1 %v11945_v13 }
0x334f   :  { %11948 = vmatpush3.bf16.msra.mxu1 %v11945_v13 }
0x340f   :  { %v11346_v26 = vpop.f32.mrb[68].mxu0 }
0x3410   :  { %v7301_v52 = vadd.f32 %v11346_v26, %v10226_v50  ;;  %v7295_v27 = vpop.f32.mrb[69].mxu0 }
0x3411   :  { %v7296_v21 = vadd.f32 %v10226_v50, %v7295_v27 }
0x3412   :  { %v10230_v30 = vmul.f32 -1.442695, %v7301_v52 }
0x3413   :  { %v10229_v42 = vmul.f32 -1.442695, %v7296_v21 }
0x3414   :  { %12329 = vpow2.f32 %v10230_v30 }
0x3415   :  { %12331 = vpow2.f32 %v10229_v42 }
0x341e   :  { %v12330_v43 = vpop.eup %12329 }
0x341f   :  { %v12332_v39 = vpop.eup %12331  ;;  %v7311_v32 = vadd.f32 1.0, %v12330_v43 }
0x3420   :  { %v7310_v45 = vadd.f32 1.0, %v12332_v39  ;;  %v10232_v39 = vld [vmem:[%s14717_s4 + $0x3c] ss:$0 sm:$0xff] }
0x3421   :  { %12333 = vrcp.f32 %v7311_v32 }
0x3422   :  { %12335 = vrcp.f32 %v7310_v45 }
0x342b   :  { %v12334_v1 = vpop.eup %12333 }
0x342c   :  { %v12336_v31 = vpop.eup %12335  ;;  %v7317_v4 = vmul.f32 %v12334_v1, %v7301_v52 }
0x342d   :  { %v7316_v35 = vmul.f32 %v12336_v31, %v7296_v21  ;;  %v10233_v31 = vld [vmem:[%s14717_s4 + $0x42] ss:$0 sm:$0xff] }
0x342f   :  { %11379 = vmatprep.mubr.f32.mxu1 %v7316_v35 }
0x3430   :  { %11380 = vmatmul.mubr.f32.vlgmr.msra.gmra.mrb[74].mxu1 %v7317_v4 }
0x3503   :  { %v11381_v5 = vpop.f32.mrb[74].mxu1 }
0x3504   :  { %v7411_v36 = vadd.f32 %v11381_v5, %v10231_v14  ;;  %v7405_v17 = vpop.f32.mrb[75].mxu1 }
0x3505   :  { %v7406_v8 = vadd.f32 %v10231_v14, %v7405_v17 }
0x3506   :  { %v7415_v40 = vmul.f32 0.5, %v7411_v36 }
0x3507   :  { %v7414_v57 = vmul.f32 0.5, %v7406_v8 }
0x3508   :  { %v7417_v48 = vadd.f32 %v7415_v40, %v13973_v19 }
0x3509   :  { %v7416_v49 = vadd.f32 %v7414_v57, %v13976_v41 }
0x350a   :  { %v7423_v54 = vsel %vm119_vm1, %v7417_v48, 0.0 }
0x350b   :  { %7424 = vadd.xlane.f32.xlu1 %v7423_v54  ;;  %v7420_v53 = vsel %vm119_vm1, %v7416_v49, 0.0 }
0x350c   :  { %7421 = vadd.xlane.f32.xlu0 %v7420_v53 }
0x3598   :  { %v7425_v10 = vpop.xlane.xlu1 %7424 }
0x3599   :  { %v7427_v23 = vmul.f32 0.03125, %v7425_v10  ;;  %v7422_v62 = vpop.xlane.xlu0 %7421 }
0x359a   :  { %v7426_v11 = vmul.f32 0.03125, %v7422_v62 }
0x359b   :  { %v7429_v3 = vsub.f32 %v7417_v48, %v7427_v23 }
0x359c   :  { %v7428_v24 = vsub.f32 %v7416_v49, %v7426_v11  ;;  %v7500_v11 = vld [vmem:[%s14714_s1 + $0x180] sm:$0xff] }
0x359d   :  { %v7431_v13 = vmul.f32 %v7429_v3, %v7429_v3 }
0x359e   :  { %v7430_v50 = vmul.f32 %v7428_v24, %v7428_v24 }
0x359f   :  { %v7435_v26 = vsel %vm119_vm1, %v7431_v13, 0.0  ;;  %v7502_v13 = vld [vmem:[%s14714_s1 + $0x1c0] sm:$0xff] }
0x35a0   :  { %7436 = vadd.xlane.f32.xlu1 %v7435_v26  ;;  %v7432_v19 = vsel %vm119_vm1, %v7430_v50, 0.0  ;;  %v7503_v50 = vld [vmem:[%s14714_s1 + $0x1e0] sm:$0xff] }
0x35a1   :  { %7433 = vadd.xlane.f32.xlu0 %v7432_v19  ;;  %v11953_v26 = vpack.c.bf16 %v7503_v50, %v7502_v13  ;;  %v7615_v13 = vld [vmem:[%s14716_s3 + $0x358] sm:$0xff] }
0x362d   :  { %v7437_v41 = vpop.xlane.xlu1 %7436 }
0x362e   :  { %v7439_v52 = vmul.f32 0.03125, %v7437_v41  ;;  %v7434_v27 = vpop.xlane.xlu0 %7433 }
0x362f   :  { %v7438_v21 = vmul.f32 0.03125, %v7434_v27 }
0x3630   :  { %v7441_v30 = vadd.f32 1e-05, %v7439_v52 }
0x3631   :  { %v7440_v42 = vadd.f32 1e-05, %v7438_v21 }
0x3632   :  { %12337 = vrsqrt.f32 %v7441_v30 }
0x3633   :  { %12339 = vrsqrt.f32 %v7440_v42 }
0x363c   :  { %v12338_v43 = vpop.eup %12337 }
0x363d   :  { %v12340_v32 = vpop.eup %12339  ;;  %v7445_v45 = vmul.f32 %v12338_v43, %v7429_v3  ;;  %v7501_v3 = vld [vmem:[%s14714_s1 + $0x1a0] sm:$0xff]  ;;  %v10234_v43 = vld [vmem:[%s14717_s4 + $0x50] ss:$0 sm:$0xff] }
0x363e   :  { %v7444_v1 = vmul.f32 %v12340_v32, %v7428_v24  ;;  %v11949_v24 = vpack.c.bf16 %v7501_v3, %v7500_v11  ;;  %v7613_v11 = vld [vmem:[%s14716_s3 + $0x348] sm:$0xff] }
0x363f   :  { %v7451_v35 = vmul.f32 %v10232_v39, %v7445_v45 }
0x3640   :  { %v7450_v4 = vmul.f32 %v10232_v39, %v7444_v1  ;;  %11950 = vmatprep.subr.bf16.mxu0 %v11949_v24  ;;  %v10235_v1 = vld [vmem:[%s14717_s4 + $0x56] ss:$0 sm:$0xff] }
0x3641   :  { %v7457_v14 = vadd.f32 %v10233_v31, %v7451_v35  ;;  %11952 = vmatpush3.bf16.msra.mxu0 %v11949_v24  ;;  %v7614_v24 = vld [vmem:[%s14716_s3 + $0x350] sm:$0xff] }
0x3642   :  { %v7456_v5 = vadd.f32 %v10233_v31, %v7450_v4  ;;  %11954 = vmatprep.subr.bf16.mxu0 %v11953_v26  ;;  %v11977_v50 = vpack.c.bf16 %v7615_v13, %v7614_v24 }
0x3643   :  { %v14073_v36 = vadd.f32 %v7457_v14, %v13571_v44 }
0x3644   :  { %v14076_v17 = vadd.f32 %v7456_v5, %v13574_v47  ;;  %v7604_v5 = vld [vmem:[%s14716_s3 + $0x300] sm:$0xff] }
0x3645   :  { %v7465_v8 = vsel %vm119_vm1, %v14073_v36, 0.0  ;;  %11956 = vmatpush3.bf16.msra.mxu0 %v11953_v26  ;;  %v7616_v26 = vld [vmem:[%s14716_s3 + $0x360] sm:$0xff] }
0x3646   :  { %7466 = vadd.xlane.f32.xlu1 %v7465_v8  ;;  %v7462_v40 = vsel %vm119_vm1, %v14076_v17, 0.0  ;;  %v7605_v8 = vld [vmem:[%s14716_s3 + $0x308] sm:$0xff] }
0x3647   :  { %7463 = vadd.xlane.f32.xlu0 %v7462_v40  ;;  %v11957_v40 = vpack.c.bf16 %v7605_v8, %v7604_v5 }
0x3649   :  { %11958 = vmatprep.subr.bf16.mxu0 %v11957_v40 }
0x36d3   :  { %v7467_v57 = vpop.xlane.xlu1 %7466 }
0x36d4   :  { %v7469_v48 = vmul.f32 0.03125, %v7467_v57  ;;  %v7464_v49 = vpop.xlane.xlu0 %7463  ;;  %v7606_v57 = vld [vmem:[%s14716_s3 + $0x310] sm:$0xff] }
0x36d5   :  { %v7468_v54 = vmul.f32 0.03125, %v7464_v49 }
0x36d6   :  { %v7471_v53 = vsub.f32 %v14073_v36, %v7469_v48  ;;  %v7607_v48 = vld [vmem:[%s14716_s3 + $0x318] sm:$0xff] }
0x36d7   :  { %v7470_v44 = vsub.f32 %v14076_v17, %v7468_v54  ;;  %v11961_v49 = vpack.c.bf16 %v7607_v48, %v7606_v57  ;;  %v7608_v54 = vld [vmem:[%s14716_s3 + $0x320] sm:$0xff] }
0x36d8   :  { %v7473_v10 = vmul.f32 %v7471_v53, %v7471_v53  ;;  %v10241_v48 = vld [vmem:[%s14717_s4 + $0x60] ss:$0 sm:$0xff] }
0x36d9   :  { %v7472_v23 = vmul.f32 %v7470_v44, %v7470_v44 }
0x36da   :  { %v7477_v47 = vsel %vm119_vm1, %v7473_v10, 0.0  ;;  %v7610_v10 = vld [vmem:[%s14716_s3 + $0x330] sm:$0xff] }
0x36db   :  { %7478 = vadd.xlane.f32.xlu1 %v7477_v47  ;;  %v7474_v62 = vsel %vm119_vm1, %v7472_v23, 0.0  ;;  %v7611_v23 = vld [vmem:[%s14716_s3 + $0x338] sm:$0xff] }
0x36dc   :  { %7475 = vadd.xlane.f32.xlu0 %v7474_v62  ;;  %v11969_v47 = vpack.c.bf16 %v7611_v23, %v7610_v10  ;;  %v7612_v62 = vld [vmem:[%s14716_s3 + $0x340] sm:$0xff] }
0x36dd   :  { %v11973_v3 = vpack.c.bf16 %v7613_v11, %v7612_v62 }
0x3768   :  { %v7479_v19 = vpop.xlane.xlu1 %7478 }
0x3769   :  { %v7481_v41 = vmul.f32 0.03125, %v7479_v19  ;;  %v7476_v52 = vpop.xlane.xlu0 %7475  ;;  %v7617_v19 = vld [vmem:[%s14716_s3 + $0x368] sm:$0xff] }
0x376a   :  { %v7480_v27 = vmul.f32 0.03125, %v7476_v52  ;;  %v7618_v52 = vld [vmem:[%s14716_s3 + $0x370] sm:$0xff] }
0x376b   :  { %v7483_v21 = vadd.f32 1e-05, %v7481_v41  ;;  %v11981_v41 = vpack.c.bf16 %v7617_v19, %v7616_v26 }
0x376c   :  { %v7482_v30 = vadd.f32 1e-05, %v7480_v27  ;;  %v7619_v27 = vld [vmem:[%s14716_s3 + $0x378] sm:$0xff] }
0x376d   :  { %12341 = vrsqrt.f32 %v7483_v21  ;;  %v11985_v21 = vpack.c.bf16 %v7619_v27, %v7618_v52 }
0x376e   :  { %12343 = vrsqrt.f32 %v7482_v30  ;;  %v10236_v30 = vld [vmem:[%s14717_s4 + $0x5c] ss:$0 sm:$0xff] }
0x3777   :  { %v12342_v42 = vpop.eup %12341 }
0x3778   :  { %v12344_v39 = vpop.eup %12343  ;;  %v7487_v32 = vmul.f32 %v12342_v42, %v7471_v53  ;;  %v7609_v53 = vld [vmem:[%s14716_s3 + $0x328] sm:$0xff] }
0x3779   :  { %v7486_v45 = vmul.f32 %v12344_v39, %v7470_v44  ;;  %v11965_v44 = vpack.c.bf16 %v7609_v53, %v7608_v54 }
0x377a   :  { %v7493_v31 = vmul.f32 %v10234_v43, %v7487_v32 }
0x377b   :  { %v7492_v35 = vmul.f32 %v10234_v43, %v7486_v45 }
0x377c   :  { %v7499_v14 = vadd.f32 %v10235_v1, %v7493_v31 }
0x377d   :  { %v7498_v4 = vadd.f32 %v10235_v1, %v7492_v35 }
0x377f   :  { %11390 = vmatprep.mubr.msk.f32.mxu0 %vm119_vm1, %v7498_v4 }
0x3780   :  { %11391 = vmatmul.mubr.msk.f32.vlgmr.msra.gmra.mrb[70].mxu0 %vm119_vm1, %v7499_v14 }
0x3781   :  { %11960 = vmatpush3.bf16.msra.mxu0 %v11957_v40 }
0x3782   :  { %11962 = vmatprep.subr.bf16.mxu0 %v11961_v49 }
0x3785   :  { %11964 = vmatpush3.bf16.msra.mxu0 %v11961_v49 }
0x3786   :  { %11966 = vmatprep.subr.bf16.mxu0 %v11965_v44 }
0x3789   :  { %11968 = vmatpush3.bf16.msra.mxu0 %v11965_v44 }
0x378a   :  { %11970 = vmatprep.subr.bf16.mxu0 %v11969_v47 }
0x378d   :  { %11972 = vmatpush3.bf16.msra.mxu0 %v11969_v47 }
0x378e   :  { %11974 = vmatprep.subr.bf16.mxu0 %v11973_v3 }
0x3791   :  { %11976 = vmatpush3.bf16.msra.mxu0 %v11973_v3 }
0x3792   :  { %11978 = vmatprep.subr.bf16.mxu0 %v11977_v50 }
0x3795   :  { %11980 = vmatpush3.bf16.msra.mxu0 %v11977_v50 }
0x3796   :  { %11982 = vmatprep.subr.bf16.mxu0 %v11981_v41 }
0x3799   :  { %11984 = vmatpush3.bf16.msra.mxu0 %v11981_v41 }
0x379a   :  { %11986 = vmatprep.subr.bf16.mxu0 %v11985_v21 }
0x379d   :  { %11988 = vmatpush3.bf16.msra.mxu0 %v11985_v21 }
0x379e   :  { %11444 = vmatprep.subr.mxu0 %v12473_v0 }
0x3853   :  { %v11392_v42 = vpop.f32.mrb[70].mxu0 }
0x3854   :  { %v7587_v43 = vadd.f32 %v11392_v42, %v10236_v30  ;;  %v7581_v39 = vpop.f32.mrb[71].mxu0  ;;  %v7744_v42 = vld [vmem:[%s14714_s1 + $0x190] sm:$0xff] }
0x3855   :  { %v7582_v32 = vadd.f32 %v10236_v30, %v7581_v39 }
0x3856   :  { %v10240_v45 = vmul.f32 -1.442695, %v7587_v43 }
0x3857   :  { %v10239_v1 = vmul.f32 -1.442695, %v7582_v32 }
0x3858   :  { %12345 = vpow2.f32 %v10240_v45  ;;  %v7747_v45 = vld [vmem:[%s14714_s1 + $0x1f0] sm:$0xff] }
0x3859   :  { %12347 = vpow2.f32 %v10239_v1 }
0x3862   :  { %v12346_v31 = vpop.eup %12345 }
0x3863   :  { %v12348_v35 = vpop.eup %12347  ;;  %v7597_v4 = vadd.f32 1.0, %v12346_v31 }
0x3864   :  { %v7596_v14 = vadd.f32 1.0, %v12348_v35 }
0x3865   :  { %12349 = vrcp.f32 %v7597_v4 }
0x3866   :  { %12351 = vrcp.f32 %v7596_v14 }
0x386f   :  { %v12350_v5 = vpop.eup %12349 }
0x3870   :  { %v12352_v8 = vpop.eup %12351  ;;  %v7603_v57 = vmul.f32 %v12350_v5, %v7587_v43  ;;  %v7745_v43 = vld [vmem:[%s14714_s1 + $0x1b0] sm:$0xff] }
0x3871   :  { %v7602_v40 = vmul.f32 %v12352_v8, %v7582_v32  ;;  %v11989_v39 = vpack.c.bf16 %v7745_v43, %v7744_v42  ;;  %v7746_v32 = vld [vmem:[%s14714_s1 + $0x1d0] sm:$0xff] }
0x3872   :  { %v11993_v1 = vpack.c.bf16 %v7747_v45, %v7746_v32 }
0x3873   :  { %11425 = vmatprep.mubr.f32.mxu0 %v7602_v40  ;;  %11990 = vmatprep.subr.bf16.mxu1 %v11989_v39 }
0x3874   :  { %11426 = vmatmul.mubr.f32.vlgmr.msra.gmra.mrb[72].mxu0 %v7603_v57  ;;  %11992 = vmatpush3.bf16.msra.mxu1 %v11989_v39  ;;  %v10242_v57 = vld [vmem:[%s14717_s4 + $0x51] ss:$0 sm:$0xff] }
0x3875   :  { %11446 = vmatprep.mubr.msk.f32.mxu0 %vm12474_vm2, %v12473_v0  ;;  %11994 = vmatprep.subr.bf16.mxu1 %v11993_v1 }
0x3878   :  { %11996 = vmatpush3.bf16.msra.mxu1 %v11993_v1 }
0x3879   :  { %11439 = vmatprep.subr.mxu1 %v12473_v0 }
0x3947   :  { %v11427_v49 = vpop.f32.mrb[72].mxu0 }
0x3948   :  { %v7697_v54 = vadd.f32 %v11427_v49, %v10241_v48  ;;  %v7691_v53 = vpop.f32.mrb[73].mxu0 }
0x3949   :  { %v7692_v44 = vadd.f32 %v10241_v48, %v7691_v53  ;;  %v10243_v53 = vld [vmem:[%s14717_s4 + $0x57] ss:$0 sm:$0xff] }
0x394a   :  { %v7701_v10 = vmul.f32 0.5, %v7697_v54 }
0x394b   :  { %v7700_v23 = vmul.f32 0.5, %v7692_v44 }
0x394c   :  { %v14164_v47 = vadd.f32 %v7701_v10, %v14073_v36 }
0x394d   :  { %v14167_v62 = vadd.f32 %v7700_v23, %v14076_v17 }
0x394e   :  { %v7709_v11 = vsel %vm119_vm1, %v14164_v47, 0.0 }
0x394f   :  { %7710 = vadd.xlane.f32.xlu1 %v7709_v11  ;;  %v7706_v3 = vsel %vm119_vm1, %v14167_v62, 0.0 }
0x3950   :  { %7707 = vadd.xlane.f32.xlu0 %v7706_v3  ;;  %v10244_v3 = vld [vmem:[%s14717_s4 + $0x5e] ss:$0 sm:$0xff] }
0x39dc   :  { %v7711_v24 = vpop.xlane.xlu1 %7710 }
0x39dd   :  { %v7713_v13 = vmul.f32 0.03125, %v7711_v24  ;;  %v7708_v50 = vpop.xlane.xlu0 %7707 }
0x39de   :  { %v7712_v26 = vmul.f32 0.03125, %v7708_v50 }
0x39df   :  { %v7715_v19 = vsub.f32 %v14164_v47, %v7713_v13 }
0x39e0   :  { %v7714_v41 = vsub.f32 %v14167_v62, %v7712_v26 }
0x39e1   :  { %v7717_v52 = vmul.f32 %v7715_v19, %v7715_v19 }
0x39e2   :  { %v7716_v27 = vmul.f32 %v7714_v41, %v7714_v41 }
0x39e3   :  { %v7721_v21 = vsel %vm119_vm1, %v7717_v52, 0.0 }
0x39e4   :  { %7722 = vadd.xlane.f32.xlu1 %v7721_v21  ;;  %v7718_v30 = vsel %vm119_vm1, %v7716_v27, 0.0 }
0x39e5   :  { %7719 = vadd.xlane.f32.xlu0 %v7718_v30 }
0x3a71   :  { %v7723_v31 = vpop.xlane.xlu1 %7722 }
0x3a72   :  { %v7725_v35 = vmul.f32 0.03125, %v7723_v31  ;;  %v7720_v4 = vpop.xlane.xlu0 %7719 }
0x3a73   :  { %v7724_v14 = vmul.f32 0.03125, %v7720_v4 }
0x3a74   :  { %v7727_v5 = vadd.f32 1e-05, %v7725_v35 }
0x3a75   :  { %v7726_v8 = vadd.f32 1e-05, %v7724_v14 }
0x3a76   :  { %12353 = vrsqrt.f32 %v7727_v5 }
0x3a77   :  { %12355 = vrsqrt.f32 %v7726_v8 }
0x3a80   :  { %v12354_v40 = vpop.eup %12353 }
0x3a81   :  { %v12356_v48 = vpop.eup %12355  ;;  %v7731_v49 = vmul.f32 %v12354_v40, %v7715_v19 }
0x3a82   :  { %v7730_v54 = vmul.f32 %v12356_v48, %v7714_v41 }
0x3a83   :  { %v7737_v44 = vmul.f32 %v10242_v57, %v7731_v49 }
0x3a84   :  { %v7736_v10 = vmul.f32 %v10242_v57, %v7730_v54 }
0x3a85   :  { %v7743_v11 = vadd.f32 %v10243_v53, %v7737_v44 }
0x3a86   :  { %v7742_v23 = vadd.f32 %v10243_v53, %v7736_v10 }
0x3a88   :  { %11436 = vmatprep.mubr.msk.f32.mxu1 %vm119_vm1, %v7742_v23 }
0x3a89   :  { %11437 = vmatmul.mubr.msk.f32.vlgmr.msra.gmra.mrb[76].mxu1 %vm119_vm1, %v7743_v11 }
0x3a8a   :  { %11441 = vmatprep.mubr.msk.f32.mxu1 %vm12474_vm2, %v12473_v0 }
0x3b5c   :  { %v11438_v24 = vpop.f32.mrb[76].mxu1 }
0x3b5d   :  { %v14203_v13 = vadd.f32 %v11438_v24, %v10244_v3  ;;  %v7825_v50 = vpop.f32.mrb[77].mxu1 }
0x3b5e   :  { %v14209_v26 = vadd.f32 %v10244_v3, %v7825_v50 }
0x3b5f   :  { %8224 = vrot.lane.b32.xlu0 %v14203_v13, %s12476_s19  ;;  %8146 = vrot.lane.b32.xlu1 %v14203_v13, %s12475_s18 }
0x3b63   :  { %7913 = vrot.lane.b32.xlu1 %v14209_v26, %s12476_s19  ;;  %7835 = vrot.lane.b32.xlu0 %v14209_v26, %s12475_s18 }
0x3b67   :  { %7911 = vrot.lane.b32.xlu1 %v14209_v26, %s12477_s20  ;;  %8069 = vrot.lane.b32.xlu0 %v14209_v26, %s12481_s24 }
0x3b6b   :  { %7991 = vrot.lane.b32.xlu1 %v14209_v26, %s12479_s22  ;;  %8067 = vrot.lane.b32.xlu0 %v14209_v26, %s12480_s23 }
0x3b6f   :  { %7989 = vrot.lane.b32.xlu1 %v14209_v26, %s12478_s21  ;;  %8302 = vrot.lane.b32.xlu0 %v14203_v13, %s12479_s22 }
0x3b73   :  { %8222 = vrot.lane.b32.xlu1 %v14203_v13, %s12477_s20  ;;  %8300 = vrot.lane.b32.xlu0 %v14203_v13, %s12478_s21 }
0x3b77   :  { %8380 = vrot.lane.b32.xlu1 %v14203_v13, %s12481_s24 }
0x3b7b   :  { %8378 = vrot.lane.b32.xlu1 %v14203_v13, %s12480_s23 }
0x3bd1   :  { %v8225_v19 = vpop.permute.xlu0 %8224  ;;  %v8147_v41 = vpop.permute.xlu1 %8146 }
0x3bd5   :  { %v7914_v52 = vpop.permute.xlu1 %7913  ;;  %v7836_v27 = vpop.permute.xlu0 %7835 }
0x3bd6   :  { %11440 = vmatpush3.xpose.msk.msra.mxu1 %vm496_vm3, %v7836_v27  ;;  %11445 = vmatpush3.xpose.msk.msra.mxu0 %vm496_vm3, %v7914_v52 }
0x3bd7   :  { %11454 = vmatprep.subr.mxu0 %v12473_v0  ;;  %11449 = vmatprep.subr.mxu1 %v12473_v0 }
0x3bd9   :  { %v7912_v21 = vpop.permute.xlu1 %7911  ;;  %11442 = vmatmul.mubr.msk.f32.vlgmr.msra.gmra.mrb[78].mxu1 %vm496_vm3, %v14209_v26  ;;  %v8070_v30 = vpop.permute.xlu0 %8069 }
0x3bda   :  { %11447 = vmatmul.mubr.msk.f32.vlgmr.msra.gmra.mrb[74].mxu0 %vm496_vm3, %v7912_v21  ;;  %11451 = vmatprep.mubr.msk.f32.mxu1 %vm12474_vm2, %v12473_v0 }
0x3bdb   :  { %11455 = vmatpush3.xpose.msk.msra.mxu0 %vm496_vm3, %v8070_v30  ;;  %11456 = vmatprep.mubr.msk.f32.mxu0 %vm12474_vm2, %v12473_v0 }
0x3bdc   :  { %11464 = vmatprep.subr.mxu0 %v12473_v0 }
0x3bdd   :  { %v7992_v42 = vpop.permute.xlu1 %7991  ;;  %v8068_v43 = vpop.permute.xlu0 %8067 }
0x3bde   :  { %11450 = vmatpush3.xpose.msk.msra.mxu1 %vm496_vm3, %v7992_v42  ;;  %11457 = vmatmul.mubr.msk.f32.vlgmr.msra.gmra.mrb[76].mxu0 %vm496_vm3, %v8068_v43 }
0x3bdf   :  { %11465 = vmatpush3.xpose.msk.msra.mxu0 %vm496_vm3, %v8225_v19  ;;  %11459 = vmatprep.subr.mxu1 %v12473_v0 }
0x3be0   :  { %11466 = vmatprep.mubr.msk.f32.mxu0 %vm12474_vm2, %v12473_v0  ;;  %11474 = vmatprep.subr.mxu0 %v12473_v0 }
0x3be1   :  { %v7990_v39 = vpop.permute.xlu1 %7989  ;;  %v8303_v32 = vpop.permute.xlu0 %8302 }
0x3be2   :  { %11452 = vmatmul.mubr.msk.f32.vlgmr.msra.gmra.mrb[80].mxu1 %vm496_vm3, %v7990_v39 }
0x3be3   :  { %11460 = vmatpush3.xpose.msk.msra.mxu1 %vm496_vm3, %v8147_v41  ;;  %11461 = vmatprep.mubr.msk.f32.mxu1 %vm12474_vm2, %v12473_v0 }
0x3be4   :  { %11469 = vmatprep.subr.mxu1 %v12473_v0 }
0x3be5   :  { %v8223_v45 = vpop.permute.xlu1 %8222  ;;  %v8301_v1 = vpop.permute.xlu0 %8300 }
0x3be6   :  { %11462 = vmatmul.mubr.msk.f32.vlgmr.msra.gmra.mrb[82].mxu1 %vm496_vm3, %v14203_v13  ;;  %11467 = vmatmul.mubr.msk.f32.vlgmr.msra.gmra.mrb[78].mxu0 %vm496_vm3, %v8223_v45 }
0x3be7   :  { %11470 = vmatpush3.xpose.msk.msra.mxu1 %vm496_vm3, %v8303_v32  ;;  %11471 = vmatprep.mubr.msk.f32.mxu1 %vm12474_vm2, %v12473_v0 }
0x3be8   :  { %11476 = vmatprep.mubr.msk.f32.mxu0 %vm12474_vm2, %v12473_v0  ;;  %11479 = vmatprep.subr.mxu1 %v12473_v0 }
0x3be9   :  { %v8381_v31 = vpop.permute.xlu1 %8380 }
0x3bea   :  { %11472 = vmatmul.mubr.msk.f32.vlgmr.msra.gmra.mrb[84].mxu1 %vm496_vm3, %v8301_v1  ;;  %11475 = vmatpush3.xpose.msk.msra.mxu0 %vm496_vm3, %v8381_v31 }
0x3beb   :  { %11484 = vmatprep.subr.mxu0 %v12473_v0  ;;  %11481 = vmatprep.mubr.msk.f32.mxu1 %vm12474_vm2, %v12473_v0 }
0x3bed   :  { %v8379_v35 = vpop.permute.xlu1 %8378 }
0x3bee   :  { %11477 = vmatmul.mubr.msk.f32.vlgmr.msra.gmra.mrb[80].mxu0 %vm496_vm3, %v8379_v35 }
0x3bef   :  { %11486 = vmatprep.mubr.msk.f32.mxu0 %vm12474_vm2, %v12473_v0 }
0x3cac   :  { %v7907_v4 = vpop.f32.mrb[78].mxu1 }
0x3cad   :  { %v8456_v14 = vmul.f32 0.35355338, %v7907_v4  ;;  %v11443_v5 = vpop.f32.mrb[79].mxu1  ;;  %v7985_v8 = vpop.f32.mrb[74].mxu0 }
0x3cae   :  { %v8457_v40 = vmul.f32 0.35355338, %v7985_v8  ;;  %v11448_v57 = vpop.f32.mrb[75].mxu0 }
0x3caf   :  { %v8464_v48 = vsel %vm496_vm3, %v8456_v14, -inf }
0x3cb0   :  { %8465 = vmax.xlane.f32.xlu0 %v8464_v48  ;;  %v8467_v49 = vsel %vm496_vm3, %v8457_v40, -inf }
0x3cb1   :  { %8468 = vmax.xlane.f32.xlu1 %v8467_v49  ;;  %v8141_v54 = vpop.f32.mrb[76].mxu0 }
0x3cb2   :  { %v11458_v53 = vpop.f32.mrb[77].mxu0  ;;  %v8459_v11 = vmul.f32 0.35355338, %v8141_v54 }
0x3cb4   :  { %v8473_v21 = vsel %vm496_vm3, %v8459_v11, -inf }
0x3cb5   :  { %v8063_v44 = vpop.f32.mrb[80].mxu1 }
0x3cb6   :  { %v8458_v10 = vmul.f32 0.35355338, %v8063_v44  ;;  %v11453_v23 = vpop.f32.mrb[81].mxu1 }
0x3cb8   :  { %v8470_v3 = vsel %vm496_vm3, %v8458_v10, -inf }
0x3cb9   :  { %8471 = vmax.xlane.f32.xlu0 %v8470_v3  ;;  %v8218_v24 = vpop.f32.mrb[82].mxu1  ;;  %v8296_v50 = vpop.f32.mrb[78].mxu0 }
0x3cba   :  { %v8461_v19 = vmul.f32 0.35355338, %v8296_v50  ;;  %v11463_v41 = vpop.f32.mrb[83].mxu1  ;;  %v11468_v52 = vpop.f32.mrb[79].mxu0  ;;  %v8460_v27 = vmul.f32 0.35355338, %v8218_v24 }
0x3cbc   :  { %v8479_v30 = vsel %vm496_vm3, %v8461_v19, -inf  ;;  %v8476_v32 = vsel %vm496_vm3, %v8460_v27, -inf }
0x3cbd   :  { %8474 = vmax.xlane.f32.xlu0 %v8473_v21  ;;  %8480 = vmax.xlane.f32.xlu1 %v8479_v30  ;;  %v8374_v42 = vpop.f32.mrb[84].mxu1 }
0x3cbe   :  { %v11473_v43 = vpop.f32.mrb[85].mxu1  ;;  %v8462_v39 = vmul.f32 0.35355338, %v8374_v42 }
0x3cc0   :  { %v8482_v4 = vsel %vm496_vm3, %v8462_v39, -inf }
0x3cc1   :  { %8477 = vmax.xlane.f32.xlu0 %v8476_v32  ;;  %v8452_v45 = vpop.f32.mrb[80].mxu0 }
0x3cc2   :  { %v8463_v1 = vmul.f32 0.35355338, %v8452_v45  ;;  %v11478_v31 = vpop.f32.mrb[81].mxu0 }
0x3cc4   :  { %v8485_v35 = vsel %vm496_vm3, %v8463_v1, -inf }
0x3cc5   :  { %8486 = vmax.xlane.f32.xlu1 %v8485_v35  ;;  %8483 = vmax.xlane.f32.xlu0 %v8482_v4 }
0x3cd6   :  { %8628 = vrot.lane.b32.xlu1 %v14209_v26, %s12482_s25 }
0x3cda   :  { %8704 = vrot.lane.b32.xlu1 %v14209_v26, %s12483_s26 }
0x3cdb   :  { %8552 = vrot.lane.b32.xlu0 %v14209_v26, %s12484_s27 }
0x3cde   :  { %8780 = vrot.lane.b32.xlu1 %v14209_v26, %s12485_s28 }
0x3cdf   :  { %8883 = vrot.lane.b32.xlu0 %v14203_v13, %s12484_s27 }
0x3ce2   :  { %8959 = vrot.lane.b32.xlu1 %v14203_v13, %s12482_s25 }
0x3d3d   :  { %v8466_v5 = vpop.xlane.xlu0 %8465 }
0x3d3e   :  { %v8488_v8 = vsub.f32 %v8456_v14, %v8466_v5  ;;  %v8469_v57 = vpop.xlane.xlu1 %8468 }
0x3d3f   :  { %v8489_v48 = vsub.f32 %v8457_v40, %v8469_v57 }
0x3d40   :  { %v8496_v49 = vmul.f32 1.442695, %v8488_v8 }
0x3d41   :  { %v8498_v54 = vmul.f32 1.442695, %v8489_v48 }
0x3d42   :  { %12357 = vpow2.f32 %v8496_v49 }
0x3d43   :  { %12359 = vpow2.f32 %v8498_v54 }
0x3d46   :  { %v8472_v53 = vpop.xlane.xlu0 %8471 }
0x3d47   :  { %v8490_v44 = vsub.f32 %v8458_v10, %v8472_v53 }
0x3d49   :  { %v8500_v23 = vmul.f32 1.442695, %v8490_v44 }
0x3d4a   :  { %v8481_v3 = vpop.xlane.xlu1 %8480  ;;  %v8475_v24 = vpop.xlane.xlu0 %8474 }
0x3d4b   :  { %12361 = vpow2.f32 %v8500_v23  ;;  %v8493_v26 = vsub.f32 %v8461_v19, %v8481_v3  ;;  %v8491_v50 = vsub.f32 %v8459_v11, %v8475_v24 }
0x3d4c   :  { %v12358_v41 = vpop.eup %12357 }
0x3d4d   :  { %v12360_v52 = vpop.eup %12359  ;;  %v8502_v21 = vmul.f32 1.442695, %v8491_v50  ;;  %v8512_v30 = vsel %vm496_vm3, %v12358_v41, 0.0  ;;  %v8506_v14 = vmul.f32 1.442695, %v8493_v26 }
0x3d4e   :  { %8513 = vadd.xlane.f32.xlu0 %v8512_v30  ;;  %v8478_v40 = vpop.xlane.xlu0 %8477  ;;  %v8515_v42 = vsel %vm496_vm3, %v12360_v52, 0.0 }
0x3d4f   :  { %v8492_v43 = vsub.f32 %v8460_v27, %v8478_v40  ;;  %8516 = vadd.xlane.f32.xlu1 %v8515_v42  ;;  %12363 = vpow2.f32 %v8502_v21 }
0x3d50   :  { %12365 = vpow2.f32 %v8506_v14 }
0x3d51   :  { %v8504_v10 = vmul.f32 1.442695, %v8492_v43 }
0x3d52   :  { %v8487_v32 = vpop.xlane.xlu1 %8486  ;;  %v8484_v45 = vpop.xlane.xlu0 %8483 }
0x3d53   :  { %12367 = vpow2.f32 %v8504_v10  ;;  %v8495_v19 = vsub.f32 %v8463_v1, %v8487_v32  ;;  %v8494_v11 = vsub.f32 %v8462_v39, %v8484_v45 }
0x3d55   :  { %v12362_v31 = vpop.eup %12361  ;;  %v8510_v35 = vmul.f32 1.442695, %v8495_v19  ;;  %v8508_v4 = vmul.f32 1.442695, %v8494_v11 }
0x3d56   :  { %v8629_v5 = vpop.permute.xlu1 %8628  ;;  %v8553_v8 = vpop.permute.xlu0 %8552  ;;  %v8518_v57 = vsel %vm496_vm3, %v12362_v31, 0.0 }
0x3d57   :  { %12369 = vpow2.f32 %v8510_v35  ;;  %11485 = vmatpush3.msra.mxu0 %v8629_v5  ;;  %8519 = vadd.xlane.f32.xlu0 %v8518_v57 }
0x3d58   :  { %12371 = vpow2.f32 %v8508_v4  ;;  %11480 = vmatpush3.msra.mxu1 %v8553_v8  ;;  %11494 = vmatprep.subr.mxu0 %v12473_v0 }
0x3d59   :  { %11489 = vmatprep.subr.mxu1 %v12473_v0  ;;  %v12364_v27 = vpop.eup %12363 }
0x3d5a   :  { %v8521_v1 = vsel %vm496_vm3, %v12364_v27, 0.0  ;;  %v12366_v39 = vpop.eup %12365  ;;  %v8705_v24 = vpop.permute.xlu1 %8704 }
0x3d5b   :  { %8522 = vadd.xlane.f32.xlu1 %v8521_v1  ;;  %v8527_v54 = vsel %vm496_vm3, %v12366_v39, 0.0  ;;  %v8884_v50 = vpop.permute.xlu0 %8883 }
0x3d5d   :  { %v12368_v48 = vpop.eup %12367 }
0x3d5e   :  { %v8524_v49 = vsel %vm496_vm3, %v12368_v48, 0.0  ;;  %v8781_v26 = vpop.permute.xlu1 %8780 }
0x3d5f   :  { %8525 = vadd.xlane.f32.xlu0 %v8524_v49  ;;  %8528 = vadd.xlane.f32.xlu1 %v8527_v54 }
0x3d61   :  { %v14305_v53 = vpop.eup %12369 }
0x3d62   :  { %v14307_v44 = vpop.eup %12371  ;;  %v8533_v23 = vsel %vm496_vm3, %v14305_v53, 0.0  ;;  %v8960_v21 = vpop.permute.xlu1 %8959 }
0x3d63   :  { %v8530_v3 = vsel %vm496_vm3, %v14307_v44, 0.0  ;;  %8534 = vadd.xlane.f32.xlu1 %v8533_v23 }
0x3d64   :  { %8531 = vadd.xlane.f32.xlu0 %v8530_v3 }
0x3d74   :  { %9111 = vrot.lane.b32.xlu1 %v14203_v13, %s12485_s28 }
0x3d7a   :  { %9035 = vrot.lane.b32.xlu0 %v14203_v13, %s12483_s26 }
0x3ddb   :  { %v8514_v30 = vpop.xlane.xlu0 %8513 }
0x3ddc   :  { %12373 = vrcp.f32 %v8514_v30  ;;  %v8517_v14 = vpop.xlane.xlu1 %8516  ;;  %v9217_v30 = vld [vmem:[%s14715_s2 + $0x120] sm:$0xff] }
0x3ddd   :  { %12375 = vrcp.f32 %v8517_v14 }
0x3de4   :  { %v8520_v40 = vpop.xlane.xlu0 %8519 }
0x3de5   :  { %12377 = vrcp.f32 %v8520_v40 }
0x3de6   :  { %v12374_v42 = vpop.eup %12373 }
0x3de7   :  { %v12376_v43 = vpop.eup %12375  ;;  %v14317_v10 = vmul.f32 %v12374_v42, %v12358_v41 }
0x3de8   :  { %v14319_v32 = vmul.f32 %v12376_v43, %v12360_v52  ;;  %v8523_v45 = vpop.xlane.xlu1 %8522 }
0x3de9   :  { %11482 = vmatmul.mubr.msk.f32.vlgmr.msra.gmra.mrb[86].mxu1 %vm496_vm3, %v14317_v10  ;;  %12379 = vrcp.f32 %v8523_v45 }
0x3dea   :  { %11490 = vmatpush3.msra.mxu1 %v8705_v24  ;;  %11487 = vmatmul.mubr.msk.f32.vlgmr.msra.gmra.mrb[82].mxu0 %vm496_vm3, %v14319_v32 }
0x3deb   :  { %11495 = vmatpush3.msra.mxu0 %v8781_v26  ;;  %11491 = vmatprep.mubr.msk.f32.mxu1 %vm12474_vm2, %v12473_v0 }
0x3dec   :  { %v8526_v13 = vpop.xlane.xlu0 %8525  ;;  %11499 = vmatprep.subr.mxu1 %v12473_v0  ;;  %11496 = vmatprep.mubr.msk.f32.mxu0 %vm12474_vm2, %v12473_v0  ;;  %v8529_v41 = vpop.xlane.xlu1 %8528 }
0x3ded   :  { %12381 = vrcp.f32 %v8526_v13  ;;  %11504 = vmatprep.subr.mxu0 %v12473_v0 }
0x3dee   :  { %12383 = vrcp.f32 %v8529_v41 }
0x3def   :  { %v12378_v52 = vpop.eup %12377 }
0x3df0   :  { %v14331_v19 = vmul.f32 %v12378_v52, %v12362_v31  ;;  %v8535_v11 = vpop.xlane.xlu1 %8534 }
0x3df1   :  { %v8532_v35 = vpop.xlane.xlu0 %8531  ;;  %12385 = vrcp.f32 %v8535_v11 }
0x3df2   :  { %11492 = vmatmul.mubr.msk.f32.vlgmr.msra.gmra.mrb[88].mxu1 %vm496_vm3, %v14331_v19  ;;  %12387 = vrcp.f32 %v8532_v35 }
0x3df3   :  { %11500 = vmatpush3.msra.mxu1 %v8884_v50  ;;  %11501 = vmatprep.mubr.msk.f32.mxu1 %vm12474_vm2, %v12473_v0  ;;  %v12380_v4 = vpop.eup %12379 }
0x3df4   :  { %11509 = vmatprep.subr.mxu1 %v12473_v0  ;;  %v14338_v5 = vmul.f32 %v12380_v4, %v12364_v27  ;;  %v9112_v27 = vpop.permute.xlu1 %9111 }
0x3df5   :  { %v9036_v49 = vpop.permute.xlu0 %9035 }
0x3df6   :  { %11497 = vmatmul.mubr.msk.f32.vlgmr.msra.gmra.mrb[84].mxu0 %vm496_vm3, %v14338_v5 }
0x3df7   :  { %v12382_v8 = vpop.eup %12381  ;;  %11505 = vmatpush3.msra.mxu0 %v8960_v21  ;;  %11506 = vmatprep.mubr.msk.f32.mxu0 %vm12474_vm2, %v12473_v0  ;;  %v9216_v21 = vld [vmem:[%s14715_s2 + $0x118] sm:$0xff] }
0x3df8   :  { %v12384_v31 = vpop.eup %12383  ;;  %v14342_v57 = vmul.f32 %v12382_v8, %v12368_v48  ;;  %11514 = vmatprep.subr.mxu0 %v12473_v0  ;;  %v12001_v14 = vpack.c.bf16 %v9217_v30, %v9216_v21 }
0x3df9   :  { %v14346_v1 = vmul.f32 %v12384_v31, %v12366_v39 }
0x3dfa   :  { %11502 = vmatmul.mubr.msk.f32.vlgmr.msra.gmra.mrb[90].mxu1 %vm496_vm3, %v14342_v57 }
0x3dfb   :  { %11507 = vmatmul.mubr.msk.f32.vlgmr.msra.gmra.mrb[86].mxu0 %vm496_vm3, %v14346_v1  ;;  %11510 = vmatpush3.msra.mxu1 %v9036_v49  ;;  %v12386_v54 = vpop.eup %12385 }
0x3dfc   :  { %11515 = vmatpush3.msra.mxu0 %v9112_v27  ;;  %11511 = vmatprep.mubr.msk.f32.mxu1 %vm12474_vm2, %v12473_v0  ;;  %v12388_v48 = vpop.eup %12387  ;;  %v14356_v39 = vmul.f32 %v12386_v54, %v14305_v53  ;;  %v9214_v53 = vld [vmem:[%s14715_s2 + $0x108] sm:$0xff] }
0x3dfd   :  { %11516 = vmatprep.mubr.msk.f32.mxu0 %vm12474_vm2, %v12473_v0  ;;  %v14361_v23 = vmul.f32 %v12388_v48, %v14307_v44  ;;  %v9215_v0 = vld [vmem:[%s14715_s2 + $0x110] sm:$0xff] }
0x3dfe   :  { %v11997_v44 = vpack.c.bf16 %v9215_v0, %v9214_v53 }
0x3dff   :  { %11517 = vmatmul.mubr.msk.f32.vlgmr.msra.gmra.mrb[88].mxu0 %vm496_vm3, %v14356_v39  ;;  %11512 = vmatmul.mubr.msk.f32.vlgmr.msra.gmra.mrb[92].mxu1 %vm496_vm3, %v14361_v23 }
0x3e00   :  { %11998 = vmatprep.subr.bf16.mxu1 %v11997_v44 }
0x3e01   :  { %12000 = vmatpush3.bf16.msra.mxu1 %v11997_v44 }
0x3e02   :  { %12002 = vmatprep.subr.bf16.mxu1 %v12001_v14 }
0x3e05   :  { %12004 = vmatpush3.bf16.msra.mxu1 %v12001_v14 }
0x3ebc   :  { %v8624_v3 = vpop.f32.mrb[86].mxu1 }
0x3ebd   :  { %v11483_v24 = vpop.f32.mrb[87].mxu1  ;;  %v8700_v26 = vpop.f32.mrb[82].mxu0 }
0x3ebe   :  { %v11488_v50 = vpop.f32.mrb[83].mxu0  ;;  %8857 = vrot.lane.b32.xlu0 %v8700_v26, %s12487_s13 }
0x3ec5   :  { %v8776_v40 = vpop.f32.mrb[88].mxu1 }
0x3ec6   :  { %8861 = vrot.lane.b32.xlu1 %v8776_v40, %s12486_s29  ;;  %v11493_v42 = vpop.f32.mrb[89].mxu1 }
0x3ec9   :  { %v8852_v43 = vpop.f32.mrb[84].mxu0 }
0x3eca   :  { %v11498_v45 = vpop.f32.mrb[85].mxu0  ;;  %8865 = vrot.lane.b32.xlu1 %v8852_v43, %s12488_s14 }
0x3ecd   :  { %v8955_v13 = vpop.f32.mrb[90].mxu1 }
0x3ece   :  { %v9031_v41 = vpop.f32.mrb[86].mxu0  ;;  %v11503_v52 = vpop.f32.mrb[91].mxu1 }
0x3ecf   :  { %v11508_v11 = vpop.f32.mrb[87].mxu0  ;;  %9188 = vrot.lane.b32.xlu0 %v9031_v41, %s12487_s13 }
0x3ed2   :  { %v9183_v35 = vpop.f32.mrb[88].mxu0  ;;  %v9107_v4 = vpop.f32.mrb[92].mxu1 }
0x3ed3   :  { %v11518_v8 = vpop.f32.mrb[89].mxu0  ;;  %9196 = vrot.lane.b32.xlu1 %v9183_v35, %s12488_s14  ;;  %9192 = vrot.lane.b32.xlu0 %v9107_v4, %s12486_s29  ;;  %v11513_v31 = vpop.f32.mrb[93].mxu1 }
0x3f30   :  { %v8858_v27 = vpop.permute.xlu0 %8857 }
0x3f31   :  { %v8868_v54 = vsel %vm496_vm3, %v8624_v3, %v8858_v27  ;;  %v10271_v3 = vld [vmem:[%s14717_s4 + $0x62] ss:$0 sm:$0xff] }
0x3f38   :  { %v8862_v49 = vpop.permute.xlu1 %8861 }
0x3f39   :  { %v8869_v48 = vsel %vm35_vm0, %v8868_v54, %v8862_v49 }
0x3f3c   :  { %v8866_v24 = vpop.permute.xlu1 %8865 }
0x3f3d   :  { %v8870_v26 = vsel %vm1530_vm4, %v8869_v48, %v8866_v24  ;;  %v9346_v48 = vld [vmem:[%s14714_s1 + $0x198] sm:$0xff] }
0x3f3e   :  { %11527 = vmatprep.mubr.msk.f32.mxu1 %vm119_vm1, %v8870_v26  ;;  %v9347_v24 = vld [vmem:[%s14714_s1 + $0x1b8] sm:$0xff] }
0x3f3f   :  { %v12005_v26 = vpack.c.bf16 %v9347_v24, %v9346_v48 }
0x3f41   :  { %v9189_v50 = vpop.permute.xlu0 %9188  ;;  %12006 = vmatprep.subr.bf16.mxu0 %v12005_v26 }
0x3f42   :  { %v9199_v0 = vsel %vm496_vm3, %v8955_v13, %v9189_v50  ;;  %12008 = vmatpush3.bf16.msra.mxu0 %v12005_v26  ;;  %v9348_v50 = vld [vmem:[%s14714_s1 + $0x1d8] sm:$0xff] }
0x3f45   :  { %v9197_v53 = vpop.permute.xlu1 %9196  ;;  %v9193_v44 = vpop.permute.xlu0 %9192 }
0x3f46   :  { %v9200_v21 = vsel %vm35_vm0, %v9199_v0, %v9193_v44 }
0x3f47   :  { %v9201_v30 = vsel %vm1530_vm4, %v9200_v21, %v9197_v53  ;;  %v9349_v53 = vld [vmem:[%s14714_s1 + $0x1f8] sm:$0xff] }
0x3f48   :  { %11528 = vmatmul.mubr.msk.f32.vlgmr.msra.gmra.mrb[94].mxu1 %vm119_vm1, %v9201_v30  ;;  %v12009_v0 = vpack.c.bf16 %v9349_v53, %v9348_v50 }
0x3f4a   :  { %12010 = vmatprep.subr.bf16.mxu0 %v12009_v0 }
0x3f4b   :  { %12012 = vmatpush3.bf16.msra.mxu0 %v12009_v0 }
0x401b   :  { %v11529_v14 = vpop.f32.mrb[94].mxu1 }
0x401c   :  { %v9301_v40 = vadd.f32 %v11529_v14, %v10271_v3  ;;  %v9295_v42 = vpop.f32.mrb[95].mxu1 }
0x401d   :  { %v9296_v43 = vadd.f32 %v10271_v3, %v9295_v42 }
0x401e   :  { %v14397_v45 = vadd.f32 %v9301_v40, %v14164_v47 }
0x401f   :  { %v14400_v13 = vadd.f32 %v9296_v43, %v14167_v62  ;;  %v10274_v43 = vld [vmem:[%s14717_s4 + $0x52] ss:$0 sm:$0xff] }
0x4020   :  { %v9311_v41 = vsel %vm119_vm1, %v14397_v45, 0.0 }
0x4021   :  { %9312 = vadd.xlane.f32.xlu1 %v9311_v41  ;;  %v9308_v52 = vsel %vm119_vm1, %v14400_v13, 0.0 }
0x4022   :  { %9309 = vadd.xlane.f32.xlu0 %v9308_v52  ;;  %v10275_v52 = vld [vmem:[%s14717_s4 + $0x58] ss:$0 sm:$0xff] }
0x40ae   :  { %v9313_v11 = vpop.xlane.xlu1 %9312 }
0x40af   :  { %v9315_v35 = vmul.f32 0.03125, %v9313_v11  ;;  %v9310_v4 = vpop.xlane.xlu0 %9309 }
0x40b0   :  { %v9314_v8 = vmul.f32 0.03125, %v9310_v4 }
0x40b1   :  { %v9317_v31 = vsub.f32 %v14397_v45, %v9315_v35 }
0x40b2   :  { %v9316_v47 = vsub.f32 %v14400_v13, %v9314_v8 }
0x40b3   :  { %v9319_v27 = vmul.f32 %v9317_v31, %v9317_v31 }
0x40b4   :  { %v9318_v49 = vmul.f32 %v9316_v47, %v9316_v47 }
0x40b5   :  { %v9323_v54 = vsel %vm119_vm1, %v9319_v27, 0.0  ;;  %v10276_v27 = vld [vmem:[%s14717_s4 + $0x5f] ss:$0 sm:$0xff] }
0x40b6   :  { %v9320_v62 = vsel %vm119_vm1, %v9318_v49, 0.0 }
0x40b7   :  { %9321 = vadd.xlane.f32.xlu0 %v9320_v62 }
0x40bb   :  { %9324 = vadd.xlane.f32.xlu0 %v9323_v54 }
0x4144   :  { %v9322_v44 = vpop.xlane.xlu0 %9321 }
0x4145   :  { %v9326_v21 = vmul.f32 0.03125, %v9322_v44 }
0x4147   :  { %v9328_v30 = vadd.f32 1e-05, %v9326_v21 }
0x4148   :  { %v9325_v3 = vpop.xlane.xlu0 %9324 }
0x4149   :  { %12389 = vrsqrt.f32 %v9328_v30  ;;  %v9327_v14 = vmul.f32 0.03125, %v9325_v3  ;;  %v9503_v3 = vld [vmem:[%s14715_s2 + $0x128] sm:$0xff] }
0x414b   :  { %v9329_v40 = vadd.f32 1e-05, %v9327_v14  ;;  %v9504_v14 = vld [vmem:[%s14715_s2 + $0x130] sm:$0xff] }
0x414d   :  { %12391 = vrsqrt.f32 %v9329_v40  ;;  %v12013_v40 = vpack.c.bf16 %v9504_v14, %v9503_v3 }
0x414f   :  { %12014 = vmatprep.subr.bf16.mxu1 %v12013_v40 }
0x4150   :  { %12016 = vmatpush3.bf16.msra.mxu1 %v12013_v40 }
0x4153   :  { %v12390_v42 = vpop.eup %12389 }
0x4154   :  { %v9332_v41 = vmul.f32 %v12390_v42, %v9316_v47  ;;  %v9505_v42 = vld [vmem:[%s14715_s2 + $0x138] sm:$0xff] }
0x4156   :  { %v9338_v11 = vmul.f32 %v10274_v43, %v9332_v41 }
0x4157   :  { %v12392_v35 = vpop.eup %12391 }
0x4158   :  { %v9333_v4 = vmul.f32 %v12392_v35, %v9317_v31  ;;  %v9344_v8 = vadd.f32 %v10275_v52, %v9338_v11  ;;  %v9474_v11 = vld [vmem:[%s14717_s4 + $0x55] sm:$0x1] }
0x415a   :  { %v9339_v49 = vmul.f32 %v10274_v43, %v9333_v4  ;;  %11538 = vmatprep.mubr.msk.f32.mxu0 %vm119_vm1, %v9344_v8  ;;  %v9506_v43 = vld [vmem:[%s14715_s2 + $0x140] sm:$0xff]  ;;  %v9476_v4 = vmul.f32 0.999995, %v9474_v11 }
0x415b   :  { %v12017_v41 = vpack.c.bf16 %v9506_v43, %v9505_v42  ;;  %v10285_v11 = vld [vmem:[%s14717_s4 + $0x63] ss:$0 sm:$0xff] }
0x415c   :  { %v9345_v62 = vadd.f32 %v10275_v52, %v9339_v49  ;;  %v9458_v52 = vld [vmem:[%s14715_s2 + $0x148] sm:$0x7] }
0x415d   :  { %12018 = vmatprep.subr.bf16.mxu1 %v12017_v41  ;;  %v9463_v35 = vrot.slane %v9458_v52, %v12936_v60 }
0x415e   :  { %11539 = vmatmul.mubr.msk.f32.vlgmr.msra.gmra.mrb[90].mxu0 %vm119_vm1, %v9345_v62  ;;  %12020 = vmatpush3.bf16.msra.mxu1 %v12017_v41 }
0x4231   :  { %v11540_v54 = vpop.f32.mrb[90].mxu0 }
0x4232   :  { %v9433_v47 = vadd.f32 %v11540_v54, %v10276_v27  ;;  %v9427_v48 = vpop.f32.mrb[91].mxu0 }
0x4233   :  { %v9428_v24 = vadd.f32 %v10276_v27, %v9427_v48  ;;  %v10281_v27 = vld [vmem:[%s14717_s4 + $0x64] ss:$0 sm:$0xff]  ;;  %v9480_v48 = vrot.slane %v9476_v4, %v12933_v58 }
0x4234   :  { %v10280_v26 = vmul.f32 -1.442695, %v9433_v47 }
0x4235   :  { %v10279_v50 = vmul.f32 -1.442695, %v9428_v24 }
0x4236   :  { %12393 = vpow2.f32 %v10280_v26 }
0x4237   :  { %12395 = vpow2.f32 %v10279_v50 }
0x4240   :  { %v12394_v31 = vpop.eup %12393 }
0x4241   :  { %v12396_v53 = vpop.eup %12395  ;;  %v9443_v0 = vadd.f32 1.0, %v12394_v31 }
0x4242   :  { %v9442_v44 = vadd.f32 1.0, %v12396_v53  ;;  %v10282_v53 = vld [vmem:[%s14717_s4 + $0x5b] ss:$0 sm:$0xff] }
0x4243   :  { %12397 = vrcp.f32 %v9443_v0 }
0x4244   :  { %12399 = vrcp.f32 %v9442_v44 }
0x424d   :  { %v12398_v21 = vpop.eup %12397 }
0x424e   :  { %v12400_v30 = vpop.eup %12399  ;;  %9452 = vrot.lane.b32.xlu1 %v12398_v21, %s12475_s18 }
0x424f   :  { %9450 = vrot.lane.b32.xlu0 %v12400_v30, %s12475_s18 }
0x42c0   :  { %v9453_v8 = vpop.permute.xlu1 %9452 }
0x42c1   :  { %v9457_v49 = vmul.f32 %v9453_v8, %v9433_v47  ;;  %v9451_v62 = vpop.permute.xlu0 %9450 }
0x42c2   :  { %v9456_v54 = vmul.f32 %v9451_v62, %v9428_v24 }
0x42c3   :  { %v9466_v26 = vmul.f32 %v9463_v35, %v9457_v49 }
0x42c4   :  { %v9464_v50 = vmul.f32 %v9463_v35, %v9456_v54 }
0x42c5   :  { %v9473_v31 = vadd.f32 %v10281_v27, %v9466_v26 }
0x42c6   :  { %v9472_v0 = vadd.f32 %v10281_v27, %v9464_v50 }
0x42c7   :  { %v9482_v60 = vmul.f32 %v9480_v48, %v9473_v31 }
0x42c8   :  { %v9481_v44 = vmul.f32 %v9480_v48, %v9472_v0 }
0x42c9   :  { %v9488_v21 = vadd.f32 %v10282_v53, %v9482_v60 }
0x42ca   :  { %v9487_v47 = vadd.f32 %v10282_v53, %v9481_v44 }
0x42cb   :  { %v10284_v30 = vmul.f32 -1.442695, %v9488_v21 }
0x42cc   :  { %v10283_v3 = vmul.f32 -1.442695, %v9487_v47 }
0x42cd   :  { %12401 = vpow2.f32 %v10284_v30  ;;  %v9636_v30 = vld [vmem:[%s14714_s1 + $0x1a8] sm:$0xff] }
0x42ce   :  { %12403 = vpow2.f32 %v10283_v3 }
0x42d7   :  { %v12402_v14 = vpop.eup %12401 }
0x42d8   :  { %v12404_v24 = vpop.eup %12403  ;;  %v9496_v40 = vadd.f32 1.0, %v12402_v14  ;;  %v9637_v14 = vld [vmem:[%s14714_s1 + $0x1c8] sm:$0xff] }
0x42d9   :  { %v9495_v58 = vadd.f32 1.0, %v12404_v24  ;;  %v9638_v24 = vld [vmem:[%s14714_s1 + $0x1e8] sm:$0xff] }
0x42da   :  { %12405 = vrcp.f32 %v9496_v40  ;;  %v12025_v40 = vpack.c.bf16 %v9638_v24, %v9637_v14  ;;  %v9745_v14 = vld [vmem:[%s14716_s3 + $0x3b0] sm:$0xff]  ;;  %v9746_v24 = vld [vmem:[%s14716_s3 + $0x3b8] sm:$0xff] }
0x42db   :  { %12407 = vrcp.f32 %v9495_v58 }
0x42e4   :  { %v12406_v42 = vpop.eup %12405 }
0x42e5   :  { %v12408_v43 = vpop.eup %12407  ;;  %v9502_v52 = vmul.f32 %v12406_v42, %v9488_v21 }
0x42e6   :  { %v9501_v41 = vmul.f32 %v12408_v43, %v9487_v47  ;;  %v9635_v47 = vld [vmem:[%s14714_s1 + $0x188] sm:$0xff] }
0x42e7   :  { %v12021_v3 = vpack.c.bf16 %v9636_v30, %v9635_v47  ;;  %v9743_v47 = vld [vmem:[%s14716_s3 + $0x3a0] sm:$0xff]  ;;  %v9744_v30 = vld [vmem:[%s14716_s3 + $0x3a8] sm:$0xff] }
0x42e8   :  { %11549 = vmatprep.mubr.msk.f32.mxu1 %vm119_vm1, %v9501_v41 }
0x42e9   :  { %11550 = vmatmul.mubr.msk.f32.vlgmr.msra.gmra.mrb[96].mxu1 %vm119_vm1, %v9502_v52  ;;  %12022 = vmatprep.subr.bf16.mxu0 %v12021_v3 }
0x42ea   :  { %12024 = vmatpush3.bf16.msra.mxu0 %v12021_v3  ;;  %v12037_v3 = vpack.c.bf16 %v9744_v30, %v9743_v47 }
0x42eb   :  { %12026 = vmatprep.subr.bf16.mxu0 %v12025_v40 }
0x42ee   :  { %12028 = vmatpush3.bf16.msra.mxu0 %v12025_v40  ;;  %v12041_v40 = vpack.c.bf16 %v9746_v24, %v9745_v14 }
0x43bc   :  { %v11551_v35 = vpop.f32.mrb[96].mxu1 }
0x43bd   :  { %v9590_v4 = vadd.f32 %v11551_v35, %v10285_v11  ;;  %v9584_v8 = vpop.f32.mrb[97].mxu1 }
0x43be   :  { %v9585_v49 = vadd.f32 %v10285_v11, %v9584_v8 }
0x43bf   :  { %v14467_v62 = vadd.f32 %v9590_v4, %v14397_v45  ;;  %v10288_v4 = vld [vmem:[%s14717_s4 + $0x53] ss:$0 sm:$0xff] }
0x43c0   :  { %v14470_v27 = vadd.f32 %v9585_v49, %v14400_v13 }
0x43c1   :  { %v9600_v54 = vsel %vm119_vm1, %v14467_v62, 0.0 }
0x43c2   :  { %9601 = vadd.xlane.f32.xlu0 %v9600_v54  ;;  %v9597_v48 = vsel %vm119_vm1, %v14470_v27, 0.0 }
0x43c3   :  { %9598 = vadd.xlane.f32.xlu1 %v9597_v48  ;;  %v10289_v48 = vld [vmem:[%s14717_s4 + $0x59] ss:$0 sm:$0xff] }
0x444f   :  { %v9602_v26 = vpop.xlane.xlu0 %9601 }
0x4450   :  { %v9604_v50 = vmul.f32 0.03125, %v9602_v26  ;;  %v9599_v31 = vpop.xlane.xlu1 %9598 }
0x4451   :  { %v9603_v53 = vmul.f32 0.03125, %v9599_v31 }
0x4452   :  { %v9606_v0 = vsub.f32 %v14467_v62, %v9604_v50 }
0x4453   :  { %v9605_v45 = vsub.f32 %v14470_v27, %v9603_v53 }
0x4454   :  { %v9608_v60 = vmul.f32 %v9606_v0, %v9606_v0 }
0x4455   :  { %v9607_v44 = vmul.f32 %v9605_v45, %v9605_v45 }
0x4456   :  { %v9612_v13 = vsel %vm119_vm1, %v9608_v60, 0.0  ;;  %v9739_v60 = vld [vmem:[%s14716_s3 + $0x380] sm:$0xff] }
0x4457   :  { %9613 = vadd.xlane.f32.xlu1 %v9612_v13  ;;  %v9609_v21 = vsel %vm119_vm1, %v9607_v44, 0.0  ;;  %v9741_v44 = vld [vmem:[%s14716_s3 + $0x390] sm:$0xff]  ;;  %v9742_v13 = vld [vmem:[%s14716_s3 + $0x398] sm:$0xff] }
0x4458   :  { %9610 = vadd.xlane.f32.xlu0 %v9609_v21  ;;  %v12033_v21 = vpack.c.bf16 %v9742_v13, %v9741_v44 }
0x44e4   :  { %v9614_v58 = vpop.xlane.xlu1 %9613 }
0x44e5   :  { %v9616_v42 = vmul.f32 0.03125, %v9614_v58  ;;  %v9611_v43 = vpop.xlane.xlu0 %9610  ;;  %v9747_v58 = vld [vmem:[%s14716_s3 + $0x3c0] sm:$0xff] }
0x44e6   :  { %v9615_v41 = vmul.f32 0.03125, %v9611_v43 }
0x44e7   :  { %v9618_v52 = vadd.f32 1e-05, %v9616_v42  ;;  %v9748_v42 = vld [vmem:[%s14716_s3 + $0x3c8] sm:$0xff] }
0x44e8   :  { %v9617_v11 = vadd.f32 1e-05, %v9615_v41  ;;  %v12045_v43 = vpack.c.bf16 %v9748_v42, %v9747_v58  ;;  %v9749_v41 = vld [vmem:[%s14716_s3 + $0x3d0] sm:$0xff] }
0x44e9   :  { %12409 = vrsqrt.f32 %v9618_v52  ;;  %v9750_v52 = vld [vmem:[%s14716_s3 + $0x3d8] sm:$0xff] }
0x44ea   :  { %12411 = vrsqrt.f32 %v9617_v11  ;;  %v12049_v11 = vpack.c.bf16 %v9750_v52, %v9749_v41 }
0x44f3   :  { %v12410_v35 = vpop.eup %12409 }
0x44f4   :  { %v12412_v8 = vpop.eup %12411  ;;  %v9622_v49 = vmul.f32 %v12410_v35, %v9606_v0  ;;  %v9740_v0 = vld [vmem:[%s14716_s3 + $0x388] sm:$0xff]  ;;  %v9751_v35 = vld [vmem:[%s14716_s3 + $0x3e0] sm:$0xff] }
0x44f5   :  { %v9621_v54 = vmul.f32 %v12412_v8, %v9605_v45  ;;  %v12029_v45 = vpack.c.bf16 %v9740_v0, %v9739_v60 }
0x44f6   :  { %v9628_v26 = vmul.f32 %v10288_v4, %v9622_v49  ;;  %v9753_v49 = vld [vmem:[%s14716_s3 + $0x3f0] sm:$0xff] }
0x44f7   :  { %v9627_v50 = vmul.f32 %v10288_v4, %v9621_v54  ;;  %12030 = vmatprep.subr.bf16.mxu1 %v12029_v45  ;;  %v9752_v4 = vld [vmem:[%s14716_s3 + $0x3e8] sm:$0xff]  ;;  %v9754_v54 = vld [vmem:[%s14716_s3 + $0x3f8] sm:$0xff] }
0x44f8   :  { %v9634_v53 = vadd.f32 %v10289_v48, %v9628_v26  ;;  %12032 = vmatpush3.bf16.msra.mxu1 %v12029_v45  ;;  %v12053_v8 = vpack.c.bf16 %v9752_v4, %v9751_v35  ;;  %v10290_v26 = vld [vmem:[%s14717_s4 + $0x5d] ss:$0 sm:$0xff] }
0x44f9   :  { %v9633_v31 = vadd.f32 %v10289_v48, %v9627_v50  ;;  %12034 = vmatprep.subr.bf16.mxu1 %v12033_v21  ;;  %v12057_v48 = vpack.c.bf16 %v9754_v54, %v9753_v49 }
0x44fb   :  { %11560 = vmatprep.mubr.msk.f32.mxu0 %vm119_vm1, %v9633_v31 }
0x44fc   :  { %11561 = vmatmul.mubr.msk.f32.vlgmr.msra.gmra.mrb[92].mxu0 %vm119_vm1, %v9634_v53  ;;  %12036 = vmatpush3.bf16.msra.mxu1 %v12033_v21 }
0x44fd   :  { %12038 = vmatprep.subr.bf16.mxu1 %v12037_v3 }
0x4500   :  { %12040 = vmatpush3.bf16.msra.mxu1 %v12037_v3 }
0x4501   :  { %12042 = vmatprep.subr.bf16.mxu1 %v12041_v40 }
0x4504   :  { %12044 = vmatpush3.bf16.msra.mxu1 %v12041_v40  ;;  %v10295_v40 = vld [vmem:[%s14717_s4 + $0x61] ss:$0 sm:$0xff] }
0x4505   :  { %12046 = vmatprep.subr.bf16.mxu1 %v12045_v43 }
0x4508   :  { %12048 = vmatpush3.bf16.msra.mxu1 %v12045_v43 }
0x4509   :  { %12050 = vmatprep.subr.bf16.mxu1 %v12049_v11 }
0x450c   :  { %12052 = vmatpush3.bf16.msra.mxu1 %v12049_v11 }
0x450d   :  { %12054 = vmatprep.subr.bf16.mxu1 %v12053_v8 }
0x4510   :  { %12056 = vmatpush3.bf16.msra.mxu1 %v12053_v8 }
0x4511   :  { %12058 = vmatprep.subr.bf16.mxu1 %v12057_v48 }
0x4514   :  { %12060 = vmatpush3.bf16.msra.mxu1 %v12057_v48 }
0x45cf   :  { %v11562_v50 = vpop.f32.mrb[92].mxu0 }
0x45d0   :  { %v9722_v31 = vadd.f32 %v11562_v50, %v10290_v26  ;;  %v9716_v53 = vpop.f32.mrb[93].mxu0 }
0x45d1   :  { %v9717_v60 = vadd.f32 %v10290_v26, %v9716_v53 }
0x45d2   :  { %v10294_v0 = vmul.f32 -1.442695, %v9722_v31 }
0x45d3   :  { %v10293_v45 = vmul.f32 -1.442695, %v9717_v60 }
0x45d4   :  { %12413 = vpow2.f32 %v10294_v0 }
0x45d5   :  { %12415 = vpow2.f32 %v10293_v45  ;;  %v9915_v45 = vld [vmem:[%s14715_s2 + $0x10] sm:$0xff] }
0x45de   :  { %v12414_v44 = vpop.eup %12413 }
0x45df   :  { %v12416_v13 = vpop.eup %12415  ;;  %v9732_v21 = vadd.f32 1.0, %v12414_v44 }
0x45e0   :  { %v9731_v47 = vadd.f32 1.0, %v12416_v13 }
0x45e1   :  { %12417 = vrcp.f32 %v9732_v21  ;;  %v10297_v21 = vld [vmem:[%s14717_s4 + $0x5a] ss:$0 sm:$0xff] }
0x45e2   :  { %12419 = vrcp.f32 %v9731_v47 }
0x45eb   :  { %v12418_v30 = vpop.eup %12417 }
0x45ec   :  { %v12420_v3 = vpop.eup %12419  ;;  %v9738_v24 = vmul.f32 %v12418_v30, %v9722_v31 }
0x45ed   :  { %v9737_v14 = vmul.f32 %v12420_v3, %v9717_v60 }
0x45ef   :  { %11595 = vmatprep.mubr.f32.mxu1 %v9737_v14 }
0x45f0   :  { %11596 = vmatmul.mubr.f32.vlgmr.msra.gmra.mrb[98].mxu1 %v9738_v24 }
0x46c3   :  { %v11597_v58 = vpop.f32.mrb[98].mxu1 }
0x46c4   :  { %v9832_v42 = vadd.f32 %v11597_v58, %v10295_v40  ;;  %v9826_v43 = vpop.f32.mrb[99].mxu1 }
0x46c5   :  { %v9827_v41 = vadd.f32 %v10295_v40, %v9826_v43 }
0x46c6   :  { %v9836_v52 = vmul.f32 0.5, %v9832_v42 }
0x46c7   :  { %v9835_v11 = vmul.f32 0.5, %v9827_v41 }
0x46c8   :  { %v9838_v35 = vadd.f32 %v9836_v52, %v14467_v62 }
0x46c9   :  { %v9837_v4 = vadd.f32 %v9835_v11, %v14470_v27 }
0x46ca   :  { %v9844_v8 = vsel %vm119_vm1, %v9838_v35, 0.0 }
0x46cb   :  { %9845 = vadd.xlane.f32.xlu1 %v9844_v8  ;;  %v9841_v49 = vsel %vm119_vm1, %v9837_v4, 0.0 }
0x46cc   :  { %9842 = vadd.xlane.f32.xlu0 %v9841_v49 }
0x4758   :  { %v9846_v54 = vpop.xlane.xlu1 %9845 }
0x4759   :  { %v9848_v48 = vmul.f32 0.03125, %v9846_v54  ;;  %v9843_v26 = vpop.xlane.xlu0 %9842 }
0x475a   :  { %v9847_v50 = vmul.f32 0.03125, %v9843_v26 }
0x475b   :  { %v14558_v31 = vsub.f32 %v9838_v35, %v9848_v48 }
0x475c   :  { %v14560_v53 = vsub.f32 %v9837_v4, %v9847_v50 }
0x475d   :  { %v9852_v60 = vmul.f32 %v14558_v31, %v14558_v31 }
0x475e   :  { %v9851_v62 = vmul.f32 %v14560_v53, %v14560_v53 }
0x475f   :  { %v9856_v27 = vsel %vm119_vm1, %v9852_v60, 0.0 }
0x4760   :  { %9857 = vadd.xlane.f32.xlu1 %v9856_v27  ;;  %v9853_v0 = vsel %vm119_vm1, %v9851_v62, 0.0 }
0x4761   :  { %9854 = vadd.xlane.f32.xlu0 %v9853_v0 }
0x4771   :  { %4310 = vrot.lane.b32.xlu1 %v13343_v18, %s12487_s13  ;;  %v9916_v18 = vld [vmem:[%s14715_s2 + $0x18] sm:$0xff] }
0x4775   :  { %3982 = vrot.lane.b32.xlu1 %v13327_v12, %s12486_s29  ;;  %v12061_v12 = vpack.c.bf16 %v9916_v18, %v9915_v45 }
0x4777   :  { %3979 = vrot.lane.b32.xlu0 %v13315_v29, %s12487_s13  ;;  %12062 = vmatprep.subr.bf16.mxu0 %v12061_v12  ;;  %v9917_v29 = vld [vmem:[%s14715_s2 + $0x20] sm:$0xff] }
0x4778   :  { %12064 = vmatpush3.bf16.msra.mxu0 %v12061_v12 }
0x4779   :  { %4313 = vrot.lane.b32.xlu1 %v13357_v25, %s12486_s29  ;;  %v9918_v25 = vld [vmem:[%s14715_s2 + $0x28] sm:$0xff]  ;;  %s12489_s2 = smov 32  }
0x477b   :  { %6426 = vrot.lane.b32.xlu0 %v13817_v34, %s12487_s13  ;;  %v12065_v34 = vpack.c.bf16 %v9918_v25, %v9917_v29 }
0x477d   :  { %6757 = vrot.lane.b32.xlu1 %v13845_v38, %s12487_s13  ;;  %12066 = vmatprep.subr.bf16.mxu0 %v12065_v34 }
0x477e   :  { %12068 = vmatpush3.bf16.msra.mxu0 %v12065_v34 }
0x477f   :  { %3985 = vrot.lane.b32.xlu0 %v13334_v15, %s12488_s14 }
0x4781   :  { %4316 = vrot.lane.b32.xlu1 %v13354_v22, %s12488_s14 }
0x4783   :  { %6429 = vrot.lane.b32.xlu0 %v13829_v20, %s12486_s29 }
0x4785   :  { %6760 = vrot.lane.b32.xlu1 %v13859_v37, %s12486_s29 }
0x4787   :  { %8871 = vrot.lane.b32.xlu0 %v14319_v32, %s12487_s13 }
0x4789   :  { %9202 = vrot.lane.b32.xlu1 %v14346_v1, %s12487_s13  ;;  %v10296_v1 = vld [vmem:[%s14717_s4 + $0x54] ss:$0 sm:$0xff] }
0x478b   :  { %6432 = vrot.lane.b32.xlu0 %v13836_v7, %s12488_s14 }
0x478d   :  { %6763 = vrot.lane.b32.xlu1 %v13856_v56, %s12488_s14 }
0x478f   :  { %8874 = vrot.lane.b32.xlu0 %v14331_v19, %s12486_s29 }
0x4791   :  { %9205 = vrot.lane.b32.xlu1 %v14361_v23, %s12486_s29 }
0x4793   :  { %8877 = vrot.lane.b32.xlu0 %v14338_v5, %s12488_s14 }
0x4795   :  { %9208 = vrot.lane.b32.xlu1 %v14356_v39, %s12488_s14 }
0x4797   :  { %1532 = vrot.lane.b32.xlu0 %v12824_v61, %s12487_s13 }
0x4799   :  { %1863 = vrot.lane.b32.xlu1 %v12839_v2, %s12487_s13 }
0x479b   :  { %1535 = vrot.lane.b32.xlu0 %v12807_v51, %s12486_s29 }
0x479d   :  { %1866 = vrot.lane.b32.xlu1 %v12820_v59, %s12486_s29 }
0x479f   :  { %1538 = vrot.lane.b32.xlu0 %v12831_v63, %s12488_s14 }
0x47a1   :  { %1869 = vrot.lane.b32.xlu1 %v12846_v6, %s12488_s14 }
0x47ed   :  { %v9858_v15 = vpop.xlane.xlu1 %9857 }
0x47ee   :  { %v9860_v22 = vmul.f32 0.03125, %v9858_v15  ;;  %v9855_v20 = vpop.xlane.xlu0 %9854 }
0x47ef   :  { %v9859_v7 = vmul.f32 0.03125, %v9855_v20 }
0x47f0   :  { %v9862_v61 = vadd.f32 1e-05, %v9860_v22 }
0x47f1   :  { %v9861_v38 = vadd.f32 1e-05, %v9859_v7  ;;  %v4311_v56 = vpop.permute.xlu1 %4310 }
0x47f2   :  { %12421 = vrsqrt.f32 %v9862_v61  ;;  %v3980_v2 = vpop.permute.xlu0 %3979  ;;  %v4319_v30 = vsel %vm496_vm3, %v13340_v16, %v4311_v56 }
0x47f3   :  { %12423 = vrsqrt.f32 %v9861_v38  ;;  %v3988_v59 = vsel %vm496_vm3, %v13313_v28, %v3980_v2 }
0x47f5   :  { %v3983_v51 = vpop.permute.xlu1 %3982 }
0x47f6   :  { %v6427_v37 = vpop.permute.xlu0 %6426  ;;  %v3989_v63 = vsel %vm35_vm0, %v3988_v59, %v3983_v51 }
0x47f7   :  { %v6435_v52 = vsel %vm496_vm3, %v13815_v33, %v6427_v37 }
0x47f9   :  { %v4314_v32 = vpop.permute.xlu1 %4313 }
0x47fa   :  { %v3986_v19 = vpop.permute.xlu0 %3985  ;;  %v4320_v14 = vsel %vm35_vm0, %v4319_v30, %v4314_v32 }
0x47fb   :  { %v3990_v6 = vsel %vm1530_vm4, %v3989_v63, %v3986_v19 }
0x47fc   :  { %v12422_v5 = vpop.eup %12421  ;;  %9883 = vrot.lane.b32.xlu0 %v3990_v6, %s12489_s2 }
0x47fd   :  { %v12424_v39 = vpop.eup %12423  ;;  %v9866_v23 = vmul.f32 %v12422_v5, %v14558_v31  ;;  %v6758_v44 = vpop.permute.xlu1 %6757 }
0x47fe   :  { %v9865_v13 = vmul.f32 %v12424_v39, %v14560_v53  ;;  %v6430_v28 = vpop.permute.xlu0 %6429 }
0x47ff   :  { %v9872_v47 = vmul.f32 %v10296_v1, %v9866_v23  ;;  %v6436_v16 = vsel %vm35_vm0, %v6435_v52, %v6430_v28 }
0x4800   :  { %v9871_v3 = vmul.f32 %v10296_v1, %v9865_v13 }
0x4801   :  { %v4317_v24 = vpop.permute.xlu1 %4316  ;;  %v9878_v40 = vadd.f32 %v10297_v21, %v9872_v47 }
0x4802   :  { %v4321_v58 = vsel %vm1530_vm4, %v4320_v14, %v4317_v24  ;;  %v8872_v42 = vpop.permute.xlu0 %8871  ;;  %v9877_v43 = vadd.f32 %v10297_v21, %v9871_v3 }
0x4803   :  { %9885 = vrot.lane.b32.xlu1 %v4321_v58, %s12489_s2  ;;  %v9880_v35 = vadd.f32 %v9878_v40, %v14073_v36  ;;  %v8880_v33 = vsel %vm496_vm3, %v14317_v10, %v8872_v42 }
0x4804   :  { %v9879_v41 = vadd.f32 %v9877_v43, %v14076_v17  ;;  %v6766_v17 = vsel %vm496_vm3, %v13842_v9, %v6758_v44 }
0x4805   :  { %v6761_v11 = vpop.permute.xlu1 %6760 }
0x4806   :  { %11606 = vmatprep.mubr.msk.f32.mxu0 %vm119_vm1, %v9879_v41  ;;  %v6433_v4 = vpop.permute.xlu0 %6432  ;;  %v6767_v36 = vsel %vm35_vm0, %v6766_v17, %v6761_v11 }
0x4807   :  { %v6437_v8 = vsel %vm1530_vm4, %v6436_v16, %v6433_v4  ;;  %11607 = vmatmul.mubr.msk.f32.vlgmr.msra.gmra.mrb[94].mxu0 %vm119_vm1, %v9880_v35 }
0x4808   :  { %9891 = vrot.lane.b32.xlu0 %v6437_v8, %s12484_s27 }
0x4809   :  { %v9203_v49 = vpop.permute.xlu1 %9202 }
0x480a   :  { %v8875_v54 = vpop.permute.xlu0 %8874  ;;  %v9211_v9 = vsel %vm496_vm3, %v14342_v57, %v9203_v49 }
0x480b   :  { %v8881_v26 = vsel %vm35_vm0, %v8880_v33, %v8875_v54 }
0x480d   :  { %v6764_v48 = vpop.permute.xlu1 %6763 }
0x480e   :  { %v6768_v50 = vsel %vm1530_vm4, %v6767_v36, %v6764_v48  ;;  %v8878_v31 = vpop.permute.xlu0 %8877 }
0x480f   :  { %v8882_v53 = vsel %vm1530_vm4, %v8881_v26, %v8878_v31  ;;  %9893 = vrot.lane.b32.xlu1 %v6768_v50, %s12484_s27 }
0x4810   :  { %9899 = vrot.lane.b32.xlu0 %v8882_v53, %s12475_s18 }
0x4811   :  { %v9206_v60 = vpop.permute.xlu1 %9205 }
0x4812   :  { %v9212_v10 = vsel %vm35_vm0, %v9211_v9, %v9206_v60  ;;  %v1533_v0 = vpop.permute.xlu0 %1532 }
0x4813   :  { %v1541_v15 = vsel %vm496_vm3, %v12800_v46, %v1533_v0 }
0x4815   :  { %v9209_v62 = vpop.permute.xlu1 %9208 }
0x4816   :  { %v9213_v27 = vsel %vm1530_vm4, %v9212_v10, %v9209_v62  ;;  %v1536_v45 = vpop.permute.xlu0 %1535 }
0x4817   :  { %9901 = vrot.lane.b32.xlu1 %v9213_v27, %s12475_s18  ;;  %v1542_v57 = vsel %vm35_vm0, %v1541_v15, %v1536_v45  ;;  %s12490_s18 = smov [#allocation4]  }
0x4818   :  { %s10024_s27 = sshll.u32 %s12490_s18, 4  ;;  %s10025_s27 = int_to_ptr.vmem [resolvable:$true] %s10024_s27 }
0x4819   :  { %v1864_v18 = vpop.permute.xlu1 %1863  ;;  %s12425_s7 = scalar_lea.vmem %s10025_s27, 256  ;;  %p12430_p1 = scmp.lt.s32.totalorder %s10025_s27, %s10025_s27 }
0x481a   :  { %v1539_v12 = vpop.permute.xlu0 %1538  ;;  %v1872_v51 = vsel %vm496_vm3, %v12814_v55, %v1864_v18  ;;  %p12426_p0 = scmp.ne.s32.totalorder %s10025_s27, %s12425_s7  ;;  %p12431_p2 = scmp.lt.s32.totalorder %s12425_s7, %s12425_s7 }
0x481b   :  { %v1543_v20 = vsel %vm1530_vm4, %v1542_v57, %v1539_v12 }
0x481c   :  { %p12432_p3 = por %p12431_p2, %p12430_p1 }
0x481d   :  { %v1867_v29 = vpop.permute.xlu1 %1866 }
0x481e   :  { %v1873_v37 = vsel %vm35_vm0, %v1872_v51, %v1867_v29  ;;  %p12433_p4 = pnand %p12432_p3, %p12426_p0 }
0x4821   :  { %v1870_v34 = vpop.permute.xlu1 %1869 }
0x4822   :  { %v1874_v59 = vsel %vm1530_vm4, %v1873_v37, %v1870_v34 }
0x486e   :  { %v9884_v25 = vpop.permute.xlu0 %9883 }
0x486f   :  { %v9905_v7 = vsel %vm119_vm1, %v1543_v20, %v9884_v25 }
0x4875   :  { %v9886_v61 = vpop.permute.xlu1 %9885 }
0x4876   :  { %v9906_v32 = vsel %vm119_vm1, %v1874_v59, %v9886_v61 }
0x487a   :  { %v9892_v22 = vpop.permute.xlu0 %9891 }
0x487b   :  { %v9908_v38 = vsel %vm9907_vm11, %v9905_v7, %v9892_v22 }
0x4881   :  { %v9894_v46 = vpop.permute.xlu1 %9893 }
0x4882   :  { %v9900_v56 = vpop.permute.xlu0 %9899  ;;  %v9909_v63 = vsel %vm9907_vm11, %v9906_v32, %v9894_v46 }
0x4883   :  { %v9911_v2 = vsel %vm9910_vm12, %v9908_v38, %v9900_v56 }
0x4884   :  { %9913 = vst [vmem:[#allocation4] sm:$0xff] %v9911_v2 }
0x4889   :  { %v9902_v19 = vpop.permute.xlu1 %9901 }
0x488a   :  { %v9912_v6 = vsel %vm9910_vm12, %v9909_v63, %v9902_v19 }
0x488b   :  { %9914 = vst [vmem:[#allocation4 + $0x8] sm:$0xff] %v9912_v6 }
0x488c   :  { %12436 = shalt.err (!%p12433_p4)
}
0x488d   :  { %s12437_s10 = scalar_lea.hbm %s14719_s6, 256 }
0x488e   :  { %p12438_p5 = scmp.ne.s32.totalorder %s14719_s6, %s12437_s10  ;;  %p12441_p6 = scmp.lt.u32.totalorder %s12437_s10, %s14719_s6 }
0x4890   :  { %p12443_p7 = pnand %p12441_p6, %p12438_p5 }
0x4892   :  { %12446 = shalt.err (!%p12443_p7)
}
0x4893   :  { %s12491_s23 = smov 128   ;;  %v10298_v55 = vld [vmem:[%s14717_s4 + $0x1] ss:$0 sm:$0xff]  ;;  %s12492_s28 = smov [#allocation2]  }
0x4894   :  { %10030 = dma.vmem_to_hbm [thread:$0]  %s10025_s27, 256, %s14719_s6, [#allocation5], %s12491_s23, %s12491_s23, %s12487_s13  }
0x4895   :  { %s10012_s11 = sshll.u32 %s12492_s28, 4  ;;  %s10013_s11 = int_to_ptr.vmem [resolvable:$true] %s10012_s11 }
0x4896   :  { %s12447_s12 = scalar_lea.vmem %s10013_s11, 256  ;;  %p12452_p9 = scmp.lt.s32.totalorder %s10013_s11, %s10013_s11 }
0x4897   :  { %p12448_p8 = scmp.ne.s32.totalorder %s10013_s11, %s12447_s12  ;;  %p12453_p10 = scmp.lt.s32.totalorder %s12447_s12, %s12447_s12 }
0x4899   :  { %p12454_p11 = por %p12453_p10, %p12452_p9 }
0x489b   :  { %p12455_p12 = pnand %p12454_p11, %p12448_p8 }
0x48da   :  { %v11608_v5 = vpop.f32.mrb[94].mxu0 }
0x48db   :  { %v10002_v1 = vadd.f32 %v11608_v5, %v10298_v55  ;;  %v9996_v39 = vpop.f32.mrb[95].mxu0 }
0x48dc   :  { %v9997_v23 = vadd.f32 %v10298_v55, %v9996_v39 }
0x48dd   :  { %10006 = vst.msk [vmem:[#allocation2 + $0x8] sm:$0xff] %vm35_vm0, %v10002_v1 }
0x48de   :  { %10005 = vst.msk [vmem:[#allocation2] sm:$0xff] %vm35_vm0, %v9997_v23 }
0x48df   :  { %12458 = shalt.err (!%p12455_p12)
}
0x48e0   :  { %s12459_s15 = scalar_lea.hbm %s14718_s5, 256 }
0x48e1   :  { %p12460_p13 = scmp.ne.s32.totalorder %s14718_s5, %s12459_s15  ;;  %p12463_p0 = scmp.lt.u32.totalorder %s12459_s15, %s14718_s5 }
0x48e3   :  { %p12465_p1 = pnand %p12463_p0, %p12460_p13 }
0x48e5   :  { %12468 = shalt.err (!%p12465_p1)
}
0x48e6   :  { %10018 = dma.vmem_to_hbm [thread:$0]  %s10013_s11, 256, %s14718_s5, [#allocation3], %s12491_s23, %s12491_s23, %s12487_s13  }
0x48e7   :  { %12469 = dma.done.wait [#allocation3], 256  }
0x48e8   :  { %12470 = vsyncadd [#allocation3], 4294967040 }
0x48e9   :  { %12471 = dma.done.wait [#allocation5], 256  }
0x48ea   :  { %12472 = vsyncadd [#allocation5], 4294967040 }
0x48eb   :  { %10037 = vsyncpa [#allocation3], 1 }
0x48ec   :  { %10038 = vsyncpa [#allocation5], 1 }

</bundles_post_ra>
